<compile_context>
chip_gen: v7x
topology: tpu7x:2x2x1
jax: 0.10.0
libtpu: 0.0.40
codegen_flags: <defaults>
</compile_context>

<pallas_src>
import functools

import jax
import jax.numpy as jnp
from jax.experimental import pallas as pl
from jax.experimental.pallas import tpu as pltpu

SCALE = 0.2
NEG_INF = -1e30


def _flash_fwd_kernel(qi_ids_ref, ki_ids_ref, q_ref, kt_ref, v_ref, o_ref,
                      m_sc, acc_sc, *, tq, tk, d):
    step = pl.program_id(1)
    qi = qi_ids_ref[step]
    ki = ki_ids_ref[step]

    @pl.when(ki == 0)
    def _init():
        m_sc[...] = jnp.full(m_sc.shape, NEG_INF, m_sc.dtype)
        acc_sc[...] = jnp.zeros(acc_sc.shape, acc_sc.dtype)

    def _update(masked):
        q = q_ref[...]       # (G, tq, D)   bf16, scale already folded in
        kt = kt_ref[...]     # (G, D, tk)   bf16, lane-dense along tk
        v = v_ref[...]       # (G, tk, D+1) bf16, last column == 1 (row-sum trick)

        # Score matmul on the MXU, f32 accumulation.
        s = jnp.einsum("gqd,gdk->gqk", q, kt, preferred_element_type=jnp.float32)

        if masked:
            # Diagonal block only (ki == qi, tq == tk): block offsets cancel, so
            # tile-local iotas suffice.
            row = jax.lax.broadcasted_iota(jnp.int32, (tq, tk), 0)
            col = jax.lax.broadcasted_iota(jnp.int32, (tq, tk), 1)
            s = jnp.where((col <= row)[None, :, :], s, NEG_INF)

        m_prev = m_sc[...]                                       # (G, tq, 1) f32
        m_new = jnp.maximum(m_prev, s.max(axis=-1, keepdims=True))
        alpha = jnp.exp(m_prev - m_new)                          # (G, tq, 1) f32
        p = jnp.exp(s - m_new).astype(v.dtype)                   # bf16 for the MXU

        # p @ [V | 1]: columns 0..D-1 accumulate the softmax numerator, column D
        # accumulates the denominator (row-sum on the MXU instead of a 2nd XLU reduce).
        acc_sc[...] = alpha * acc_sc[...] + jnp.einsum(
            "gqk,gke->gqe", p, v, preferred_element_type=jnp.float32)
        m_sc[...] = m_new

    # Strictly below the diagonal: unmasked fast path (no iota / where).
    @pl.when(ki < qi)
    def _unmasked():
        _update(masked=False)

    # Diagonal block: mask, and (it is the last step for this q tile) finalize.
    @pl.when(ki == qi)
    def _masked_and_finalize():
        _update(masked=True)
        acc = acc_sc[...]
        inv_l = pl.reciprocal(acc[:, :, d:], approx=True)   # EUP slot, ~free
        o_ref[...] = (acc[:, :, :d] * inv_l).astype(o_ref.dtype)


def _pick_head_block(bh, max_g=8):
    """Largest head-batch G dividing bh while keeping bh // G >= 2, so the leading
    'parallel' grid axis can still shard across v7x's 2 TensorCores.  On single-TC
    v5e/v6e, pass head_block=bh explicitly to trade that axis for bigger steps."""
    g = 1
    for cand in (2, 4, 8):
        if cand <= max_g and bh % cand == 0 and bh // cand >= 2:
            g = cand
    return g


def _pick_tile(s, pref=256):
    if s <= pref:
        return s                      # full extent is always a legal block
    t = pref
    while t >= 8:
        if s % t == 0:
            return t
        t //= 2
    return s                          # no clean power-of-two divisor: use full extent


def flash_attention(q, k, v, *, scale=SCALE, tq=None, tk=None, head_block=None):
    """Causal scaled-dot-product attention.  q, k, v: (B, H, S, D)."""
    B, H, S, D = q.shape
    BH = B * H

    # 256-wide tiles feed the 256x256 MXU edge; go to 512 only for long sequences
    # (diagonal-mask waste ~tk/(2S)); fall back to divisors of S automatically.
    pref = 512 if (S % 512 == 0 and S >= 2048) else 256
    if tq is None:
        tq = _pick_tile(S, pref)
    if tk is None:
        tk = tq
    assert tq == tk and S % tq == 0, (S, tq, tk)
    assert tq == S or tq % 8 == 0, f"tile {tq} violates the (8,128) sublane rule"
    nq = S // tq

    G = head_block if head_block is not None else _pick_head_block(BH)
    assert BH % G == 0, (BH, G)

    # Operand prep (cheap, fused XLA ops, done once):
    #  * scale folded into Q in f32, then cast to bf16 for the MXU,
    #  * K pre-transposed to (BH, D, S) -> natural 'gqd,gdk->gqk' matmul, lane-dense K,
    #  * V padded with a ones column -> softmax denominator comes out of the PV matmul.
    qf = (q.reshape(BH, S, D) * scale).astype(jnp.bfloat16)
    kt = jnp.swapaxes(k.reshape(BH, S, D), 1, 2).astype(jnp.bfloat16)   # (BH, D, S)
    ones = jnp.ones((BH, S, 1), dtype=v.dtype)
    vf = jnp.concatenate([v.reshape(BH, S, D), ones], axis=-1).astype(jnp.bfloat16)

    # Flattened lower-triangle schedule: only the nq*(nq+1)/2 blocks at or below the
    # causal diagonal are visited; per q tile, ki runs 0..qi with the diagonal last.
    qi_list, ki_list = [], []
    for i in range(nq):
        for j in range(i + 1):
            qi_list.append(i)
            ki_list.append(j)
    n_steps = len(qi_list)
    qi_ids = jnp.asarray(qi_list, dtype=jnp.int32)
    ki_ids = jnp.asarray(ki_list, dtype=jnp.int32)

    q_index = lambda b, s, qi_r, ki_r: (b, qi_r[s], 0)
    k_index = lambda b, s, qi_r, ki_r: (b, 0, ki_r[s])
    v_index = lambda b, s, qi_r, ki_r: (b, ki_r[s], 0)

    kernel = functools.partial(_flash_fwd_kernel, tq=tq, tk=tk, d=D)

    out = pl.pallas_call(
        kernel,
        out_shape=jax.ShapeDtypeStruct((BH, S, D), q.dtype),
        grid_spec=pltpu.PrefetchScalarGridSpec(
            num_scalar_prefetch=2,
            grid=(BH // G, n_steps),
            in_specs=[
                pl.BlockSpec((G, tq, D), q_index),        # Q  (bf16)
                pl.BlockSpec((G, D, tk), k_index),        # K^T (bf16, lane-dense)
                pl.BlockSpec((G, tk, D + 1), v_index),    # [V | 1] (bf16)
            ],
            out_specs=pl.BlockSpec((G, tq, D), q_index),
            scratch_shapes=[
                pltpu.VMEM((G, tq, 1), jnp.float32),      # running max
                pltpu.VMEM((G, tq, D + 1), jnp.float32),  # numerator + denominator acc
            ],
        ),
        compiler_params=pltpu.CompilerParams(
            dimension_semantics=("parallel", "arbitrary")
        ),
    )(qi_ids, ki_ids, qf, kt, vf)

    return out.reshape(B, H, S, D)


def _reference_sdpa(q, k, v, scale=SCALE):
    S = q.shape[-2]
    s = jnp.einsum("bhqd,bhkd->bhqk", q, k).astype(jnp.float32) * scale
    mask = jnp.tril(jnp.ones((S, S), dtype=bool))
    s = jnp.where(mask, s, -jnp.inf)
    p = jax.nn.softmax(s, axis=-1)
    return jnp.einsum("bhqk,bhkd->bhqd", p.astype(q.dtype), v)


if __name__ == "__main__":
    key = jax.random.PRNGKey(0)
    kq, kk, kv = jax.random.split(key, 3)

    B, H, S, D = 2, 2, 256, 32
    q = jax.random.normal(kq, (B, H, S, D), dtype=jnp.float32)
    k = jax.random.normal(kk, (B, H, S, D), dtype=jnp.float32)
    v = jax.random.normal(kv, (B, H, S, D), dtype=jnp.float32)

    out = flash_attention(q, k, v)
    jax.block_until_ready(out)

    ref = _reference_sdpa(q, k, v)
    # Tolerance budget includes the bf16 MXU operands and the approx reciprocal.
    assert jnp.allclose(out, ref, atol=2e-2, rtol=2e-2), "mismatch vs reference"

    print("KERNEL_OK")
</pallas_src>

<mosaic_0001>
module attributes {stable_mosaic.version = 11 : i64} {
  func.func @_flash_fwd_kernel(%arg0: i32, %arg1: i32, %arg2: memref<1xi32, #tpu.memory_space<smem>>, %arg3: memref<1xi32, #tpu.memory_space<smem>>, %arg4: memref<2x256x32xbf16, #tpu.memory_space<vmem>>, %arg5: memref<2x32x256xbf16, #tpu.memory_space<vmem>>, %arg6: memref<2x256x33xbf16, #tpu.memory_space<vmem>>, %arg7: memref<2x256x32xf32, #tpu.memory_space<vmem>>, %arg8: memref<2x256x1xf32, #tpu.memory_space<vmem>>, %arg9: memref<2x256x33xf32, #tpu.memory_space<vmem>>) attributes {dimension_semantics = [#tpu.dimension_semantics<parallel>, #tpu.dimension_semantics<arbitrary>], iteration_bounds = array<i64: 2, 1>, scalar_prefetch = 2 : i64, scratch_operands = 2 : i64, tpu.core_type = #tpu.core_type<tc>, window_params = [{transform_indices = @transform_0, window_bounds = array<i64: 2, 256, 32>}, {transform_indices = @transform_1, window_bounds = array<i64: 2, 32, 256>}, {transform_indices = @transform_2, window_bounds = array<i64: 2, 256, 33>}, {transform_indices = @transform_3, window_bounds = array<i64: 2, 256, 32>}]} {
    %0 = arith.index_cast %arg1 : i32 to index
    %1 = memref.load %arg2[%0] : memref<1xi32, #tpu.memory_space<smem>>
    %2 = arith.index_cast %arg1 : i32 to index
    %3 = memref.load %arg3[%2] : memref<1xi32, #tpu.memory_space<smem>>
    %c0_i32 = arith.constant 0 : i32
    %4 = arith.cmpi eq, %3, %c0_i32 : i32
    %5 = arith.extui %4 : i1 to i32
    %c0_i32_0 = arith.constant 0 : i32
    %6 = arith.cmpi ne, %5, %c0_i32_0 : i32
    scf.if %6 {
      %cst = arith.constant -1.000000e+30 : f32
      %13 = vector.broadcast %cst : f32 to vector<2x256x1xf32>
      %c0 = arith.constant 0 : index
      %c0_3 = arith.constant 0 : index
      %c0_4 = arith.constant 0 : index
      %14 = vector.load %arg8[%c0, %c0_3, %c0_4] : memref<2x256x1xf32, #tpu.memory_space<vmem>>, vector<2x256x1xf32>
      tpu.vector_store %arg8[%c0, %c0_3, %c0_4], %13 {strides = array<i32>} : memref<2x256x1xf32, #tpu.memory_space<vmem>>, vector<2x256x1xf32>,
      %cst_5 = arith.constant 0.000000e+00 : f32
      %15 = vector.broadcast %cst_5 : f32 to vector<2x256x33xf32>
      %c0_6 = arith.constant 0 : index
      %c0_7 = arith.constant 0 : index
      %c0_8 = arith.constant 0 : index
      %16 = vector.load %arg9[%c0_6, %c0_7, %c0_8] : memref<2x256x33xf32, #tpu.memory_space<vmem>>, vector<2x256x33xf32>
      tpu.vector_store %arg9[%c0_6, %c0_7, %c0_8], %15 {strides = array<i32>} : memref<2x256x33xf32, #tpu.memory_space<vmem>>, vector<2x256x33xf32>,
    } else {
    }
    %7 = arith.cmpi slt, %3, %1 : i32
    %8 = arith.extui %7 : i1 to i32
    %c0_i32_1 = arith.constant 0 : i32
    %9 = arith.cmpi ne, %8, %c0_i32_1 : i32
    scf.if %9 {
      %c0 = arith.constant 0 : index
      %c0_3 = arith.constant 0 : index
      %c0_4 = arith.constant 0 : index
      %13 = vector.load %arg4[%c0, %c0_3, %c0_4] : memref<2x256x32xbf16, #tpu.memory_space<vmem>>, vector<2x256x32xbf16>
      %c0_5 = arith.constant 0 : index
      %c0_6 = arith.constant 0 : index
      %c0_7 = arith.constant 0 : index
      %14 = vector.load %arg5[%c0_5, %c0_6, %c0_7] : memref<2x32x256xbf16, #tpu.memory_space<vmem>>, vector<2x32x256xbf16>
      %c0_8 = arith.constant 0 : index
      %c0_9 = arith.constant 0 : index
      %c0_10 = arith.constant 0 : index
      %15 = vector.load %arg6[%c0_8, %c0_9, %c0_10] : memref<2x256x33xbf16, #tpu.memory_space<vmem>>, vector<2x256x33xbf16>
      "tpu.trace_start"() <{level = 10 : i32, message = "gqd,gdk->gqk"}> : () -> ()
      %cst = arith.constant dense<0.000000e+00> : vector<2x256x256xf32>
      %16 = tpu.matmul %13, %14, %cst {dimension_numbers = #tpu.dot_dimension_numbers<[2], [1], [1], [2], [0, 0, 0, 1, 1, 2], [0], [0]>} : vector<2x256x32xbf16>, vector<2x32x256xbf16>, vector<2x256x256xf32> -> vector<2x256x256xf32>
      "tpu.trace_stop"() : () -> ()
      %c0_11 = arith.constant 0 : index
      %c0_12 = arith.constant 0 : index
      %c0_13 = arith.constant 0 : index
      %17 = vector.load %arg8[%c0_11, %c0_12, %c0_13] : memref<2x256x1xf32, #tpu.memory_space<vmem>>, vector<2x256x1xf32>
      %cst_14 = arith.constant dense<0xFF800000> : vector<2x256xf32>
      %18 = vector.multi_reduction <maximumf>, %16, %cst_14 [2] : vector<2x256x256xf32> to vector<2x256xf32>
      %19 = vector.shape_cast %18 : vector<2x256xf32> to vector<2x256x1xf32>
      %20 = arith.maximumf %17, %19 : vector<2x256x1xf32>
      %21 = arith.subf %17, %20 : vector<2x256x1xf32>
      %22 = math.exp %21 : vector<2x256x1xf32>
      %23 = vector.broadcast %20 : vector<2x256x1xf32> to vector<2x256x256xf32>
      %24 = arith.subf %16, %23 : vector<2x256x256xf32>
      %25 = math.exp %24 : vector<2x256x256xf32>
      %26 = arith.truncf %25 : vector<2x256x256xf32> to vector<2x256x256xbf16>
      %c0_15 = arith.constant 0 : index
      %c0_16 = arith.constant 0 : index
      %c0_17 = arith.constant 0 : index
      %27 = vector.load %arg9[%c0_15, %c0_16, %c0_17] : memref<2x256x33xf32, #tpu.memory_space<vmem>>, vector<2x256x33xf32>
      %28 = vector.broadcast %22 : vector<2x256x1xf32> to vector<2x256x33xf32>
      %29 = arith.mulf %28, %27 : vector<2x256x33xf32>
      "tpu.trace_start"() <{level = 10 : i32, message = "gqk,gke->gqe"}> : () -> ()
      %cst_18 = arith.constant dense<0.000000e+00> : vector<2x256x33xf32>
      %30 = tpu.matmul %26, %15, %cst_18 {dimension_numbers = #tpu.dot_dimension_numbers<[2], [1], [1], [2], [0, 0, 0, 1, 1, 2], [0], [0]>} : vector<2x256x256xbf16>, vector<2x256x33xbf16>, vector<2x256x33xf32> -> vector<2x256x33xf32>
      "tpu.trace_stop"() : () -> ()
      %31 = arith.addf %29, %30 : vector<2x256x33xf32>
      %c0_19 = arith.constant 0 : index
      %c0_20 = arith.constant 0 : index
      %c0_21 = arith.constant 0 : index
      %32 = vector.load %arg9[%c0_19, %c0_20, %c0_21] : memref<2x256x33xf32, #tpu.memory_space<vmem>>, vector<2x256x33xf32>
      tpu.vector_store %arg9[%c0_19, %c0_20, %c0_21], %31 {strides = array<i32>} : memref<2x256x33xf32, #tpu.memory_space<vmem>>, vector<2x256x33xf32>,
      %c0_22 = arith.constant 0 : index
      %c0_23 = arith.constant 0 : index
      %c0_24 = arith.constant 0 : index
      %33 = vector.load %arg8[%c0_22, %c0_23, %c0_24] : memref<2x256x1xf32, #tpu.memory_space<vmem>>, vector<2x256x1xf32>
      tpu.vector_store %arg8[%c0_22, %c0_23, %c0_24], %20 {strides = array<i32>} : memref<2x256x1xf32, #tpu.memory_space<vmem>>, vector<2x256x1xf32>,
    } else {
    }
    %10 = arith.cmpi eq, %3, %1 : i32
    %11 = arith.extui %10 : i1 to i32
    %c0_i32_2 = arith.constant 0 : i32
    %12 = arith.cmpi ne, %11, %c0_i32_2 : i32
    scf.if %12 {
      %c0 = arith.constant 0 : index
      %c0_3 = arith.constant 0 : index
      %c0_4 = arith.constant 0 : index
      %13 = vector.load %arg4[%c0, %c0_3, %c0_4] : memref<2x256x32xbf16, #tpu.memory_space<vmem>>, vector<2x256x32xbf16>
      %c0_5 = arith.constant 0 : index
      %c0_6 = arith.constant 0 : index
      %c0_7 = arith.constant 0 : index
      %14 = vector.load %arg5[%c0_5, %c0_6, %c0_7] : memref<2x32x256xbf16, #tpu.memory_space<vmem>>, vector<2x32x256xbf16>
      %c0_8 = arith.constant 0 : index
      %c0_9 = arith.constant 0 : index
      %c0_10 = arith.constant 0 : index
      %15 = vector.load %arg6[%c0_8, %c0_9, %c0_10] : memref<2x256x33xbf16, #tpu.memory_space<vmem>>, vector<2x256x33xbf16>
      "tpu.trace_start"() <{level = 10 : i32, message = "gqd,gdk->gqk"}> : () -> ()
      %cst = arith.constant dense<0.000000e+00> : vector<2x256x256xf32>
      %16 = tpu.matmul %13, %14, %cst {dimension_numbers = #tpu.dot_dimension_numbers<[2], [1], [1], [2], [0, 0, 0, 1, 1, 2], [0], [0]>} : vector<2x256x32xbf16>, vector<2x32x256xbf16>, vector<2x256x256xf32> -> vector<2x256x256xf32>
      "tpu.trace_stop"() : () -> ()
      %17 = tpu.iota {dimensions = array<i32: 0>} : vector<256x256xi32>
      %18 = tpu.iota {dimensions = array<i32: 1>} : vector<256x256xi32>
      %19 = arith.cmpi sle, %18, %17 : vector<256x256xi32>
      %20 = vector.shape_cast %19 : vector<256x256xi1> to vector<1x256x256xi1>
      %cst_11 = arith.constant -1.000000e+30 : f32
      %21 = vector.shape_cast %20 : vector<1x256x256xi1> to vector<1x256x256xi1>
      %22 = vector.broadcast %21 : vector<1x256x256xi1> to vector<2x256x256xi1>
      %23 = vector.broadcast %cst_11 : f32 to vector<2x256x256xf32>
      %24 = arith.select %22, %16, %23 : vector<2x256x256xi1>, vector<2x256x256xf32>
      %c0_12 = arith.constant 0 : index
      %c0_13 = arith.constant 0 : index
      %c0_14 = arith.constant 0 : index
      %25 = vector.load %arg8[%c0_12, %c0_13, %c0_14] : memref<2x256x1xf32, #tpu.memory_space<vmem>>, vector<2x256x1xf32>
      %cst_15 = arith.constant dense<0xFF800000> : vector<2x256xf32>
      %26 = vector.multi_reduction <maximumf>, %24, %cst_15 [2] : vector<2x256x256xf32> to vector<2x256xf32>
      %27 = vector.shape_cast %26 : vector<2x256xf32> to vector<2x256x1xf32>
      %28 = arith.maximumf %25, %27 : vector<2x256x1xf32>
      %29 = arith.subf %25, %28 : vector<2x256x1xf32>
      %30 = math.exp %29 : vector<2x256x1xf32>
      %31 = vector.broadcast %28 : vector<2x256x1xf32> to vector<2x256x256xf32>
      %32 = arith.subf %24, %31 : vector<2x256x256xf32>
      %33 = math.exp %32 : vector<2x256x256xf32>
      %34 = arith.truncf %33 : vector<2x256x256xf32> to vector<2x256x256xbf16>
      %c0_16 = arith.constant 0 : index
      %c0_17 = arith.constant 0 : index
      %c0_18 = arith.constant 0 : index
      %35 = vector.load %arg9[%c0_16, %c0_17, %c0_18] : memref<2x256x33xf32, #tpu.memory_space<vmem>>, vector<2x256x33xf32>
      %36 = vector.broadcast %30 : vector<2x256x1xf32> to vector<2x256x33xf32>
      %37 = arith.mulf %36, %35 : vector<2x256x33xf32>
      "tpu.trace_start"() <{level = 10 : i32, message = "gqk,gke->gqe"}> : () -> ()
      %cst_19 = arith.constant dense<0.000000e+00> : vector<2x256x33xf32>
      %38 = tpu.matmul %34, %15, %cst_19 {dimension_numbers = #tpu.dot_dimension_numbers<[2], [1], [1], [2], [0, 0, 0, 1, 1, 2], [0], [0]>} : vector<2x256x256xbf16>, vector<2x256x33xbf16>, vector<2x256x33xf32> -> vector<2x256x33xf32>
      "tpu.trace_stop"() : () -> ()
      %39 = arith.addf %37, %38 : vector<2x256x33xf32>
      %c0_20 = arith.constant 0 : index
      %c0_21 = arith.constant 0 : index
      %c0_22 = arith.constant 0 : index
      %40 = vector.load %arg9[%c0_20, %c0_21, %c0_22] : memref<2x256x33xf32, #tpu.memory_space<vmem>>, vector<2x256x33xf32>
      tpu.vector_store %arg9[%c0_20, %c0_21, %c0_22], %39 {strides = array<i32>} : memref<2x256x33xf32, #tpu.memory_space<vmem>>, vector<2x256x33xf32>,
      %c0_23 = arith.constant 0 : index
      %c0_24 = arith.constant 0 : index
      %c0_25 = arith.constant 0 : index
      %41 = vector.load %arg8[%c0_23, %c0_24, %c0_25] : memref<2x256x1xf32, #tpu.memory_space<vmem>>, vector<2x256x1xf32>
      tpu.vector_store %arg8[%c0_23, %c0_24, %c0_25], %28 {strides = array<i32>} : memref<2x256x1xf32, #tpu.memory_space<vmem>>, vector<2x256x1xf32>,
      %c0_26 = arith.constant 0 : index
      %c0_27 = arith.constant 0 : index
      %c0_28 = arith.constant 0 : index
      %42 = vector.load %arg9[%c0_26, %c0_27, %c0_28] : memref<2x256x33xf32, #tpu.memory_space<vmem>>, vector<2x256x33xf32>
      %43 = vector.extract_strided_slice %42 {offsets = [0, 0, 32], sizes = [2, 256, 1], strides = [1, 1, 1]} : vector<2x256x33xf32> to vector<2x256x1xf32>
      %44 = tpu.reciprocal %43 {approx = true} : vector<2x256x1xf32> -> vector<2x256x1xf32>
      %45 = vector.extract_strided_slice %42 {offsets = [0, 0, 0], sizes = [2, 256, 32], strides = [1, 1, 1]} : vector<2x256x33xf32> to vector<2x256x32xf32>
      %46 = vector.broadcast %44 : vector<2x256x1xf32> to vector<2x256x32xf32>
      %47 = arith.mulf %45, %46 : vector<2x256x32xf32>
      %c0_29 = arith.constant 0 : index
      %c0_30 = arith.constant 0 : index
      %c0_31 = arith.constant 0 : index
      %48 = vector.load %arg7[%c0_29, %c0_30, %c0_31] : memref<2x256x32xf32, #tpu.memory_space<vmem>>, vector<2x256x32xf32>
      tpu.vector_store %arg7[%c0_29, %c0_30, %c0_31], %47 {strides = array<i32>} : memref<2x256x32xf32, #tpu.memory_space<vmem>>, vector<2x256x32xf32>,
    } else {
    }
    return
  }
  func.func @transform_0(%arg0: i32, %arg1: i32, %arg2: memref<1xi32, #tpu.memory_space<smem>>, %arg3: memref<1xi32, #tpu.memory_space<smem>>) -> (i32, i32, i32) {
    %0 = arith.index_cast %arg1 : i32 to index
    %1 = memref.load %arg2[%0] : memref<1xi32, #tpu.memory_space<smem>>
    %c0_i32 = arith.constant 0 : i32
    %c0_i32_0 = arith.constant 0 : i32
    return %arg0, %1, %c0_i32 : i32, i32, i32
  }
  func.func @transform_1(%arg0: i32, %arg1: i32, %arg2: memref<1xi32, #tpu.memory_space<smem>>, %arg3: memref<1xi32, #tpu.memory_space<smem>>) -> (i32, i32, i32) {
    %0 = arith.index_cast %arg1 : i32 to index
    %1 = memref.load %arg3[%0] : memref<1xi32, #tpu.memory_space<smem>>
    %c0_i32 = arith.constant 0 : i32
    %c0_i32_0 = arith.constant 0 : i32
    return %arg0, %c0_i32, %1 : i32, i32, i32
  }
  func.func @transform_2(%arg0: i32, %arg1: i32, %arg2: memref<1xi32, #tpu.memory_space<smem>>, %arg3: memref<1xi32, #tpu.memory_space<smem>>) -> (i32, i32, i32) {
    %0 = arith.index_cast %arg1 : i32 to index
    %1 = memref.load %arg3[%0] : memref<1xi32, #tpu.memory_space<smem>>
    %c0_i32 = arith.constant 0 : i32
    %c0_i32_0 = arith.constant 0 : i32
    return %arg0, %1, %c0_i32 : i32, i32, i32
  }
  func.func @transform_3(%arg0: i32, %arg1: i32, %arg2: memref<1xi32, #tpu.memory_space<smem>>, %arg3: memref<1xi32, #tpu.memory_space<smem>>) -> (i32, i32, i32) {
    %0 = arith.index_cast %arg1 : i32 to index
    %1 = memref.load %arg2[%0] : memref<1xi32, #tpu.memory_space<smem>>
    %c0_i32 = arith.constant 0 : i32
    %c0_i32_0 = arith.constant 0 : i32
    return %arg0, %1, %c0_i32 : i32, i32, i32
  }
}

</mosaic_0001>

<bundles_post_ra>
// kernel: tpu_custom_call.1
= control target key start
LH: loop header
LB: loop body
LE: loop exit
PB: predicated region body
PF: predicated region fallthrough
CT: control target
= control target key end

     0   :  { %s9900_s22 = smov 0   ;;  %s9902_s23 = smov 0   ;;  %s14494_s0 = inlined_call_operand.<no memory space> [shape: s32[1], index: 0, kind: input, shape index: {}]   ;;  %s14495_s1 = inlined_call_operand.<no memory space> [shape: s32[1], index: 1, kind: input, shape index: {}]   ;;  %s14496_s2 = inlined_call_operand.vmem [shape: bf16[4,256,32], index: 2, kind: input, shape index: {}]   ;;  %s14497_s3 = inlined_call_operand.vmem [shape: bf16[4,32,256], index: 3, kind: input, shape index: {}]   ;;  %s14498_s4 = inlined_call_operand.vmem [shape: bf16[4,256,33], index: 4, kind: input, shape index: {}]   ;;  %s14499_s5 = inlined_call_operand.vmem [shape: f32[4,256,32], index: 5, kind: output, shape index: {}]  }
   0x1   :  { %10 = sst [smem:[#allocation5]] %s14494_s0  ;;  %s9904_s24 = smov 0  }
   0x2   :  { %11 = sst [smem:[#allocation6]] %s14495_s1 }
   0x3 LB: > { %s29_s0 = sadd.s32 1, %s9853_s23  ;;  %p8050_p0 = scmp.ge.s32.totalorder %s9857_s24, 1  ;;  %s9857_s24 = sphi %s9904_s24, %s17_s24   ;;  %s9853_s23 = sphi %s9902_s23, %s15498_s23   ;;  %s9849_s22 = sphi %s9900_s22, %s15497_s22  }
   0x4   : > { %p31_p1 = scmp.ge.s32.totalorder %s29_s0, 2  ;;  %p216_p2 = scmp.lt.s32.totalorder %s9857_s24, 3 }
   0x6   : > { %s15500_s0 = smov (%p31_p1, %s29_s0), 0  ;;  %p217_p3 = pnand %p8050_p0, %p216_p2 }
   0x7   : > { %s9918_s1 = sld [smem:[#allocation5]] (!%p217_p3)  ;;  %s8051_s25 = sshll.u32 (!%p217_p3), %s9849_s22, 1 }
   0x8   : > { %220 = sbr.rel (%p217_p3) target bundleno = 2022 (0x7e6), region = 32  ;;  %p277_p4 = scmp.lt.s32.totalorder (!%p217_p3), %s8051_s25, 3 }
   0x9   : > { %s9920_s26 = sld [smem:[#allocation6]] (!%p217_p3) }
   0xd   : > { %s8052_s28 = sshll.u32 (!%p217_p3), %s9918_s1, 5 }
   0xe   : > { %p279_p5 = scmp.lt.s32.totalorder (!%p217_p3), %s8052_s28, 31 }
   0xf   : > { %s15502_s25 = smov (!%p277_p4, %s8051_s25), 3  ;;  %s8056_s30 = sshll.u32 %s9920_s26, 1 }
  0x10   : > { %s8053_s27 = sshll.u32 %s15502_s25, 5  ;;  %s8057_s29 = sshll.u32 %s15502_s25, 3 }
  0x11   : > { %p293_p6 = scmp.lt.s32.totalorder %s8056_s30, 1  ;;  %s8060_s6 = sshll.u32 %s9920_s26, 5 }
  0x12   : > { %s15504_s28 = smov (!%p279_p5, %s8052_s28), 31  ;;  %p307_p7 = scmp.lt.s32.totalorder %s8060_s6, 31 }
  0x13   : > { %s15506_s30 = smov (!%p293_p6, %s8056_s30), 1  ;;  %s282_s7 = sadd.s32 %s8053_s27, %s15504_s28 }
  0x14   : > { %s8054_s8 = sshll.u32 %s282_s7, 2  ;;  %s296_s9 = sadd.s32 %s8057_s29, %s15506_s30 }
  0x15   : > { %s9928_s12 = scalar_lea.vmem %s14496_s2, %s8054_s8  ;;  %s8058_s13 = sshll.u32 %s296_s9, 2 }
  0x16   : > { %s9933_s16 = scalar_lea.vmem %s14497_s3, %s8058_s13  ;;  %s8066_s17 = sshll.u32 %s282_s7, 3 }
  0x17   : > { %s15508_s6 = smov (!%p307_p7, %s8060_s6), 31  ;;  %s9938_s20 = scalar_lea.vmem %s14499_s5, %s8066_s17 }
  0x18   : > { %s310_s21 = sadd.s32 %s8053_s27, %s15508_s6  ;;  %p8067_p8 = scmp.ne.s32.totalorder %s9920_s26, 0 }
  0x19   : > { %s8062_s22 = sshll.u32 %s310_s21, 2  ;;  %vm337_vm0 = vcmask (!%p8067_p8), 7168   ;;  %vm402_vm1 = vcmask (!%p8067_p8), 269312   ;;  %v9859_v0 = vmov (!%p8067_p8), -1e+30   ;;  %v9860_v1 = vmov (!%p8067_p8), 0.0  }
  0x1a   : > { %s9943_s29 = scalar_lea.vmem %s14498_s4, %s8062_s22  ;;  %336 = sbr.rel (%p8067_p8) target bundleno = 90 (0x5a), region = 36  ;;  %338 = vst.msk [vmem:[#allocation2] sm:$0xff] (!%p8067_p8), %vm337_vm0, %v9859_v0  ;;  %339 = vst.msk [vmem:[#allocation2 + $0x8] sm:$0xff] (!%p8067_p8), %vm337_vm0, %v9859_v0 }
  0x1b   : > { %340 = vst.msk [vmem:[#allocation2 + $0x10] sm:$0xff] (!%p8067_p8), %vm337_vm0, %v9859_v0  ;;  %341 = vst.msk [vmem:[#allocation2 + $0x18] sm:$0xff] (!%p8067_p8), %vm337_vm0, %v9859_v0 }
  0x1c   : > { %342 = vst.msk [vmem:[#allocation2 + $0x20] sm:$0xff] (!%p8067_p8), %vm337_vm0, %v9859_v0  ;;  %343 = vst.msk [vmem:[#allocation2 + $0x28] sm:$0xff] (!%p8067_p8), %vm337_vm0, %v9859_v0 }
  0x1d   : > { %344 = vst.msk [vmem:[#allocation2 + $0x30] sm:$0xff] (!%p8067_p8), %vm337_vm0, %v9859_v0  ;;  %345 = vst.msk [vmem:[#allocation2 + $0x38] sm:$0xff] (!%p8067_p8), %vm337_vm0, %v9859_v0 }
  0x1e   : > { %346 = vst.msk [vmem:[#allocation2 + $0x40] sm:$0xff] (!%p8067_p8), %vm337_vm0, %v9859_v0  ;;  %347 = vst.msk [vmem:[#allocation2 + $0x48] sm:$0xff] (!%p8067_p8), %vm337_vm0, %v9859_v0 }
  0x1f   : > { %348 = vst.msk [vmem:[#allocation2 + $0x50] sm:$0xff] (!%p8067_p8), %vm337_vm0, %v9859_v0  ;;  %349 = vst.msk [vmem:[#allocation2 + $0x58] sm:$0xff] (!%p8067_p8), %vm337_vm0, %v9859_v0 }
  0x20   : > { %350 = vst.msk [vmem:[#allocation2 + $0x60] sm:$0xff] (!%p8067_p8), %vm337_vm0, %v9859_v0  ;;  %351 = vst.msk [vmem:[#allocation2 + $0x68] sm:$0xff] (!%p8067_p8), %vm337_vm0, %v9859_v0 }
  0x21   : > { %352 = vst.msk [vmem:[#allocation2 + $0x70] sm:$0xff] %vm337_vm0, %v9859_v0  ;;  %353 = vst.msk [vmem:[#allocation2 + $0x78] sm:$0xff] %vm337_vm0, %v9859_v0 }
  0x22   : > { %354 = vst.msk [vmem:[#allocation2 + $0x80] sm:$0xff] %vm337_vm0, %v9859_v0  ;;  %355 = vst.msk [vmem:[#allocation2 + $0x88] sm:$0xff] %vm337_vm0, %v9859_v0 }
  0x23   : > { %356 = vst.msk [vmem:[#allocation2 + $0x90] sm:$0xff] %vm337_vm0, %v9859_v0  ;;  %357 = vst.msk [vmem:[#allocation2 + $0x98] sm:$0xff] %vm337_vm0, %v9859_v0 }
  0x24   : > { %358 = vst.msk [vmem:[#allocation2 + $0xa0] sm:$0xff] %vm337_vm0, %v9859_v0  ;;  %359 = vst.msk [vmem:[#allocation2 + $0xa8] sm:$0xff] %vm337_vm0, %v9859_v0 }
  0x25   : > { %360 = vst.msk [vmem:[#allocation2 + $0xb0] sm:$0xff] %vm337_vm0, %v9859_v0  ;;  %361 = vst.msk [vmem:[#allocation2 + $0xb8] sm:$0xff] %vm337_vm0, %v9859_v0 }
  0x26   : > { %362 = vst.msk [vmem:[#allocation2 + $0xc0] sm:$0xff] %vm337_vm0, %v9859_v0  ;;  %363 = vst.msk [vmem:[#allocation2 + $0xc8] sm:$0xff] %vm337_vm0, %v9859_v0 }
  0x27   : > { %364 = vst.msk [vmem:[#allocation2 + $0xd0] sm:$0xff] %vm337_vm0, %v9859_v0  ;;  %365 = vst.msk [vmem:[#allocation2 + $0xd8] sm:$0xff] %vm337_vm0, %v9859_v0 }
  0x28   : > { %366 = vst.msk [vmem:[#allocation2 + $0xe0] sm:$0xff] %vm337_vm0, %v9859_v0  ;;  %367 = vst.msk [vmem:[#allocation2 + $0xe8] sm:$0xff] %vm337_vm0, %v9859_v0 }
  0x29   : > { %368 = vst.msk [vmem:[#allocation2 + $0xf0] sm:$0xff] %vm337_vm0, %v9859_v0  ;;  %369 = vst.msk [vmem:[#allocation2 + $0xf8] sm:$0xff] %vm337_vm0, %v9859_v0 }
  0x2a   : > { %370 = vst.msk [vmem:[#allocation2 + $0x100] sm:$0xff] %vm337_vm0, %v9859_v0  ;;  %371 = vst.msk [vmem:[#allocation2 + $0x108] sm:$0xff] %vm337_vm0, %v9859_v0 }
  0x2b   : > { %372 = vst.msk [vmem:[#allocation2 + $0x110] sm:$0xff] %vm337_vm0, %v9859_v0  ;;  %373 = vst.msk [vmem:[#allocation2 + $0x118] sm:$0xff] %vm337_vm0, %v9859_v0 }
  0x2c   : > { %374 = vst.msk [vmem:[#allocation2 + $0x120] sm:$0xff] %vm337_vm0, %v9859_v0  ;;  %375 = vst.msk [vmem:[#allocation2 + $0x128] sm:$0xff] %vm337_vm0, %v9859_v0 }
  0x2d   : > { %376 = vst.msk [vmem:[#allocation2 + $0x130] sm:$0xff] %vm337_vm0, %v9859_v0  ;;  %377 = vst.msk [vmem:[#allocation2 + $0x138] sm:$0xff] %vm337_vm0, %v9859_v0 }
  0x2e   : > { %378 = vst.msk [vmem:[#allocation2 + $0x140] sm:$0xff] %vm337_vm0, %v9859_v0  ;;  %379 = vst.msk [vmem:[#allocation2 + $0x148] sm:$0xff] %vm337_vm0, %v9859_v0 }
  0x2f   : > { %380 = vst.msk [vmem:[#allocation2 + $0x150] sm:$0xff] %vm337_vm0, %v9859_v0  ;;  %381 = vst.msk [vmem:[#allocation2 + $0x158] sm:$0xff] %vm337_vm0, %v9859_v0 }
  0x30   : > { %382 = vst.msk [vmem:[#allocation2 + $0x160] sm:$0xff] %vm337_vm0, %v9859_v0  ;;  %383 = vst.msk [vmem:[#allocation2 + $0x168] sm:$0xff] %vm337_vm0, %v9859_v0 }
  0x31   : > { %384 = vst.msk [vmem:[#allocation2 + $0x170] sm:$0xff] %vm337_vm0, %v9859_v0  ;;  %385 = vst.msk [vmem:[#allocation2 + $0x178] sm:$0xff] %vm337_vm0, %v9859_v0 }
  0x32   : > { %386 = vst.msk [vmem:[#allocation2 + $0x180] sm:$0xff] %vm337_vm0, %v9859_v0  ;;  %387 = vst.msk [vmem:[#allocation2 + $0x188] sm:$0xff] %vm337_vm0, %v9859_v0 }
  0x33   : > { %388 = vst.msk [vmem:[#allocation2 + $0x190] sm:$0xff] %vm337_vm0, %v9859_v0  ;;  %389 = vst.msk [vmem:[#allocation2 + $0x198] sm:$0xff] %vm337_vm0, %v9859_v0 }
  0x34   : > { %390 = vst.msk [vmem:[#allocation2 + $0x1a0] sm:$0xff] %vm337_vm0, %v9859_v0  ;;  %391 = vst.msk [vmem:[#allocation2 + $0x1a8] sm:$0xff] %vm337_vm0, %v9859_v0 }
  0x35   : > { %392 = vst.msk [vmem:[#allocation2 + $0x1b0] sm:$0xff] %vm337_vm0, %v9859_v0  ;;  %393 = vst.msk [vmem:[#allocation2 + $0x1b8] sm:$0xff] %vm337_vm0, %v9859_v0 }
  0x36   : > { %394 = vst.msk [vmem:[#allocation2 + $0x1c0] sm:$0xff] %vm337_vm0, %v9859_v0  ;;  %395 = vst.msk [vmem:[#allocation2 + $0x1c8] sm:$0xff] %vm337_vm0, %v9859_v0 }
  0x37   : > { %396 = vst.msk [vmem:[#allocation2 + $0x1d0] sm:$0xff] %vm337_vm0, %v9859_v0  ;;  %397 = vst.msk [vmem:[#allocation2 + $0x1d8] sm:$0xff] %vm337_vm0, %v9859_v0 }
  0x38   : > { %398 = vst.msk [vmem:[#allocation2 + $0x1e0] sm:$0xff] %vm337_vm0, %v9859_v0  ;;  %399 = vst.msk [vmem:[#allocation2 + $0x1e8] sm:$0xff] %vm337_vm0, %v9859_v0 }
  0x39   : > { %400 = vst.msk [vmem:[#allocation2 + $0x1f0] sm:$0xff] %vm337_vm0, %v9859_v0  ;;  %401 = vst.msk [vmem:[#allocation2 + $0x1f8] sm:$0xff] %vm337_vm0, %v9859_v0 }
  0x3a   : > { %403 = vst.msk [vmem:[#allocation3] sm:$0xff] %vm402_vm1, %v9860_v1  ;;  %404 = vst.msk [vmem:[#allocation3 + $0x8] sm:$0xff] %vm402_vm1, %v9860_v1 }
  0x3b   : > { %405 = vst.msk [vmem:[#allocation3 + $0x10] sm:$0xff] %vm402_vm1, %v9860_v1  ;;  %406 = vst.msk [vmem:[#allocation3 + $0x18] sm:$0xff] %vm402_vm1, %v9860_v1 }
  0x3c   : > { %407 = vst.msk [vmem:[#allocation3 + $0x20] sm:$0xff] %vm402_vm1, %v9860_v1  ;;  %408 = vst.msk [vmem:[#allocation3 + $0x28] sm:$0xff] %vm402_vm1, %v9860_v1 }
  0x3d   : > { %409 = vst.msk [vmem:[#allocation3 + $0x30] sm:$0xff] %vm402_vm1, %v9860_v1  ;;  %410 = vst.msk [vmem:[#allocation3 + $0x38] sm:$0xff] %vm402_vm1, %v9860_v1 }
  0x3e   : > { %411 = vst.msk [vmem:[#allocation3 + $0x40] sm:$0xff] %vm402_vm1, %v9860_v1  ;;  %412 = vst.msk [vmem:[#allocation3 + $0x48] sm:$0xff] %vm402_vm1, %v9860_v1 }
  0x3f   : > { %413 = vst.msk [vmem:[#allocation3 + $0x50] sm:$0xff] %vm402_vm1, %v9860_v1  ;;  %414 = vst.msk [vmem:[#allocation3 + $0x58] sm:$0xff] %vm402_vm1, %v9860_v1 }
  0x40   : > { %415 = vst.msk [vmem:[#allocation3 + $0x60] sm:$0xff] %vm402_vm1, %v9860_v1  ;;  %416 = vst.msk [vmem:[#allocation3 + $0x68] sm:$0xff] %vm402_vm1, %v9860_v1 }
  0x41   : > { %417 = vst.msk [vmem:[#allocation3 + $0x70] sm:$0xff] %vm402_vm1, %v9860_v1  ;;  %418 = vst.msk [vmem:[#allocation3 + $0x78] sm:$0xff] %vm402_vm1, %v9860_v1 }
  0x42   : > { %419 = vst.msk [vmem:[#allocation3 + $0x80] sm:$0xff] %vm402_vm1, %v9860_v1  ;;  %420 = vst.msk [vmem:[#allocation3 + $0x88] sm:$0xff] %vm402_vm1, %v9860_v1 }
  0x43   : > { %421 = vst.msk [vmem:[#allocation3 + $0x90] sm:$0xff] %vm402_vm1, %v9860_v1  ;;  %422 = vst.msk [vmem:[#allocation3 + $0x98] sm:$0xff] %vm402_vm1, %v9860_v1 }
  0x44   : > { %423 = vst.msk [vmem:[#allocation3 + $0xa0] sm:$0xff] %vm402_vm1, %v9860_v1  ;;  %424 = vst.msk [vmem:[#allocation3 + $0xa8] sm:$0xff] %vm402_vm1, %v9860_v1 }
  0x45   : > { %425 = vst.msk [vmem:[#allocation3 + $0xb0] sm:$0xff] %vm402_vm1, %v9860_v1  ;;  %426 = vst.msk [vmem:[#allocation3 + $0xb8] sm:$0xff] %vm402_vm1, %v9860_v1 }
  0x46   : > { %427 = vst.msk [vmem:[#allocation3 + $0xc0] sm:$0xff] %vm402_vm1, %v9860_v1  ;;  %428 = vst.msk [vmem:[#allocation3 + $0xc8] sm:$0xff] %vm402_vm1, %v9860_v1 }
  0x47   : > { %429 = vst.msk [vmem:[#allocation3 + $0xd0] sm:$0xff] %vm402_vm1, %v9860_v1  ;;  %430 = vst.msk [vmem:[#allocation3 + $0xd8] sm:$0xff] %vm402_vm1, %v9860_v1 }
  0x48   : > { %431 = vst.msk [vmem:[#allocation3 + $0xe0] sm:$0xff] %vm402_vm1, %v9860_v1  ;;  %432 = vst.msk [vmem:[#allocation3 + $0xe8] sm:$0xff] %vm402_vm1, %v9860_v1 }
  0x49   : > { %433 = vst.msk [vmem:[#allocation3 + $0xf0] sm:$0xff] %vm402_vm1, %v9860_v1  ;;  %434 = vst.msk [vmem:[#allocation3 + $0xf8] sm:$0xff] %vm402_vm1, %v9860_v1 }
  0x4a   : > { %435 = vst.msk [vmem:[#allocation3 + $0x100] sm:$0xff] %vm402_vm1, %v9860_v1  ;;  %436 = vst.msk [vmem:[#allocation3 + $0x108] sm:$0xff] %vm402_vm1, %v9860_v1 }
  0x4b   : > { %437 = vst.msk [vmem:[#allocation3 + $0x110] sm:$0xff] %vm402_vm1, %v9860_v1  ;;  %438 = vst.msk [vmem:[#allocation3 + $0x118] sm:$0xff] %vm402_vm1, %v9860_v1 }
  0x4c   : > { %439 = vst.msk [vmem:[#allocation3 + $0x120] sm:$0xff] %vm402_vm1, %v9860_v1  ;;  %440 = vst.msk [vmem:[#allocation3 + $0x128] sm:$0xff] %vm402_vm1, %v9860_v1 }
  0x4d   : > { %441 = vst.msk [vmem:[#allocation3 + $0x130] sm:$0xff] %vm402_vm1, %v9860_v1  ;;  %442 = vst.msk [vmem:[#allocation3 + $0x138] sm:$0xff] %vm402_vm1, %v9860_v1 }
  0x4e   : > { %443 = vst.msk [vmem:[#allocation3 + $0x140] sm:$0xff] %vm402_vm1, %v9860_v1  ;;  %444 = vst.msk [vmem:[#allocation3 + $0x148] sm:$0xff] %vm402_vm1, %v9860_v1 }
  0x4f   : > { %445 = vst.msk [vmem:[#allocation3 + $0x150] sm:$0xff] %vm402_vm1, %v9860_v1  ;;  %446 = vst.msk [vmem:[#allocation3 + $0x158] sm:$0xff] %vm402_vm1, %v9860_v1 }
  0x50   : > { %447 = vst.msk [vmem:[#allocation3 + $0x160] sm:$0xff] %vm402_vm1, %v9860_v1  ;;  %448 = vst.msk [vmem:[#allocation3 + $0x168] sm:$0xff] %vm402_vm1, %v9860_v1 }
  0x51   : > { %449 = vst.msk [vmem:[#allocation3 + $0x170] sm:$0xff] %vm402_vm1, %v9860_v1  ;;  %450 = vst.msk [vmem:[#allocation3 + $0x178] sm:$0xff] %vm402_vm1, %v9860_v1 }
  0x52   : > { %451 = vst.msk [vmem:[#allocation3 + $0x180] sm:$0xff] %vm402_vm1, %v9860_v1  ;;  %452 = vst.msk [vmem:[#allocation3 + $0x188] sm:$0xff] %vm402_vm1, %v9860_v1 }
  0x53   : > { %453 = vst.msk [vmem:[#allocation3 + $0x190] sm:$0xff] %vm402_vm1, %v9860_v1  ;;  %454 = vst.msk [vmem:[#allocation3 + $0x198] sm:$0xff] %vm402_vm1, %v9860_v1 }
  0x54   : > { %455 = vst.msk [vmem:[#allocation3 + $0x1a0] sm:$0xff] %vm402_vm1, %v9860_v1  ;;  %456 = vst.msk [vmem:[#allocation3 + $0x1a8] sm:$0xff] %vm402_vm1, %v9860_v1 }
  0x55   : > { %457 = vst.msk [vmem:[#allocation3 + $0x1b0] sm:$0xff] %vm402_vm1, %v9860_v1  ;;  %458 = vst.msk [vmem:[#allocation3 + $0x1b8] sm:$0xff] %vm402_vm1, %v9860_v1 }
  0x56   : > { %459 = vst.msk [vmem:[#allocation3 + $0x1c0] sm:$0xff] %vm402_vm1, %v9860_v1  ;;  %460 = vst.msk [vmem:[#allocation3 + $0x1c8] sm:$0xff] %vm402_vm1, %v9860_v1 }
  0x57   : > { %461 = vst.msk [vmem:[#allocation3 + $0x1d0] sm:$0xff] %vm402_vm1, %v9860_v1  ;;  %462 = vst.msk [vmem:[#allocation3 + $0x1d8] sm:$0xff] %vm402_vm1, %v9860_v1 }
  0x58   : > { %463 = vst.msk [vmem:[#allocation3 + $0x1e0] sm:$0xff] %vm402_vm1, %v9860_v1  ;;  %464 = vst.msk [vmem:[#allocation3 + $0x1e8] sm:$0xff] %vm402_vm1, %v9860_v1 }
  0x59   : > { %465 = vst.msk [vmem:[#allocation3 + $0x1f0] sm:$0xff] %vm402_vm1, %v9860_v1  ;;  %466 = vst.msk [vmem:[#allocation3 + $0x1f8] sm:$0xff] %vm402_vm1, %v9860_v1 }
  0x5a PF: > { %p8068_p9 = scmp.ge.s32.totalorder %s9920_s26, %s9918_s1 }
  0x5c   : > { %470 = sbr.rel (%p8068_p9) target bundleno = 981 (0x3d5), region = 40 }
  0x63   : > { %v8759_v2 = vld [vmem:[%s9933_s16 + $0x4] ss:$8 sps:$4 sm:$0xff]   ;;  %v8761_v3 = vld [vmem:[%s9933_s16] ss:$8 sps:$4 sm:$0xff]   ;;  %v9861_v4 = vmov 0   ;;  %vm707_vm2 = vcmask 261120  }
  0x64   : > { %788 = vmatprep.mubr.bf16.mxu0 %v9861_v4  ;;  %1129 = vmatprep.mubr.bf16.mxu1 %v9861_v4  ;;  %v8762_v5 = vld [vmem:[%s9933_s16 + $0x24] ss:$8 sps:$4 sm:$0xff]   ;;  %v8764_v6 = vld [vmem:[%s9933_s16 + $0x20] ss:$8 sps:$4 sm:$0xff]   ;;  %v8765_v7 = vld [vmem:[%s9933_s16 + $0x14] ss:$8 sps:$4 sm:$0xff]  }
  0x65   : > { %756 = vmatprep.subr.bf16.mxu0 %v8759_v2  ;;  %8757 = vset.pattern.permute.xlu0 %v9861_v4  ;;  %v8767_v8 = vld [vmem:[%s9933_s16 + $0x10] ss:$8 sps:$4 sm:$0xff]   ;;  %v8768_v9 = vld [vmem:[%s9933_s16 + $0x34] ss:$8 sps:$4 sm:$0xff]   ;;  %v8771_v11 = vld [vmem:[%s9928_s12] sm:$0xff]   ;;  %vm3661_vm3 = vcmask 7168  }
  0x66   : > { %757 = vmatpush1.bf16.msra.mxu0 %v8761_v3  ;;  %8758 = vset.pattern.permute.xlu1 %v9861_v4  ;;  %v8770_v10 = vld [vmem:[%s9933_s16 + $0x30] ss:$8 sps:$4 sm:$0xff]   ;;  %v8772_v12 = vld [vmem:[%s9928_s12 + $0x80] sm:$0xff]   ;;  %v8773_v13 = vld [vmem:[%s9928_s12 + $0x8] sm:$0xff]   ;;  %vm3596_vm4 = vcmask 269312  }
  0x67   : > { %1097 = vmatprep.subr.bf16.mxu1 %v8762_v5  ;;  %758 = vmatprep.subr.bf16.mxu0 %v8765_v7  ;;  %v8774_v14 = vld [vmem:[%s9928_s12 + $0x88] sm:$0xff]   ;;  %v8775_v15 = vld [vmem:[%s9928_s12 + $0x10] sm:$0xff]   ;;  %v8777_v17 = vld [vmem:[%s9928_s12 + $0x18] sm:$0xff]  }
  0x68   : > { %1098 = vmatpush1.bf16.msra.mxu1 %v8764_v6  ;;  %v8776_v16 = vld [vmem:[%s9928_s12 + $0x90] sm:$0xff]   ;;  %v8778_v18 = vld [vmem:[%s9928_s12 + $0x98] sm:$0xff]   ;;  %v8779_v19 = vld [vmem:[%s9928_s12 + $0x20] sm:$0xff]  }
  0x69   : > { %1099 = vmatprep.subr.bf16.mxu1 %v8768_v9  ;;  %v8780_v20 = vld [vmem:[%s9928_s12 + $0xa0] sm:$0xff]   ;;  %v8781_v21 = vld [vmem:[%s9928_s12 + $0x28] sm:$0xff]   ;;  %v8783_v23 = vld [vmem:[%s9928_s12 + $0x30] sm:$0xff]  }
  0x6a   : > { %759 = vmatpush1.bf16.msra.mxu0 %v8767_v8  ;;  %v8782_v22 = vld [vmem:[%s9928_s12 + $0xa8] sm:$0xff]   ;;  %v8784_v24 = vld [vmem:[%s9928_s12 + $0xb0] sm:$0xff]   ;;  %v8785_v25 = vld [vmem:[%s9928_s12 + $0x38] sm:$0xff]  }
  0x6b   : > { %v8786_v26 = vld [vmem:[%s9928_s12 + $0xb8] sm:$0xff]   ;;  %v8787_v27 = vld [vmem:[%s9928_s12 + $0x40] sm:$0xff]   ;;  %v8789_v29 = vld [vmem:[%s9928_s12 + $0x48] sm:$0xff]  }
  0x6c   : > { %1100 = vmatpush1.bf16.msra.mxu1 %v8770_v10  ;;  %v8788_v28 = vld [vmem:[%s9928_s12 + $0xc0] sm:$0xff]   ;;  %v8790_v30 = vld [vmem:[%s9928_s12 + $0xc8] sm:$0xff]   ;;  %v8791_v31 = vld [vmem:[%s9928_s12 + $0x50] sm:$0xff]  }
  0x6d   : > { %8089 = vmatmul.mubr.msk.bf16.vlgmr.msra.gmra.mrb[0].mxu0 %vm707_vm2, %v8771_v11  ;;  %v8792_v32 = vld [vmem:[%s9928_s12 + $0xd0] sm:$0xff]   ;;  %v8793_v33 = vld [vmem:[%s9928_s12 + $0x58] sm:$0xff]   ;;  %v8795_v35 = vld [vmem:[%s9928_s12 + $0x60] sm:$0xff]  }
  0x6e   : > { %798 = vmatprep.mubr.bf16.mxu0 %v9861_v4  ;;  %v8794_v34 = vld [vmem:[%s9928_s12 + $0xd8] sm:$0xff]   ;;  %v8796_v36 = vld [vmem:[%s9928_s12 + $0xe0] sm:$0xff]   ;;  %v8797_v37 = vld [vmem:[%s9928_s12 + $0x68] sm:$0xff]  }
  0x6f   : > { %8125 = vmatmul.mubr.msk.bf16.vlgmr.msra.gmra.mrb[0].mxu1 %vm707_vm2, %v8772_v12  ;;  %v8798_v38 = vld [vmem:[%s9928_s12 + $0xe8] sm:$0xff]   ;;  %v8799_v39 = vld [vmem:[%s9928_s12 + $0x70] sm:$0xff]   ;;  %v8801_v41 = vld [vmem:[%s9928_s12 + $0x78] sm:$0xff]  }
  0x70   : > { %1139 = vmatprep.mubr.bf16.mxu1 %v9861_v4  ;;  %v8800_v40 = vld [vmem:[%s9928_s12 + $0xf0] sm:$0xff]   ;;  %v8802_v42 = vld [vmem:[%s9928_s12 + $0xf8] sm:$0xff]  }
  0x75   : > { %8090 = vmatmul.mubr.msk.bf16.gmra.mrb[4].mxu0 %vm707_vm2, %v8773_v13 }
  0x76   : > { %808 = vmatprep.mubr.bf16.mxu0 %v9861_v4 }
  0x77   : > { %8126 = vmatmul.mubr.msk.bf16.gmra.mrb[4].mxu1 %vm707_vm2, %v8774_v14 }
  0x78   : > { %1149 = vmatprep.mubr.bf16.mxu1 %v9861_v4 }
  0x7d   : > { %8091 = vmatmul.mubr.msk.bf16.gmra.mrb[8].mxu0 %vm707_vm2, %v8775_v15 }
  0x7e   : > { %818 = vmatprep.mubr.bf16.mxu0 %v9861_v4 }
  0x7f   : > { %8127 = vmatmul.mubr.msk.bf16.gmra.mrb[8].mxu1 %vm707_vm2, %v8776_v16 }
  0x80   : > { %1159 = vmatprep.mubr.bf16.mxu1 %v9861_v4 }
  0x85   : > { %8092 = vmatmul.mubr.msk.bf16.gmra.mrb[12].mxu0 %vm707_vm2, %v8777_v17 }
  0x86   : > { %828 = vmatprep.mubr.bf16.mxu0 %v9861_v4 }
  0x87   : > { %8128 = vmatmul.mubr.msk.bf16.gmra.mrb[12].mxu1 %vm707_vm2, %v8778_v18 }
  0x88   : > { %1169 = vmatprep.mubr.bf16.mxu1 %v9861_v4 }
  0x8d   : > { %8093 = vmatmul.mubr.msk.bf16.gmra.mrb[16].mxu0 %vm707_vm2, %v8779_v19 }
  0x8e   : > { %838 = vmatprep.mubr.bf16.mxu0 %v9861_v4 }
  0x8f   : > { %8129 = vmatmul.mubr.msk.bf16.gmra.mrb[16].mxu1 %vm707_vm2, %v8780_v20 }
  0x90   : > { %1179 = vmatprep.mubr.bf16.mxu1 %v9861_v4 }
  0x95   : > { %8094 = vmatmul.mubr.msk.bf16.gmra.mrb[20].mxu0 %vm707_vm2, %v8781_v21 }
  0x96   : > { %848 = vmatprep.mubr.bf16.mxu0 %v9861_v4 }
  0x97   : > { %8130 = vmatmul.mubr.msk.bf16.gmra.mrb[20].mxu1 %vm707_vm2, %v8782_v22 }
  0x98   : > { %1189 = vmatprep.mubr.bf16.mxu1 %v9861_v4 }
  0x9d   : > { %8095 = vmatmul.mubr.msk.bf16.gmra.mrb[24].mxu0 %vm707_vm2, %v8783_v23 }
  0x9e   : > { %858 = vmatprep.mubr.bf16.mxu0 %v9861_v4 }
  0x9f   : > { %8131 = vmatmul.mubr.msk.bf16.gmra.mrb[24].mxu1 %vm707_vm2, %v8784_v24 }
  0xa0   : > { %1199 = vmatprep.mubr.bf16.mxu1 %v9861_v4 }
  0xa5   : > { %8096 = vmatmul.mubr.msk.bf16.gmra.mrb[28].mxu0 %vm707_vm2, %v8785_v25 }
  0xa6   : > { %868 = vmatprep.mubr.bf16.mxu0 %v9861_v4 }
  0xa7   : > { %8132 = vmatmul.mubr.msk.bf16.gmra.mrb[28].mxu1 %vm707_vm2, %v8786_v26 }
  0xa8   : > { %1209 = vmatprep.mubr.bf16.mxu1 %v9861_v4 }
  0xad   : > { %8097 = vmatmul.mubr.msk.bf16.gmra.mrb[32].mxu0 %vm707_vm2, %v8787_v27 }
  0xae   : > { %878 = vmatprep.mubr.bf16.mxu0 %v9861_v4 }
  0xaf   : > { %8133 = vmatmul.mubr.msk.bf16.gmra.mrb[32].mxu1 %vm707_vm2, %v8788_v28 }
  0xb0   : > { %1219 = vmatprep.mubr.bf16.mxu1 %v9861_v4 }
  0xb5   : > { %8098 = vmatmul.mubr.msk.bf16.gmra.mrb[36].mxu0 %vm707_vm2, %v8789_v29 }
  0xb6   : > { %888 = vmatprep.mubr.bf16.mxu0 %v9861_v4 }
  0xb7   : > { %8134 = vmatmul.mubr.msk.bf16.gmra.mrb[36].mxu1 %vm707_vm2, %v8790_v30 }
  0xb8   : > { %1229 = vmatprep.mubr.bf16.mxu1 %v9861_v4 }
  0xbd   : > { %8099 = vmatmul.mubr.msk.bf16.gmra.mrb[40].mxu0 %vm707_vm2, %v8791_v31 }
  0xbe   : > { %898 = vmatprep.mubr.bf16.mxu0 %v9861_v4 }
  0xbf   : > { %8135 = vmatmul.mubr.msk.bf16.gmra.mrb[40].mxu1 %vm707_vm2, %v8792_v32 }
  0xc0   : > { %1239 = vmatprep.mubr.bf16.mxu1 %v9861_v4 }
  0xc5   : > { %8100 = vmatmul.mubr.msk.bf16.gmra.mrb[44].mxu0 %vm707_vm2, %v8793_v33 }
  0xc6   : > { %908 = vmatprep.mubr.bf16.mxu0 %v9861_v4 }
  0xc7   : > { %8136 = vmatmul.mubr.msk.bf16.gmra.mrb[44].mxu1 %vm707_vm2, %v8794_v34 }
  0xc8   : > { %1249 = vmatprep.mubr.bf16.mxu1 %v9861_v4 }
  0xcd   : > { %8101 = vmatmul.mubr.msk.bf16.gmra.mrb[48].mxu0 %vm707_vm2, %v8795_v35 }
  0xce   : > { %918 = vmatprep.mubr.bf16.mxu0 %v9861_v4 }
  0xcf   : > { %8137 = vmatmul.mubr.msk.bf16.gmra.mrb[48].mxu1 %vm707_vm2, %v8796_v36 }
  0xd0   : > { %1259 = vmatprep.mubr.bf16.mxu1 %v9861_v4 }
  0xd5   : > { %8102 = vmatmul.mubr.msk.bf16.gmra.mrb[52].mxu0 %vm707_vm2, %v8797_v37 }
  0xd6   : > { %928 = vmatprep.mubr.bf16.mxu0 %v9861_v4 }
  0xd7   : > { %8138 = vmatmul.mubr.msk.bf16.gmra.mrb[52].mxu1 %vm707_vm2, %v8798_v38 }
  0xd8   : > { %1269 = vmatprep.mubr.bf16.mxu1 %v9861_v4 }
  0xdd   : > { %8103 = vmatmul.mubr.msk.bf16.gmra.mrb[56].mxu0 %vm707_vm2, %v8799_v39 }
  0xde   : > { %938 = vmatprep.mubr.bf16.mxu0 %v9861_v4 }
  0xdf   : > { %8139 = vmatmul.mubr.msk.bf16.gmra.mrb[56].mxu1 %vm707_vm2, %v8800_v40 }
  0xe0   : > { %1279 = vmatprep.mubr.bf16.mxu1 %v9861_v4 }
  0xe5   : > { %8104 = vmatmul.mubr.msk.bf16.gmra.mrb[60].mxu0 %vm707_vm2, %v8801_v41 }
  0xe7   : > { %8140 = vmatmul.mubr.msk.bf16.gmra.mrb[60].mxu1 %vm707_vm2, %v8802_v42 }
 0x140   : > { %v10310_v43 = vpop.f32.mrb[0].mxu0 }
 0x141   : > { %14770 = vst [vmem:[#allocation7_spill] sm:$0xff] %v10310_v43  ;;  %v10312_v44 = vpop.f32.mrb[1].mxu0 }
 0x142   : > { %14771 = vst [vmem:[#allocation8_spill] sm:$0xff] %v10312_v44  ;;  %v10314_v45 = vpop.f32.mrb[0].mxu1  ;;  %v10316_v46 = vpop.f32.mrb[2].mxu0  ;;  %v1354_v47 = vmax.f32 %v10310_v43, %v10312_v44  ;;  %v11003_v44 = vld [vmem:[#allocation2 + $0x78] sm:$0xff] }
 0x143   : > { %14772 = vst [vmem:[#allocation9_spill] sm:$0xff] %v10314_v45  ;;  %14773 = vst [vmem:[#allocation10_spill] sm:$0xff] %v10316_v46  ;;  %v10320_v48 = vpop.f32.mrb[1].mxu1  ;;  %v10322_v49 = vpop.f32.mrb[3].mxu0 }
 0x144   : > { %14774 = vst [vmem:[#allocation11_spill] sm:$0xff] %v10320_v48  ;;  %14775 = vst [vmem:[#allocation12_spill] sm:$0xff] %v10322_v49  ;;  %v10324_v50 = vpop.f32.mrb[2].mxu1  ;;  %1355 = vmax.xlane.f32.xlu0 %v1354_v47  ;;  %v1450_v51 = vmax.f32 %v10314_v45, %v10320_v48  ;;  %v1357_v52 = vmax.f32 %v10316_v46, %v10322_v49  ;;  %v10983_v48 = vld [vmem:[#allocation2 + $0x70] sm:$0xff] }
 0x145   : > { %14776 = vst [vmem:[#allocation13_spill] sm:$0xff] %v10324_v50  ;;  %v10330_v53 = vpop.f32.mrb[3].mxu1  ;;  %14908 = vst [vmem:[#allocation145_spill] sm:$0xff] %v10983_v48  ;;  %v11001_v45 = vld [vmem:[#allocation2 + $0x170] sm:$0xff] }
 0x146   : > { %14777 = vst [vmem:[#allocation14_spill] sm:$0xff] %v10330_v53  ;;  %v1453_v54 = vmax.f32 %v10324_v50, %v10330_v53  ;;  %v10981_v50 = vld [vmem:[#allocation2 + $0x168] sm:$0xff]  ;;  %14910 = vst [vmem:[#allocation147_spill] sm:$0xff] %v11001_v45 }
 0x147   : > { %14907 = vst [vmem:[#allocation144_spill] sm:$0xff] %v10981_v50  ;;  %14911 = vst [vmem:[#allocation148_spill] sm:$0xff] %v11003_v44 }
 0x148   : > { %1454 = vmax.xlane.f32.xlu1 %v1453_v54  ;;  %1451 = vmax.xlane.f32.xlu0 %v1450_v51  ;;  %v10334_v55 = vpop.f32.mrb[4].mxu0 }
 0x149   : > { %14778 = vst [vmem:[#allocation15_spill] sm:$0xff] %v10334_v55  ;;  %v10336_v56 = vpop.f32.mrb[5].mxu0 }
 0x14a   : > { %14779 = vst [vmem:[#allocation16_spill] sm:$0xff] %v10336_v56  ;;  %v10338_v57 = vpop.f32.mrb[4].mxu1  ;;  %v1360_v58 = vmax.f32 %v10334_v55, %v10336_v56  ;;  %v10342_v59 = vpop.f32.mrb[6].mxu0  ;;  %v10961_v56 = vld [vmem:[#allocation2 + $0x160] sm:$0xff]  ;;  %v10963_v55 = vld [vmem:[#allocation2 + $0x68] sm:$0xff] }
 0x14b   : > { %14780 = vst [vmem:[#allocation17_spill] sm:$0xff] %v10338_v57  ;;  %14781 = vst [vmem:[#allocation18_spill] sm:$0xff] %v10342_v59  ;;  %v10344_v60 = vpop.f32.mrb[7].mxu0  ;;  %v10346_v61 = vpop.f32.mrb[5].mxu1 }
 0x14c   : > { %14782 = vst [vmem:[#allocation19_spill] sm:$0xff] %v10344_v60  ;;  %14783 = vst [vmem:[#allocation20_spill] sm:$0xff] %v10346_v61  ;;  %1358 = vmax.xlane.f32.xlu0 %v1357_v52  ;;  %1361 = vmax.xlane.f32.xlu1 %v1360_v58  ;;  %v10348_v62 = vpop.f32.mrb[6].mxu1  ;;  %v1456_v63 = vmax.f32 %v10338_v57, %v10346_v61  ;;  %v1363_v0 = vmax.f32 %v10342_v59, %v10344_v60  ;;  %v10943_v61 = vld [vmem:[#allocation2 + $0x60] sm:$0xff] }
 0x14d   : > { %14784 = vst [vmem:[#allocation21_spill] sm:$0xff] %v10348_v62  ;;  %v10354_v1 = vpop.f32.mrb[7].mxu1  ;;  %14900 = vst [vmem:[#allocation137_spill] sm:$0xff] %v10943_v61 }
 0x14e   : > { %14785 = vst [vmem:[#allocation22_spill] sm:$0xff] %v10354_v1  ;;  %v1459_v2 = vmax.f32 %v10348_v62, %v10354_v1  ;;  %v10923_v1 = vld [vmem:[#allocation2 + $0x58] sm:$0xff]  ;;  %14903 = vst [vmem:[#allocation140_spill] sm:$0xff] %v10961_v56 }
 0x14f   : > { %14904 = vst [vmem:[#allocation141_spill] sm:$0xff] %v10963_v55 }
 0x150   : > { %1457 = vmax.xlane.f32.xlu0 %v1456_v63  ;;  %1364 = vmax.xlane.f32.xlu1 %v1363_v0  ;;  %v10358_v3 = vpop.f32.mrb[8].mxu0 }
 0x151   : > { %14786 = vst [vmem:[#allocation23_spill] sm:$0xff] %v10358_v3  ;;  %v10360_v4 = vpop.f32.mrb[9].mxu0 }
 0x152   : > { %14787 = vst [vmem:[#allocation24_spill] sm:$0xff] %v10360_v4  ;;  %v10362_v5 = vpop.f32.mrb[8].mxu1  ;;  %v1366_v6 = vmax.f32 %v10358_v3, %v10360_v4  ;;  %v10366_v7 = vpop.f32.mrb[10].mxu0 }
 0x153   : > { %14788 = vst [vmem:[#allocation25_spill] sm:$0xff] %v10362_v5  ;;  %14789 = vst [vmem:[#allocation26_spill] sm:$0xff] %v10366_v7  ;;  %v10368_v8 = vpop.f32.mrb[11].mxu0  ;;  %v10370_v9 = vpop.f32.mrb[9].mxu1 }
 0x154   : > { %14790 = vst [vmem:[#allocation27_spill] sm:$0xff] %v10368_v8  ;;  %14791 = vst [vmem:[#allocation28_spill] sm:$0xff] %v10370_v9  ;;  %1460 = vmax.xlane.f32.xlu1 %v1459_v2  ;;  %1367 = vmax.xlane.f32.xlu0 %v1366_v6  ;;  %v10372_v10 = vpop.f32.mrb[10].mxu1  ;;  %v1462_v11 = vmax.f32 %v10362_v5, %v10370_v9  ;;  %v1369_v12 = vmax.f32 %v10366_v7, %v10368_v8  ;;  %v10901_v8 = vld [vmem:[#allocation2 + $0x148] sm:$0xff]  ;;  %v10941_v5 = vld [vmem:[#allocation2 + $0x158] sm:$0xff] }
 0x155   : > { %14792 = vst [vmem:[#allocation29_spill] sm:$0xff] %v10372_v10  ;;  %v10378_v13 = vpop.f32.mrb[11].mxu1  ;;  %14899 = vst [vmem:[#allocation136_spill] sm:$0xff] %v10941_v5 }
 0x156   : > { %14793 = vst [vmem:[#allocation30_spill] sm:$0xff] %v10378_v13  ;;  %v1465_v14 = vmax.f32 %v10372_v10, %v10378_v13  ;;  %v8833_v13 = vld [vmem:[%s9943_s29 + $0xf8] sm:$0xff]  }
 0x158   : > { %1463 = vmax.xlane.f32.xlu0 %v1462_v11  ;;  %1370 = vmax.xlane.f32.xlu1 %v1369_v12  ;;  %v10382_v15 = vpop.f32.mrb[12].mxu0 }
 0x159   : > { %14794 = vst [vmem:[#allocation31_spill] sm:$0xff] %v10382_v15  ;;  %v10384_v16 = vpop.f32.mrb[13].mxu0 }
 0x15a   : > { %14795 = vst [vmem:[#allocation32_spill] sm:$0xff] %v10384_v16  ;;  %v10386_v17 = vpop.f32.mrb[12].mxu1  ;;  %v1372_v18 = vmax.f32 %v10382_v15, %v10384_v16  ;;  %v10390_v19 = vpop.f32.mrb[14].mxu0  ;;  %v10862_v16 = vld [vmem:[#allocation2 + $0x40] sm:$0xff] }
 0x15b   : > { %14796 = vst [vmem:[#allocation33_spill] sm:$0xff] %v10386_v17  ;;  %14797 = vst [vmem:[#allocation34_spill] sm:$0xff] %v10390_v19  ;;  %v10392_v20 = vpop.f32.mrb[15].mxu0  ;;  %v10394_v21 = vpop.f32.mrb[13].mxu1 }
 0x15c   : > { %14798 = vst [vmem:[#allocation35_spill] sm:$0xff] %v10392_v20  ;;  %14799 = vst [vmem:[#allocation36_spill] sm:$0xff] %v10394_v21  ;;  %1466 = vmax.xlane.f32.xlu1 %v1465_v14  ;;  %1373 = vmax.xlane.f32.xlu0 %v1372_v18  ;;  %v10396_v22 = vpop.f32.mrb[14].mxu1  ;;  %v1468_v23 = vmax.f32 %v10386_v17, %v10394_v21  ;;  %v1375_v24 = vmax.f32 %v10390_v19, %v10392_v20  ;;  %v10821_v20 = vld [vmem:[#allocation2 + $0x30] sm:$0xff] }
 0x15d   : > { %14800 = vst [vmem:[#allocation37_spill] sm:$0xff] %v10396_v22  ;;  %v10402_v25 = vpop.f32.mrb[15].mxu1  ;;  %v10839_v19 = vld [vmem:[#allocation2 + $0x130] sm:$0xff] }
 0x15e   : > { %14801 = vst [vmem:[#allocation38_spill] sm:$0xff] %v10402_v25  ;;  %v1471_v26 = vmax.f32 %v10396_v22, %v10402_v25  ;;  %v8830_v25 = vld [vmem:[%s9943_s29 + $0xb0] sm:$0xff]   ;;  %v10802_v22 = vld [vmem:[#allocation2 + $0x28] sm:$0xff] }
 0x15f   : > { %v10903_v21 = vld [vmem:[#allocation2 + $0x50] sm:$0xff] }
 0x160   : > { %1469 = vmax.xlane.f32.xlu0 %v1468_v23  ;;  %1376 = vmax.xlane.f32.xlu1 %v1375_v24  ;;  %v10406_v27 = vpop.f32.mrb[16].mxu0  ;;  %v10921_v17 = vld [vmem:[#allocation2 + $0x150] sm:$0xff] }
 0x161   : > { %14802 = vst [vmem:[#allocation39_spill] sm:$0xff] %v10406_v27  ;;  %v10408_v28 = vpop.f32.mrb[17].mxu0 }
 0x162   : > { %14803 = vst [vmem:[#allocation40_spill] sm:$0xff] %v10408_v28  ;;  %v10410_v29 = vpop.f32.mrb[16].mxu1  ;;  %v1378_v30 = vmax.f32 %v10406_v27, %v10408_v28  ;;  %v10414_v31 = vpop.f32.mrb[18].mxu0  ;;  %v8827_v28 = vld [vmem:[%s9943_s29 + $0x70] sm:$0xff]  }
 0x163   : > { %14804 = vst [vmem:[#allocation41_spill] sm:$0xff] %v10410_v29  ;;  %14805 = vst [vmem:[#allocation42_spill] sm:$0xff] %v10414_v31  ;;  %v10416_v32 = vpop.f32.mrb[19].mxu0  ;;  %v10418_v33 = vpop.f32.mrb[17].mxu1  ;;  %v8828_v27 = vld [vmem:[%s9943_s29 + $0xf0] sm:$0xff]  }
 0x164   : > { %14806 = vst [vmem:[#allocation43_spill] sm:$0xff] %v10416_v32  ;;  %14807 = vst [vmem:[#allocation44_spill] sm:$0xff] %v10418_v33  ;;  %1472 = vmax.xlane.f32.xlu1 %v1471_v26  ;;  %1379 = vmax.xlane.f32.xlu0 %v1378_v30  ;;  %v10420_v34 = vpop.f32.mrb[18].mxu1  ;;  %v1474_v35 = vmax.f32 %v10410_v29, %v10418_v33  ;;  %v1381_v36 = vmax.f32 %v10414_v31, %v10416_v32  ;;  %v10860_v31 = vld [vmem:[#allocation2 + $0x138] sm:$0xff]  ;;  %v10882_v29 = vld [vmem:[#allocation2 + $0x140] sm:$0xff] }
 0x165   : > { %14808 = vst [vmem:[#allocation45_spill] sm:$0xff] %v10420_v34  ;;  %v10426_v37 = vpop.f32.mrb[19].mxu1 }
 0x166   : > { %14809 = vst [vmem:[#allocation46_spill] sm:$0xff] %v10426_v37  ;;  %v1477_v38 = vmax.f32 %v10420_v34, %v10426_v37  ;;  %v10776_v34 = vld [vmem:[#allocation2 + $0x118] sm:$0xff] }
 0x168   : > { %1475 = vmax.xlane.f32.xlu0 %v1474_v35  ;;  %1382 = vmax.xlane.f32.xlu1 %v1381_v36  ;;  %v10430_v39 = vpop.f32.mrb[20].mxu0 }
 0x169   : > { %14810 = vst [vmem:[#allocation47_spill] sm:$0xff] %v10430_v39  ;;  %v10432_v40 = vpop.f32.mrb[21].mxu0 }
 0x16a   : > { %14811 = vst [vmem:[#allocation48_spill] sm:$0xff] %v10432_v40  ;;  %v10434_v41 = vpop.f32.mrb[20].mxu1  ;;  %v1384_v42 = vmax.f32 %v10430_v39, %v10432_v40  ;;  %v10438_v47 = vpop.f32.mrb[22].mxu0 }
 0x16b   : > { %14812 = vst [vmem:[#allocation49_spill] sm:$0xff] %v10434_v41  ;;  %14813 = vst [vmem:[#allocation50_spill] sm:$0xff] %v10438_v47  ;;  %v10440_v51 = vpop.f32.mrb[23].mxu0  ;;  %v10442_v52 = vpop.f32.mrb[21].mxu1 }
 0x16c   : > { %14814 = vst [vmem:[#allocation51_spill] sm:$0xff] %v10440_v51  ;;  %14815 = vst [vmem:[#allocation52_spill] sm:$0xff] %v10442_v52  ;;  %1478 = vmax.xlane.f32.xlu1 %v1477_v38  ;;  %1385 = vmax.xlane.f32.xlu0 %v1384_v42  ;;  %v10444_v54 = vpop.f32.mrb[22].mxu1  ;;  %v1480_v58 = vmax.f32 %v10434_v41, %v10442_v52  ;;  %v1387_v63 = vmax.f32 %v10438_v47, %v10440_v51  ;;  %v10819_v51 = vld [vmem:[#allocation2 + $0x128] sm:$0xff]  ;;  %v10841_v52 = vld [vmem:[#allocation2 + $0x38] sm:$0xff] }
 0x16d   : > { %14816 = vst [vmem:[#allocation53_spill] sm:$0xff] %v10444_v54  ;;  %v10450_v0 = vpop.f32.mrb[23].mxu1 }
 0x16e   : > { %14817 = vst [vmem:[#allocation54_spill] sm:$0xff] %v10450_v0  ;;  %v1483_v2 = vmax.f32 %v10444_v54, %v10450_v0 }
 0x170   : > { %1481 = vmax.xlane.f32.xlu0 %v1480_v58  ;;  %1388 = vmax.xlane.f32.xlu1 %v1387_v63  ;;  %v10454_v6 = vpop.f32.mrb[24].mxu0 }
 0x171   : > { %14818 = vst [vmem:[#allocation55_spill] sm:$0xff] %v10454_v6  ;;  %v10456_v11 = vpop.f32.mrb[25].mxu0 }
 0x172   : > { %14819 = vst [vmem:[#allocation56_spill] sm:$0xff] %v10456_v11  ;;  %v10458_v12 = vpop.f32.mrb[24].mxu1  ;;  %v1390_v14 = vmax.f32 %v10454_v6, %v10456_v11  ;;  %v10462_v18 = vpop.f32.mrb[26].mxu0 }
 0x173   : > { %14820 = vst [vmem:[#allocation57_spill] sm:$0xff] %v10458_v12  ;;  %14821 = vst [vmem:[#allocation58_spill] sm:$0xff] %v10462_v18  ;;  %v10464_v23 = vpop.f32.mrb[27].mxu0  ;;  %v10466_v24 = vpop.f32.mrb[25].mxu1 }
 0x174   : > { %14822 = vst [vmem:[#allocation59_spill] sm:$0xff] %v10464_v23  ;;  %14823 = vst [vmem:[#allocation60_spill] sm:$0xff] %v10466_v24  ;;  %1484 = vmax.xlane.f32.xlu1 %v1483_v2  ;;  %1391 = vmax.xlane.f32.xlu0 %v1390_v14  ;;  %v10468_v26 = vpop.f32.mrb[26].mxu1  ;;  %v1486_v30 = vmax.f32 %v10458_v12, %v10466_v24  ;;  %v1393_v35 = vmax.f32 %v10462_v18, %v10464_v23  ;;  %v8829_v24 = vld [vmem:[%s9943_s29 + $0x30] sm:$0xff]   ;;  %v10800_v18 = vld [vmem:[#allocation2 + $0x120] sm:$0xff] }
 0x175   : > { %14824 = vst [vmem:[#allocation61_spill] sm:$0xff] %v10468_v26  ;;  %v10474_v36 = vpop.f32.mrb[27].mxu1 }
 0x176   : > { %14825 = vst [vmem:[#allocation62_spill] sm:$0xff] %v10474_v36  ;;  %v1489_v38 = vmax.f32 %v10468_v26, %v10474_v36 }
 0x178   : > { %1487 = vmax.xlane.f32.xlu0 %v1486_v30  ;;  %1394 = vmax.xlane.f32.xlu1 %v1393_v35  ;;  %v10478_v42 = vpop.f32.mrb[28].mxu0 }
 0x179   : > { %14826 = vst [vmem:[#allocation63_spill] sm:$0xff] %v10478_v42  ;;  %v10480_v58 = vpop.f32.mrb[29].mxu0 }
 0x17a   : > { %14827 = vst [vmem:[#allocation64_spill] sm:$0xff] %v10480_v58  ;;  %v10482_v63 = vpop.f32.mrb[28].mxu1  ;;  %v1396_v2 = vmax.f32 %v10478_v42, %v10480_v58  ;;  %v10486_v14 = vpop.f32.mrb[30].mxu0 }
 0x17b   : > { %14828 = vst [vmem:[#allocation65_spill] sm:$0xff] %v10482_v63  ;;  %14829 = vst [vmem:[#allocation66_spill] sm:$0xff] %v10486_v14  ;;  %v10488_v11 = vpop.f32.mrb[31].mxu0  ;;  %v10490_v6 = vpop.f32.mrb[29].mxu1 }
 0x17c   : > { %14830 = vst [vmem:[#allocation67_spill] sm:$0xff] %v10488_v11  ;;  %14831 = vst [vmem:[#allocation68_spill] sm:$0xff] %v10490_v6  ;;  %1490 = vmax.xlane.f32.xlu1 %v1489_v38  ;;  %1397 = vmax.xlane.f32.xlu0 %v1396_v2  ;;  %v10492_v30 = vpop.f32.mrb[30].mxu1  ;;  %v1492_v35 = vmax.f32 %v10482_v63, %v10490_v6  ;;  %v1399_v36 = vmax.f32 %v10486_v14, %v10488_v11  ;;  %v8803_v38 = vld [vmem:[%s9943_s29 + $0x40] sm:$0xff]  }
 0x17d   : > { %14832 = vst [vmem:[#allocation69_spill] sm:$0xff] %v10492_v30  ;;  %v10498_v26 = vpop.f32.mrb[31].mxu1  ;;  %v8804_v2 = vld [vmem:[%s9943_s29 + $0xc0] sm:$0xff]   ;;  %8280 = vmatprep.subr.bf16.mxu0 %v8803_v38 }
 0x17e   : > { %14833 = vst [vmem:[#allocation70_spill] sm:$0xff] %v10498_v26  ;;  %v1495_v58 = vmax.f32 %v10492_v30, %v10498_v26  ;;  %8392 = vmatprep.subr.bf16.mxu1 %v8804_v2  ;;  %v10778_v63 = vld [vmem:[#allocation2 + $0x20] sm:$0xff] }
 0x180   : > { %1493 = vmax.xlane.f32.xlu0 %v1492_v35  ;;  %1400 = vmax.xlane.f32.xlu1 %v1399_v36  ;;  %v10502_v42 = vpop.f32.mrb[32].mxu0 }
 0x181   : > { %14834 = vst [vmem:[#allocation71_spill] sm:$0xff] %v10502_v42  ;;  %v10504_v0 = vpop.f32.mrb[33].mxu0 }
 0x182   : > { %14835 = vst [vmem:[#allocation72_spill] sm:$0xff] %v10504_v0  ;;  %v10508_v54 = vpop.f32.mrb[32].mxu1  ;;  %v1402_v11 = vmax.f32 %v10502_v42, %v10504_v0  ;;  %v10512_v14 = vpop.f32.mrb[34].mxu0  ;;  %v8805_v0 = vld [vmem:[%s9943_s29] sm:$0xff]  }
 0x183   : > { %14836 = vst [vmem:[#allocation73_spill] sm:$0xff] %v10508_v54  ;;  %14837 = vst [vmem:[#allocation74_spill] sm:$0xff] %v10512_v14  ;;  %v10514_v40 = vpop.f32.mrb[35].mxu0  ;;  %v10516_v26 = vpop.f32.mrb[33].mxu1  ;;  %v8806_v42 = vld [vmem:[%s9943_s29 + $0x80] sm:$0xff]   ;;  %8281 = vmatpush3.bf16.msra.mxu0 %v8805_v0 }
 0x184   : > { %14838 = vst [vmem:[#allocation75_spill] sm:$0xff] %v10514_v40  ;;  %14839 = vst [vmem:[#allocation76_spill] sm:$0xff] %v10516_v26  ;;  %1496 = vmax.xlane.f32.xlu1 %v1495_v58  ;;  %1403 = vmax.xlane.f32.xlu0 %v1402_v11  ;;  %v10518_v36 = vpop.f32.mrb[34].mxu1  ;;  %v1498_v35 = vmax.f32 %v10508_v54, %v10516_v26  ;;  %v1405_v30 = vmax.f32 %v10512_v14, %v10514_v40 }
 0x185   : > { %14840 = vst [vmem:[#allocation77_spill] sm:$0xff] %v10518_v36  ;;  %v10524_v39 = vpop.f32.mrb[35].mxu1  ;;  %8393 = vmatpush3.bf16.msra.mxu1 %v8806_v42 }
 0x186   : > { %14841 = vst [vmem:[#allocation78_spill] sm:$0xff] %v10524_v39  ;;  %v1501_v6 = vmax.f32 %v10518_v36, %v10524_v39 }
 0x188   : > { %1499 = vmax.xlane.f32.xlu0 %v1498_v35  ;;  %1406 = vmax.xlane.f32.xlu1 %v1405_v30  ;;  %v10530_v11 = vpop.f32.mrb[36].mxu0 }
 0x189   : > { %14842 = vst [vmem:[#allocation79_spill] sm:$0xff] %v10530_v11  ;;  %v10532_v58 = vpop.f32.mrb[37].mxu0 }
 0x18a   : > { %14843 = vst [vmem:[#allocation80_spill] sm:$0xff] %v10532_v58  ;;  %v10534_v38 = vpop.f32.mrb[36].mxu1  ;;  %v1408_v2 = vmax.f32 %v10530_v11, %v10532_v58  ;;  %v10538_v40 = vpop.f32.mrb[38].mxu0 }
 0x18b   : > { %14844 = vst [vmem:[#allocation81_spill] sm:$0xff] %v10534_v38  ;;  %14845 = vst [vmem:[#allocation82_spill] sm:$0xff] %v10538_v40  ;;  %v10540_v14 = vpop.f32.mrb[39].mxu0  ;;  %v10542_v39 = vpop.f32.mrb[37].mxu1 }
 0x18c   : > { %14846 = vst [vmem:[#allocation83_spill] sm:$0xff] %v10540_v14  ;;  %14847 = vst [vmem:[#allocation84_spill] sm:$0xff] %v10542_v39  ;;  %1502 = vmax.xlane.f32.xlu1 %v1501_v6  ;;  %1409 = vmax.xlane.f32.xlu0 %v1408_v2  ;;  %v10544_v0 = vpop.f32.mrb[38].mxu1  ;;  %v1504_v42 = vmax.f32 %v10534_v38, %v10542_v39  ;;  %v1411_v30 = vmax.f32 %v10538_v40, %v10540_v14  ;;  %v8807_v6 = vld [vmem:[%s9943_s29 + $0x48] sm:$0xff]  }
 0x18d   : > { %14848 = vst [vmem:[#allocation85_spill] sm:$0xff] %v10544_v0  ;;  %v10550_v35 = vpop.f32.mrb[39].mxu1  ;;  %v8808_v2 = vld [vmem:[%s9943_s29 + $0xc8] sm:$0xff]   ;;  %8282 = vmatprep.subr.bf16.mxu0 %v8807_v6 }
 0x18e   : > { %14849 = vst [vmem:[#allocation86_spill] sm:$0xff] %v10550_v35  ;;  %v1507_v58 = vmax.f32 %v10544_v0, %v10550_v35  ;;  %8394 = vmatprep.subr.bf16.mxu1 %v8808_v2 }
 0x190   : > { %1505 = vmax.xlane.f32.xlu0 %v1504_v42  ;;  %1412 = vmax.xlane.f32.xlu1 %v1411_v30  ;;  %v10554_v11 = vpop.f32.mrb[40].mxu0 }
 0x191   : > { %14850 = vst [vmem:[#allocation87_spill] sm:$0xff] %v10554_v11  ;;  %v10556_v36 = vpop.f32.mrb[41].mxu0 }
 0x192   : > { %14851 = vst [vmem:[#allocation88_spill] sm:$0xff] %v10556_v36  ;;  %v10560_v26 = vpop.f32.mrb[40].mxu1  ;;  %v1414_v14 = vmax.f32 %v10554_v11, %v10556_v36  ;;  %v10564_v40 = vpop.f32.mrb[42].mxu0  ;;  %v8809_v36 = vld [vmem:[%s9943_s29 + $0x8] sm:$0xff]  }
 0x193   : > { %14852 = vst [vmem:[#allocation89_spill] sm:$0xff] %v10560_v26  ;;  %14853 = vst [vmem:[#allocation90_spill] sm:$0xff] %v10564_v40  ;;  %v10566_v39 = vpop.f32.mrb[43].mxu0  ;;  %v10568_v35 = vpop.f32.mrb[41].mxu1  ;;  %v8810_v11 = vld [vmem:[%s9943_s29 + $0x88] sm:$0xff]   ;;  %8283 = vmatpush3.bf16.msra.mxu0 %v8809_v36 }
 0x194   : > { %14854 = vst [vmem:[#allocation91_spill] sm:$0xff] %v10566_v39  ;;  %14855 = vst [vmem:[#allocation92_spill] sm:$0xff] %v10568_v35  ;;  %1508 = vmax.xlane.f32.xlu1 %v1507_v58  ;;  %1415 = vmax.xlane.f32.xlu0 %v1414_v14  ;;  %v10570_v42 = vpop.f32.mrb[42].mxu1  ;;  %v1510_v30 = vmax.f32 %v10560_v26, %v10568_v35  ;;  %v1417_v0 = vmax.f32 %v10564_v40, %v10566_v39 }
 0x195   : > { %14856 = vst [vmem:[#allocation93_spill] sm:$0xff] %v10570_v42  ;;  %v10576_v38 = vpop.f32.mrb[43].mxu1  ;;  %8395 = vmatpush3.bf16.msra.mxu1 %v8810_v11 }
 0x196   : > { %14857 = vst [vmem:[#allocation94_spill] sm:$0xff] %v10576_v38  ;;  %v1513_v54 = vmax.f32 %v10570_v42, %v10576_v38 }
 0x198   : > { %1511 = vmax.xlane.f32.xlu0 %v1510_v30  ;;  %1418 = vmax.xlane.f32.xlu1 %v1417_v0  ;;  %v10582_v14 = vpop.f32.mrb[44].mxu0 }
 0x199   : > { %14858 = vst [vmem:[#allocation95_spill] sm:$0xff] %v10582_v14  ;;  %v10584_v58 = vpop.f32.mrb[45].mxu0 }
 0x19a   : > { %14859 = vst [vmem:[#allocation96_spill] sm:$0xff] %v10584_v58  ;;  %v10586_v6 = vpop.f32.mrb[44].mxu1  ;;  %v1420_v2 = vmax.f32 %v10582_v14, %v10584_v58  ;;  %v10590_v39 = vpop.f32.mrb[46].mxu0 }
 0x19b   : > { %14860 = vst [vmem:[#allocation97_spill] sm:$0xff] %v10586_v6  ;;  %14861 = vst [vmem:[#allocation98_spill] sm:$0xff] %v10590_v39  ;;  %v10592_v40 = vpop.f32.mrb[47].mxu0  ;;  %v10594_v38 = vpop.f32.mrb[45].mxu1 }
 0x19c   : > { %14862 = vst [vmem:[#allocation99_spill] sm:$0xff] %v10592_v40  ;;  %14863 = vst [vmem:[#allocation100_spill] sm:$0xff] %v10594_v38  ;;  %1514 = vmax.xlane.f32.xlu1 %v1513_v54  ;;  %1421 = vmax.xlane.f32.xlu0 %v1420_v2  ;;  %v10596_v36 = vpop.f32.mrb[46].mxu1  ;;  %v1516_v11 = vmax.f32 %v10586_v6, %v10594_v38  ;;  %v1423_v0 = vmax.f32 %v10590_v39, %v10592_v40  ;;  %v8811_v54 = vld [vmem:[%s9943_s29 + $0x50] sm:$0xff]  }
 0x19d   : > { %14864 = vst [vmem:[#allocation101_spill] sm:$0xff] %v10596_v36  ;;  %v10602_v30 = vpop.f32.mrb[47].mxu1  ;;  %v8812_v2 = vld [vmem:[%s9943_s29 + $0xd0] sm:$0xff]   ;;  %8284 = vmatprep.subr.bf16.mxu0 %v8811_v54 }
 0x19e   : > { %14865 = vst [vmem:[#allocation102_spill] sm:$0xff] %v10602_v30  ;;  %v1519_v58 = vmax.f32 %v10596_v36, %v10602_v30  ;;  %8396 = vmatprep.subr.bf16.mxu1 %v8812_v2 }
 0x1a0   : > { %1517 = vmax.xlane.f32.xlu0 %v1516_v11  ;;  %1424 = vmax.xlane.f32.xlu1 %v1423_v0  ;;  %v10606_v14 = vpop.f32.mrb[48].mxu0 }
 0x1a1   : > { %14866 = vst [vmem:[#allocation103_spill] sm:$0xff] %v10606_v14  ;;  %v10608_v42 = vpop.f32.mrb[49].mxu0 }
 0x1a2   : > { %14867 = vst [vmem:[#allocation104_spill] sm:$0xff] %v10608_v42  ;;  %v10612_v35 = vpop.f32.mrb[48].mxu1  ;;  %v1426_v38 = vmax.f32 %v10606_v14, %v10608_v42  ;;  %v10616_v6 = vpop.f32.mrb[50].mxu0  ;;  %v8813_v42 = vld [vmem:[%s9943_s29 + $0x10] sm:$0xff]  }
 0x1a3   : > { %14868 = vst [vmem:[#allocation105_spill] sm:$0xff] %v10612_v35  ;;  %14869 = vst [vmem:[#allocation106_spill] sm:$0xff] %v10616_v6  ;;  %v10618_v40 = vpop.f32.mrb[51].mxu0  ;;  %v10620_v30 = vpop.f32.mrb[49].mxu1  ;;  %v8814_v14 = vld [vmem:[%s9943_s29 + $0x90] sm:$0xff]   ;;  %8285 = vmatpush3.bf16.msra.mxu0 %v8813_v42 }
 0x1a4   : > { %14870 = vst [vmem:[#allocation107_spill] sm:$0xff] %v10618_v40  ;;  %14871 = vst [vmem:[#allocation108_spill] sm:$0xff] %v10620_v30  ;;  %1520 = vmax.xlane.f32.xlu1 %v1519_v58  ;;  %1427 = vmax.xlane.f32.xlu0 %v1426_v38  ;;  %v10622_v11 = vpop.f32.mrb[50].mxu1  ;;  %v1522_v0 = vmax.f32 %v10612_v35, %v10620_v30  ;;  %v1429_v36 = vmax.f32 %v10616_v6, %v10618_v40 }
 0x1a5   : > { %14872 = vst [vmem:[#allocation109_spill] sm:$0xff] %v10622_v11  ;;  %v10628_v39 = vpop.f32.mrb[51].mxu1  ;;  %8397 = vmatpush3.bf16.msra.mxu1 %v8814_v14 }
 0x1a6   : > { %14873 = vst [vmem:[#allocation110_spill] sm:$0xff] %v10628_v39  ;;  %v1525_v26 = vmax.f32 %v10622_v11, %v10628_v39 }
 0x1a8   : > { %1523 = vmax.xlane.f32.xlu0 %v1522_v0  ;;  %1430 = vmax.xlane.f32.xlu1 %v1429_v36  ;;  %v10634_v38 = vpop.f32.mrb[52].mxu0 }
 0x1a9   : > { %14874 = vst [vmem:[#allocation111_spill] sm:$0xff] %v10634_v38  ;;  %v10636_v58 = vpop.f32.mrb[53].mxu0 }
 0x1aa   : > { %14875 = vst [vmem:[#allocation112_spill] sm:$0xff] %v10636_v58  ;;  %v10638_v54 = vpop.f32.mrb[52].mxu1  ;;  %v1432_v2 = vmax.f32 %v10634_v38, %v10636_v58  ;;  %v10642_v30 = vpop.f32.mrb[54].mxu0 }
 0x1ab   : > { %14876 = vst [vmem:[#allocation113_spill] sm:$0xff] %v10638_v54  ;;  %14877 = vst [vmem:[#allocation114_spill] sm:$0xff] %v10642_v30  ;;  %v10644_v35 = vpop.f32.mrb[55].mxu0  ;;  %v10646_v39 = vpop.f32.mrb[53].mxu1 }
 0x1ac   : > { %14878 = vst [vmem:[#allocation115_spill] sm:$0xff] %v10644_v35  ;;  %14879 = vst [vmem:[#allocation116_spill] sm:$0xff] %v10646_v39  ;;  %1526 = vmax.xlane.f32.xlu1 %v1525_v26  ;;  %1433 = vmax.xlane.f32.xlu0 %v1432_v2  ;;  %v10648_v42 = vpop.f32.mrb[54].mxu1  ;;  %v1528_v14 = vmax.f32 %v10638_v54, %v10646_v39  ;;  %v1435_v36 = vmax.f32 %v10642_v30, %v10644_v35  ;;  %v8815_v26 = vld [vmem:[%s9943_s29 + $0x58] sm:$0xff]  }
 0x1ad   : > { %14880 = vst [vmem:[#allocation117_spill] sm:$0xff] %v10648_v42  ;;  %v10654_v0 = vpop.f32.mrb[55].mxu1  ;;  %v8816_v2 = vld [vmem:[%s9943_s29 + $0xd8] sm:$0xff]   ;;  %8286 = vmatprep.subr.bf16.mxu0 %v8815_v26 }
 0x1ae   : > { %14881 = vst [vmem:[#allocation118_spill] sm:$0xff] %v10654_v0  ;;  %v1531_v58 = vmax.f32 %v10648_v42, %v10654_v0  ;;  %8398 = vmatprep.subr.bf16.mxu1 %v8816_v2  ;;  %v8817_v30 = vld [vmem:[%s9943_s29 + $0x18] sm:$0xff]  }
 0x1af   : > { %8287 = vmatpush3.bf16.msra.mxu0 %v8817_v30 }
 0x1b0   : > { %1529 = vmax.xlane.f32.xlu0 %v1528_v14  ;;  %1436 = vmax.xlane.f32.xlu1 %v1435_v36  ;;  %v10658_v38 = vpop.f32.mrb[56].mxu0 }
 0x1b1   : > { %14882 = vst [vmem:[#allocation119_spill] sm:$0xff] %v10658_v38  ;;  %v10662_v11 = vpop.f32.mrb[57].mxu0 }
 0x1b2   : > { %14883 = vst [vmem:[#allocation120_spill] sm:$0xff] %v10662_v11  ;;  %v10664_v40 = vpop.f32.mrb[56].mxu1  ;;  %v1438_v39 = vmax.f32 %v10658_v38, %v10662_v11  ;;  %v10668_v54 = vpop.f32.mrb[58].mxu0  ;;  %v8818_v11 = vld [vmem:[%s9943_s29 + $0x98] sm:$0xff]  }
 0x1b3   : > { %14884 = vst [vmem:[#allocation121_spill] sm:$0xff] %v10664_v40  ;;  %14885 = vst [vmem:[#allocation122_spill] sm:$0xff] %v10668_v54  ;;  %v10670_v0 = vpop.f32.mrb[59].mxu0  ;;  %v10672_v14 = vpop.f32.mrb[57].mxu1  ;;  %8399 = vmatpush3.bf16.msra.mxu1 %v8818_v11 }
 0x1b4   : > { %14886 = vst [vmem:[#allocation123_spill] sm:$0xff] %v10670_v0  ;;  %14887 = vst [vmem:[#allocation124_spill] sm:$0xff] %v10672_v14  ;;  %1532 = vmax.xlane.f32.xlu1 %v1531_v58  ;;  %1439 = vmax.xlane.f32.xlu0 %v1438_v39  ;;  %v10674_v36 = vpop.f32.mrb[58].mxu1  ;;  %v1534_v42 = vmax.f32 %v10664_v40, %v10672_v14  ;;  %v1441_v35 = vmax.f32 %v10668_v54, %v10670_v0 }
 0x1b5   : > { %14888 = vst [vmem:[#allocation125_spill] sm:$0xff] %v10674_v36  ;;  %v10682_v38 = vpop.f32.mrb[59].mxu1 }
 0x1b6   : > { %14889 = vst [vmem:[#allocation126_spill] sm:$0xff] %v10682_v38  ;;  %v1537_v26 = vmax.f32 %v10674_v36, %v10682_v38  ;;  %v8819_v38 = vld [vmem:[%s9943_s29 + $0x60] sm:$0xff]  }
 0x1b7   : > { %8288 = vmatprep.subr.bf16.mxu0 %v8819_v38  ;;  %v10721_v38 = vld [vmem:[#allocation2 + $0x108] sm:$0xff] }
 0x1b8   : > { %1535 = vmax.xlane.f32.xlu0 %v1534_v42  ;;  %1442 = vmax.xlane.f32.xlu1 %v1441_v35  ;;  %v10686_v39 = vpop.f32.mrb[60].mxu0 }
 0x1b9   : > { %14890 = vst [vmem:[#allocation127_spill] sm:$0xff] %v10686_v39  ;;  %v10688_v58 = vpop.f32.mrb[61].mxu0 }
 0x1ba   : > { %14891 = vst [vmem:[#allocation128_spill] sm:$0xff] %v10688_v58  ;;  %v10690_v2 = vpop.f32.mrb[60].mxu1  ;;  %v1444_v14 = vmax.f32 %v10686_v39, %v10688_v58  ;;  %v10694_v40 = vpop.f32.mrb[62].mxu0 }
 0x1bb   : > { %14892 = vst [vmem:[#allocation129_spill] sm:$0xff] %v10690_v2  ;;  %14893 = vst [vmem:[#allocation130_spill] sm:$0xff] %v10694_v40  ;;  %v10696_v0 = vpop.f32.mrb[63].mxu0  ;;  %v10698_v30 = vpop.f32.mrb[61].mxu1 }
 0x1bc   : > { %14894 = vst [vmem:[#allocation131_spill] sm:$0xff] %v10696_v0  ;;  %14895 = vst [vmem:[#allocation132_spill] sm:$0xff] %v10698_v30  ;;  %1538 = vmax.xlane.f32.xlu1 %v1537_v26  ;;  %1445 = vmax.xlane.f32.xlu0 %v1444_v14  ;;  %v10700_v35 = vpop.f32.mrb[62].mxu1  ;;  %v1540_v11 = vmax.f32 %v10690_v2, %v10698_v30  ;;  %v1447_v42 = vmax.f32 %v10694_v40, %v10696_v0  ;;  %v8820_v26 = vld [vmem:[%s9943_s29 + $0xe0] sm:$0xff]   ;;  %v8823_v0 = vld [vmem:[%s9943_s29 + $0x68] sm:$0xff]  }
 0x1bd   : > { %14896 = vst [vmem:[#allocation133_spill] sm:$0xff] %v10700_v35  ;;  %v10706_v58 = vpop.f32.mrb[63].mxu1  ;;  %8400 = vmatprep.subr.bf16.mxu1 %v8820_v26  ;;  %v8821_v14 = vld [vmem:[%s9943_s29 + $0x20] sm:$0xff]   ;;  %v8824_v40 = vld [vmem:[%s9943_s29 + $0xe8] sm:$0xff]  }
 0x1be   : > { %14897 = vst [vmem:[#allocation134_spill] sm:$0xff] %v10706_v58  ;;  %v1543_v39 = vmax.f32 %v10700_v35, %v10706_v58  ;;  %v8822_v30 = vld [vmem:[%s9943_s29 + $0xa0] sm:$0xff]   ;;  %8289 = vmatpush3.bf16.msra.mxu0 %v8821_v14  ;;  %v8826_v26 = vld [vmem:[%s9943_s29 + $0xa8] sm:$0xff]  }
 0x1bf   : > { %8401 = vmatpush3.bf16.msra.mxu1 %v8822_v30  ;;  %v10714_v2 = vld [vmem:[#allocation2] sm:$0xff]  ;;  %8290 = vmatprep.subr.bf16.mxu0 %v8823_v0  ;;  %v8825_v30 = vld [vmem:[%s9943_s29 + $0x28] sm:$0xff]  }
 0x1c0   : > { %1541 = vmax.xlane.f32.xlu0 %v1540_v11  ;;  %1448 = vmax.xlane.f32.xlu1 %v1447_v42  ;;  %v10759_v42 = vld [vmem:[#allocation2 + $0x18] sm:$0xff] }
 0x1c1   : > { %8402 = vmatprep.subr.bf16.mxu1 %v8824_v40  ;;  %v10738_v40 = vld [vmem:[#allocation2 + $0x8] sm:$0xff] }
 0x1c2   : > { %8291 = vmatpush3.bf16.msra.mxu0 %v8825_v30 }
 0x1c3   : > { %8403 = vmatpush3.bf16.msra.mxu1 %v8826_v26  ;;  %v10757_v26 = vld [vmem:[#allocation2 + $0x110] sm:$0xff]  ;;  %8292 = vmatprep.subr.bf16.mxu0 %v8827_v28 }
 0x1c4   : > { %1544 = vmax.xlane.f32.xlu1 %v1543_v39  ;;  %v10723_v39 = vld [vmem:[#allocation2 + $0x100] sm:$0xff]  ;;  %8404 = vmatprep.subr.bf16.mxu1 %v8828_v27 }
 0x1c6   : > { %8293 = vmatpush3.bf16.msra.mxu0 %v8829_v24 }
 0x1c7   : > { %8405 = vmatpush3.bf16.msra.mxu1 %v8830_v25  ;;  %v8831_v25 = vld [vmem:[%s9943_s29 + $0x78] sm:$0xff]  }
 0x1c8   : > { %8294 = vmatprep.subr.bf16.mxu0 %v8831_v25  ;;  %8406 = vmatprep.subr.bf16.mxu1 %v8833_v13  ;;  %v10884_v25 = vld [vmem:[#allocation2 + $0x48] sm:$0xff] }
 0x1d1   : > { %v1356_v36 = vpop.xlane.xlu0 %1355 }
 0x1d2   : > { %v10719_v11 = vmax.f32 %v10714_v2, %v1356_v36  ;;  %v10740_v36 = vld [vmem:[#allocation2 + $0x10] sm:$0xff] }
 0x1d4   : > { %3662 = vst.msk [vmem:[#allocation2] sm:$0xff] %vm3661_vm3, %v10719_v11 }
 0x1d5   : > { %v1455_v14 = vpop.xlane.xlu1 %1454  ;;  %v1452_v58 = vpop.xlane.xlu0 %1451 }
 0x1d6   : > { %v10732_v35 = vmax.f32 %v10721_v38, %v1455_v14  ;;  %v10735_v0 = vmax.f32 %v10723_v39, %v1452_v58  ;;  %1804 = vperm.xlu0 %8757, %v10719_v11  }
 0x1d8   : > { %3695 = vst.msk [vmem:[#allocation2 + $0x108] sm:$0xff] %vm3661_vm3, %v10732_v35  ;;  %3694 = vst.msk [vmem:[#allocation2 + $0x100] sm:$0xff] %vm3661_vm3, %v10735_v0 }
 0x1d9   : > { %v1359_v58 = vpop.xlane.xlu0 %1358  ;;  %v1362_v54 = vpop.xlane.xlu1 %1361 }
 0x1da   : > { %v10751_v30 = vmax.f32 %v10738_v40, %v1359_v58  ;;  %v10754_v6 = vmax.f32 %v10740_v36, %v1362_v54  ;;  %1964 = vperm.xlu0 %8757, %v10735_v0  }
 0x1dc   : > { %3663 = vst.msk [vmem:[#allocation2 + $0x8] sm:$0xff] %vm3661_vm3, %v10751_v30  ;;  %3664 = vst.msk [vmem:[#allocation2 + $0x10] sm:$0xff] %vm3661_vm3, %v10754_v6  ;;  %1809 = vperm.xlu1 %8758, %v10751_v30  }
 0x1dd   : > { %v1458_v54 = vpop.xlane.xlu0 %1457  ;;  %v1365_v58 = vpop.xlane.xlu1 %1364 }
 0x1de   : > { %v10771_v37 = vmax.f32 %v10757_v26, %v1458_v54  ;;  %v10774_v14 = vmax.f32 %v10759_v42, %v1365_v58 }
 0x1e0   : > { %3696 = vst.msk [vmem:[#allocation2 + $0x110] sm:$0xff] %vm3661_vm3, %v10771_v37  ;;  %3665 = vst.msk [vmem:[#allocation2 + $0x18] sm:$0xff] %vm3661_vm3, %v10774_v14  ;;  %1974 = vperm.xlu0 %8757, %v10771_v37   ;;  %1969 = vperm.xlu1 %8758, %v10732_v35  }
 0x1e1   : > { %v1461_v54 = vpop.xlane.xlu1 %1460  ;;  %v1368_v58 = vpop.xlane.xlu0 %1367 }
 0x1e2   : > { %v10794_v23 = vmax.f32 %v10776_v34, %v1461_v54  ;;  %v10797_v12 = vmax.f32 %v10778_v63, %v1368_v58 }
 0x1e4   : > { %3697 = vst.msk [vmem:[#allocation2 + $0x118] sm:$0xff] %vm3661_vm3, %v10794_v23  ;;  %3666 = vst.msk [vmem:[#allocation2 + $0x20] sm:$0xff] %vm3661_vm3, %v10797_v12  ;;  %1814 = vperm.xlu1 %8758, %v10754_v6  }
 0x1e5   : > { %v1464_v58 = vpop.xlane.xlu0 %1463  ;;  %v1371_v47 = vpop.xlane.xlu1 %1370 }
 0x1e6   : > { %v10814_v27 = vmax.f32 %v10800_v18, %v1464_v58  ;;  %v10817_v28 = vmax.f32 %v10802_v22, %v1371_v47 }
 0x1e8   : > { %3698 = vst.msk [vmem:[#allocation2 + $0x120] sm:$0xff] %vm3661_vm3, %v10814_v27  ;;  %3667 = vst.msk [vmem:[#allocation2 + $0x28] sm:$0xff] %vm3661_vm3, %v10817_v28  ;;  %1984 = vperm.xlu0 %8757, %v10814_v27   ;;  %1819 = vperm.xlu1 %8758, %v10774_v14  }
 0x1e9   : > { %v1467_v47 = vpop.xlane.xlu1 %1466  ;;  %v1374_v24 = vpop.xlane.xlu0 %1373 }
 0x1ea   : > { %v10834_v58 = vmax.f32 %v10819_v51, %v1467_v47  ;;  %v10837_v54 = vmax.f32 %v10821_v20, %v1374_v24  ;;  %v8832_v47 = vld [vmem:[%s9943_s29 + $0x38] sm:$0xff]  }
 0x1eb   : > { %8295 = vmatpush3.bf16.msra.mxu0 %v8832_v47 }
 0x1ec   : > { %3699 = vst.msk [vmem:[#allocation2 + $0x128] sm:$0xff] %vm3661_vm3, %v10834_v58  ;;  %3668 = vst.msk [vmem:[#allocation2 + $0x30] sm:$0xff] %vm3661_vm3, %v10837_v54  ;;  %1979 = vperm.xlu1 %8758, %v10794_v23  }
 0x1ed   : > { %v1470_v24 = vpop.xlane.xlu0 %1469  ;;  %v1377_v15 = vpop.xlane.xlu1 %1376 }
 0x1ee   : > { %v10855_v32 = vmax.f32 %v10839_v19, %v1470_v24  ;;  %v10858_v41 = vmax.f32 %v10841_v52, %v1377_v15  ;;  %v8834_v15 = vld [vmem:[%s9943_s29 + $0xb8] sm:$0xff]  }
 0x1ef   : > { %8407 = vmatpush3.bf16.msra.mxu1 %v8834_v15 }
 0x1f0   : > { %3700 = vst.msk [vmem:[#allocation2 + $0x130] sm:$0xff] %vm3661_vm3, %v10855_v32  ;;  %3669 = vst.msk [vmem:[#allocation2 + $0x38] sm:$0xff] %vm3661_vm3, %v10858_v41  ;;  %1994 = vperm.xlu0 %8757, %v10855_v32   ;;  %1824 = vperm.xlu1 %8758, %v10797_v12  }
 0x1f1   : > { %v1473_v47 = vpop.xlane.xlu1 %1472  ;;  %v1380_v24 = vpop.xlane.xlu0 %1379 }
 0x1f2   : > { %v10877_v33 = vmax.f32 %v10860_v31, %v1473_v47  ;;  %v10880_v10 = vmax.f32 %v10862_v16, %v1380_v24 }
 0x1f4   : > { %3701 = vst.msk [vmem:[#allocation2 + $0x138] sm:$0xff] %vm3661_vm3, %v10877_v33  ;;  %3670 = vst.msk [vmem:[#allocation2 + $0x40] sm:$0xff] %vm3661_vm3, %v10880_v10  ;;  %1829 = vperm.xlu1 %8758, %v10817_v28  }
 0x1f5   : > { %v1476_v47 = vpop.xlane.xlu0 %1475  ;;  %v1383_v15 = vpop.xlane.xlu1 %1382 }
 0x1f6   : > { %v10896_v24 = vmax.f32 %v10882_v29, %v1476_v47  ;;  %v10899_v7 = vmax.f32 %v10884_v25, %v1383_v15 }
 0x1f8   : > { %3702 = vst.msk [vmem:[#allocation2 + $0x140] sm:$0xff] %vm3661_vm3, %v10896_v24  ;;  %3671 = vst.msk [vmem:[#allocation2 + $0x48] sm:$0xff] %vm3661_vm3, %v10899_v7  ;;  %2004 = vperm.xlu0 %8757, %v10896_v24   ;;  %1989 = vperm.xlu1 %8758, %v10834_v58  }
 0x1f9   : > { %v1479_v47 = vpop.xlane.xlu1 %1478  ;;  %v1386_v15 = vpop.xlane.xlu0 %1385 }
 0x1fa   : > { %v10916_v3 = vmax.f32 %v10901_v8, %v1479_v47  ;;  %v10919_v13 = vmax.f32 %v10903_v21, %v1386_v15 }
 0x1fc   : > { %3703 = vst.msk [vmem:[#allocation2 + $0x148] sm:$0xff] %vm3661_vm3, %v10916_v3  ;;  %3672 = vst.msk [vmem:[#allocation2 + $0x50] sm:$0xff] %vm3661_vm3, %v10919_v13  ;;  %1849 = vperm.xlu0 %8757, %v10899_v7   ;;  %1834 = vperm.xlu1 %8758, %v10837_v54  }
 0x1fd   : > { %v1482_v47 = vpop.xlane.xlu0 %1481  ;;  %v1389_v15 = vpop.xlane.xlu1 %1388 }
 0x1fe   : > { %v10936_v9 = vmax.f32 %v10921_v17, %v1482_v47  ;;  %v10939_v4 = vmax.f32 %v10923_v1, %v1389_v15 }
 0x200   : > { %14898 = vst [vmem:[#allocation135_spill] sm:$0xff] %v10939_v4  ;;  %3704 = vst.msk [vmem:[#allocation2 + $0x150] sm:$0xff] %vm3661_vm3, %v10936_v9  ;;  %2014 = vperm.xlu0 %8757, %v10936_v9   ;;  %1839 = vperm.xlu1 %8758, %v10858_v41  }
 0x201   : > { %3673 = vst.msk [vmem:[#allocation2 + $0x58] sm:$0xff] %vm3661_vm3, %v10939_v4  ;;  %v1485_v47 = vpop.xlane.xlu1 %1484  ;;  %v1392_v15 = vpop.xlane.xlu0 %1391 }
 0x202   : > { %v10956_v59 = vmax.f32 %v10941_v5, %v1485_v47  ;;  %v10959_v62 = vmax.f32 %v10943_v61, %v1392_v15  ;;  %v11063_v61 = vld [vmem:[#allocation2 + $0x90] sm:$0xff]  ;;  %v11107_v5 = vld [vmem:[#allocation2 + $0x198] sm:$0xff] }
 0x203   : > { %14921 = vst [vmem:[#allocation158_spill] sm:$0xff] %v11063_v61 }
 0x204   : > { %14901 = vst [vmem:[#allocation138_spill] sm:$0xff] %v10956_v59  ;;  %14902 = vst [vmem:[#allocation139_spill] sm:$0xff] %v10959_v62  ;;  %1859 = vperm.xlu0 %8757, %v10939_v4   ;;  %1999 = vperm.xlu1 %8758, %v10877_v33  }
 0x205   : > { %3705 = vst.msk [vmem:[#allocation2 + $0x158] sm:$0xff] %vm3661_vm3, %v10956_v59  ;;  %3674 = vst.msk [vmem:[#allocation2 + $0x60] sm:$0xff] %vm3661_vm3, %v10959_v62  ;;  %v1488_v47 = vpop.xlane.xlu0 %1487  ;;  %v1395_v15 = vpop.xlane.xlu1 %1394 }
 0x206   : > { %v10976_v53 = vmax.f32 %v10961_v56, %v1488_v47  ;;  %v10979_v60 = vmax.f32 %v10963_v55, %v1395_v15  ;;  %v11043_v56 = vld [vmem:[#allocation2 + $0x88] sm:$0xff] }
 0x207   : > { %14917 = vst [vmem:[#allocation154_spill] sm:$0xff] %v11043_v56 }
 0x208   : > { %14905 = vst [vmem:[#allocation142_spill] sm:$0xff] %v10976_v53  ;;  %14906 = vst [vmem:[#allocation143_spill] sm:$0xff] %v10979_v60  ;;  %2024 = vperm.xlu0 %8757, %v10976_v53   ;;  %1844 = vperm.xlu1 %8758, %v10880_v10  }
 0x209   : > { %3706 = vst.msk [vmem:[#allocation2 + $0x160] sm:$0xff] %vm3661_vm3, %v10976_v53  ;;  %3675 = vst.msk [vmem:[#allocation2 + $0x68] sm:$0xff] %vm3661_vm3, %v10979_v60  ;;  %v1491_v47 = vpop.xlane.xlu1 %1490  ;;  %v1398_v15 = vpop.xlane.xlu0 %1397  ;;  %v11023_v53 = vld [vmem:[#allocation2 + $0x80] sm:$0xff] }
 0x20a   : > { %v10996_v46 = vmax.f32 %v10981_v50, %v1491_v47  ;;  %v10999_v57 = vmax.f32 %v10983_v48, %v1398_v15  ;;  %v11021_v50 = vld [vmem:[#allocation2 + $0x178] sm:$0xff]  ;;  %14915 = vst [vmem:[#allocation152_spill] sm:$0xff] %v11023_v53 }
 0x20b   : > { %14914 = vst [vmem:[#allocation151_spill] sm:$0xff] %v11021_v50 }
 0x20c   : > { %14909 = vst [vmem:[#allocation146_spill] sm:$0xff] %v10996_v46  ;;  %3707 = vst.msk [vmem:[#allocation2 + $0x168] sm:$0xff] %vm3661_vm3, %v10996_v46  ;;  %1869 = vperm.xlu0 %8757, %v10979_v60   ;;  %2009 = vperm.xlu1 %8758, %v10916_v3  }
 0x20d   : > { %3676 = vst.msk [vmem:[#allocation2 + $0x70] sm:$0xff] %vm3661_vm3, %v10999_v57  ;;  %v1494_v47 = vpop.xlane.xlu0 %1493  ;;  %v1401_v15 = vpop.xlane.xlu1 %1400 }
 0x20e   : > { %v11016_v55 = vmax.f32 %v11001_v45, %v1494_v47  ;;  %v11019_v49 = vmax.f32 %v11003_v44, %v1401_v15  ;;  %v11041_v45 = vld [vmem:[#allocation2 + $0x180] sm:$0xff] }
 0x20f   : > { %14916 = vst [vmem:[#allocation153_spill] sm:$0xff] %v11041_v45 }
 0x210   : > { %14912 = vst [vmem:[#allocation149_spill] sm:$0xff] %v11016_v55  ;;  %14913 = vst [vmem:[#allocation150_spill] sm:$0xff] %v11019_v49  ;;  %2034 = vperm.xlu0 %8757, %v11016_v55   ;;  %1854 = vperm.xlu1 %8758, %v10919_v13  }
 0x211   : > { %3708 = vst.msk [vmem:[#allocation2 + $0x170] sm:$0xff] %vm3661_vm3, %v11016_v55  ;;  %3677 = vst.msk [vmem:[#allocation2 + $0x78] sm:$0xff] %vm3661_vm3, %v11019_v49  ;;  %v1497_v47 = vpop.xlane.xlu1 %1496  ;;  %v1404_v15 = vpop.xlane.xlu0 %1403 }
 0x212   : > { %v11036_v60 = vmax.f32 %v11021_v50, %v1497_v47  ;;  %v11039_v43 = vmax.f32 %v11023_v53, %v1404_v15  ;;  %v11061_v50 = vld [vmem:[#allocation2 + $0x188] sm:$0xff] }
 0x213   : > { %14920 = vst [vmem:[#allocation157_spill] sm:$0xff] %v11061_v50 }
 0x214   : > { %3709 = vst.msk [vmem:[#allocation2 + $0x178] sm:$0xff] %vm3661_vm3, %v11036_v60  ;;  %3678 = vst.msk [vmem:[#allocation2 + $0x80] sm:$0xff] %vm3661_vm3, %v11039_v43  ;;  %1879 = vperm.xlu0 %8757, %v11019_v49   ;;  %2019 = vperm.xlu1 %8758, %v10956_v59   ;;  %v11083_v59 = vld [vmem:[#allocation2 + $0x98] sm:$0xff] }
 0x215   : > { %v1500_v47 = vpop.xlane.xlu0 %1499  ;;  %v1407_v15 = vpop.xlane.xlu1 %1406 }
 0x216   : > { %v11056_v55 = vmax.f32 %v11041_v45, %v1500_v47  ;;  %v11059_v48 = vmax.f32 %v11043_v56, %v1407_v15  ;;  %v11081_v45 = vld [vmem:[#allocation2 + $0x190] sm:$0xff]  ;;  %v14923_v56 = vsub.f32 %v10721_v38, %v10732_v35  ;;  %v14926_v38 = vsub.f32 %v10740_v36, %v10754_v6 }
 0x218   : > { %14918 = vst [vmem:[#allocation155_spill] sm:$0xff] %v11056_v55  ;;  %14919 = vst [vmem:[#allocation156_spill] sm:$0xff] %v11059_v48  ;;  %2044 = vperm.xlu0 %8757, %v11056_v55   ;;  %1864 = vperm.xlu1 %8758, %v10959_v62  }
 0x219   : > { %3710 = vst.msk [vmem:[#allocation2 + $0x180] sm:$0xff] %vm3661_vm3, %v11056_v55  ;;  %3679 = vst.msk [vmem:[#allocation2 + $0x88] sm:$0xff] %vm3661_vm3, %v11059_v48  ;;  %v1503_v47 = vpop.xlane.xlu1 %1502  ;;  %v1410_v15 = vpop.xlane.xlu0 %1409  ;;  %v14922_v55 = vsub.f32 %v10714_v2, %v10719_v11 }
 0x21a   : > { %v11076_v49 = vmax.f32 %v11061_v50, %v1503_v47  ;;  %v11079_v44 = vmax.f32 %v11063_v61, %v1410_v15  ;;  %v1740_v61 = vmul.f32 1.442695, %v14923_v56  ;;  %v14925_v56 = vsub.f32 %v10738_v40, %v10751_v30  ;;  %v11139_v40 = vld [vmem:[#allocation2 + $0x1a0] sm:$0xff]  ;;  %v11141_v30 = vld [vmem:[#allocation2 + $0xa8] sm:$0xff] }
 0x21b   : > { %v1674_v62 = vmul.f32 1.442695, %v14922_v55 }
 0x21c   : > { %3711 = vst.msk [vmem:[#allocation2 + $0x188] sm:$0xff] %vm3661_vm3, %v11076_v49  ;;  %3680 = vst.msk [vmem:[#allocation2 + $0x90] sm:$0xff] %vm3661_vm3, %v11079_v44  ;;  %1889 = vperm.xlu0 %8757, %v11059_v48   ;;  %2029 = vperm.xlu1 %8758, %v10996_v46   ;;  %v11109_v48 = vld [vmem:[#allocation2 + $0xa0] sm:$0xff]  ;;  %v14924_v46 = vsub.f32 %v10723_v39, %v10735_v0  ;;  %v1678_v39 = vmul.f32 1.442695, %v14926_v38 }
 0x21d   : > { %v1506_v47 = vpop.xlane.xlu0 %1505  ;;  %v1413_v15 = vpop.xlane.xlu1 %1412  ;;  %8835 = vpow2.f32 %v1674_v62  ;;  %v14928_v62 = vsub.f32 %v10759_v42, %v10774_v14 }
 0x21e   : > { %v11099_v53 = vmax.f32 %v11081_v45, %v1506_v47  ;;  %v11102_v50 = vmax.f32 %v11083_v59, %v1413_v15  ;;  %v1738_v4 = vmul.f32 1.442695, %v14924_v46  ;;  %v1676_v46 = vmul.f32 1.442695, %v14925_v56 }
 0x21f   : > { %8837 = vpow2.f32 %v1740_v61  ;;  %v14927_v15 = vsub.f32 %v10757_v26, %v10771_v37  ;;  %v1680_v6 = vmul.f32 1.442695, %v14928_v62  ;;  %v14930_v26 = vsub.f32 %v10778_v63, %v10797_v12  ;;  %v14969_v61 = vld [vmem:[#allocation145_spill] sm:$0xff] }
 0x220   : > { %3712 = vst.msk [vmem:[#allocation2 + $0x190] sm:$0xff] %vm3661_vm3, %v11099_v53  ;;  %3681 = vst.msk [vmem:[#allocation2 + $0x98] sm:$0xff] %vm3661_vm3, %v11102_v50  ;;  %2054 = vperm.xlu0 %8757, %v11099_v53   ;;  %1874 = vperm.xlu1 %8758, %v10999_v57   ;;  %8839 = vpow2.f32 %v1738_v4  ;;  %v14929_v4 = vsub.f32 %v10776_v34, %v10794_v23  ;;  %v11171_v34 = vld [vmem:[#allocation2 + $0x1a8] sm:$0xff]  ;;  %v11173_v23 = vld [vmem:[#allocation2 + $0xb0] sm:$0xff]  ;;  %v14932_v12 = vsub.f32 %v10802_v22, %v10817_v28 }
 0x221   : > { %v1509_v35 = vpop.xlane.xlu1 %1508  ;;  %v1416_v11 = vpop.xlane.xlu0 %1415  ;;  %v1742_v2 = vmul.f32 1.442695, %v14927_v15  ;;  %8841 = vpow2.f32 %v1676_v46  ;;  %v1682_v56 = vmul.f32 1.442695, %v14930_v26  ;;  %v14931_v46 = vsub.f32 %v10800_v18, %v10814_v27 }
 0x222   : > { %v11131_v0 = vmax.f32 %v11107_v5, %v1509_v35  ;;  %v11134_v47 = vmax.f32 %v11109_v48, %v1416_v11  ;;  %v1744_v37 = vmul.f32 1.442695, %v14929_v4  ;;  %8843 = vpow2.f32 %v1678_v39 }
 0x223   : > { %8845 = vpow2.f32 %v1742_v2  ;;  %v1746_v38 = vmul.f32 1.442695, %v14931_v46  ;;  %v1684_v63 = vmul.f32 1.442695, %v14932_v12  ;;  %v14933_v22 = vsub.f32 %v10819_v51, %v10834_v58  ;;  %v11203_v51 = vld [vmem:[#allocation2 + $0xb8] sm:$0xff]  ;;  %v11205_v58 = vld [vmem:[#allocation2 + $0x1b0] sm:$0xff] }
 0x224   : > { %3713 = vst.msk [vmem:[#allocation2 + $0x198] sm:$0xff] %vm3661_vm3, %v11131_v0  ;;  %3682 = vst.msk [vmem:[#allocation2 + $0xa0] sm:$0xff] %vm3661_vm3, %v11134_v47  ;;  %1899 = vperm.xlu0 %8757, %v11102_v50   ;;  %2039 = vperm.xlu1 %8758, %v11036_v60   ;;  %8847 = vpow2.f32 %v1680_v6  ;;  %v14934_v15 = vsub.f32 %v10821_v20, %v10837_v54  ;;  %v14936_v20 = vsub.f32 %v10841_v52, %v10858_v41  ;;  %v11323_v2 = vld [vmem:[#allocation2 + $0x1c8] sm:$0xff] }
 0x225   : > { %v1512_v42 = vpop.xlane.xlu0 %1511  ;;  %v1419_v14 = vpop.xlane.xlu1 %1418  ;;  %8849 = vpow2.f32 %v1744_v37  ;;  %v1748_v18 = vmul.f32 1.442695, %v14933_v22  ;;  %v14935_v37 = vsub.f32 %v10839_v19, %v10855_v32  ;;  %v14938_v41 = vsub.f32 %v10860_v31, %v10877_v33 }
 0x226   : > { %v11163_v35 = vmax.f32 %v11139_v40, %v1512_v42  ;;  %v11166_v11 = vmax.f32 %v11141_v30, %v1419_v14  ;;  %8851 = vpow2.f32 %v1682_v56  ;;  %v1686_v62 = vmul.f32 1.442695, %v14934_v15  ;;  %v11245_v15 = vld [vmem:[#allocation2 + $0xc0] sm:$0xff] }
 0x227   : > { %8853 = vpow2.f32 %v1746_v38  ;;  %v1750_v42 = vmul.f32 1.442695, %v14935_v37  ;;  %v11207_v14 = vpop.eup %8835  ;;  %v1688_v54 = vmul.f32 1.442695, %v14936_v20  ;;  %v1752_v52 = vmul.f32 1.442695, %v14938_v41 }
 0x228   : > { %3714 = vst.msk [vmem:[#allocation2 + $0x1a0] sm:$0xff] %vm3661_vm3, %v11163_v35  ;;  %3683 = vst.msk [vmem:[#allocation2 + $0xa8] sm:$0xff] %vm3661_vm3, %v11166_v11  ;;  %2064 = vperm.xlu0 %8757, %v11163_v35   ;;  %1884 = vperm.xlu1 %8758, %v11039_v43   ;;  %8855 = vpow2.f32 %v1684_v63  ;;  %v14940_v12 = vsub.f32 %v10862_v16, %v10880_v10  ;;  %v14941_v31 = vsub.f32 %v10882_v29, %v10896_v24 }
 0x229   : > { %v1515_v27 = vpop.xlane.xlu1 %1514  ;;  %v1422_v28 = vpop.xlane.xlu0 %1421  ;;  %8857 = vpow2.f32 %v1748_v18  ;;  %v14942_v10 = vsub.f32 %v10884_v25, %v10899_v7  ;;  %v14944_v7 = vsub.f32 %v10901_v8, %v10916_v3  ;;  %v14945_v41 = vsub.f32 %v10903_v21, %v10919_v13  ;;  %v14948_v21 = vld [vmem:[#allocation135_spill] sm:$0xff] }
 0x22a   : > { %v11195_v6 = vmax.f32 %v11171_v34, %v1515_v27  ;;  %v11198_v4 = vmax.f32 %v11173_v23, %v1422_v28  ;;  %v11222_v32 = vpop.eup %8837  ;;  %8859 = vpow2.f32 %v1686_v62  ;;  %v1690_v63 = vmul.f32 1.442695, %v14940_v12  ;;  %v11243_v28 = vld [vmem:[#allocation2 + $0x1b8] sm:$0xff] }
 0x22b   : > { %14937 = vst [vmem:[#allocation159_spill] sm:$0xff] %v11222_v32  ;;  %v11227_v38 = vpop.eup %8839  ;;  %8861 = vpow2.f32 %v1750_v42  ;;  %v1754_v33 = vmul.f32 1.442695, %v14941_v31  ;;  %v1692_v16 = vmul.f32 1.442695, %v14942_v10  ;;  %v14947_v3 = vsub.f32 %v10921_v17, %v10936_v9  ;;  %v11283_v31 = vld [vmem:[#allocation2 + $0xc8] sm:$0xff] }
 0x22c   : > { %3715 = vst.msk [vmem:[#allocation2 + $0x1a8] sm:$0xff] %vm3661_vm3, %v11195_v6  ;;  %1909 = vperm.xlu0 %8757, %v11166_v11   ;;  %2049 = vperm.xlu1 %8758, %v11076_v49   ;;  %3684 = vst.msk [vmem:[#allocation2 + $0xb0] sm:$0xff] %vm3661_vm3, %v11198_v4  ;;  %v11238_v18 = vpop.eup %8841  ;;  %8863 = vpow2.f32 %v1688_v54  ;;  %v1756_v25 = vmul.f32 1.442695, %v14944_v7  ;;  %v14949_v13 = vsub.f32 %v10923_v1, %v14948_v21  ;;  %v14951_v1 = vld [vmem:[#allocation136_spill] sm:$0xff]  ;;  %v11403_v32 = vld [vmem:[#allocation2 + $0x1d8] sm:$0xff] }
 0x22d   : > { %v1425_v56 = vpop.xlane.xlu1 %1424  ;;  %v1518_v46 = vpop.xlane.xlu0 %1517  ;;  %14939 = vst [vmem:[#allocation160_spill] sm:$0xff] %v11227_v38  ;;  %8865 = vpow2.f32 %v1752_v52  ;;  %v1758_v8 = vmul.f32 1.442695, %v14947_v3  ;;  %v14970_v36 = vsub.f32 %v14969_v61, %v10999_v57  ;;  %v14976_v57 = vld [vmem:[#allocation148_spill] sm:$0xff] }
 0x22e   : > { %v11233_v22 = vmax.f32 %v11203_v51, %v1425_v56  ;;  %v11236_v27 = vmax.f32 %v11205_v58, %v1518_v46  ;;  %v11247_v62 = vpop.eup %8843  ;;  %8867 = vpow2.f32 %v1690_v63  ;;  %v1694_v56 = vmul.f32 1.442695, %v14945_v41  ;;  %v11285_v63 = vld [vmem:[#allocation2 + $0x1c0] sm:$0xff] }
 0x22f   : > { %v11262_v24 = vpop.eup %8845  ;;  %8869 = vpow2.f32 %v1754_v33  ;;  %v1696_v7 = vmul.f32 1.442695, %v14949_v13  ;;  %v14952_v33 = vld [vmem:[#allocation138_spill] sm:$0xff]  ;;  %v14954_v13 = vld [vmem:[#allocation137_spill] sm:$0xff]  ;;  %v1702_v55 = vmul.f32 1.442695, %v14970_v36 }
 0x230   : > { %3685 = vst.msk [vmem:[#allocation2 + $0xb8] sm:$0xff] %vm3661_vm3, %v11233_v22  ;;  %1919 = vperm.xlu0 %8757, %v11233_v22   ;;  %1894 = vperm.xlu1 %8758, %v11079_v44   ;;  %3716 = vst.msk [vmem:[#allocation2 + $0x1b0] sm:$0xff] %vm3661_vm3, %v11236_v27  ;;  %v11267_v54 = vpop.eup %8847  ;;  %8871 = vpow2.f32 %v1692_v16  ;;  %v14953_v16 = vsub.f32 %v14951_v1, %v14952_v33  ;;  %v14958_v1 = vld [vmem:[#allocation140_spill] sm:$0xff]  ;;  %v14959_v33 = vld [vmem:[#allocation142_spill] sm:$0xff] }
 0x231   : > { %14943 = vst [vmem:[#allocation161_spill] sm:$0xff] %v11262_v24  ;;  %v1521_v42 = vpop.xlane.xlu1 %1520  ;;  %v1428_v20 = vpop.xlane.xlu0 %1427  ;;  %8873 = vpow2.f32 %v1756_v25  ;;  %v11363_v24 = vld [vmem:[#allocation2 + $0xd8] sm:$0xff] }
 0x232   : > { %v11273_v46 = vmax.f32 %v11243_v28, %v1521_v42  ;;  %v11276_v12 = vmax.f32 %v11245_v15, %v1428_v20  ;;  %v11278_v52 = vpop.eup %8849  ;;  %v1760_v20 = vmul.f32 1.442695, %v14953_v16  ;;  %8875 = vpow2.f32 %v1694_v56  ;;  %v14955_v42 = vld [vmem:[#allocation139_spill] sm:$0xff]  ;;  %v11325_v56 = vld [vmem:[#allocation2 + $0xd0] sm:$0xff]  ;;  %v14977_v36 = vld [vmem:[#allocation150_spill] sm:$0xff] }
 0x233   : > { %14946 = vst [vmem:[#allocation162_spill] sm:$0xff] %v11278_v52  ;;  %v11287_v10 = vpop.eup %8851  ;;  %v14956_v29 = vsub.f32 %v14954_v13, %v14955_v42  ;;  %8877 = vpow2.f32 %v1758_v8  ;;  %v14960_v16 = vsub.f32 %v14958_v1, %v14959_v33  ;;  %v14963_v42 = vld [vmem:[#allocation143_spill] sm:$0xff]  ;;  %v14966_v1 = vld [vmem:[#allocation144_spill] sm:$0xff]  ;;  %v14967_v33 = vld [vmem:[#allocation146_spill] sm:$0xff]  ;;  %v14978_v61 = vsub.f32 %v14976_v57, %v14977_v36 }
 0x234   : > { %3717 = vst.msk [vmem:[#allocation2 + $0x1b8] sm:$0xff] %vm3661_vm3, %v11273_v46  ;;  %2079 = vperm.xlu0 %8757, %v11273_v46   ;;  %2059 = vperm.xlu1 %8758, %v11131_v0   ;;  %3686 = vst.msk [vmem:[#allocation2 + $0xc0] sm:$0xff] %vm3661_vm3, %v11276_v12  ;;  %v11302_v17 = vpop.eup %8853  ;;  %8879 = vpow2.f32 %v1696_v7 }
 0x235   : > { %14950 = vst [vmem:[#allocation135_spill] sm:$0xff] %v11302_v17  ;;  %v1431_v41 = vpop.xlane.xlu1 %1430  ;;  %v1524_v3 = vpop.xlane.xlu0 %1523  ;;  %v1698_v37 = vmul.f32 1.442695, %v14956_v29  ;;  %v1762_v26 = vmul.f32 1.442695, %v14960_v16  ;;  %v14962_v29 = vld [vmem:[#allocation141_spill] sm:$0xff]  ;;  %8881 = vpow2.f32 %v1760_v20  ;;  %v14968_v16 = vsub.f32 %v14966_v1, %v14967_v33 }
 0x236   : > { %v11307_v21 = vpop.eup %8855  ;;  %v11313_v9 = vmax.f32 %v11283_v31, %v1431_v41  ;;  %v11316_v19 = vmax.f32 %v11285_v63, %v1524_v3  ;;  %v14964_v41 = vsub.f32 %v14962_v29, %v14963_v42  ;;  %v14972_v1 = vld [vmem:[#allocation147_spill] sm:$0xff]  ;;  %v14973_v33 = vld [vmem:[#allocation149_spill] sm:$0xff] }
 0x237   : > { %v11318_v25 = vpop.eup %8857  ;;  %v1764_v29 = vmul.f32 1.442695, %v14968_v16  ;;  %8883 = vpow2.f32 %v1698_v37  ;;  %v14974_v16 = vsub.f32 %v14972_v1, %v14973_v33  ;;  %v11365_v37 = vld [vmem:[#allocation2 + $0x1d0] sm:$0xff]  ;;  %v14980_v1 = vld [vmem:[#allocation151_spill] sm:$0xff] }
 0x238   : > { %14957 = vst [vmem:[#allocation136_spill] sm:$0xff] %v11318_v25  ;;  %v11327_v39 = vpop.eup %8859  ;;  %v1700_v13 = vmul.f32 1.442695, %v14964_v41  ;;  %3687 = vst.msk [vmem:[#allocation2 + $0xc8] sm:$0xff] %vm3661_vm3, %v11313_v9  ;;  %1929 = vperm.xlu0 %8757, %v11313_v9   ;;  %1904 = vperm.xlu1 %8758, %v11134_v47   ;;  %8885 = vpow2.f32 %v1762_v26  ;;  %v14981_v33 = vsub.f32 %v14980_v1, %v11036_v60  ;;  %v14985_v60 = vld [vmem:[#allocation153_spill] sm:$0xff]  ;;  %v14986_v1 = vld [vmem:[#allocation155_spill] sm:$0xff] }
 0x239   : > { %14961 = vst [vmem:[#allocation138_spill] sm:$0xff] %v11327_v39  ;;  %3718 = vst.msk [vmem:[#allocation2 + $0x1c0] sm:$0xff] %vm3661_vm3, %v11316_v19  ;;  %v11342_v7 = vpop.eup %8861  ;;  %v1527_v42 = vpop.xlane.xlu1 %1526 }
 0x23a   : > { %14965 = vst [vmem:[#allocation137_spill] sm:$0xff] %v11342_v7  ;;  %v1434_v41 = vpop.xlane.xlu0 %1433  ;;  %v11347_v3 = vpop.eup %8863  ;;  %v11353_v8 = vmax.f32 %v11323_v2, %v1527_v42  ;;  %v1766_v7 = vmul.f32 1.442695, %v14974_v16  ;;  %8887 = vpow2.f32 %v1700_v13  ;;  %v1704_v42 = vmul.f32 1.442695, %v14978_v61 }
 0x23b   : > { %v11356_v17 = vmax.f32 %v11325_v56, %v1434_v41  ;;  %v11358_v20 = vpop.eup %8865  ;;  %8889 = vpow2.f32 %v1764_v29  ;;  %v1768_v16 = vmul.f32 1.442695, %v14981_v33  ;;  %v14982_v41 = vld [vmem:[#allocation152_spill] sm:$0xff]  ;;  %v14987_v33 = vsub.f32 %v14985_v60, %v14986_v1 }
 0x23c   : > { %14971 = vst [vmem:[#allocation139_spill] sm:$0xff] %v11358_v20  ;;  %v11367_v38 = vpop.eup %8867  ;;  %3719 = vst.msk [vmem:[#allocation2 + $0x1c8] sm:$0xff] %vm3661_vm3, %v11353_v8  ;;  %2089 = vperm.xlu0 %8757, %v11353_v8   ;;  %2069 = vperm.xlu1 %8758, %v11195_v6   ;;  %8891 = vpow2.f32 %v1702_v55  ;;  %v14983_v20 = vsub.f32 %v14982_v41, %v11039_v43  ;;  %v11405_v55 = vld [vmem:[#allocation2 + $0xe0] sm:$0xff]  ;;  %v14989_v43 = vld [vmem:[#allocation154_spill] sm:$0xff] }
 0x23d   : > { %14975 = vst [vmem:[#allocation140_spill] sm:$0xff] %v11367_v38  ;;  %3688 = vst.msk [vmem:[#allocation2 + $0xd0] sm:$0xff] %vm3661_vm3, %v11356_v17  ;;  %v11382_v13 = vpop.eup %8869  ;;  %v1437_v57 = vpop.xlane.xlu1 %1436  ;;  %8893 = vpow2.f32 %v1766_v7 }
 0x23e   : > { %14979 = vst [vmem:[#allocation142_spill] sm:$0xff] %v11382_v13  ;;  %v1530_v36 = vpop.xlane.xlu0 %1529  ;;  %v11387_v61 = vpop.eup %8871  ;;  %v1706_v25 = vmul.f32 1.442695, %v14983_v20  ;;  %v11393_v26 = vmax.f32 %v11363_v24, %v1437_v57  ;;  %v1770_v13 = vmul.f32 1.442695, %v14987_v33  ;;  %8895 = vpow2.f32 %v1704_v42  ;;  %v14990_v20 = vld [vmem:[#allocation156_spill] sm:$0xff] }
 0x23f   : > { %v11396_v52 = vmax.f32 %v11365_v37, %v1530_v36  ;;  %v11398_v29 = vpop.eup %8873  ;;  %v14991_v41 = vsub.f32 %v14989_v43, %v14990_v20  ;;  %8897 = vpow2.f32 %v1768_v16  ;;  %v14993_v42 = vld [vmem:[#allocation157_spill] sm:$0xff] }
 0x240   : > { %14984 = vst [vmem:[#allocation141_spill] sm:$0xff] %v11398_v29  ;;  %v11407_v38 = vpop.eup %8875  ;;  %3689 = vst.msk [vmem:[#allocation2 + $0xd8] sm:$0xff] %vm3661_vm3, %v11393_v26  ;;  %1939 = vperm.xlu0 %8757, %v11393_v26   ;;  %1914 = vperm.xlu1 %8758, %v11198_v4   ;;  %v14994_v60 = vsub.f32 %v14993_v42, %v11076_v49  ;;  %8899 = vpow2.f32 %v1706_v25  ;;  %v14997_v49 = vsub.f32 %v11081_v45, %v11099_v53  ;;  %v11443_v25 = vld [vmem:[#allocation2 + $0x1e0] sm:$0xff] }
 0x241   : > { %14988 = vst [vmem:[#allocation143_spill] sm:$0xff] %v11407_v38  ;;  %v1708_v57 = vmul.f32 1.442695, %v14991_v41  ;;  %3720 = vst.msk [vmem:[#allocation2 + $0x1d0] sm:$0xff] %vm3661_vm3, %v11396_v52  ;;  %v11420_v36 = vpop.eup %8877  ;;  %v1533_v33 = vpop.xlane.xlu1 %1532  ;;  %v14995_v41 = vld [vmem:[#allocation158_spill] sm:$0xff]  ;;  %8901 = vpow2.f32 %v1770_v13 }
 0x242   : > { %14992 = vst [vmem:[#allocation144_spill] sm:$0xff] %v11420_v36  ;;  %v1772_v1 = vmul.f32 1.442695, %v14994_v60  ;;  %v1440_v43 = vpop.xlane.xlu0 %1439  ;;  %v11425_v20 = vpop.eup %8879  ;;  %v14996_v29 = vsub.f32 %v14995_v41, %v11079_v44  ;;  %v11431_v7 = vmax.f32 %v11403_v32, %v1533_v33  ;;  %v1774_v42 = vmul.f32 1.442695, %v14997_v49  ;;  %v11441_v60 = vld [vmem:[#allocation2 + $0xe8] sm:$0xff] }
 0x243   : > { %v11434_v39 = vmax.f32 %v11405_v55, %v1440_v43  ;;  %v11436_v16 = vpop.eup %8881  ;;  %8903 = vpow2.f32 %v1708_v57  ;;  %v14998_v44 = vsub.f32 %v11083_v59, %v11102_v50  ;;  %v14999_v50 = vsub.f32 %v11107_v5, %v11131_v0 }
 0x244   : > { %v1710_v38 = vmul.f32 1.442695, %v14996_v29  ;;  %v11445_v36 = vpop.eup %8883  ;;  %3721 = vst.msk [vmem:[#allocation2 + $0x1d8] sm:$0xff] %vm3661_vm3, %v11431_v7  ;;  %2099 = vperm.xlu0 %8757, %v11431_v7   ;;  %2074 = vperm.xlu1 %8758, %v11236_v27   ;;  %8905 = vpow2.f32 %v1772_v1  ;;  %v15000_v41 = vsub.f32 %v11109_v48, %v11134_v47  ;;  %v15001_v5 = vsub.f32 %v11139_v40, %v11163_v35 }
 0x245   : > { %v1712_v29 = vmul.f32 1.442695, %v14998_v44  ;;  %3690 = vst.msk [vmem:[#allocation2 + $0xe0] sm:$0xff] %vm3661_vm3, %v11434_v39  ;;  %v11460_v53 = vpop.eup %8885  ;;  %v1776_v59 = vmul.f32 1.442695, %v14999_v50  ;;  %v1443_v13 = vpop.xlane.xlu1 %1442  ;;  %v11481_v50 = vld [vmem:[#allocation2 + $0x1e8] sm:$0xff]  ;;  %v15002_v48 = vsub.f32 %v11141_v30, %v11166_v11  ;;  %v15003_v30 = vsub.f32 %v11171_v34, %v11195_v6 }
 0x246   : > { %v1536_v57 = vpop.xlane.xlu0 %1535  ;;  %v11465_v43 = vpop.eup %8887  ;;  %8907 = vpow2.f32 %v1710_v38  ;;  %v1714_v49 = vmul.f32 1.442695, %v15000_v41  ;;  %v11471_v44 = vmax.f32 %v11441_v60, %v1443_v13  ;;  %v1778_v0 = vmul.f32 1.442695, %v15001_v5  ;;  %v11483_v38 = vld [vmem:[#allocation2 + $0xf0] sm:$0xff] }
 0x247   : > { %v11474_v45 = vmax.f32 %v11443_v25, %v1536_v57  ;;  %v11476_v1 = vpop.eup %8889  ;;  %8909 = vpow2.f32 %v1774_v42  ;;  %v1716_v47 = vmul.f32 1.442695, %v15002_v48  ;;  %v1780_v11 = vmul.f32 1.442695, %v15003_v30  ;;  %v11521_v30 = vld [vmem:[#allocation2 + $0xf8] sm:$0xff] }
 0x248   : > { %v11485_v33 = vpop.eup %8891  ;;  %8911 = vpow2.f32 %v1712_v29  ;;  %3691 = vst.msk [vmem:[#allocation2 + $0xe8] sm:$0xff] %vm3661_vm3, %v11471_v44  ;;  %1949 = vperm.xlu0 %8757, %v11471_v44   ;;  %1924 = vperm.xlu1 %8758, %v11276_v12   ;;  %v15004_v41 = vsub.f32 %v11173_v23, %v11198_v4  ;;  %v15005_v34 = vsub.f32 %v11203_v51, %v11233_v22 }
 0x249   : > { %3722 = vst.msk [vmem:[#allocation2 + $0x1e0] sm:$0xff] %vm3661_vm3, %v11474_v45  ;;  %v11500_v35 = vpop.eup %8893  ;;  %8913 = vpow2.f32 %v1776_v59  ;;  %v1539_v42 = vpop.xlane.xlu1 %1538  ;;  %v15006_v23 = vsub.f32 %v11205_v58, %v11236_v27  ;;  %v15007_v58 = vsub.f32 %v11243_v28, %v11273_v46  ;;  %v15009_v28 = vsub.f32 %v11283_v31, %v11313_v9 }
 0x24a   : > { %v1446_v29 = vpop.xlane.xlu0 %1445  ;;  %v11505_v57 = vpop.eup %8895  ;;  %8915 = vpow2.f32 %v1714_v49  ;;  %v1718_v5 = vmul.f32 1.442695, %v15004_v41  ;;  %v11511_v48 = vmax.f32 %v11481_v50, %v1539_v42  ;;  %v1720_v6 = vmul.f32 1.442695, %v15005_v34  ;;  %v11523_v49 = vld [vmem:[#allocation2 + $0x1f0] sm:$0xff] }
 0x24b   : > { %v11514_v40 = vmax.f32 %v11483_v38, %v1446_v29  ;;  %v11516_v59 = vpop.eup %8897  ;;  %8917 = vpow2.f32 %v1778_v0  ;;  %v1782_v4 = vmul.f32 1.442695, %v15006_v23  ;;  %v1784_v27 = vmul.f32 1.442695, %v15007_v58  ;;  %v11563_v58 = vld [vmem:[#allocation2 + $0x1f8] sm:$0xff] }
 0x24c   : > { %v11525_v13 = vpop.eup %8899  ;;  %8919 = vpow2.f32 %v1716_v47  ;;  %v1671_v42 = vsub.f32 %v11481_v50, %v11511_v48  ;;  %3723 = vst.msk [vmem:[#allocation2 + $0x1e8] sm:$0xff] %vm3661_vm3, %v11511_v48  ;;  %2109 = vperm.xlu0 %8757, %v11511_v48   ;;  %2084 = vperm.xlu1 %8758, %v11316_v19   ;;  %v15008_v41 = vsub.f32 %v11245_v15, %v11276_v12  ;;  %v1724_v46 = vmul.f32 1.442695, %v15009_v28 }
 0x24d   : > { %3692 = vst.msk [vmem:[#allocation2 + $0xf0] sm:$0xff] %vm3661_vm3, %v11514_v40  ;;  %v11540_v22 = vpop.eup %8901  ;;  %8921 = vpow2.f32 %v1780_v11  ;;  %v1449_v0 = vpop.xlane.xlu1 %1448  ;;  %v15010_v12 = vsub.f32 %v11285_v63, %v11316_v19  ;;  %v15011_v19 = vsub.f32 %v11323_v2, %v11353_v8  ;;  %v15013_v2 = vsub.f32 %v11365_v37, %v11396_v52 }
 0x24e   : > { %v1542_v47 = vpop.xlane.xlu0 %1541  ;;  %v11545_v29 = vpop.eup %8903  ;;  %8923 = vpow2.f32 %v1718_v5  ;;  %v1722_v34 = vmul.f32 1.442695, %v15008_v41  ;;  %v11551_v23 = vmax.f32 %v11521_v30, %v1449_v0  ;;  %v1637_v5 = vsub.f32 %v11363_v24, %v11393_v26 }
 0x24f   : > { %v11554_v51 = vmax.f32 %v11523_v49, %v1542_v47  ;;  %v11556_v11 = vpop.eup %8905  ;;  %8925 = vpow2.f32 %v1720_v6  ;;  %v1786_v0 = vmul.f32 1.442695, %v15010_v12  ;;  %v1788_v63 = vmul.f32 1.442695, %v15011_v19 }
 0x250   : > { %v11565_v15 = vpop.eup %8907  ;;  %8927 = vpow2.f32 %v1782_v4  ;;  %v1641_v47 = vsub.f32 %v11521_v30, %v11551_v23  ;;  %3693 = vst.msk [vmem:[#allocation2 + $0xf8] sm:$0xff] %vm3661_vm3, %v11551_v23  ;;  %1934 = vperm.xlu1 %8758, %v11356_v17   ;;  %1959 = vperm.xlu0 %8757, %v11551_v23   ;;  %v15012_v6 = vsub.f32 %v11325_v56, %v11356_v17  ;;  %v1728_v12 = vmul.f32 1.442695, %v1637_v5  ;;  %v15026_v30 = vld [vmem:[#allocation14_spill] sm:$0xff] }
 0x251   : > { %v1672_v24 = vsub.f32 %v11523_v49, %v11554_v51  ;;  %3724 = vst.msk [vmem:[#allocation2 + $0x1f0] sm:$0xff] %vm3661_vm3, %v11554_v51  ;;  %v11580_v31 = vpop.eup %8909  ;;  %8929 = vpow2.f32 %v1784_v27  ;;  %v1545_v9 = vpop.xlane.xlu1 %1544  ;;  %v1790_v8 = vmul.f32 1.442695, %v15013_v2  ;;  %v15014_v56 = vsub.f32 %v11403_v32, %v11431_v7 }
 0x252   : > { %v11585_v26 = vpop.eup %8911  ;;  %8931 = vpow2.f32 %v1722_v34  ;;  %v1726_v4 = vmul.f32 1.442695, %v15012_v6  ;;  %v11591_v41 = vmax.f32 %v11563_v58, %v1545_v9  ;;  %v15016_v9 = vld [vmem:[#allocation7_spill] sm:$0xff]  ;;  %v15018_v34 = vld [vmem:[#allocation8_spill] sm:$0xff] }
 0x253   : > { %v11593_v28 = vpop.eup %8913  ;;  %8933 = vpow2.f32 %v1724_v46  ;;  %v1792_v46 = vmul.f32 1.442695, %v15014_v56 }
 0x254   : > { %v11595_v27 = vpop.eup %8915  ;;  %8935 = vpow2.f32 %v1786_v0  ;;  %3725 = vst.msk [vmem:[#allocation2 + $0x1f8] sm:$0xff] %vm3661_vm3, %v11591_v41  ;;  %2094 = vperm.xlu1 %8758, %v11396_v52   ;;  %2119 = vperm.xlu0 %8757, %v11591_v41   ;;  %v15015_v0 = vsub.f32 %v11405_v55, %v11434_v39 }
 0x255   : > { %v11606_v17 = vpop.eup %8917  ;;  %8937 = vpow2.f32 %v1788_v63  ;;  %v1805_v5 = vpop.permute.xlu0 %1804  ;;  %v15017_v63 = vsub.f32 %v11441_v60, %v11471_v44  ;;  %v1796_v60 = vmul.f32 1.442695, %v1671_v42  ;;  %v15023_v42 = vld [vmem:[#allocation11_spill] sm:$0xff] }
 0x256   : > { %v11611_v37 = vpop.eup %8919  ;;  %8939 = vpow2.f32 %v1726_v4  ;;  %v1730_v19 = vmul.f32 1.442695, %v15015_v0  ;;  %v2122_v6 = vsub.f32 %v15016_v9, %v1805_v5  ;;  %v2123_v32 = vsub.f32 %v15018_v34, %v1805_v5 }
 0x257   : > { %v11617_v52 = vpop.eup %8921  ;;  %8941 = vpow2.f32 %v1728_v12  ;;  %v1732_v2 = vmul.f32 1.442695, %v15017_v63  ;;  %v15019_v4 = vsub.f32 %v11443_v25, %v11474_v45  ;;  %v15022_v63 = vld [vmem:[#allocation12_spill] sm:$0xff] }
 0x258   : > { %v11623_v7 = vpop.eup %8923  ;;  %8943 = vpow2.f32 %v1790_v8  ;;  %1944 = vperm.xlu1 %8758, %v11434_v39   ;;  %2641 = vperm.xlu0 %8757, %v11238_v18   ;;  %v2250_v8 = vmul.f32 1.442695, %v2122_v6  ;;  %v2252_v25 = vmul.f32 1.442695, %v2123_v32  ;;  %v15020_v18 = vld [vmem:[#allocation9_spill] sm:$0xff] }
 0x259   : > { %v1794_v56 = vmul.f32 1.442695, %v15019_v4  ;;  %v11630_v55 = vpop.eup %8925  ;;  %8945 = vpow2.f32 %v1792_v46  ;;  %v1965_v44 = vpop.permute.xlu0 %1964  ;;  %v15021_v46 = vld [vmem:[#allocation10_spill] sm:$0xff] }
 0x25a   : > { %v11635_v12 = vpop.eup %8927  ;;  %8947 = vpow2.f32 %v1730_v19  ;;  %v2186_v0 = vsub.f32 %v15020_v18, %v1965_v44  ;;  %v2187_v19 = vsub.f32 %v15023_v42, %v1965_v44 }
 0x25b   : > { %v11637_v34 = vpop.eup %8929  ;;  %8949 = vpow2.f32 %v1732_v2  ;;  %v1810_v5 = vpop.permute.xlu1 %1809  ;;  %v15024_v2 = vsub.f32 %v11483_v38, %v11514_v40 }
 0x25c   : > { %v11639_v39 = vpop.eup %8931  ;;  %8951 = vpow2.f32 %v1794_v56  ;;  %v2124_v9 = vsub.f32 %v15021_v46, %v1810_v5  ;;  %v2125_v50 = vsub.f32 %v15022_v63, %v1810_v5  ;;  %2104 = vperm.xlu1 %8758, %v11474_v45   ;;  %2651 = vperm.xlu0 %8757, %v11267_v54   ;;  %v1736_v54 = vmul.f32 1.442695, %v1641_v47  ;;  %v15025_v46 = vld [vmem:[#allocation13_spill] sm:$0xff] }
 0x25d   : > { %v11646_v48 = vpop.eup %8933  ;;  %8953 = vpow2.f32 %v1796_v60  ;;  %v1734_v32 = vmul.f32 1.442695, %v15024_v2  ;;  %v2378_v5 = vmul.f32 1.442695, %v2186_v0 }
 0x25e   : > { %v11649_v6 = vpop.eup %8935  ;;  %8955 = vpow2.f32 %v2250_v8  ;;  %v2254_v4 = vmul.f32 1.442695, %v2124_v9  ;;  %v2256_v56 = vmul.f32 1.442695, %v2125_v50  ;;  %v2380_v9 = vmul.f32 1.442695, %v2187_v19 }
 0x25f   : > { %v11654_v18 = vpop.eup %8937  ;;  %8957 = vpow2.f32 %v2252_v25  ;;  %v11659_v45 = vpop.permute.xlu0 %1974  ;;  %v15027_v25 = vld [vmem:[#allocation17_spill] sm:$0xff]  ;;  %v15029_v19 = vld [vmem:[#allocation15_spill] sm:$0xff] }
 0x260   : > { %v1970_v60 = vpop.permute.xlu1 %1969  ;;  %v11661_v44 = vpop.eup %8939  ;;  %8959 = vpow2.f32 %v2254_v4  ;;  %1954 = vperm.xlu1 %8758, %v11514_v40   ;;  %2661 = vperm.xlu0 %8757, %v11307_v21   ;;  %v2190_v63 = vsub.f32 %v15027_v25, %v11659_v45  ;;  %v1798_v21 = vmul.f32 1.442695, %v1672_v24 }
 0x261   : > { %v2188_v38 = vsub.f32 %v15025_v46, %v1970_v60  ;;  %v11666_v8 = vpop.eup %8941  ;;  %8961 = vpow2.f32 %v2256_v56  ;;  %v2189_v23 = vsub.f32 %v15026_v30, %v1970_v60  ;;  %v15030_v56 = vsub.f32 %v11563_v58, %v11591_v41  ;;  %v15031_v60 = vld [vmem:[#allocation16_spill] sm:$0xff] }
 0x262   : > { %v11669_v47 = vpop.eup %8943  ;;  %8963 = vpow2.f32 %v1734_v32  ;;  %v2386_v49 = vmul.f32 1.442695, %v2190_v63 }
 0x263   : > { %v2382_v0 = vmul.f32 1.442695, %v2188_v38  ;;  %v11673_v50 = vpop.eup %8945  ;;  %8965 = vpow2.f32 %v1736_v54  ;;  %v2384_v42 = vmul.f32 1.442695, %v2189_v23  ;;  %v1800_v54 = vmul.f32 1.442695, %v15030_v56 }
 0x264   : > { %v1815_v40 = vpop.permute.xlu1 %1814  ;;  %v11675_v2 = vpop.eup %8947  ;;  %8967 = vpow2.f32 %v2378_v5  ;;  %2114 = vperm.xlu1 %8758, %v11554_v51   ;;  %2671 = vperm.xlu0 %8757, %v11347_v3   ;;  %v15033_v23 = vld [vmem:[#allocation18_spill] sm:$0xff] }
 0x265   : > { %15028 = vst [vmem:[#allocation146_spill] sm:$0xff] %v11675_v2  ;;  %v2126_v4 = vsub.f32 %v15029_v19, %v1815_v40  ;;  %v11683_v32 = vpop.eup %8949  ;;  %8969 = vpow2.f32 %v2380_v9  ;;  %v2127_v46 = vsub.f32 %v15031_v60, %v1815_v40  ;;  %v15034_v9 = vld [vmem:[#allocation19_spill] sm:$0xff]  ;;  %v15035_v40 = vld [vmem:[#allocation20_spill] sm:$0xff] }
 0x266   : > { %v11689_v38 = vpop.eup %8951  ;;  %8971 = vpow2.f32 %v2382_v0  ;;  %v15037_v60 = vld [vmem:[#allocation28_spill] sm:$0xff] }
 0x267   : > { %15032 = vst [vmem:[#allocation145_spill] sm:$0xff] %v11689_v38  ;;  %v11691_v24 = vpop.eup %8953  ;;  %8973 = vpow2.f32 %v2384_v42  ;;  %v2258_v3 = vmul.f32 1.442695, %v2126_v4  ;;  %v1985_v30 = vpop.permute.xlu0 %1984  ;;  %v2260_v41 = vmul.f32 1.442695, %v2127_v46  ;;  %v2191_v42 = vsub.f32 %v15035_v40, %v11659_v45  ;;  %v15036_v4 = vld [vmem:[#allocation25_spill] sm:$0xff] }
 0x268   : > { %v1820_v5 = vpop.permute.xlu1 %1819  ;;  %v8956_v51 = vpop.eup %8955  ;;  %8975 = vpow2.f32 %v1798_v21  ;;  %2636 = vperm.xlu1 %8758, %v11207_v14   ;;  %2681 = vperm.xlu0 %8757, %v11387_v61   ;;  %v2194_v56 = vsub.f32 %v15036_v4, %v1985_v30 }
 0x269   : > { %v2128_v25 = vsub.f32 %v15033_v23, %v1820_v5  ;;  %v8958_v58 = vpop.eup %8957  ;;  %8977 = vpow2.f32 %v1800_v54  ;;  %v2129_v63 = vsub.f32 %v15034_v9, %v1820_v5  ;;  %v2195_v23 = vsub.f32 %v15037_v60, %v1985_v30  ;;  %v15038_v54 = vld [vmem:[#allocation21_spill] sm:$0xff]  ;;  %v15039_v5 = vld [vmem:[#allocation22_spill] sm:$0xff] }
 0x26a   : > { %v8960_v0 = vpop.eup %8959  ;;  %8979 = vpow2.f32 %v2386_v49  ;;  %v2388_v30 = vmul.f32 1.442695, %v2191_v42  ;;  %v15042_v42 = vld [vmem:[#allocation24_spill] sm:$0xff] }
 0x26b   : > { %v2262_v19 = vmul.f32 1.442695, %v2128_v25  ;;  %v8962_v21 = vpop.eup %8961  ;;  %v2264_v38 = vmul.f32 1.442695, %v2129_v63  ;;  %v2506_v2 = vpack.c.bf16 %v8960_v0, %v8956_v51  ;;  %8981 = vpow2.f32 %v2258_v3 }
 0x26c   : > { %v1980_v14 = vpop.permute.xlu1 %1979  ;;  %v11701_v61 = vpop.eup %8963  ;;  %2646 = vperm.xlu1 %8758, %v11247_v62   ;;  %2691 = vperm.xlu0 %8757, %v11425_v20   ;;  %v2507_v45 = vpack.c.bf16 %v8962_v21, %v8958_v58  ;;  %8983 = vpow2.f32 %v2260_v41  ;;  %v2394_v3 = vmul.f32 1.442695, %v2194_v56  ;;  %v2396_v62 = vmul.f32 1.442695, %v2195_v23  ;;  %v15040_v20 = vld [vmem:[#allocation33_spill] sm:$0xff]  ;;  %v15041_v21 = vld [vmem:[#allocation23_spill] sm:$0xff] }
 0x26d   : > { %v2192_v46 = vsub.f32 %v15038_v54, %v1980_v14  ;;  %v2193_v9 = vsub.f32 %v15039_v5, %v1980_v14  ;;  %v11707_v49 = vpop.eup %8965  ;;  %8985 = vpow2.f32 %v2262_v19  ;;  %v15043_v5 = vld [vmem:[#allocation36_spill] sm:$0xff] }
 0x26e   : > { %v8968_v25 = vpop.eup %8967  ;;  %3146 = vmatprep.mubr.bf16.mxu0 %v2507_v45  ;;  %8987 = vpow2.f32 %v2264_v38 }
 0x26f   : > { %v2390_v63 = vmul.f32 1.442695, %v2192_v46  ;;  %v2392_v51 = vmul.f32 1.442695, %v2193_v9  ;;  %v8970_v0 = vpop.eup %8969  ;;  %3147 = vmatmul.mubr.bf16.vlgmr.msra.gmra.mrb[64].mxu0 %v2506_v2  ;;  %v1995_v40 = vpop.permute.xlu0 %1994 }
 0x270   : > { %v1825_v4 = vpop.permute.xlu1 %1824  ;;  %v8972_v60 = vpop.eup %8971  ;;  %v2198_v58 = vsub.f32 %v15040_v20, %v1995_v40  ;;  %2656 = vperm.xlu1 %8758, %v11287_v10   ;;  %2701 = vperm.xlu0 %8757, %v11465_v43   ;;  %v2199_v9 = vsub.f32 %v15043_v5, %v1995_v40  ;;  %v15044_v43 = vld [vmem:[#allocation26_spill] sm:$0xff] }
 0x271   : > { %8989 = vpow2.f32 %v2390_v63  ;;  %v2130_v14 = vsub.f32 %v15041_v21, %v1825_v4  ;;  %v8974_v41 = vpop.eup %8973  ;;  %v2131_v19 = vsub.f32 %v15042_v42, %v1825_v4  ;;  %v2538_v56 = vpack.c.bf16 %v8972_v60, %v8968_v25  ;;  %v15045_v25 = vld [vmem:[#allocation27_spill] sm:$0xff]  ;;  %v15046_v60 = vld [vmem:[#allocation138_spill] sm:$0xff]  ;;  %v15048_v42 = vld [vmem:[#allocation44_spill] sm:$0xff] }
 0x272   : > { %8991 = vpow2.f32 %v2392_v51  ;;  %v11714_v38 = vpop.eup %8975  ;;  %v2402_v2 = vmul.f32 1.442695, %v2198_v58  ;;  %v2539_v23 = vpack.c.bf16 %v8974_v41, %v8970_v0  ;;  %v2404_v20 = vmul.f32 1.442695, %v2199_v9 }
 0x273   : > { %8993 = vpow2.f32 %v2388_v30  ;;  %v2266_v54 = vmul.f32 1.442695, %v2130_v14  ;;  %v11716_v46 = vpop.eup %8977  ;;  %v2268_v45 = vmul.f32 1.442695, %v2131_v19  ;;  %v15047_v14 = vld [vmem:[#allocation41_spill] sm:$0xff] }
 0x274   : > { %8995 = vpow2.f32 %v2394_v3  ;;  %v1830_v10 = vpop.permute.xlu1 %1829  ;;  %v11719_v63 = vpop.eup %8979  ;;  %3403 = vmatprep.mubr.bf16.mxu1 %v2539_v23  ;;  %2666 = vperm.xlu1 %8758, %v15046_v60   ;;  %v15049_v23 = vld [vmem:[#allocation29_spill] sm:$0xff] }
 0x275   : > { %8997 = vpow2.f32 %v2396_v62  ;;  %v2132_v51 = vsub.f32 %v15044_v43, %v1830_v10  ;;  %v2133_v4 = vsub.f32 %v15045_v25, %v1830_v10  ;;  %3404 = vmatmul.mubr.bf16.vlgmr.msra.gmra.mrb[64].mxu1 %v2538_v56  ;;  %2711 = vperm.xlu0 %8757, %v11505_v57   ;;  %v8982_v30 = vpop.eup %8981  ;;  %v15050_v56 = vld [vmem:[#allocation140_spill] sm:$0xff] }
 0x276   : > { %8999 = vpow2.f32 %v2402_v2  ;;  %v8984_v40 = vpop.eup %8983 }
 0x277   : > { %9001 = vpow2.f32 %v2266_v54  ;;  %v2270_v0 = vmul.f32 1.442695, %v2132_v51  ;;  %v2272_v3 = vmul.f32 1.442695, %v2133_v4  ;;  %v2005_v58 = vpop.permute.xlu0 %2004  ;;  %v8986_v21 = vpop.eup %8985  ;;  %v15051_v54 = vld [vmem:[#allocation30_spill] sm:$0xff] }
 0x278   : > { %9003 = vpow2.f32 %v2268_v45  ;;  %v1990_v62 = vpop.permute.xlu1 %1989  ;;  %v2202_v41 = vsub.f32 %v15047_v14, %v2005_v58  ;;  %v2203_v19 = vsub.f32 %v15048_v42, %v2005_v58  ;;  %2676 = vperm.xlu1 %8758, %v15050_v56   ;;  %v8988_v57 = vpop.eup %8987  ;;  %v2508_v9 = vpack.c.bf16 %v8986_v21, %v8982_v30  ;;  %v15054_v30 = vld [vmem:[#allocation31_spill] sm:$0xff] }
 0x279   : > { %9005 = vpow2.f32 %v2270_v0  ;;  %v2196_v2 = vsub.f32 %v15049_v23, %v1990_v62  ;;  %v2197_v5 = vsub.f32 %v15051_v54, %v1990_v62  ;;  %2721 = vperm.xlu0 %8757, %v11545_v29   ;;  %v2509_v25 = vpack.c.bf16 %v8988_v57, %v8984_v40  ;;  %v15053_v23 = vld [vmem:[#allocation43_spill] sm:$0xff]  ;;  %v15056_v40 = vld [vmem:[#allocation32_spill] sm:$0xff] }
 0x27a   : > { %9007 = vpow2.f32 %v2272_v3  ;;  %v2410_v10 = vmul.f32 1.442695, %v2202_v41  ;;  %v2412_v43 = vmul.f32 1.442695, %v2203_v19  ;;  %v15052_v3 = vld [vmem:[#allocation42_spill] sm:$0xff]  ;;  %v15055_v41 = vld [vmem:[#allocation143_spill] sm:$0xff] }
 0x27b   : > { %v8990_v45 = vpop.eup %8989  ;;  %v2398_v51 = vmul.f32 1.442695, %v2196_v2  ;;  %9009 = vpow2.f32 %v2404_v20  ;;  %v2400_v60 = vmul.f32 1.442695, %v2197_v5  ;;  %v1850_v0 = vpop.permute.xlu0 %1849  ;;  %3154 = vmatprep.mubr.bf16.mxu0 %v2509_v25 }
 0x27c   : > { %v8992_v4 = vpop.eup %8991  ;;  %v1835_v58 = vpop.permute.xlu1 %1834  ;;  %v2540_v14 = vpack.c.bf16 %v8990_v45, %v11719_v63  ;;  %9011 = vpow2.f32 %v2410_v10  ;;  %v2140_v62 = vsub.f32 %v15052_v3, %v1850_v0  ;;  %v2141_v29 = vsub.f32 %v15053_v23, %v1850_v0  ;;  %2686 = vperm.xlu1 %8758, %v15055_v41   ;;  %3155 = vmatmul.mubr.bf16.gmra.mrb[68].mxu0 %v2508_v9  ;;  %v15057_v9 = vld [vmem:[#allocation49_spill] sm:$0xff]  ;;  %v15060_v3 = vld [vmem:[#allocation35_spill] sm:$0xff] }
 0x27d   : > { %v8994_v42 = vpop.eup %8993  ;;  %v2134_v21 = vsub.f32 %v15054_v30, %v1835_v58  ;;  %9013 = vpow2.f32 %v2412_v43  ;;  %v2135_v20 = vsub.f32 %v15056_v40, %v1835_v58  ;;  %2731 = vperm.xlu0 %8757, %v11585_v26   ;;  %v15058_v26 = vld [vmem:[#allocation52_spill] sm:$0xff]  ;;  %v15059_v58 = vld [vmem:[#allocation34_spill] sm:$0xff] }
 0x27e   : > { %v11736_v19 = vpop.eup %8995  ;;  %v2541_v63 = vpack.c.bf16 %v8992_v4, %v8994_v42  ;;  %9015 = vpow2.f32 %v2398_v51  ;;  %v2286_v56 = vmul.f32 1.442695, %v2140_v62  ;;  %v2288_v57 = vmul.f32 1.442695, %v2141_v29 }
 0x27f   : > { %v11740_v2 = vpop.eup %8997  ;;  %v2274_v54 = vmul.f32 1.442695, %v2134_v21  ;;  %9017 = vpow2.f32 %v2400_v60  ;;  %v2276_v45 = vmul.f32 1.442695, %v2135_v20  ;;  %v2015_v10 = vpop.permute.xlu0 %2014 }
 0x280   : > { %v11742_v5 = vpop.eup %8999  ;;  %3411 = vmatprep.mubr.bf16.mxu1 %v2541_v63  ;;  %v1840_v25 = vpop.permute.xlu1 %1839  ;;  %9019 = vpow2.f32 %v2286_v56  ;;  %v2206_v0 = vsub.f32 %v15057_v9, %v2015_v10  ;;  %v2207_v4 = vsub.f32 %v15058_v26, %v2015_v10  ;;  %2696 = vperm.xlu1 %8758, %v11445_v36   ;;  %v15061_v63 = vld [vmem:[#allocation50_spill] sm:$0xff]  ;;  %v15062_v56 = vld [vmem:[#allocation51_spill] sm:$0xff]  ;;  %v15063_v10 = vld [vmem:[#allocation37_spill] sm:$0xff] }
 0x281   : > { %v9002_v43 = vpop.eup %9001  ;;  %3412 = vmatmul.mubr.bf16.gmra.mrb[68].mxu1 %v2540_v14  ;;  %v2136_v42 = vsub.f32 %v15059_v58, %v1840_v25  ;;  %9021 = vpow2.f32 %v2288_v57  ;;  %v2137_v62 = vsub.f32 %v15060_v3, %v1840_v25  ;;  %2741 = vperm.xlu0 %8757, %v11611_v37  }
 0x282   : > { %v9004_v51 = vpop.eup %9003  ;;  %9023 = vpow2.f32 %v2274_v54  ;;  %v2418_v23 = vmul.f32 1.442695, %v2206_v0  ;;  %v2420_v29 = vmul.f32 1.442695, %v2207_v4  ;;  %v15064_v54 = vld [vmem:[#allocation38_spill] sm:$0xff] }
 0x283   : > { %v9006_v60 = vpop.eup %9005  ;;  %v2278_v30 = vmul.f32 1.442695, %v2136_v42  ;;  %9025 = vpow2.f32 %v2276_v45  ;;  %v2280_v21 = vmul.f32 1.442695, %v2137_v62  ;;  %v1860_v41 = vpop.permute.xlu0 %1859 }
 0x284   : > { %v9008_v14 = vpop.eup %9007  ;;  %v2000_v40 = vpop.permute.xlu1 %1999  ;;  %v2510_v20 = vpack.c.bf16 %v9006_v60, %v9002_v43  ;;  %9027 = vpow2.f32 %v2418_v23  ;;  %v2144_v36 = vsub.f32 %v15061_v63, %v1860_v41  ;;  %v2145_v57 = vsub.f32 %v15062_v56, %v1860_v41  ;;  %2706 = vperm.xlu1 %8758, %v11485_v33   ;;  %v15065_v60 = vld [vmem:[#allocation57_spill] sm:$0xff]  ;;  %v15068_v41 = vld [vmem:[#allocation40_spill] sm:$0xff] }
 0x285   : > { %v2200_v25 = vsub.f32 %v15063_v10, %v2000_v40  ;;  %v11754_v37 = vpop.eup %9009  ;;  %9029 = vpow2.f32 %v2420_v29  ;;  %v2201_v9 = vsub.f32 %v15064_v54, %v2000_v40  ;;  %2751 = vperm.xlu0 %8757, %v11630_v55   ;;  %v2511_v45 = vpack.c.bf16 %v9008_v14, %v9004_v51  ;;  %v15066_v55 = vld [vmem:[#allocation60_spill] sm:$0xff]  ;;  %v15067_v29 = vld [vmem:[#allocation39_spill] sm:$0xff] }
 0x286   : > { %v11758_v0 = vpop.eup %9011  ;;  %9031 = vpow2.f32 %v2278_v30  ;;  %v2294_v43 = vmul.f32 1.442695, %v2144_v36  ;;  %v2296_v26 = vmul.f32 1.442695, %v2145_v57 }
 0x287   : > { %v2406_v4 = vmul.f32 1.442695, %v2200_v25  ;;  %v11760_v58 = vpop.eup %9013  ;;  %9033 = vpow2.f32 %v2280_v21  ;;  %v2408_v42 = vmul.f32 1.442695, %v2201_v9  ;;  %3162 = vmatprep.mubr.bf16.mxu0 %v2511_v45  ;;  %v2025_v33 = vpop.permute.xlu0 %2024  ;;  %v15069_v45 = vld [vmem:[#allocation58_spill] sm:$0xff] }
 0x288   : > { %v1845_v3 = vpop.permute.xlu1 %1844  ;;  %v9016_v62 = vpop.eup %9015  ;;  %9035 = vpow2.f32 %v2294_v43  ;;  %3163 = vmatmul.mubr.bf16.gmra.mrb[72].mxu0 %v2510_v20  ;;  %v2210_v23 = vsub.f32 %v15065_v60, %v2025_v33  ;;  %v2211_v51 = vsub.f32 %v15066_v55, %v2025_v33  ;;  %2716 = vperm.xlu1 %8758, %v11525_v13   ;;  %v15070_v43 = vld [vmem:[#allocation59_spill] sm:$0xff] }
 0x289   : > { %v2138_v14 = vsub.f32 %v15067_v29, %v1845_v3  ;;  %v9018_v30 = vpop.eup %9017  ;;  %9037 = vpow2.f32 %v2296_v26  ;;  %v2139_v40 = vsub.f32 %v15068_v41, %v1845_v3  ;;  %2761 = vperm.xlu0 %8757, %v11646_v48   ;;  %v2542_v21 = vpack.c.bf16 %v9016_v62, %v11736_v19  ;;  %v15071_v26 = vld [vmem:[#allocation45_spill] sm:$0xff]  ;;  %v15072_v3 = vld [vmem:[#allocation46_spill] sm:$0xff] }
 0x28a   : > { %v11769_v63 = vpop.eup %9019  ;;  %9039 = vpow2.f32 %v2406_v4  ;;  %v2426_v20 = vmul.f32 1.442695, %v2210_v23  ;;  %v2428_v36 = vmul.f32 1.442695, %v2211_v51  ;;  %v2543_v13 = vpack.c.bf16 %v9018_v30, %v11740_v2  ;;  %v15073_v30 = vld [vmem:[#allocation65_spill] sm:$0xff] }
 0x28b   : > { %v2282_v56 = vmul.f32 1.442695, %v2138_v14  ;;  %v11771_v57 = vpop.eup %9021  ;;  %9041 = vpow2.f32 %v2408_v42  ;;  %v2284_v10 = vmul.f32 1.442695, %v2139_v40  ;;  %v1870_v25 = vpop.permute.xlu0 %1869  ;;  %v15074_v40 = vld [vmem:[#allocation68_spill] sm:$0xff] }
 0x28c   : > { %v2010_v54 = vpop.permute.xlu1 %2009  ;;  %v9024_v9 = vpop.eup %9023  ;;  %9043 = vpow2.f32 %v2426_v20  ;;  %v2148_v48 = vsub.f32 %v15069_v45, %v1870_v25  ;;  %v2149_v19 = vsub.f32 %v15070_v43, %v1870_v25  ;;  %2726 = vperm.xlu1 %8758, %v11565_v15   ;;  %3419 = vmatprep.mubr.bf16.mxu1 %v2543_v13  ;;  %v15077_v25 = vld [vmem:[#allocation159_spill] sm:$0xff] }
 0x28d   : > { %v2204_v33 = vsub.f32 %v15071_v26, %v2010_v54  ;;  %v9026_v4 = vpop.eup %9025  ;;  %9045 = vpow2.f32 %v2428_v36  ;;  %v2205_v42 = vsub.f32 %v15072_v3, %v2010_v54  ;;  %2771 = vperm.xlu0 %8757, %v11666_v8   ;;  %3420 = vmatmul.mubr.bf16.gmra.mrb[72].mxu1 %v2542_v21  ;;  %v15075_v8 = vld [vmem:[#allocation47_spill] sm:$0xff] }
 0x28e   : > { %v11780_v2 = vpop.eup %9027  ;;  %9047 = vpow2.f32 %v2282_v56  ;;  %v2302_v62 = vmul.f32 1.442695, %v2148_v48  ;;  %v2304_v60 = vmul.f32 1.442695, %v2149_v19  ;;  %v15076_v56 = vld [vmem:[#allocation48_spill] sm:$0xff] }
 0x28f   : > { %v2414_v23 = vmul.f32 1.442695, %v2204_v33  ;;  %v11782_v55 = vpop.eup %9029  ;;  %9049 = vpow2.f32 %v2284_v10  ;;  %v2416_v51 = vmul.f32 1.442695, %v2205_v42  ;;  %v2035_v29 = vpop.permute.xlu0 %2034 }
 0x290   : > { %v1855_v15 = vpop.permute.xlu1 %1854  ;;  %v9032_v14 = vpop.eup %9031  ;;  %9051 = vpow2.f32 %v2302_v62  ;;  %v2214_v41 = vsub.f32 %v15073_v30, %v2035_v29  ;;  %v2215_v20 = vsub.f32 %v15074_v40, %v2035_v29  ;;  %2736 = vperm.xlu1 %8758, %v11595_v27   ;;  %v15078_v62 = vld [vmem:[#allocation66_spill] sm:$0xff]  ;;  %v15079_v29 = vld [vmem:[#allocation67_spill] sm:$0xff] }
 0x291   : > { %v2142_v36 = vsub.f32 %v15075_v8, %v1855_v15  ;;  %v9034_v21 = vpop.eup %9033  ;;  %9053 = vpow2.f32 %v2304_v60  ;;  %v2143_v13 = vsub.f32 %v15076_v56, %v1855_v15  ;;  %2801 = vperm.xlu0 %8757, %v15077_v25   ;;  %v2512_v10 = vpack.c.bf16 %v9032_v14, %v9024_v9  ;;  %v15080_v9 = vld [vmem:[#allocation53_spill] sm:$0xff]  ;;  %v15081_v30 = vld [vmem:[#allocation54_spill] sm:$0xff] }
 0x292   : > { %v11790_v54 = vpop.eup %9035  ;;  %9055 = vpow2.f32 %v2414_v23  ;;  %v2434_v45 = vmul.f32 1.442695, %v2214_v41  ;;  %v2436_v48 = vmul.f32 1.442695, %v2215_v20  ;;  %v2513_v33 = vpack.c.bf16 %v9034_v21, %v9026_v4 }
 0x293   : > { %v2290_v43 = vmul.f32 1.442695, %v2142_v36  ;;  %v11792_v19 = vpop.eup %9037  ;;  %9057 = vpow2.f32 %v2416_v51  ;;  %v2292_v26 = vmul.f32 1.442695, %v2143_v13  ;;  %v1880_v3 = vpop.permute.xlu0 %1879  ;;  %v15082_v51 = vld [vmem:[#allocation162_spill] sm:$0xff] }
 0x294   : > { %v2020_v27 = vpop.permute.xlu1 %2019  ;;  %v9040_v42 = vpop.eup %9039  ;;  %9059 = vpow2.f32 %v2434_v45  ;;  %v2152_v60 = vsub.f32 %v15078_v62, %v1880_v3  ;;  %v2153_v15 = vsub.f32 %v15079_v29, %v1880_v3  ;;  %2746 = vperm.xlu1 %8758, %v11623_v7   ;;  %3170 = vmatprep.mubr.bf16.mxu0 %v2513_v33  ;;  %v15087_v62 = vld [vmem:[#allocation136_spill] sm:$0xff] }
 0x295   : > { %v2208_v14 = vsub.f32 %v15080_v9, %v2020_v27  ;;  %v9042_v23 = vpop.eup %9041  ;;  %9061 = vpow2.f32 %v2436_v48  ;;  %v2209_v41 = vsub.f32 %v15081_v30, %v2020_v27  ;;  %2811 = vperm.xlu0 %8757, %v15082_v51   ;;  %v2544_v4 = vpack.c.bf16 %v9040_v42, %v11742_v5  ;;  %3171 = vmatmul.mubr.bf16.gmra.mrb[76].mxu0 %v2512_v10  ;;  %v15083_v48 = vld [vmem:[#allocation73_spill] sm:$0xff]  ;;  %v15084_v5 = vld [vmem:[#allocation76_spill] sm:$0xff]  ;;  %v15085_v27 = vld [vmem:[#allocation55_spill] sm:$0xff] }
 0x296   : > { %v11801_v40 = vpop.eup %9043  ;;  %9063 = vpow2.f32 %v2290_v43  ;;  %v2310_v20 = vmul.f32 1.442695, %v2152_v60  ;;  %v2312_v8 = vmul.f32 1.442695, %v2153_v15  ;;  %v2545_v56 = vpack.c.bf16 %v9042_v23, %v11754_v37  ;;  %v15086_v42 = vld [vmem:[#allocation56_spill] sm:$0xff] }
 0x297   : > { %v2422_v36 = vmul.f32 1.442695, %v2208_v14  ;;  %v11803_v21 = vpop.eup %9045  ;;  %9065 = vpow2.f32 %v2292_v26  ;;  %v2424_v7 = vmul.f32 1.442695, %v2209_v41  ;;  %v2045_v13 = vpop.permute.xlu0 %2044 }
 0x298   : > { %v1865_v25 = vpop.permute.xlu1 %1864  ;;  %v9048_v45 = vpop.eup %9047  ;;  %9067 = vpow2.f32 %v2310_v20  ;;  %v2218_v33 = vsub.f32 %v15083_v48, %v2045_v13  ;;  %v2219_v3 = vsub.f32 %v15084_v5, %v2045_v13  ;;  %2756 = vperm.xlu1 %8758, %v11639_v39   ;;  %3427 = vmatprep.mubr.bf16.mxu1 %v2545_v56  ;;  %v15088_v20 = vld [vmem:[#allocation74_spill] sm:$0xff]  ;;  %v15090_v13 = vld [vmem:[#allocation61_spill] sm:$0xff] }
 0x299   : > { %v2146_v43 = vsub.f32 %v15085_v27, %v1865_v25  ;;  %v9050_v10 = vpop.eup %9049  ;;  %9069 = vpow2.f32 %v2312_v8  ;;  %v2147_v26 = vsub.f32 %v15086_v42, %v1865_v25  ;;  %2821 = vperm.xlu0 %8757, %v15087_v62   ;;  %v2514_v37 = vpack.c.bf16 %v11769_v63, %v9048_v45  ;;  %3428 = vmatmul.mubr.bf16.gmra.mrb[76].mxu1 %v2544_v4  ;;  %v15089_v63 = vld [vmem:[#allocation75_spill] sm:$0xff]  ;;  %v15091_v25 = vld [vmem:[#allocation62_spill] sm:$0xff]  ;;  %v15093_v62 = vld [vmem:[#allocation81_spill] sm:$0xff] }
 0x29a   : > { %v11813_v60 = vpop.eup %9051  ;;  %9071 = vpow2.f32 %v2422_v36  ;;  %v2442_v29 = vmul.f32 1.442695, %v2218_v33  ;;  %v2444_v15 = vmul.f32 1.442695, %v2219_v3  ;;  %v2515_v23 = vpack.c.bf16 %v11771_v57, %v9050_v10  ;;  %v15092_v45 = vld [vmem:[#allocation139_spill] sm:$0xff] }
 0x29b   : > { %v2298_v9 = vmul.f32 1.442695, %v2146_v43  ;;  %v11815_v14 = vpop.eup %9053  ;;  %9073 = vpow2.f32 %v2424_v7  ;;  %v2300_v39 = vmul.f32 1.442695, %v2147_v26  ;;  %v1890_v30 = vpop.permute.xlu0 %1889 }
 0x29c   : > { %v2030_v41 = vpop.permute.xlu1 %2029  ;;  %v9056_v51 = vpop.eup %9055  ;;  %9075 = vpow2.f32 %v2442_v29  ;;  %v2156_v8 = vsub.f32 %v15088_v20, %v1890_v30  ;;  %v2157_v56 = vsub.f32 %v15089_v63, %v1890_v30  ;;  %2766 = vperm.xlu1 %8758, %v11661_v44   ;;  %3178 = vmatprep.mubr.bf16.mxu0 %v2515_v23  ;;  %v15095_v23 = vld [vmem:[#allocation63_spill] sm:$0xff] }
 0x29d   : > { %v2212_v36 = vsub.f32 %v15090_v13, %v2030_v41  ;;  %v9058_v4 = vpop.eup %9057  ;;  %9077 = vpow2.f32 %v2444_v15  ;;  %v2213_v7 = vsub.f32 %v15091_v25, %v2030_v41  ;;  %2831 = vperm.xlu0 %8757, %v15092_v45   ;;  %v2546_v57 = vpack.c.bf16 %v9056_v51, %v11758_v0  ;;  %3179 = vmatmul.mubr.bf16.gmra.mrb[80].mxu0 %v2514_v37  ;;  %v15094_v0 = vld [vmem:[#allocation84_spill] sm:$0xff]  ;;  %v15098_v51 = vld [vmem:[#allocation141_spill] sm:$0xff] }
 0x29e   : > { %v11825_v48 = vpop.eup %9059  ;;  %9079 = vpow2.f32 %v2298_v9  ;;  %v2318_v33 = vmul.f32 1.442695, %v2156_v8  ;;  %v2320_v5 = vmul.f32 1.442695, %v2157_v56  ;;  %v2547_v43 = vpack.c.bf16 %v9058_v4, %v11760_v58  ;;  %v15096_v37 = vld [vmem:[#allocation160_spill] sm:$0xff] }
 0x29f   : > { %v2430_v3 = vmul.f32 1.442695, %v2212_v36  ;;  %v11827_v27 = vpop.eup %9061  ;;  %9081 = vpow2.f32 %v2300_v39  ;;  %v2432_v44 = vmul.f32 1.442695, %v2213_v7  ;;  %v2055_v10 = vpop.permute.xlu0 %2054  ;;  %v15097_v41 = vld [vmem:[#allocation64_spill] sm:$0xff] }
 0x2a0   : > { %v1875_v42 = vpop.permute.xlu1 %1874  ;;  %v9064_v26 = vpop.eup %9063  ;;  %9083 = vpow2.f32 %v2318_v33  ;;  %v2222_v29 = vsub.f32 %v15093_v62, %v2055_v10  ;;  %v2223_v15 = vsub.f32 %v15094_v0, %v2055_v10  ;;  %2796 = vperm.xlu1 %8758, %v15096_v37   ;;  %3435 = vmatprep.mubr.bf16.mxu1 %v2547_v43  ;;  %v15099_v33 = vld [vmem:[#allocation82_spill] sm:$0xff]  ;;  %v15101_v10 = vld [vmem:[#allocation69_spill] sm:$0xff] }
 0x2a1   : > { %v2150_v9 = vsub.f32 %v15095_v23, %v1875_v42  ;;  %v9066_v30 = vpop.eup %9065  ;;  %9085 = vpow2.f32 %v2320_v5  ;;  %v2151_v39 = vsub.f32 %v15097_v41, %v1875_v42  ;;  %2841 = vperm.xlu0 %8757, %v15098_v51   ;;  %v2516_v58 = vpack.c.bf16 %v11790_v54, %v9064_v26  ;;  %3436 = vmatmul.mubr.bf16.gmra.mrb[80].mxu1 %v2546_v57  ;;  %v15100_v54 = vld [vmem:[#allocation83_spill] sm:$0xff]  ;;  %v15102_v57 = vld [vmem:[#allocation161_spill] sm:$0xff]  ;;  %v15103_v26 = vld [vmem:[#allocation70_spill] sm:$0xff] }
 0x2a2   : > { %v11837_v20 = vpop.eup %9067  ;;  %9087 = vpow2.f32 %v2430_v3  ;;  %v2450_v8 = vmul.f32 1.442695, %v2222_v29  ;;  %v2452_v63 = vmul.f32 1.442695, %v2223_v15  ;;  %v2517_v4 = vpack.c.bf16 %v11792_v19, %v9066_v30 }
 0x2a3   : > { %v2306_v56 = vmul.f32 1.442695, %v2150_v9  ;;  %v11839_v13 = vpop.eup %9069  ;;  %9089 = vpow2.f32 %v2432_v44  ;;  %v2308_v36 = vmul.f32 1.442695, %v2151_v39  ;;  %v1900_v25 = vpop.permute.xlu0 %1899 }
 0x2a4   : > { %v2040_v7 = vpop.permute.xlu1 %2039  ;;  %v9072_v45 = vpop.eup %9071  ;;  %9091 = vpow2.f32 %v2450_v8  ;;  %v2160_v5 = vsub.f32 %v15099_v33, %v1900_v25  ;;  %v2161_v43 = vsub.f32 %v15100_v54, %v1900_v25  ;;  %2806 = vperm.xlu1 %8758, %v15102_v57   ;;  %3186 = vmatprep.mubr.bf16.mxu0 %v2517_v4  ;;  %v15108_v25 = vld [vmem:[#allocation72_spill] sm:$0xff] }
 0x2a5   : > { %v2216_v3 = vsub.f32 %v15101_v10, %v2040_v7  ;;  %v9074_v42 = vpop.eup %9073  ;;  %9093 = vpow2.f32 %v2452_v63  ;;  %v2217_v44 = vsub.f32 %v15103_v26, %v2040_v7  ;;  %2851 = vperm.xlu0 %8757, %v11436_v16   ;;  %v2548_v19 = vpack.c.bf16 %v9072_v45, %v11780_v2  ;;  %3187 = vmatmul.mubr.bf16.gmra.mrb[84].mxu0 %v2516_v58  ;;  %v15104_v16 = vld [vmem:[#allocation89_spill] sm:$0xff]  ;;  %v15105_v2 = vld [vmem:[#allocation92_spill] sm:$0xff]  ;;  %v15106_v63 = vld [vmem:[#allocation71_spill] sm:$0xff] }
 0x2a6   : > { %v11849_v62 = vpop.eup %9075  ;;  %9095 = vpow2.f32 %v2306_v56  ;;  %v2326_v29 = vmul.f32 1.442695, %v2160_v5  ;;  %v2328_v0 = vmul.f32 1.442695, %v2161_v43  ;;  %v2549_v37 = vpack.c.bf16 %v9074_v42, %v11782_v55  ;;  %v15107_v58 = vld [vmem:[#allocation135_spill] sm:$0xff] }
 0x2a7   : > { %v2438_v15 = vmul.f32 1.442695, %v2216_v3  ;;  %v11851_v23 = vpop.eup %9077  ;;  %9097 = vpow2.f32 %v2308_v36  ;;  %v2440_v9 = vmul.f32 1.442695, %v2217_v44  ;;  %v2065_v30 = vpop.permute.xlu0 %2064 }
 0x2a8   : > { %v1885_v41 = vpop.permute.xlu1 %1884  ;;  %v9080_v39 = vpop.eup %9079  ;;  %9099 = vpow2.f32 %v2326_v29  ;;  %v2226_v51 = vsub.f32 %v15104_v16, %v2065_v30  ;;  %v2227_v8 = vsub.f32 %v15105_v2, %v2065_v30  ;;  %2816 = vperm.xlu1 %8758, %v15107_v58   ;;  %3443 = vmatprep.mubr.bf16.mxu1 %v2549_v37  ;;  %v15111_v29 = vld [vmem:[#allocation77_spill] sm:$0xff]  ;;  %v15113_v37 = vld [vmem:[#allocation78_spill] sm:$0xff] }
 0x2a9   : > { %v2154_v56 = vsub.f32 %v15106_v63, %v1885_v41  ;;  %v9082_v4 = vpop.eup %9081  ;;  %9101 = vpow2.f32 %v2328_v0  ;;  %v2155_v36 = vsub.f32 %v15108_v25, %v1885_v41  ;;  %2861 = vperm.xlu0 %8757, %v11476_v1   ;;  %v2518_v55 = vpack.c.bf16 %v11813_v60, %v9080_v39  ;;  %3444 = vmatmul.mubr.bf16.gmra.mrb[84].mxu1 %v2548_v19  ;;  %v15109_v1 = vld [vmem:[#allocation90_spill] sm:$0xff]  ;;  %v15110_v60 = vld [vmem:[#allocation91_spill] sm:$0xff]  ;;  %v15112_v19 = vld [vmem:[#allocation137_spill] sm:$0xff] }
 0x2aa   : > { %v11861_v7 = vpop.eup %9083  ;;  %9103 = vpow2.f32 %v2438_v15  ;;  %v2458_v45 = vmul.f32 1.442695, %v2226_v51  ;;  %v2460_v33 = vmul.f32 1.442695, %v2227_v8  ;;  %v2519_v10 = vpack.c.bf16 %v11815_v14, %v9082_v4  ;;  %v15114_v4 = vld [vmem:[#allocation98_spill] sm:$0xff]  ;;  %v15115_v25 = vld [vmem:[#allocation99_spill] sm:$0xff] }
 0x2ab   : > { %v2314_v5 = vmul.f32 1.442695, %v2154_v56  ;;  %v11863_v54 = vpop.eup %9085  ;;  %9105 = vpow2.f32 %v2440_v9  ;;  %v2316_v43 = vmul.f32 1.442695, %v2155_v36  ;;  %v1910_v3 = vpop.permute.xlu0 %1909  ;;  %v15116_v36 = vld [vmem:[#allocation79_spill] sm:$0xff] }
 0x2ac   : > { %v2050_v57 = vpop.permute.xlu1 %2049  ;;  %v9088_v42 = vpop.eup %9087  ;;  %9107 = vpow2.f32 %v2458_v45  ;;  %v2164_v26 = vsub.f32 %v15109_v1, %v1910_v3  ;;  %v2165_v44 = vsub.f32 %v15110_v60, %v1910_v3  ;;  %2826 = vperm.xlu1 %8758, %v15112_v19   ;;  %3194 = vmatprep.mubr.bf16.mxu0 %v2519_v10 }
 0x2ad   : > { %v2220_v0 = vsub.f32 %v15111_v29, %v2050_v57  ;;  %v9090_v15 = vpop.eup %9089  ;;  %9109 = vpow2.f32 %v2460_v33  ;;  %v2221_v9 = vsub.f32 %v15113_v37, %v2050_v57  ;;  %2871 = vperm.xlu0 %8757, %v11516_v59   ;;  %v2550_v14 = vpack.c.bf16 %v9088_v42, %v11801_v40  ;;  %3195 = vmatmul.mubr.bf16.gmra.mrb[88].mxu0 %v2518_v55  ;;  %v15117_v33 = vld [vmem:[#allocation142_spill] sm:$0xff]  ;;  %v15121_v37 = vld [vmem:[#allocation144_spill] sm:$0xff] }
 0x2ae   : > { %v11873_v30 = vpop.eup %9091  ;;  %9111 = vpow2.f32 %v2314_v5  ;;  %v2334_v41 = vmul.f32 1.442695, %v2164_v26  ;;  %v2551_v2 = vpack.c.bf16 %v9090_v15, %v11803_v21  ;;  %v2336_v58 = vmul.f32 1.442695, %v2165_v44  ;;  %v15118_v5 = vld [vmem:[#allocation80_spill] sm:$0xff] }
 0x2af   : > { %v2446_v39 = vmul.f32 1.442695, %v2220_v0  ;;  %v11875_v16 = vpop.eup %9093  ;;  %9113 = vpow2.f32 %v2316_v43  ;;  %v2448_v51 = vmul.f32 1.442695, %v2221_v9  ;;  %v1920_v8 = vpop.permute.xlu0 %1919 }
 0x2b0   : > { %v1895_v63 = vpop.permute.xlu1 %1894  ;;  %v9096_v56 = vpop.eup %9095  ;;  %v2168_v59 = vsub.f32 %v15114_v4, %v1920_v8  ;;  %v2169_v40 = vsub.f32 %v15115_v25, %v1920_v8  ;;  %2836 = vperm.xlu1 %8758, %v15117_v33   ;;  %9115 = vpow2.f32 %v2334_v41  ;;  %3451 = vmatprep.mubr.bf16.mxu1 %v2551_v2 }
 0x2b1   : > { %v2158_v45 = vsub.f32 %v15116_v36, %v1895_v63  ;;  %v9098_v55 = vpop.eup %9097  ;;  %v2159_v43 = vsub.f32 %v15118_v5, %v1895_v63  ;;  %2881 = vperm.xlu0 %8757, %v11556_v11   ;;  %v2520_v21 = vpack.c.bf16 %v11837_v20, %v9096_v56  ;;  %9117 = vpow2.f32 %v2446_v39  ;;  %3452 = vmatmul.mubr.bf16.gmra.mrb[88].mxu1 %v2550_v14  ;;  %v15119_v11 = vld [vmem:[#allocation101_spill] sm:$0xff]  ;;  %v15122_v14 = vld [vmem:[#allocation102_spill] sm:$0xff]  ;;  %v15126_v5 = vld [vmem:[#allocation107_spill] sm:$0xff] }
 0x2b2   : > { %v11885_v10 = vpop.eup %9099  ;;  %v2342_v3 = vmul.f32 1.442695, %v2168_v59  ;;  %9119 = vpow2.f32 %v2448_v51  ;;  %v2521_v26 = vpack.c.bf16 %v11839_v13, %v9098_v55  ;;  %v2344_v0 = vmul.f32 1.442695, %v2169_v40  ;;  %v15120_v20 = vld [vmem:[#allocation85_spill] sm:$0xff]  ;;  %v15123_v39 = vld [vmem:[#allocation86_spill] sm:$0xff] }
 0x2b3   : > { %v2322_v57 = vmul.f32 1.442695, %v2158_v45  ;;  %v11887_v42 = vpop.eup %9101  ;;  %v2324_v1 = vmul.f32 1.442695, %v2159_v43  ;;  %v2080_v60 = vpop.permute.xlu0 %2079  ;;  %9121 = vpow2.f32 %v2336_v58  ;;  %v15124_v36 = vld [vmem:[#allocation106_spill] sm:$0xff]  ;;  %v15125_v45 = vld [vmem:[#allocation87_spill] sm:$0xff] }
 0x2b4   : > { %v2060_v44 = vpop.permute.xlu1 %2059  ;;  %v9104_v29 = vpop.eup %9103  ;;  %v2232_v19 = vsub.f32 %v15119_v11, %v2080_v60  ;;  %2846 = vperm.xlu1 %8758, %v15121_v37   ;;  %9123 = vpow2.f32 %v2342_v3  ;;  %3202 = vmatprep.mubr.bf16.mxu0 %v2521_v26  ;;  %v2233_v41 = vsub.f32 %v15122_v14, %v2080_v60  ;;  %v15128_v11 = vld [vmem:[#allocation109_spill] sm:$0xff]  ;;  %v15130_v37 = vld [vmem:[#allocation94_spill] sm:$0xff] }
 0x2b5   : > { %v2224_v15 = vsub.f32 %v15120_v20, %v2060_v44  ;;  %v9106_v9 = vpop.eup %9105  ;;  %v2225_v51 = vsub.f32 %v15123_v39, %v2060_v44  ;;  %2891 = vperm.xlu0 %8757, %v11593_v28   ;;  %v2552_v13 = vpack.c.bf16 %v9104_v29, %v11825_v48  ;;  %9125 = vpow2.f32 %v2322_v57  ;;  %3203 = vmatmul.mubr.bf16.gmra.mrb[92].mxu0 %v2520_v21  ;;  %v15127_v21 = vld [vmem:[#allocation88_spill] sm:$0xff]  ;;  %v15129_v20 = vld [vmem:[#allocation93_spill] sm:$0xff] }
 0x2b6   : > { %v11897_v2 = vpop.eup %9107  ;;  %9127 = vpow2.f32 %v2324_v1  ;;  %v2553_v58 = vpack.c.bf16 %v9106_v9, %v11827_v27  ;;  %v2470_v40 = vmul.f32 1.442695, %v2232_v19  ;;  %v2472_v55 = vmul.f32 1.442695, %v2233_v41 }
 0x2b7   : > { %v2454_v8 = vmul.f32 1.442695, %v2224_v15  ;;  %v11899_v63 = vpop.eup %9109  ;;  %v2456_v56 = vmul.f32 1.442695, %v2225_v51  ;;  %v1930_v4 = vpop.permute.xlu0 %1929  ;;  %9129 = vpow2.f32 %v2344_v0 }
 0x2b8   : > { %v1905_v59 = vpop.permute.xlu1 %1904  ;;  %v9112_v25 = vpop.eup %9111  ;;  %v2172_v28 = vsub.f32 %v15124_v36, %v1930_v4  ;;  %2856 = vperm.xlu1 %8758, %v11460_v53   ;;  %3459 = vmatprep.mubr.bf16.mxu1 %v2553_v58  ;;  %v2173_v43 = vsub.f32 %v15126_v5, %v1930_v4  ;;  %v15131_v58 = vld [vmem:[#allocation110_spill] sm:$0xff] }
 0x2b9   : > { %v2162_v48 = vsub.f32 %v15125_v45, %v1905_v59  ;;  %v9114_v33 = vpop.eup %9113  ;;  %v2163_v3 = vsub.f32 %v15127_v21, %v1905_v59  ;;  %2901 = vperm.xlu0 %8757, %v11617_v52   ;;  %v2522_v27 = vpack.c.bf16 %v11861_v7, %v9112_v25  ;;  %9131 = vpow2.f32 %v2454_v8  ;;  %3460 = vmatmul.mubr.bf16.gmra.mrb[92].mxu1 %v2552_v13  ;;  %v15132_v59 = vld [vmem:[#allocation95_spill] sm:$0xff] }
 0x2ba   : > { %v11909_v1 = vpop.eup %9115  ;;  %9133 = vpow2.f32 %v2456_v56  ;;  %v2523_v53 = vpack.c.bf16 %v11863_v54, %v9114_v33  ;;  %v2350_v0 = vmul.f32 1.442695, %v2172_v28  ;;  %v2352_v15 = vmul.f32 1.442695, %v2173_v43  ;;  %v15134_v28 = vld [vmem:[#allocation96_spill] sm:$0xff] }
 0x2bb   : > { %v2330_v57 = vmul.f32 1.442695, %v2162_v48  ;;  %v2332_v26 = vmul.f32 1.442695, %v2163_v3  ;;  %v2090_v60 = vpop.permute.xlu0 %2089  ;;  %v9118_v29 = vpop.eup %9117  ;;  %9135 = vpow2.f32 %v2470_v40  ;;  %v15133_v40 = vld [vmem:[#allocation114_spill] sm:$0xff] }
 0x2bc   : > { %v2070_v44 = vpop.permute.xlu1 %2069  ;;  %v2236_v19 = vsub.f32 %v15128_v11, %v2090_v60  ;;  %2866 = vperm.xlu1 %8758, %v11500_v35   ;;  %v9120_v7 = vpop.eup %9119  ;;  %9137 = vpow2.f32 %v2472_v55  ;;  %3210 = vmatprep.mubr.bf16.mxu0 %v2523_v53  ;;  %v2554_v54 = vpack.c.bf16 %v9118_v29, %v11849_v62  ;;  %v2237_v4 = vsub.f32 %v15131_v58, %v2090_v60  ;;  %v15137_v60 = vld [vmem:[#allocation117_spill] sm:$0xff]  ;;  %v15138_v29 = vld [vmem:[#allocation100_spill] sm:$0xff] }
 0x2bd   : > { %v2228_v52 = vsub.f32 %v15129_v20, %v2070_v44  ;;  %v2229_v9 = vsub.f32 %v15130_v37, %v2070_v44  ;;  %2911 = vperm.xlu0 %8757, %v11637_v34   ;;  %v11918_v14 = vpop.eup %9121  ;;  %9139 = vpow2.f32 %v2330_v57  ;;  %3211 = vmatmul.mubr.bf16.gmra.mrb[96].mxu0 %v2522_v27  ;;  %v2555_v35 = vpack.c.bf16 %v9120_v7, %v11851_v23  ;;  %v15135_v27 = vld [vmem:[#allocation115_spill] sm:$0xff] }
 0x2be   : > { %v11920_v39 = vpop.eup %9123  ;;  %9141 = vpow2.f32 %v2332_v26  ;;  %v2478_v34 = vmul.f32 1.442695, %v2236_v19  ;;  %v2480_v3 = vmul.f32 1.442695, %v2237_v4  ;;  %v15136_v26 = vld [vmem:[#allocation97_spill] sm:$0xff] }
 0x2bf   : > { %v2462_v41 = vmul.f32 1.442695, %v2228_v52  ;;  %v2464_v51 = vmul.f32 1.442695, %v2229_v9  ;;  %v1940_v13 = vpop.permute.xlu0 %1939  ;;  %v9126_v56 = vpop.eup %9125  ;;  %9143 = vpow2.f32 %v2350_v0  ;;  %3467 = vmatprep.mubr.bf16.mxu1 %v2555_v35 }
 0x2c0   : > { %v1915_v8 = vpop.permute.xlu1 %1914  ;;  %2876 = vperm.xlu1 %8758, %v11540_v22   ;;  %v9128_v25 = vpop.eup %9127  ;;  %9145 = vpow2.f32 %v2352_v15  ;;  %v2176_v36 = vsub.f32 %v15133_v40, %v1940_v13  ;;  %v2524_v23 = vpack.c.bf16 %v11885_v10, %v9126_v56  ;;  %v2177_v57 = vsub.f32 %v15135_v27, %v1940_v13  ;;  %v15141_v13 = vld [vmem:[#allocation104_spill] sm:$0xff]  ;;  %v15142_v40 = vld [vmem:[#allocation122_spill] sm:$0xff] }
 0x2c1   : > { %v2166_v62 = vsub.f32 %v15132_v59, %v1915_v8  ;;  %v2167_v45 = vsub.f32 %v15134_v28, %v1915_v8  ;;  %2921 = vperm.xlu0 %8757, %v11654_v18   ;;  %v11930_v48 = vpop.eup %9129  ;;  %9147 = vpow2.f32 %v2462_v41  ;;  %3468 = vmatmul.mubr.bf16.gmra.mrb[96].mxu1 %v2554_v54  ;;  %v2525_v22 = vpack.c.bf16 %v11887_v42, %v9128_v25  ;;  %v15139_v54 = vld [vmem:[#allocation118_spill] sm:$0xff]  ;;  %v15140_v41 = vld [vmem:[#allocation103_spill] sm:$0xff] }
 0x2c2   : > { %9149 = vpow2.f32 %v2464_v51  ;;  %v2358_v53 = vmul.f32 1.442695, %v2176_v36  ;;  %v2360_v9 = vmul.f32 1.442695, %v2177_v57 }
 0x2c3   : > { %v2338_v33 = vmul.f32 1.442695, %v2166_v62  ;;  %v2340_v55 = vmul.f32 1.442695, %v2167_v45  ;;  %v2100_v5 = vpop.permute.xlu0 %2099  ;;  %v9132_v21 = vpop.eup %9131  ;;  %9151 = vpow2.f32 %v2478_v34  ;;  %3218 = vmatprep.mubr.bf16.mxu0 %v2525_v22  ;;  %v15144_v45 = vld [vmem:[#allocation123_spill] sm:$0xff] }
 0x2c4   : > { %v2075_v43 = vpop.permute.xlu1 %2074  ;;  %2886 = vperm.xlu1 %8758, %v11580_v31   ;;  %v9134_v10 = vpop.eup %9133  ;;  %v2240_v44 = vsub.f32 %v15137_v60, %v2100_v5  ;;  %v2556_v42 = vpack.c.bf16 %v9132_v21, %v11873_v30  ;;  %v15148_v60 = vld [vmem:[#allocation126_spill] sm:$0xff] }
 0x2c5   : > { %v2230_v18 = vsub.f32 %v15136_v26, %v2075_v43  ;;  %v2231_v0 = vsub.f32 %v15138_v29, %v2075_v43  ;;  %2931 = vperm.xlu0 %8757, %v11673_v50   ;;  %v11940_v11 = vpop.eup %9135  ;;  %9153 = vpow2.f32 %v2338_v33  ;;  %3219 = vmatmul.mubr.bf16.gmra.mrb[100].mxu0 %v2524_v23  ;;  %v2557_v52 = vpack.c.bf16 %v9134_v10, %v11875_v16  ;;  %v15146_v26 = vld [vmem:[#allocation125_spill] sm:$0xff]  ;;  %v15147_v10 = vld [vmem:[#allocation111_spill] sm:$0xff]  ;;  %v15149_v29 = vld [vmem:[#allocation112_spill] sm:$0xff] }
 0x2c6   : > { %v11942_v20 = vpop.eup %9137  ;;  %9155 = vpow2.f32 %v2340_v55  ;;  %v2241_v50 = vsub.f32 %v15139_v54, %v2100_v5  ;;  %v2486_v35 = vmul.f32 1.442695, %v2240_v44  ;;  %v15145_v55 = vld [vmem:[#allocation108_spill] sm:$0xff]  ;;  %v15150_v54 = vld [vmem:[#allocation113_spill] sm:$0xff] }
 0x2c7   : > { %v2466_v19 = vmul.f32 1.442695, %v2230_v18  ;;  %v2468_v31 = vmul.f32 1.442695, %v2231_v0  ;;  %v1950_v7 = vpop.permute.xlu0 %1949  ;;  %v9140_v37 = vpop.eup %9139  ;;  %9157 = vpow2.f32 %v2480_v3  ;;  %3475 = vmatprep.mubr.bf16.mxu1 %v2557_v52 }
 0x2c8   : > { %v1925_v15 = vpop.permute.xlu1 %1924  ;;  %2896 = vperm.xlu1 %8758, %v11606_v17   ;;  %v9142_v51 = vpop.eup %9141  ;;  %9159 = vpow2.f32 %v2358_v53  ;;  %v2526_v16 = vpack.c.bf16 %v11909_v1, %v9140_v37  ;;  %v2488_v25 = vmul.f32 1.442695, %v2241_v50  ;;  %v2180_v36 = vsub.f32 %v15142_v40, %v1950_v7 }
 0x2c9   : > { %v2170_v30 = vsub.f32 %v15140_v41, %v1925_v15  ;;  %v2171_v8 = vsub.f32 %v15141_v13, %v1925_v15  ;;  %2781 = vperm.xlu0 %8757, %v11683_v32   ;;  %v11951_v56 = vpop.eup %9143  ;;  %9161 = vpow2.f32 %v2466_v19  ;;  %3476 = vmatmul.mubr.bf16.gmra.mrb[100].mxu1 %v2556_v42  ;;  %v2527_v17 = vpack.c.bf16 %v11918_v14, %v9142_v51  ;;  %v15143_v32 = vld [vmem:[#allocation105_spill] sm:$0xff]  ;;  %v15151_v41 = vld [vmem:[#allocation116_spill] sm:$0xff] }
 0x2ca   : > { %v11953_v4 = vpop.eup %9145  ;;  %9163 = vpow2.f32 %v2468_v31  ;;  %v2181_v23 = vsub.f32 %v15144_v45, %v1950_v7  ;;  %v2366_v57 = vmul.f32 1.442695, %v2180_v36  ;;  %v15156_v45 = vld [vmem:[#allocation131_spill] sm:$0xff] }
 0x2cb   : > { %v2346_v58 = vmul.f32 1.442695, %v2170_v30  ;;  %v2348_v34 = vmul.f32 1.442695, %v2171_v8  ;;  %v9148_v62 = vpop.eup %9147  ;;  %9165 = vpow2.f32 %v2360_v9  ;;  %3226 = vmatprep.mubr.bf16.mxu0 %v2527_v17  ;;  %v2110_v33 = vpop.permute.xlu0 %2109  ;;  %v15152_v8 = vld [vmem:[#allocation130_spill] sm:$0xff] }
 0x2cc   : > { %v2085_v59 = vpop.permute.xlu1 %2084  ;;  %2906 = vperm.xlu1 %8758, %v11635_v12   ;;  %v9150_v1 = vpop.eup %9149  ;;  %9167 = vpow2.f32 %v2486_v35  ;;  %v2558_v14 = vpack.c.bf16 %v9148_v62, %v11897_v2  ;;  %v2244_v18 = vsub.f32 %v15146_v26, %v2110_v33  ;;  %v2368_v2 = vmul.f32 1.442695, %v2181_v23  ;;  %v15154_v62 = vld [vmem:[#allocation120_spill] sm:$0xff]  ;;  %v15160_v26 = vld [vmem:[#allocation133_spill] sm:$0xff] }
 0x2cd   : > { %v2234_v28 = vsub.f32 %v15143_v32, %v2085_v59  ;;  %v2235_v22 = vsub.f32 %v15145_v55, %v2085_v59  ;;  %2941 = vperm.xlu0 %8757, %v11691_v24   ;;  %v11963_v5 = vpop.eup %9151  ;;  %9169 = vpow2.f32 %v2346_v58  ;;  %3227 = vmatmul.mubr.bf16.gmra.mrb[104].mxu0 %v2526_v16  ;;  %v2559_v12 = vpack.c.bf16 %v9150_v1, %v11899_v63  ;;  %v15153_v59 = vld [vmem:[#allocation119_spill] sm:$0xff] }
 0x2ce   : > { %9171 = vpow2.f32 %v2348_v34  ;;  %v2245_v44 = vsub.f32 %v15148_v60, %v2110_v33  ;;  %v2494_v37 = vmul.f32 1.442695, %v2244_v18 }
 0x2cf   : > { %v2474_v43 = vmul.f32 1.442695, %v2234_v28  ;;  %v2476_v21 = vmul.f32 1.442695, %v2235_v22  ;;  %v9154_v27 = vpop.eup %9153  ;;  %9173 = vpow2.f32 %v2488_v25  ;;  %3483 = vmatprep.mubr.bf16.mxu1 %v2559_v12  ;;  %v1960_v9 = vpop.permute.xlu0 %1959  ;;  %v15155_v25 = vld [vmem:[#allocation146_spill] sm:$0xff] }
 0x2d0   : > { %v1935_v3 = vpop.permute.xlu1 %1934  ;;  %2916 = vperm.xlu1 %8758, %v11649_v6   ;;  %v9156_v24 = vpop.eup %9155  ;;  %v2528_v63 = vpack.c.bf16 %v11920_v39, %v9154_v27  ;;  %v2496_v50 = vmul.f32 1.442695, %v2245_v44  ;;  %v2184_v16 = vsub.f32 %v15152_v8, %v1960_v9  ;;  %v2185_v23 = vsub.f32 %v15156_v45, %v1960_v9  ;;  %v15161_v44 = vld [vmem:[#allocation134_spill] sm:$0xff] }
 0x2d1   : > { %v2174_v53 = vsub.f32 %v15147_v10, %v1935_v3  ;;  %v2175_v0 = vsub.f32 %v15149_v29, %v1935_v3  ;;  %2791 = vperm.xlu0 %8757, %v11707_v49   ;;  %v11973_v42 = vpop.eup %9157  ;;  %9175 = vpow2.f32 %v2474_v43  ;;  %3484 = vmatmul.mubr.bf16.gmra.mrb[104].mxu1 %v2558_v14  ;;  %v2529_v52 = vpack.c.bf16 %v11930_v48, %v9156_v24  ;;  %v15157_v43 = vld [vmem:[#allocation121_spill] sm:$0xff] }
 0x2d2   : > { %v11975_v31 = vpop.eup %9159  ;;  %9177 = vpow2.f32 %v2476_v21  ;;  %v2374_v33 = vmul.f32 1.442695, %v2184_v16  ;;  %v15159_v3 = vld [vmem:[#allocation145_spill] sm:$0xff]  ;;  %v2376_v60 = vmul.f32 1.442695, %v2185_v23 }
 0x2d3   : > { %v2354_v19 = vmul.f32 1.442695, %v2174_v53  ;;  %v2356_v6 = vmul.f32 1.442695, %v2175_v0  ;;  %v9162_v15 = vpop.eup %9161  ;;  %9179 = vpow2.f32 %v2366_v57  ;;  %3234 = vmatprep.mubr.bf16.mxu0 %v2529_v52  ;;  %v2120_v55 = vpop.permute.xlu0 %2119 }
 0x2d4   : > { %v2095_v7 = vpop.permute.xlu1 %2094  ;;  %2926 = vperm.xlu1 %8758, %v11669_v47   ;;  %v9164_v39 = vpop.eup %9163  ;;  %9181 = vpow2.f32 %v2368_v2  ;;  %v2560_v51 = vpack.c.bf16 %v11940_v11, %v9162_v15  ;;  %v2248_v18 = vsub.f32 %v15160_v26, %v2120_v55  ;;  %v2249_v29 = vsub.f32 %v15161_v44, %v2120_v55 }
 0x2d5   : > { %v2238_v49 = vsub.f32 %v15150_v54, %v2095_v7  ;;  %v2239_v30 = vsub.f32 %v15151_v41, %v2095_v7  ;;  %2951 = vperm.xlu0 %8757, %v11716_v46   ;;  %v11983_v48 = vpop.eup %9165  ;;  %9183 = vpow2.f32 %v2354_v19  ;;  %3235 = vmatmul.mubr.bf16.gmra.mrb[108].mxu0 %v2528_v63  ;;  %v2561_v58 = vpack.c.bf16 %v11942_v20, %v9164_v39  ;;  %v15162_v19 = vld [vmem:[#allocation127_spill] sm:$0xff] }
 0x2d6   : > { %v11985_v13 = vpop.eup %9167  ;;  %9185 = vpow2.f32 %v2356_v6 }
 0x2d7   : > { %v2482_v35 = vmul.f32 1.442695, %v2238_v49  ;;  %v2484_v47 = vmul.f32 1.442695, %v2239_v30  ;;  %v9170_v17 = vpop.eup %9169  ;;  %9187 = vpow2.f32 %v2494_v37  ;;  %3491 = vmatprep.mubr.bf16.mxu1 %v2561_v58  ;;  %v2502_v37 = vmul.f32 1.442695, %v2248_v18 }
 0x2d8   : > { %v1945_v34 = vpop.permute.xlu1 %1944  ;;  %2776 = vperm.xlu1 %8758, %v15155_v25   ;;  %v9172_v40 = vpop.eup %9171  ;;  %9189 = vpow2.f32 %v2496_v50  ;;  %v2530_v36 = vpack.c.bf16 %v11951_v56, %v9170_v17  ;;  %v15158_v56 = vld [vmem:[#allocation124_spill] sm:$0xff]  ;;  %v2504_v50 = vmul.f32 1.442695, %v2249_v29 }
 0x2d9   : > { %v2178_v46 = vsub.f32 %v15153_v59, %v1945_v34  ;;  %v2179_v11 = vsub.f32 %v15154_v62, %v1945_v34  ;;  %v11993_v32 = vpop.eup %9173  ;;  %9191 = vpow2.f32 %v2482_v35  ;;  %3492 = vmatmul.mubr.bf16.gmra.mrb[108].mxu1 %v2560_v51  ;;  %v2531_v1 = vpack.c.bf16 %v11953_v4, %v9172_v40  ;;  %v15164_v51 = vld [vmem:[#allocation129_spill] sm:$0xff]  ;;  %v15165_v35 = vld [vmem:[#allocation132_spill] sm:$0xff] }
 0x2da   : > { %9193 = vpow2.f32 %v2484_v47 }
 0x2db   : > { %v2362_v28 = vmul.f32 1.442695, %v2178_v46  ;;  %v2364_v20 = vmul.f32 1.442695, %v2179_v11  ;;  %v9176_v14 = vpop.eup %9175  ;;  %3242 = vmatprep.mubr.bf16.mxu0 %v2531_v1 }
 0x2dc   : > { %v2105_v22 = vpop.permute.xlu1 %2104  ;;  %2936 = vperm.xlu1 %8758, %v15159_v3   ;;  %v9178_v27 = vpop.eup %9177  ;;  %v2562_v57 = vpack.c.bf16 %v11963_v5, %v9176_v14  ;;  %v15163_v5 = vld [vmem:[#allocation128_spill] sm:$0xff] }
 0x2dd   : > { %9195 = vpow2.f32 %v2362_v28  ;;  %v2242_v21 = vsub.f32 %v15157_v43, %v2105_v22  ;;  %v2243_v12 = vsub.f32 %v15158_v56, %v2105_v22  ;;  %v9180_v4 = vpop.eup %9179  ;;  %3243 = vmatmul.mubr.bf16.gmra.mrb[112].mxu0 %v2530_v36  ;;  %v2563_v24 = vpack.c.bf16 %v11973_v42, %v9178_v27  ;;  %v2642_v43 = vpop.permute.xlu0 %2641 }
 0x2de   : > { %9197 = vpow2.f32 %v2364_v20  ;;  %v9182_v2 = vpop.eup %9181 }
 0x2df   : > { %v2490_v10 = vmul.f32 1.442695, %v2242_v21  ;;  %v2492_v53 = vmul.f32 1.442695, %v2243_v12  ;;  %9199 = vpow2.f32 %v2374_v33  ;;  %v9184_v63 = vpop.eup %9183  ;;  %3499 = vmatprep.mubr.bf16.mxu1 %v2563_v24 }
 0x2e0   : > { %v1955_v0 = vpop.permute.xlu1 %1954  ;;  %2786 = vperm.xlu1 %8758, %v11701_v61   ;;  %v9186_v7 = vpop.eup %9185  ;;  %v2532_v15 = vpack.c.bf16 %v11975_v31, %v9184_v63 }
 0x2e1   : > { %9201 = vpow2.f32 %v2490_v10  ;;  %v2182_v6 = vsub.f32 %v15162_v19, %v1955_v0  ;;  %v2183_v52 = vsub.f32 %v15163_v5, %v1955_v0  ;;  %v9188_v42 = vpop.eup %9187  ;;  %3500 = vmatmul.mubr.bf16.gmra.mrb[112].mxu1 %v2562_v57  ;;  %v2533_v49 = vpack.c.bf16 %v11983_v48, %v9186_v7  ;;  %v12014_v56 = vpop.permute.xlu0 %2651 }
 0x2e2   : > { %9203 = vpow2.f32 %v2492_v53  ;;  %v9190_v39 = vpop.eup %9189 }
 0x2e3   : > { %v2370_v9 = vmul.f32 1.442695, %v2182_v6  ;;  %v2372_v54 = vmul.f32 1.442695, %v2183_v52  ;;  %9205 = vpow2.f32 %v2376_v60  ;;  %v9192_v30 = vpop.eup %9191  ;;  %3250 = vmatprep.mubr.bf16.mxu0 %v2533_v49 }
 0x2e4   : > { %v2115_v41 = vpop.permute.xlu1 %2114  ;;  %2946 = vperm.xlu1 %8758, %v11714_v38   ;;  %v9194_v31 = vpop.eup %9193  ;;  %v2564_v16 = vpack.c.bf16 %v11985_v13, %v9192_v30 }
 0x2e5   : > { %9207 = vpow2.f32 %v2370_v9  ;;  %v2246_v61 = vsub.f32 %v15164_v51, %v2115_v41  ;;  %v2247_v8 = vsub.f32 %v15165_v35, %v2115_v41  ;;  %3251 = vmatmul.mubr.bf16.gmra.mrb[116].mxu0 %v2532_v15  ;;  %v2565_v34 = vpack.c.bf16 %v11993_v32, %v9194_v31  ;;  %v12018_v3 = vpop.permute.xlu0 %2661  ;;  %v2602_v31 = vld [vmem:[#allocation3 + $0x100] sm:$0xff] }
 0x2e6   : > { %9209 = vpow2.f32 %v2372_v54  ;;  %v2571_v54 = vld [vmem:[#allocation3 + $0x8] sm:$0xff] }
 0x2e7   : > { %v9196_v47 = vpop.eup %9195  ;;  %9211 = vpow2.f32 %v2502_v37  ;;  %v2498_v48 = vmul.f32 1.442695, %v2246_v61  ;;  %v2500_v58 = vmul.f32 1.442695, %v2247_v8  ;;  %3507 = vmatprep.mubr.bf16.mxu1 %v2565_v34  ;;  %v2955_v61 = vmul.f32 %v2642_v43, %v2571_v54 }
 0x2e8   : > { %v9198_v17 = vpop.eup %9197  ;;  %9213 = vpow2.f32 %v2504_v50  ;;  %v2534_v59 = vpack.c.bf16 %v9180_v4, %v9196_v47  ;;  %v2637_v55 = vpop.permute.xlu1 %2636 }
 0x2e9   : > { %9215 = vpow2.f32 %v2498_v48  ;;  %v2535_v46 = vpack.c.bf16 %v9182_v2, %v9198_v17  ;;  %v9200_v62 = vpop.eup %9199  ;;  %3508 = vmatmul.mubr.bf16.gmra.mrb[116].mxu1 %v2564_v16  ;;  %v12022_v57 = vpop.permute.xlu0 %2671 }
 0x2ea   : > { %9217 = vpow2.f32 %v2500_v58  ;;  %v2603_v58 = vld [vmem:[#allocation3 + $0x108] sm:$0xff] }
 0x2eb   : > { %v9202_v38 = vpop.eup %9201  ;;  %3258 = vmatprep.mubr.bf16.mxu0 %v2535_v46 }
 0x2ec   : > { %v9204_v11 = vpop.eup %9203  ;;  %v2566_v13 = vpack.c.bf16 %v9188_v42, %v9202_v38  ;;  %v2647_v21 = vpop.permute.xlu1 %2646  ;;  %v2570_v42 = vld [vmem:[#allocation3] sm:$0xff] }
 0x2ed   : > { %v2567_v25 = vpack.c.bf16 %v9190_v39, %v9204_v11  ;;  %v9206_v40 = vpop.eup %9205  ;;  %3259 = vmatmul.mubr.bf16.gmra.mrb[120].mxu0 %v2534_v59  ;;  %v12026_v26 = vpop.permute.xlu0 %2681  ;;  %v2954_v50 = vmul.f32 %v2637_v55, %v2570_v42  ;;  %v2605_v42 = vld [vmem:[#allocation3 + $0x118] sm:$0xff] }
 0x2ef   : > { %v9208_v36 = vpop.eup %9207  ;;  %3515 = vmatprep.mubr.bf16.mxu1 %v2567_v25 }
 0x2f0   : > { %v9210_v28 = vpop.eup %9209  ;;  %v2536_v32 = vpack.c.bf16 %v9200_v62, %v9208_v36  ;;  %v12016_v12 = vpop.permute.xlu1 %2656  ;;  %v2572_v36 = vld [vmem:[#allocation3 + $0x10] sm:$0xff] }
 0x2f1   : > { %v9212_v20 = vpop.eup %9211  ;;  %v2537_v1 = vpack.c.bf16 %v9206_v40, %v9210_v28  ;;  %3516 = vmatmul.mubr.bf16.gmra.mrb[120].mxu1 %v2566_v13  ;;  %v12030_v10 = vpop.permute.xlu0 %2691 }
 0x2f2   : > { %v9214_v45 = vpop.eup %9213 }
 0x2f3   : > { %v9216_v23 = vpop.eup %9215  ;;  %3266 = vmatprep.mubr.bf16.mxu0 %v2537_v1  ;;  %v2956_v1 = vmul.f32 %v2647_v21, %v2572_v36 }
 0x2f4   : > { %v9218_v33 = vpop.eup %9217  ;;  %v2568_v22 = vpack.c.bf16 %v9212_v20, %v9216_v23  ;;  %v12020_v27 = vpop.permute.xlu1 %2666 }
 0x2f5   : > { %v2569_v14 = vpack.c.bf16 %v9214_v45, %v9218_v33  ;;  %3267 = vmatmul.mubr.bf16.gmra.mrb[124].mxu0 %v2536_v32  ;;  %v12034_v24 = vpop.permute.xlu0 %2701  ;;  %v2573_v32 = vld [vmem:[#allocation3 + $0x18] sm:$0xff]  ;;  %v2604_v45 = vld [vmem:[#allocation3 + $0x110] sm:$0xff] }
 0x2f6   : > { %v2957_v43 = vmul.f32 %v12014_v56, %v2573_v32 }
 0x2f7   : > { %3523 = vmatprep.mubr.bf16.mxu1 %v2569_v14 }
 0x2f8   : > { %v12024_v4 = vpop.permute.xlu1 %2676 }
 0x2f9   : > { %3524 = vmatmul.mubr.bf16.gmra.mrb[124].mxu1 %v2568_v22  ;;  %v12038_v60 = vpop.permute.xlu0 %2711 }
 0x2fc   : > { %v12028_v18 = vpop.permute.xlu1 %2686 }
 0x2fd   : > { %v12042_v29 = vpop.permute.xlu0 %2721 }
 0x300   : > { %v12032_v53 = vpop.permute.xlu1 %2696 }
 0x301   : > { %v12046_v63 = vpop.permute.xlu0 %2731 }
 0x304   : > { %v12036_v2 = vpop.permute.xlu1 %2706 }
 0x305   : > { %v12050_v6 = vpop.permute.xlu0 %2741 }
 0x308   : > { %v12040_v44 = vpop.permute.xlu1 %2716 }
 0x309   : > { %v12054_v52 = vpop.permute.xlu0 %2751 }
 0x30c   : > { %v12044_v0 = vpop.permute.xlu1 %2726 }
 0x30d   : > { %v12058_v15 = vpop.permute.xlu0 %2761 }
 0x310   : > { %v12048_v19 = vpop.permute.xlu1 %2736 }
 0x311   : > { %v12062_v49 = vpop.permute.xlu0 %2771 }
 0x314   : > { %v12052_v5 = vpop.permute.xlu1 %2746 }
 0x315   : > { %v2802_v34 = vpop.permute.xlu0 %2801 }
 0x316   : > { %v2987_v11 = vmul.f32 %v2802_v34, %v2603_v58 }
 0x318   : > { %v12056_v7 = vpop.permute.xlu1 %2756 }
 0x31c   : > { %v12060_v37 = vpop.permute.xlu1 %2766 }
 0x320   : > { %v2797_v16 = vpop.permute.xlu1 %2796 }
 0x321   : > { %v2986_v59 = vmul.f32 %v2797_v16, %v2602_v31  ;;  %v2574_v16 = vld [vmem:[#allocation3 + $0x20] sm:$0xff] }
 0x322   : > { %v2958_v34 = vmul.f32 %v12016_v12, %v2574_v16 }
 0x324   : > { %v2807_v23 = vpop.permute.xlu1 %2806 }
 0x342   : > { %v8296_v9 = vpop.f32.mrb[64].mxu0 }
 0x343   : > { %v8297_v39 = vpop.f32.mrb[65].mxu0 }
 0x344   : > { %v8298_v41 = vadd.f32 %v8297_v39, %v8296_v9  ;;  %v8299_v30 = vpop.f32.mrb[66].mxu0  ;;  %v2812_v9 = vpop.permute.xlu0 %2811 }
 0x345   : > { %v8300_v51 = vpop.f32.mrb[67].mxu0 }
 0x346   : > { %v3532_v35 = vadd.f32 %v8298_v41, %v2954_v50  ;;  %v8301_v8 = vadd.f32 %v8300_v51, %v8299_v30  ;;  %v2988_v41 = vmul.f32 %v2807_v23, %v2604_v45 }
 0x348   : > { %3597 = vst.msk [vmem:[#allocation3] sm:$0xff] %vm3596_vm4, %v3532_v35  ;;  %v3533_v47 = vadd.f32 %v8301_v8, %v2955_v61  ;;  %v8408_v48 = vpop.f32.mrb[64].mxu1  ;;  %v2989_v35 = vmul.f32 %v2812_v9, %v2605_v42  ;;  %v2822_v32 = vpop.permute.xlu0 %2821  ;;  %v2577_v42 = vld [vmem:[#allocation3 + $0x38] sm:$0xff] }
 0x349   : > { %v8409_v17 = vpop.f32.mrb[65].mxu1 }
 0x34a   : > { %3598 = vst.msk [vmem:[#allocation3 + $0x8] sm:$0xff] %vm3596_vm4, %v3533_v47  ;;  %v8410_v46 = vadd.f32 %v8409_v17, %v8408_v48  ;;  %v8411_v62 = vpop.f32.mrb[66].mxu1  ;;  %v2575_v48 = vld [vmem:[#allocation3 + $0x28] sm:$0xff] }
 0x34b   : > { %v8412_v38 = vpop.f32.mrb[67].mxu1 }
 0x34c   : > { %v3564_v13 = vadd.f32 %v8410_v46, %v2986_v59  ;;  %v8413_v25 = vadd.f32 %v8412_v38, %v8411_v62  ;;  %v2959_v62 = vmul.f32 %v12018_v3, %v2575_v48 }
 0x34e   : > { %3629 = vst.msk [vmem:[#allocation3 + $0x100] sm:$0xff] %vm3596_vm4, %v3564_v13  ;;  %v3565_v40 = vadd.f32 %v8413_v25, %v2987_v11  ;;  %v2606_v13 = vld [vmem:[#allocation3 + $0x120] sm:$0xff]  ;;  %v2817_v25 = vpop.permute.xlu1 %2816 }
 0x34f   : > { %v8302_v28 = vpop.f32.mrb[68].mxu0 }
 0x350   : > { %3630 = vst.msk [vmem:[#allocation3 + $0x108] sm:$0xff] %vm3596_vm4, %v3565_v40  ;;  %v8303_v20 = vpop.f32.mrb[69].mxu0 }
 0x351   : > { %v8304_v33 = vadd.f32 %v8303_v20, %v8302_v28  ;;  %v8305_v55 = vpop.f32.mrb[70].mxu0  ;;  %v2607_v28 = vld [vmem:[#allocation3 + $0x128] sm:$0xff] }
 0x352   : > { %v8306_v22 = vpop.f32.mrb[71].mxu0 }
 0x353   : > { %v3534_v54 = vadd.f32 %v8304_v33, %v2956_v1  ;;  %v8307_v39 = vadd.f32 %v8306_v22, %v8305_v55  ;;  %v2990_v1 = vmul.f32 %v2817_v25, %v2606_v13  ;;  %v2991_v33 = vmul.f32 %v2822_v32, %v2607_v28  ;;  %v2610_v28 = vld [vmem:[#allocation3 + $0x140] sm:$0xff] }
 0x354   : > { %v8414_v14 = vpop.f32.mrb[68].mxu1 }
 0x355   : > { %v8415_v50 = vpop.f32.mrb[69].mxu1  ;;  %3599 = vst.msk [vmem:[#allocation3 + $0x10] sm:$0xff] %vm3596_vm4, %v3534_v54  ;;  %v3535_v61 = vadd.f32 %v8307_v39, %v2957_v43 }
 0x356   : > { %v8416_v30 = vadd.f32 %v8415_v50, %v8414_v14  ;;  %v8417_v51 = vpop.f32.mrb[70].mxu1  ;;  %v2576_v14 = vld [vmem:[#allocation3 + $0x30] sm:$0xff] }
 0x357   : > { %v8418_v21 = vpop.f32.mrb[71].mxu1  ;;  %3600 = vst.msk [vmem:[#allocation3 + $0x18] sm:$0xff] %vm3596_vm4, %v3535_v61  ;;  %v2960_v54 = vmul.f32 %v12020_v27, %v2576_v14  ;;  %v2961_v61 = vmul.f32 %v12022_v57, %v2577_v42  ;;  %v2578_v27 = vld [vmem:[#allocation3 + $0x40] sm:$0xff]  ;;  %v2580_v42 = vld [vmem:[#allocation3 + $0x50] sm:$0xff] }
 0x358   : > { %v3566_v8 = vadd.f32 %v8416_v30, %v2988_v41  ;;  %v8419_v31 = vadd.f32 %v8418_v21, %v8417_v51  ;;  %v2608_v41 = vld [vmem:[#allocation3 + $0x130] sm:$0xff]  ;;  %v2827_v30 = vpop.permute.xlu1 %2826  ;;  %v2962_v13 = vmul.f32 %v12024_v4, %v2578_v27 }
 0x35a   : > { %3631 = vst.msk [vmem:[#allocation3 + $0x110] sm:$0xff] %vm3596_vm4, %v3566_v8  ;;  %v3567_v56 = vadd.f32 %v8419_v31, %v2989_v35  ;;  %v2609_v31 = vld [vmem:[#allocation3 + $0x138] sm:$0xff] }
 0x35b   : > { %v8308_v47 = vpop.f32.mrb[72].mxu0 }
 0x35c   : > { %3632 = vst.msk [vmem:[#allocation3 + $0x118] sm:$0xff] %vm3596_vm4, %v3567_v56  ;;  %v8309_v58 = vpop.f32.mrb[73].mxu0  ;;  %v2832_v56 = vpop.permute.xlu0 %2831 }
 0x35d   : > { %v8310_v17 = vadd.f32 %v8309_v58, %v8308_v47  ;;  %v8311_v59 = vpop.f32.mrb[74].mxu0  ;;  %v2992_v47 = vmul.f32 %v2827_v30, %v2608_v41  ;;  %v2837_v32 = vpop.permute.xlu1 %2836  ;;  %v2581_v41 = vld [vmem:[#allocation3 + $0x58] sm:$0xff] }
 0x35e   : > { %v8312_v46 = vpop.f32.mrb[75].mxu0 }
 0x35f   : > { %v3536_v38 = vadd.f32 %v8310_v17, %v2958_v34  ;;  %v8313_v11 = vadd.f32 %v8312_v46, %v8311_v59  ;;  %v2993_v59 = vmul.f32 %v2832_v56, %v2609_v31 }
 0x360   : > { %v8420_v36 = vpop.f32.mrb[72].mxu1 }
 0x361   : > { %3601 = vst.msk [vmem:[#allocation3 + $0x20] sm:$0xff] %vm3596_vm4, %v3536_v38  ;;  %v3537_v40 = vadd.f32 %v8313_v11, %v2959_v62  ;;  %v8421_v20 = vpop.f32.mrb[73].mxu1  ;;  %v2579_v38 = vld [vmem:[#allocation3 + $0x48] sm:$0xff]  ;;  %v2847_v31 = vpop.permute.xlu1 %2846 }
 0x362   : > { %v8422_v12 = vadd.f32 %v8421_v20, %v8420_v36  ;;  %v8423_v45 = vpop.f32.mrb[74].mxu1 }
 0x363   : > { %3602 = vst.msk [vmem:[#allocation3 + $0x28] sm:$0xff] %vm3596_vm4, %v3537_v40  ;;  %v8424_v23 = vpop.f32.mrb[75].mxu1 }
 0x364   : > { %v3568_v55 = vadd.f32 %v8422_v12, %v2990_v1  ;;  %v8425_v3 = vadd.f32 %v8424_v23, %v8423_v45  ;;  %v2963_v1 = vmul.f32 %v12026_v26, %v2579_v38 }
 0x366   : > { %3633 = vst.msk [vmem:[#allocation3 + $0x120] sm:$0xff] %vm3596_vm4, %v3568_v55  ;;  %v3569_v22 = vadd.f32 %v8425_v3, %v2991_v33  ;;  %v2611_v33 = vld [vmem:[#allocation3 + $0x148] sm:$0xff]  ;;  %v2842_v55 = vpop.permute.xlu0 %2841 }
 0x368   : > { %3634 = vst.msk [vmem:[#allocation3 + $0x128] sm:$0xff] %vm3596_vm4, %v3569_v22  ;;  %v8314_v43 = vpop.f32.mrb[76].mxu0  ;;  %v2994_v22 = vmul.f32 %v2837_v32, %v2610_v28 }
 0x369   : > { %v8315_v9 = vpop.f32.mrb[77].mxu0 }
 0x36a   : > { %v8316_v39 = vadd.f32 %v8315_v9, %v8314_v43  ;;  %v8317_v50 = vpop.f32.mrb[78].mxu0  ;;  %v2852_v27 = vpop.permute.xlu0 %2851 }
 0x36b   : > { %v8318_v51 = vpop.f32.mrb[79].mxu0 }
 0x36c   : > { %v3538_v21 = vadd.f32 %v8316_v39, %v2960_v54  ;;  %v8319_v35 = vadd.f32 %v8318_v51, %v8317_v50  ;;  %v8426_v8 = vpop.f32.mrb[76].mxu1  ;;  %v2995_v54 = vmul.f32 %v2842_v55, %v2611_v33  ;;  %v2964_v51 = vmul.f32 %v12028_v18, %v2580_v42 }
 0x36d   : > { %v8427_v16 = vpop.f32.mrb[77].mxu1 }
 0x36e   : > { %3603 = vst.msk [vmem:[#allocation3 + $0x30] sm:$0xff] %vm3596_vm4, %v3538_v21  ;;  %v3539_v48 = vadd.f32 %v8319_v35, %v2961_v61  ;;  %v8428_v58 = vadd.f32 %v8427_v16, %v8426_v8  ;;  %v8429_v34 = vpop.f32.mrb[78].mxu1  ;;  %v2612_v8 = vld [vmem:[#allocation3 + $0x150] sm:$0xff]  ;;  %v2965_v16 = vmul.f32 %v12030_v10, %v2581_v41 }
 0x36f   : > { %v8430_v17 = vpop.f32.mrb[79].mxu1 }
 0x370   : > { %3604 = vst.msk [vmem:[#allocation3 + $0x38] sm:$0xff] %vm3596_vm4, %v3539_v48  ;;  %v3570_v46 = vadd.f32 %v8428_v58, %v2992_v47  ;;  %v8431_v62 = vadd.f32 %v8430_v17, %v8429_v34  ;;  %v8320_v57 = vpop.f32.mrb[80].mxu0  ;;  %v2613_v34 = vld [vmem:[#allocation3 + $0x158] sm:$0xff] }
 0x371   : > { %v8321_v11 = vpop.f32.mrb[81].mxu0 }
 0x372   : > { %3635 = vst.msk [vmem:[#allocation3 + $0x130] sm:$0xff] %vm3596_vm4, %v3570_v46  ;;  %v3571_v25 = vadd.f32 %v8431_v62, %v2993_v59  ;;  %v8322_v40 = vadd.f32 %v8321_v11, %v8320_v57  ;;  %v8323_v36 = vpop.f32.mrb[82].mxu0  ;;  %v2996_v59 = vmul.f32 %v2847_v31, %v2612_v8  ;;  %v2582_v57 = vld [vmem:[#allocation3 + $0x60] sm:$0xff]  ;;  %v2997_v11 = vmul.f32 %v2852_v27, %v2613_v34 }
 0x373   : > { %v8324_v20 = vpop.f32.mrb[83].mxu0  ;;  %v2966_v28 = vmul.f32 %v12032_v53, %v2582_v57 }
 0x374   : > { %3636 = vst.msk [vmem:[#allocation3 + $0x138] sm:$0xff] %vm3596_vm4, %v3571_v25  ;;  %v3540_v12 = vadd.f32 %v8322_v40, %v2962_v13  ;;  %v8325_v45 = vadd.f32 %v8324_v20, %v8323_v36  ;;  %v8432_v23 = vpop.f32.mrb[80].mxu1  ;;  %v2583_v40 = vld [vmem:[#allocation3 + $0x68] sm:$0xff] }
 0x375   : > { %v8433_v3 = vpop.f32.mrb[81].mxu1  ;;  %v2967_v33 = vmul.f32 %v12034_v24, %v2583_v40  ;;  %v2587_v40 = vld [vmem:[#allocation3 + $0x88] sm:$0xff] }
 0x376   : > { %3605 = vst.msk [vmem:[#allocation3 + $0x40] sm:$0xff] %vm3596_vm4, %v3540_v12  ;;  %v3541_v4 = vadd.f32 %v8325_v45, %v2963_v1  ;;  %v8434_v14 = vadd.f32 %v8433_v3, %v8432_v23  ;;  %v8435_v43 = vpop.f32.mrb[82].mxu1  ;;  %v2614_v12 = vld [vmem:[#allocation3 + $0x160] sm:$0xff]  ;;  %v2857_v45 = vpop.permute.xlu1 %2856 }
 0x377   : > { %v8436_v9 = vpop.f32.mrb[83].mxu1  ;;  %v2998_v42 = vmul.f32 %v2857_v45, %v2614_v12  ;;  %v2618_v12 = vld [vmem:[#allocation3 + $0x180] sm:$0xff] }
 0x378   : > { %3606 = vst.msk [vmem:[#allocation3 + $0x48] sm:$0xff] %vm3596_vm4, %v3541_v4  ;;  %v3572_v26 = vadd.f32 %v8434_v14, %v2994_v22  ;;  %v8437_v39 = vadd.f32 %v8436_v9, %v8435_v43  ;;  %v8326_v50 = vpop.f32.mrb[84].mxu0  ;;  %v2615_v4 = vld [vmem:[#allocation3 + $0x168] sm:$0xff]  ;;  %v2862_v14 = vpop.permute.xlu0 %2861 }
 0x379   : > { %v8327_v30 = vpop.f32.mrb[85].mxu0 }
 0x37a   : > { %3637 = vst.msk [vmem:[#allocation3 + $0x140] sm:$0xff] %vm3596_vm4, %v3572_v26  ;;  %v3573_v61 = vadd.f32 %v8437_v39, %v2995_v54  ;;  %v8328_v21 = vadd.f32 %v8327_v30, %v8326_v50  ;;  %v8329_v35 = vpop.f32.mrb[86].mxu0  ;;  %v2584_v26 = vld [vmem:[#allocation3 + $0x70] sm:$0xff]  ;;  %v2999_v50 = vmul.f32 %v2862_v14, %v2615_v4  ;;  %v2619_v4 = vld [vmem:[#allocation3 + $0x188] sm:$0xff] }
 0x37b   : > { %v8330_v56 = vpop.f32.mrb[87].mxu0 }
 0x37c   : > { %3638 = vst.msk [vmem:[#allocation3 + $0x148] sm:$0xff] %vm3596_vm4, %v3573_v61  ;;  %v3542_v47 = vadd.f32 %v8328_v21, %v2964_v51  ;;  %v8331_v48 = vadd.f32 %v8330_v56, %v8329_v35  ;;  %v8438_v58 = vpop.f32.mrb[84].mxu1  ;;  %v2585_v51 = vld [vmem:[#allocation3 + $0x78] sm:$0xff]  ;;  %v2968_v21 = vmul.f32 %v12036_v2, %v2584_v26  ;;  %v2616_v56 = vld [vmem:[#allocation3 + $0x170] sm:$0xff] }
 0x37d   : > { %v8439_v17 = vpop.f32.mrb[85].mxu1 }
 0x37e   : > { %3607 = vst.msk [vmem:[#allocation3 + $0x50] sm:$0xff] %vm3596_vm4, %v3542_v47  ;;  %v3543_v18 = vadd.f32 %v8331_v48, %v2965_v16  ;;  %v8440_v46 = vadd.f32 %v8439_v17, %v8438_v58  ;;  %v8441_v62 = vpop.f32.mrb[86].mxu1  ;;  %v2867_v16 = vpop.permute.xlu1 %2866  ;;  %v2969_v48 = vmul.f32 %v12038_v60, %v2585_v51  ;;  %v2617_v17 = vld [vmem:[#allocation3 + $0x178] sm:$0xff] }
 0x37f   : > { %v8442_v38 = vpop.f32.mrb[87].mxu1 }
 0x380   : > { %3608 = vst.msk [vmem:[#allocation3 + $0x58] sm:$0xff] %vm3596_vm4, %v3543_v18  ;;  %v3574_v10 = vadd.f32 %v8440_v46, %v2996_v59  ;;  %v8443_v13 = vadd.f32 %v8442_v38, %v8441_v62  ;;  %v8332_v25 = vpop.f32.mrb[88].mxu0  ;;  %v2872_v59 = vpop.permute.xlu0 %2871  ;;  %v3000_v46 = vmul.f32 %v2867_v16, %v2616_v56  ;;  %v2586_v38 = vld [vmem:[#allocation3 + $0x80] sm:$0xff] }
 0x381   : > { %v8333_v36 = vpop.f32.mrb[89].mxu0 }
 0x382   : > { %3639 = vst.msk [vmem:[#allocation3 + $0x150] sm:$0xff] %vm3596_vm4, %v3574_v10  ;;  %v3575_v32 = vadd.f32 %v8443_v13, %v2997_v11  ;;  %v8334_v20 = vadd.f32 %v8333_v36, %v8332_v25  ;;  %v8335_v1 = vpop.f32.mrb[90].mxu0  ;;  %v3001_v10 = vmul.f32 %v2872_v59, %v2617_v17  ;;  %v2877_v45 = vpop.permute.xlu1 %2876 }
 0x383   : > { %v8336_v23 = vpop.f32.mrb[91].mxu0 }
 0x384   : > { %3640 = vst.msk [vmem:[#allocation3 + $0x158] sm:$0xff] %vm3596_vm4, %v3575_v32  ;;  %v3544_v55 = vadd.f32 %v8334_v20, %v2966_v28  ;;  %v8337_v3 = vadd.f32 %v8336_v23, %v8335_v1  ;;  %v8444_v22 = vpop.f32.mrb[88].mxu1  ;;  %v2970_v28 = vmul.f32 %v12040_v44, %v2586_v38  ;;  %v2882_v14 = vpop.permute.xlu0 %2881 }
 0x385   : > { %v8445_v43 = vpop.f32.mrb[89].mxu1 }
 0x386   : > { %3609 = vst.msk [vmem:[#allocation3 + $0x60] sm:$0xff] %vm3596_vm4, %v3544_v55  ;;  %v3545_v53 = vadd.f32 %v8337_v3, %v2967_v33  ;;  %v8446_v9 = vadd.f32 %v8445_v43, %v8444_v22  ;;  %v8447_v54 = vpop.f32.mrb[90].mxu1  ;;  %v2971_v33 = vmul.f32 %v12042_v29, %v2587_v40 }
 0x387   : > { %v8448_v39 = vpop.f32.mrb[91].mxu1 }
 0x388   : > { %3610 = vst.msk [vmem:[#allocation3 + $0x68] sm:$0xff] %vm3596_vm4, %v3545_v53  ;;  %v3576_v24 = vadd.f32 %v8446_v9, %v2998_v42  ;;  %v8449_v41 = vadd.f32 %v8448_v39, %v8447_v54  ;;  %v8338_v30 = vpop.f32.mrb[92].mxu0  ;;  %v3002_v42 = vmul.f32 %v2877_v45, %v2618_v12  ;;  %v2588_v54 = vld [vmem:[#allocation3 + $0x90] sm:$0xff]  ;;  %v3003_v39 = vmul.f32 %v2882_v14, %v2619_v4 }
 0x389   : > { %v8339_v61 = vpop.f32.mrb[93].mxu0  ;;  %v2972_v51 = vmul.f32 %v12044_v0, %v2588_v54 }
 0x38a   : > { %3641 = vst.msk [vmem:[#allocation3 + $0x160] sm:$0xff] %vm3596_vm4, %v3576_v24  ;;  %v3577_v35 = vadd.f32 %v8449_v41, %v2999_v50  ;;  %v8340_v8 = vadd.f32 %v8339_v61, %v8338_v30  ;;  %v8341_v31 = vpop.f32.mrb[94].mxu0  ;;  %v2589_v41 = vld [vmem:[#allocation3 + $0x98] sm:$0xff] }
 0x38b   : > { %v8342_v47 = vpop.f32.mrb[95].mxu0  ;;  %v2973_v16 = vmul.f32 %v12046_v63, %v2589_v41 }
 0x38c   : > { %3642 = vst.msk [vmem:[#allocation3 + $0x168] sm:$0xff] %vm3596_vm4, %v3577_v35  ;;  %v3546_v58 = vadd.f32 %v8340_v8, %v2968_v21  ;;  %v8343_v34 = vadd.f32 %v8342_v47, %v8341_v31  ;;  %v8450_v27 = vpop.f32.mrb[92].mxu1  ;;  %v2620_v8 = vld [vmem:[#allocation3 + $0x190] sm:$0xff]  ;;  %v2887_v31 = vpop.permute.xlu1 %2886 }
 0x38d   : > { %v8451_v18 = vpop.f32.mrb[93].mxu1  ;;  %v3004_v59 = vmul.f32 %v2887_v31, %v2620_v8 }
 0x38e   : > { %3611 = vst.msk [vmem:[#allocation3 + $0x70] sm:$0xff] %vm3596_vm4, %v3546_v58  ;;  %v3547_v2 = vadd.f32 %v8343_v34, %v2969_v48  ;;  %v8452_v62 = vadd.f32 %v8451_v18, %v8450_v27  ;;  %v8453_v57 = vpop.f32.mrb[94].mxu1  ;;  %v2621_v34 = vld [vmem:[#allocation3 + $0x198] sm:$0xff]  ;;  %v2892_v27 = vpop.permute.xlu0 %2891 }
 0x38f   : > { %v8454_v11 = vpop.f32.mrb[95].mxu1 }
 0x390   : > { %3612 = vst.msk [vmem:[#allocation3 + $0x78] sm:$0xff] %vm3596_vm4, %v3547_v2  ;;  %v3578_v60 = vadd.f32 %v8452_v62, %v3000_v46  ;;  %v8455_v13 = vadd.f32 %v8454_v11, %v8453_v57  ;;  %v8344_v25 = vpop.f32.mrb[96].mxu0  ;;  %v2590_v2 = vld [vmem:[#allocation3 + $0xa0] sm:$0xff]  ;;  %v3005_v57 = vmul.f32 %v2892_v27, %v2621_v34 }
 0x391   : > { %v8345_v36 = vpop.f32.mrb[97].mxu0  ;;  %v2594_v27 = vld [vmem:[#allocation3 + $0xc0] sm:$0xff] }
 0x392   : > { %3643 = vst.msk [vmem:[#allocation3 + $0x170] sm:$0xff] %vm3596_vm4, %v3578_v60  ;;  %v3579_v32 = vadd.f32 %v8455_v13, %v3001_v10  ;;  %v8346_v20 = vadd.f32 %v8345_v36, %v8344_v25  ;;  %v8347_v1 = vpop.f32.mrb[98].mxu0  ;;  %v2591_v10 = vld [vmem:[#allocation3 + $0xa8] sm:$0xff]  ;;  %v2897_v60 = vpop.permute.xlu1 %2896  ;;  %v2974_v25 = vmul.f32 %v12048_v19, %v2590_v2 }
 0x393   : > { %v8348_v23 = vpop.f32.mrb[99].mxu0  ;;  %v2975_v12 = vmul.f32 %v12050_v6, %v2591_v10  ;;  %v2595_v2 = vld [vmem:[#allocation3 + $0xc8] sm:$0xff]  ;;  %v2626_v10 = vld [vmem:[#allocation3 + $0x1c0] sm:$0xff] }
 0x394   : > { %3644 = vst.msk [vmem:[#allocation3 + $0x178] sm:$0xff] %vm3596_vm4, %v3579_v32  ;;  %v3548_v55 = vadd.f32 %v8346_v20, %v2970_v28  ;;  %v8349_v3 = vadd.f32 %v8348_v23, %v8347_v1  ;;  %v8456_v22 = vpop.f32.mrb[96].mxu1  ;;  %v2902_v32 = vpop.permute.xlu0 %2901  ;;  %v2622_v20 = vld [vmem:[#allocation3 + $0x1a0] sm:$0xff] }
 0x395   : > { %v8457_v43 = vpop.f32.mrb[97].mxu1 }
 0x396   : > { %3613 = vst.msk [vmem:[#allocation3 + $0x80] sm:$0xff] %vm3596_vm4, %v3548_v55  ;;  %v3549_v44 = vadd.f32 %v8349_v3, %v2971_v33  ;;  %v8458_v53 = vadd.f32 %v8457_v43, %v8456_v22  ;;  %v8459_v9 = vpop.f32.mrb[98].mxu1  ;;  %v2623_v55 = vld [vmem:[#allocation3 + $0x1a8] sm:$0xff]  ;;  %v3006_v22 = vmul.f32 %v2897_v60, %v2622_v20  ;;  %v2592_v43 = vld [vmem:[#allocation3 + $0xb0] sm:$0xff] }
 0x397   : > { %v8460_v26 = vpop.f32.mrb[99].mxu1 }
 0x398   : > { %3614 = vst.msk [vmem:[#allocation3 + $0x88] sm:$0xff] %vm3596_vm4, %v3549_v44  ;;  %v3580_v29 = vadd.f32 %v8458_v53, %v3002_v42  ;;  %v8461_v50 = vadd.f32 %v8460_v26, %v8459_v9  ;;  %v8350_v24 = vpop.f32.mrb[100].mxu0  ;;  %v2907_v42 = vpop.permute.xlu1 %2906  ;;  %v3007_v53 = vmul.f32 %v2902_v32, %v2623_v55  ;;  %v2593_v26 = vld [vmem:[#allocation3 + $0xb8] sm:$0xff]  ;;  %v2627_v32 = vld [vmem:[#allocation3 + $0x1c8] sm:$0xff] }
 0x399   : > { %v8351_v30 = vpop.f32.mrb[101].mxu0 }
 0x39a   : > { %3645 = vst.msk [vmem:[#allocation3 + $0x180] sm:$0xff] %vm3596_vm4, %v3580_v29  ;;  %v3581_v61 = vadd.f32 %v8461_v50, %v3003_v39  ;;  %v8352_v21 = vadd.f32 %v8351_v30, %v8350_v24  ;;  %v8353_v35 = vpop.f32.mrb[102].mxu0  ;;  %v2912_v39 = vpop.permute.xlu0 %2911  ;;  %v2976_v50 = vmul.f32 %v12052_v5, %v2592_v43 }
 0x39b   : > { %v8354_v56 = vpop.f32.mrb[103].mxu0 }
 0x39c   : > { %3646 = vst.msk [vmem:[#allocation3 + $0x188] sm:$0xff] %vm3596_vm4, %v3581_v61  ;;  %v3550_v47 = vadd.f32 %v8352_v21, %v2972_v51  ;;  %v8355_v48 = vadd.f32 %v8354_v56, %v8353_v35  ;;  %v8462_v58 = vpop.f32.mrb[100].mxu1  ;;  %v2624_v51 = vld [vmem:[#allocation3 + $0x1b0] sm:$0xff]  ;;  %v2977_v21 = vmul.f32 %v12054_v52, %v2593_v26  ;;  %v2625_v56 = vld [vmem:[#allocation3 + $0x1b8] sm:$0xff] }
 0x39d   : > { %v8463_v17 = vpop.f32.mrb[101].mxu1 }
 0x39e   : > { %3615 = vst.msk [vmem:[#allocation3 + $0x90] sm:$0xff] %vm3596_vm4, %v3550_v47  ;;  %v3551_v0 = vadd.f32 %v8355_v48, %v2973_v16  ;;  %v8464_v18 = vadd.f32 %v8463_v17, %v8462_v58  ;;  %v8465_v46 = vpop.f32.mrb[102].mxu1  ;;  %v2917_v16 = vpop.permute.xlu1 %2916  ;;  %v3008_v48 = vmul.f32 %v2907_v42, %v2624_v51 }
 0x39f   : > { %v8466_v62 = vpop.f32.mrb[103].mxu1  ;;  %v2922_v17 = vpop.permute.xlu0 %2921 }
 0x3a0   : > { %3616 = vst.msk [vmem:[#allocation3 + $0x98] sm:$0xff] %vm3596_vm4, %v3551_v0  ;;  %v3582_v63 = vadd.f32 %v8464_v18, %v3004_v59  ;;  %v8467_v38 = vadd.f32 %v8466_v62, %v8465_v46  ;;  %v8356_v11 = vpop.f32.mrb[104].mxu0  ;;  %v3009_v0 = vmul.f32 %v2912_v39, %v2625_v56 }
 0x3a1   : > { %v8357_v13 = vpop.f32.mrb[105].mxu0 }
 0x3a2   : > { %3647 = vst.msk [vmem:[#allocation3 + $0x190] sm:$0xff] %vm3596_vm4, %v3582_v63  ;;  %v3583_v40 = vadd.f32 %v8467_v38, %v3005_v57  ;;  %v8358_v36 = vadd.f32 %v8357_v13, %v8356_v11  ;;  %v8359_v28 = vpop.f32.mrb[106].mxu0  ;;  %v2978_v57 = vmul.f32 %v12056_v7, %v2594_v27  ;;  %v2927_v60 = vpop.permute.xlu1 %2926 }
 0x3a3   : > { %v8360_v1 = vpop.f32.mrb[107].mxu0  ;;  %v2932_v20 = vpop.permute.xlu0 %2931 }
 0x3a4   : > { %3648 = vst.msk [vmem:[#allocation3 + $0x198] sm:$0xff] %vm3596_vm4, %v3583_v40  ;;  %v3552_v45 = vadd.f32 %v8358_v36, %v2974_v25  ;;  %v8361_v23 = vadd.f32 %v8360_v1, %v8359_v28  ;;  %v8468_v33 = vpop.f32.mrb[104].mxu1  ;;  %v2979_v25 = vmul.f32 %v12058_v15, %v2595_v2 }
 0x3a5   : > { %v8469_v3 = vpop.f32.mrb[105].mxu1 }
 0x3a6   : > { %3617 = vst.msk [vmem:[#allocation3 + $0xa0] sm:$0xff] %vm3596_vm4, %v3552_v45  ;;  %v3553_v19 = vadd.f32 %v8361_v23, %v2975_v12  ;;  %v8470_v4 = vadd.f32 %v8469_v3, %v8468_v33  ;;  %v8471_v14 = vpop.f32.mrb[106].mxu1  ;;  %v3010_v12 = vmul.f32 %v2917_v16, %v2626_v10  ;;  %v2596_v33 = vld [vmem:[#allocation3 + $0xd0] sm:$0xff]  ;;  %v3011_v3 = vmul.f32 %v2922_v17, %v2627_v32 }
 0x3a7   : > { %v8472_v44 = vpop.f32.mrb[107].mxu1  ;;  %v2980_v42 = vmul.f32 %v12060_v37, %v2596_v33 }
 0x3a8   : > { %3618 = vst.msk [vmem:[#allocation3 + $0xa8] sm:$0xff] %vm3596_vm4, %v3553_v19  ;;  %v3584_v6 = vadd.f32 %v8470_v4, %v3006_v22  ;;  %v8473_v9 = vadd.f32 %v8472_v44, %v8471_v14  ;;  %v8362_v54 = vpop.f32.mrb[108].mxu0  ;;  %v2597_v4 = vld [vmem:[#allocation3 + $0xd8] sm:$0xff]  ;;  %v2777_v14 = vpop.permute.xlu1 %2776 }
 0x3a9   : > { %v8363_v29 = vpop.f32.mrb[109].mxu0  ;;  %v2981_v39 = vmul.f32 %v12062_v49, %v2597_v4 }
 0x3aa   : > { %3649 = vst.msk [vmem:[#allocation3 + $0x1a0] sm:$0xff] %vm3596_vm4, %v3584_v6  ;;  %v3585_v24 = vadd.f32 %v8473_v9, %v3007_v53  ;;  %v8364_v41 = vadd.f32 %v8363_v29, %v8362_v54  ;;  %v8365_v30 = vpop.f32.mrb[110].mxu0  ;;  %v2782_v9 = vpop.permute.xlu0 %2781  ;;  %v2628_v54 = vld [vmem:[#allocation3 + $0x1d0] sm:$0xff] }
 0x3ab   : > { %v8366_v61 = vpop.f32.mrb[111].mxu0  ;;  %v3012_v51 = vmul.f32 %v2927_v60, %v2628_v54 }
 0x3ac   : > { %3650 = vst.msk [vmem:[#allocation3 + $0x1a8] sm:$0xff] %vm3596_vm4, %v3585_v24  ;;  %v3554_v35 = vadd.f32 %v8364_v41, %v2976_v50  ;;  %v8367_v8 = vadd.f32 %v8366_v61, %v8365_v30  ;;  %v8474_v31 = vpop.f32.mrb[108].mxu1  ;;  %v2629_v41 = vld [vmem:[#allocation3 + $0x1d8] sm:$0xff] }
 0x3ad   : > { %v8475_v47 = vpop.f32.mrb[109].mxu1  ;;  %v3013_v56 = vmul.f32 %v2932_v20, %v2629_v41 }
 0x3ae   : > { %3619 = vst.msk [vmem:[#allocation3 + $0xb0] sm:$0xff] %vm3596_vm4, %v3554_v35  ;;  %v3555_v5 = vadd.f32 %v8367_v8, %v2977_v21  ;;  %v8476_v58 = vadd.f32 %v8475_v47, %v8474_v31  ;;  %v8477_v34 = vpop.f32.mrb[110].mxu1  ;;  %v2598_v35 = vld [vmem:[#allocation3 + $0xe0] sm:$0xff]  ;;  %v2937_v8 = vpop.permute.xlu1 %2936 }
 0x3af   : > { %v8478_v59 = vpop.f32.mrb[111].mxu1 }
 0x3b0   : > { %3620 = vst.msk [vmem:[#allocation3 + $0xb8] sm:$0xff] %vm3596_vm4, %v3555_v5  ;;  %v3586_v52 = vadd.f32 %v8476_v58, %v3008_v48  ;;  %v8479_v18 = vadd.f32 %v8478_v59, %v8477_v34  ;;  %v8368_v46 = vpop.f32.mrb[112].mxu0  ;;  %v2599_v48 = vld [vmem:[#allocation3 + $0xe8] sm:$0xff]  ;;  %v2942_v5 = vpop.permute.xlu0 %2941  ;;  %v2982_v34 = vmul.f32 %v2777_v14, %v2598_v35 }
 0x3b1   : > { %v8369_v62 = vpop.f32.mrb[113].mxu0 }
 0x3b2   : > { %3651 = vst.msk [vmem:[#allocation3 + $0x1b0] sm:$0xff] %vm3596_vm4, %v3586_v52  ;;  %v3587_v63 = vadd.f32 %v8479_v18, %v3009_v0  ;;  %v8370_v38 = vadd.f32 %v8369_v62, %v8368_v46  ;;  %v8371_v11 = vpop.f32.mrb[114].mxu0  ;;  %v2630_v0 = vld [vmem:[#allocation3 + $0x1e0] sm:$0xff]  ;;  %v2983_v18 = vmul.f32 %v2782_v9, %v2599_v48 }
 0x3b3   : > { %v8372_v13 = vpop.f32.mrb[115].mxu0 }
 0x3b4   : > { %3652 = vst.msk [vmem:[#allocation3 + $0x1b8] sm:$0xff] %vm3596_vm4, %v3587_v63  ;;  %v3556_v40 = vadd.f32 %v8370_v38, %v2978_v57  ;;  %v8373_v36 = vadd.f32 %v8372_v13, %v8371_v11  ;;  %v8480_v28 = vpop.f32.mrb[112].mxu1  ;;  %v2631_v57 = vld [vmem:[#allocation3 + $0x1e8] sm:$0xff]  ;;  %v2787_v63 = vpop.permute.xlu1 %2786  ;;  %v3014_v11 = vmul.f32 %v2937_v8, %v2630_v0 }
 0x3b5   : > { %v8481_v1 = vpop.f32.mrb[113].mxu1 }
 0x3b6   : > { %3621 = vst.msk [vmem:[#allocation3 + $0xc0] sm:$0xff] %vm3596_vm4, %v3556_v40  ;;  %v3557_v7 = vadd.f32 %v8373_v36, %v2979_v25  ;;  %v8482_v45 = vadd.f32 %v8481_v1, %v8480_v28  ;;  %v8483_v23 = vpop.f32.mrb[114].mxu1  ;;  %v2792_v25 = vpop.permute.xlu0 %2791  ;;  %v2600_v40 = vld [vmem:[#allocation3 + $0xf0] sm:$0xff]  ;;  %v3015_v28 = vmul.f32 %v2942_v5, %v2631_v57 }
 0x3b7   : > { %v8484_v55 = vpop.f32.mrb[115].mxu1 }
 0x3b8   : > { %3622 = vst.msk [vmem:[#allocation3 + $0xc8] sm:$0xff] %vm3596_vm4, %v3557_v7  ;;  %v3588_v15 = vadd.f32 %v8482_v45, %v3010_v12  ;;  %v8485_v22 = vadd.f32 %v8484_v55, %v8483_v23  ;;  %v8374_v19 = vpop.f32.mrb[116].mxu0  ;;  %v2601_v12 = vld [vmem:[#allocation3 + $0xf8] sm:$0xff]  ;;  %v2984_v45 = vmul.f32 %v2787_v63, %v2600_v40 }
 0x3b9   : > { %v8375_v43 = vpop.f32.mrb[117].mxu0 }
 0x3ba   : > { %3653 = vst.msk [vmem:[#allocation3 + $0x1c0] sm:$0xff] %vm3596_vm4, %v3588_v15  ;;  %v3589_v44 = vadd.f32 %v8485_v22, %v3011_v3  ;;  %v8376_v53 = vadd.f32 %v8375_v43, %v8374_v19  ;;  %v8377_v6 = vpop.f32.mrb[118].mxu0  ;;  %v2632_v3 = vld [vmem:[#allocation3 + $0x1f0] sm:$0xff]  ;;  %v2947_v15 = vpop.permute.xlu1 %2946  ;;  %v2985_v19 = vmul.f32 %v2792_v25, %v2601_v12 }
 0x3bb   : > { %v8378_v26 = vpop.f32.mrb[119].mxu0 }
 0x3bc   : > { %3654 = vst.msk [vmem:[#allocation3 + $0x1c8] sm:$0xff] %vm3596_vm4, %v3589_v44  ;;  %v3558_v29 = vadd.f32 %v8376_v53, %v2980_v42  ;;  %v8379_v50 = vadd.f32 %v8378_v26, %v8377_v6  ;;  %v8486_v24 = vpop.f32.mrb[116].mxu1  ;;  %v2633_v42 = vld [vmem:[#allocation3 + $0x1f8] sm:$0xff]  ;;  %v2952_v44 = vpop.permute.xlu0 %2951  ;;  %v3016_v6 = vmul.f32 %v2947_v15, %v2632_v3 }
 0x3bd   : > { %v8487_v30 = vpop.f32.mrb[117].mxu1 }
 0x3be   : > { %3623 = vst.msk [vmem:[#allocation3 + $0xd0] sm:$0xff] %vm3596_vm4, %v3558_v29  ;;  %v3559_v37 = vadd.f32 %v8379_v50, %v2981_v39  ;;  %v8488_v61 = vadd.f32 %v8487_v30, %v8486_v24  ;;  %v8489_v21 = vpop.f32.mrb[118].mxu1  ;;  %v3017_v29 = vmul.f32 %v2952_v44, %v2633_v42 }
 0x3bf   : > { %v8490_v31 = vpop.f32.mrb[119].mxu1 }
 0x3c0   : > { %3624 = vst.msk [vmem:[#allocation3 + $0xd8] sm:$0xff] %vm3596_vm4, %v3559_v37  ;;  %v3590_v49 = vadd.f32 %v8488_v61, %v3012_v51  ;;  %v8491_v16 = vadd.f32 %v8490_v31, %v8489_v21  ;;  %v8380_v47 = vpop.f32.mrb[120].mxu0 }
 0x3c1   : > { %v8381_v58 = vpop.f32.mrb[121].mxu0 }
 0x3c2   : > { %3655 = vst.msk [vmem:[#allocation3 + $0x1d0] sm:$0xff] %vm3596_vm4, %v3590_v49  ;;  %v3591_v27 = vadd.f32 %v8491_v16, %v3013_v56  ;;  %v8382_v17 = vadd.f32 %v8381_v58, %v8380_v47  ;;  %v8383_v59 = vpop.f32.mrb[122].mxu0 }
 0x3c3   : > { %v8384_v52 = vpop.f32.mrb[123].mxu0 }
 0x3c4   : > { %3656 = vst.msk [vmem:[#allocation3 + $0x1d8] sm:$0xff] %vm3596_vm4, %v3591_v27  ;;  %v3560_v46 = vadd.f32 %v8382_v17, %v2982_v34  ;;  %v8385_v2 = vadd.f32 %v8384_v52, %v8383_v59  ;;  %v8492_v62 = vpop.f32.mrb[120].mxu1 }
 0x3c5   : > { %v8493_v38 = vpop.f32.mrb[121].mxu1 }
 0x3c6   : > { %3625 = vst.msk [vmem:[#allocation3 + $0xe0] sm:$0xff] %vm3596_vm4, %v3560_v46  ;;  %v3561_v10 = vadd.f32 %v8385_v2, %v2983_v18  ;;  %v8494_v60 = vadd.f32 %v8493_v38, %v8492_v62  ;;  %v8495_v13 = vpop.f32.mrb[122].mxu1 }
 0x3c7   : > { %v8496_v36 = vpop.f32.mrb[123].mxu1 }
 0x3c8   : > { %3626 = vst.msk [vmem:[#allocation3 + $0xe8] sm:$0xff] %vm3596_vm4, %v3561_v10  ;;  %v3592_v32 = vadd.f32 %v8494_v60, %v3014_v11  ;;  %v8497_v20 = vadd.f32 %v8496_v36, %v8495_v13  ;;  %v8386_v1 = vpop.f32.mrb[124].mxu0 }
 0x3c9   : > { %v8387_v7 = vpop.f32.mrb[125].mxu0 }
 0x3ca   : > { %3657 = vst.msk [vmem:[#allocation3 + $0x1e0] sm:$0xff] %vm3596_vm4, %v3592_v32  ;;  %v3593_v23 = vadd.f32 %v8497_v20, %v3015_v28  ;;  %v8388_v33 = vadd.f32 %v8387_v7, %v8386_v1  ;;  %v8389_v55 = vpop.f32.mrb[126].mxu0 }
 0x3cb   : > { %v8390_v22 = vpop.f32.mrb[127].mxu0 }
 0x3cc   : > { %3658 = vst.msk [vmem:[#allocation3 + $0x1e8] sm:$0xff] %vm3596_vm4, %v3593_v23  ;;  %v3562_v4 = vadd.f32 %v8388_v33, %v2984_v45  ;;  %v8391_v14 = vadd.f32 %v8390_v22, %v8389_v55  ;;  %v8498_v43 = vpop.f32.mrb[124].mxu1 }
 0x3cd   : > { %v8499_v53 = vpop.f32.mrb[125].mxu1 }
 0x3ce   : > { %3627 = vst.msk [vmem:[#allocation3 + $0xf0] sm:$0xff] %vm3596_vm4, %v3562_v4  ;;  %v3563_v9 = vadd.f32 %v8391_v14, %v2985_v19  ;;  %v8500_v54 = vadd.f32 %v8499_v53, %v8498_v43  ;;  %v8501_v26 = vpop.f32.mrb[126].mxu1 }
 0x3cf   : > { %v8502_v39 = vpop.f32.mrb[127].mxu1 }
 0x3d0   : > { %3628 = vst.msk [vmem:[#allocation3 + $0xf8] sm:$0xff] %vm3596_vm4, %v3563_v9  ;;  %v3594_v50 = vadd.f32 %v8500_v54, %v3016_v6  ;;  %v8503_v24 = vadd.f32 %v8502_v39, %v8501_v26 }
 0x3d2   : > { %3659 = vst.msk [vmem:[#allocation3 + $0x1f0] sm:$0xff] %vm3596_vm4, %v3594_v50  ;;  %v3595_v41 = vadd.f32 %v8503_v24, %v3017_v29 }
 0x3d4   : > { %3660 = vst.msk [vmem:[#allocation3 + $0x1f8] sm:$0xff] %vm3596_vm4, %v3595_v41 }
 0x3d5 PF: > { %p8173_p10 = scmp.ne.s32.totalorder %s9920_s26, %s9918_s1 }
 0x3d7   : > { %3729 = sbr.rel (%p8173_p10) target bundleno = 2022 (0x7e6), region = 44 }
 0x3de   : > { %v9223_v30 = vld [vmem:[%s9933_s16 + $0x4] ss:$8 sps:$4 sm:$0xff]   ;;  %v9225_v51 = vld [vmem:[%s9933_s16] ss:$8 sps:$4 sm:$0xff]   ;;  %v9862_v37 = vmov 0   ;;  %vm3966_vm5 = vcmask 261120   ;;  %v4549_v45 = vlaneseq }
 0x3df   : > { %4047 = vmatprep.mubr.bf16.mxu0 %v9862_v37  ;;  %4388 = vmatprep.mubr.bf16.mxu1 %v9862_v37  ;;  %v9226_v61 = vld [vmem:[%s9933_s16 + $0x24] ss:$8 sps:$4 sm:$0xff]   ;;  %v9228_v21 = vld [vmem:[%s9933_s16 + $0x20] ss:$8 sps:$4 sm:$0xff]   ;;  %v9229_v35 = vld [vmem:[%s9933_s16 + $0x14] ss:$8 sps:$4 sm:$0xff]  }
 0x3e0   : > { %4015 = vmatprep.subr.bf16.mxu0 %v9223_v30  ;;  %9219 = vset.pattern.permute.xlu0 %v9862_v37  ;;  %v9231_v8 = vld [vmem:[%s9933_s16 + $0x10] ss:$8 sps:$4 sm:$0xff]   ;;  %v9232_v31 = vld [vmem:[%s9933_s16 + $0x34] ss:$8 sps:$4 sm:$0xff]   ;;  %v9235_v49 = vld [vmem:[%s9928_s12] sm:$0xff]   ;;  %v12261_v23 = vshrl.u32 %v4549_v45, 7 }
 0x3e1   : > { %4016 = vmatpush1.bf16.msra.mxu0 %v9225_v51  ;;  %9220 = vset.pattern.permute.xlu1 %v9862_v37  ;;  %v9234_v56 = vld [vmem:[%s9933_s16 + $0x30] ss:$8 sps:$4 sm:$0xff]   ;;  %v9236_v16 = vld [vmem:[%s9928_s12 + $0x80] sm:$0xff]   ;;  %v9237_v47 = vld [vmem:[%s9928_s12 + $0x8] sm:$0xff]   ;;  %v12263_v33 = vand.u32 127, %v4549_v45 }
 0x3e2   : > { %4356 = vmatprep.subr.bf16.mxu1 %v9226_v61  ;;  %4017 = vmatprep.subr.bf16.mxu0 %v9229_v35  ;;  %v9238_v48 = vld [vmem:[%s9928_s12 + $0x88] sm:$0xff]   ;;  %v9239_v5 = vld [vmem:[%s9928_s12 + $0x10] sm:$0xff]   ;;  %v9241_v34 = vld [vmem:[%s9928_s12 + $0x18] sm:$0xff]   ;;  %v4551_v3 = vadd.s32 8, %v12261_v23  ;;  %v4552_v43 = vadd.s32 16, %v12261_v23  ;;  %v4553_v54 = vadd.s32 24, %v12261_v23 }
 0x3e3   : > { %4357 = vmatpush1.bf16.msra.mxu1 %v9228_v21  ;;  %v9240_v58 = vld [vmem:[%s9928_s12 + $0x90] sm:$0xff]   ;;  %v9242_v27 = vld [vmem:[%s9928_s12 + $0x98] sm:$0xff]   ;;  %v9243_v17 = vld [vmem:[%s9928_s12 + $0x20] sm:$0xff]   ;;  %vm4585_vm6 = vcmp.le.s32.totalorder %v12263_v33, %v12261_v23  ;;  %v4554_v51 = vadd.s32 32, %v12261_v23  ;;  %v4558_v45 = vadd.s32 64, %v12261_v23 }
 0x3e4   : > { %4358 = vmatprep.subr.bf16.mxu1 %v9232_v31  ;;  %v9244_v59 = vld [vmem:[%s9928_s12 + $0xa0] sm:$0xff]   ;;  %v9245_v0 = vld [vmem:[%s9928_s12 + $0x28] sm:$0xff]   ;;  %v9247_v18 = vld [vmem:[%s9928_s12 + $0x30] sm:$0xff]   ;;  %vm4587_vm7 = vcmp.le.s32.totalorder %v12263_v33, %v4551_v3  ;;  %vm4589_vm8 = vcmp.le.s32.totalorder %v12263_v33, %v4552_v43  ;;  %vm4591_vm9 = vcmp.le.s32.totalorder %v12263_v33, %v4553_v54 }
 0x3e5   : > { %4018 = vmatpush1.bf16.msra.mxu0 %v9231_v8  ;;  %v9246_v52 = vld [vmem:[%s9928_s12 + $0xa8] sm:$0xff]   ;;  %v9248_v46 = vld [vmem:[%s9928_s12 + $0xb0] sm:$0xff]   ;;  %v9249_v2 = vld [vmem:[%s9928_s12 + $0x38] sm:$0xff]   ;;  %vm4593_vm10 = vcmp.le.s32.totalorder %v12263_v33, %v4554_v51  ;;  %vm4601_vm14 = vcmp.le.s32.totalorder %v12263_v33, %v4558_v45 }
 0x3e6   : > { %v9250_v62 = vld [vmem:[%s9928_s12 + $0xb8] sm:$0xff]   ;;  %v9251_v57 = vld [vmem:[%s9928_s12 + $0x40] sm:$0xff]   ;;  %v9253_v38 = vld [vmem:[%s9928_s12 + $0x48] sm:$0xff]  }
 0x3e7   : > { %4359 = vmatpush1.bf16.msra.mxu1 %v9234_v56  ;;  %v9252_v63 = vld [vmem:[%s9928_s12 + $0xc0] sm:$0xff]   ;;  %v9254_v11 = vld [vmem:[%s9928_s12 + $0xc8] sm:$0xff]   ;;  %v9255_v10 = vld [vmem:[%s9928_s12 + $0x50] sm:$0xff]  }
 0x3e8   : > { %8194 = vmatmul.mubr.msk.bf16.vlgmr.msra.gmra.mrb[0].mxu0 %vm3966_vm5, %v9235_v49  ;;  %v9256_v60 = vld [vmem:[%s9928_s12 + $0xd0] sm:$0xff]   ;;  %v9257_v13 = vld [vmem:[%s9928_s12 + $0x58] sm:$0xff]   ;;  %v9259_v40 = vld [vmem:[%s9928_s12 + $0x60] sm:$0xff]  }
 0x3e9   : > { %4057 = vmatprep.mubr.bf16.mxu0 %v9862_v37  ;;  %v9258_v25 = vld [vmem:[%s9928_s12 + $0xd8] sm:$0xff]   ;;  %v9260_v36 = vld [vmem:[%s9928_s12 + $0xe0] sm:$0xff]   ;;  %v9261_v28 = vld [vmem:[%s9928_s12 + $0x68] sm:$0xff]  }
 0x3ea   : > { %8230 = vmatmul.mubr.msk.bf16.vlgmr.msra.gmra.mrb[0].mxu1 %vm3966_vm5, %v9236_v16  ;;  %v9262_v32 = vld [vmem:[%s9928_s12 + $0xe8] sm:$0xff]   ;;  %v9263_v20 = vld [vmem:[%s9928_s12 + $0x70] sm:$0xff]   ;;  %v9265_v12 = vld [vmem:[%s9928_s12 + $0x78] sm:$0xff]  }
 0x3eb   : > { %4398 = vmatprep.mubr.bf16.mxu1 %v9862_v37  ;;  %v9264_v1 = vld [vmem:[%s9928_s12 + $0xf0] sm:$0xff]   ;;  %v9266_v7 = vld [vmem:[%s9928_s12 + $0xf8] sm:$0xff]  }
 0x3f0   : > { %8195 = vmatmul.mubr.msk.bf16.gmra.mrb[4].mxu0 %vm3966_vm5, %v9237_v47 }
 0x3f1   : > { %4067 = vmatprep.mubr.bf16.mxu0 %v9862_v37 }
 0x3f2   : > { %8231 = vmatmul.mubr.msk.bf16.gmra.mrb[4].mxu1 %vm3966_vm5, %v9238_v48  ;;  %v4555_v48 = vadd.s32 40, %v12261_v23 }
 0x3f3   : > { %4408 = vmatprep.mubr.bf16.mxu1 %v9862_v37 }
 0x3f4   : > { %vm4595_vm11 = vcmp.le.s32.totalorder %v12263_v33, %v4555_v48  ;;  %v4561_v48 = vadd.s32 88, %v12261_v23 }
 0x3f6   : > { %vm4607_vm1 = vcmp.le.s32.totalorder %v12263_v33, %v4561_v48 }
 0x3f8   : > { %8196 = vmatmul.mubr.msk.bf16.gmra.mrb[8].mxu0 %vm3966_vm5, %v9239_v5 }
 0x3f9   : > { %4077 = vmatprep.mubr.bf16.mxu0 %v9862_v37 }
 0x3fa   : > { %8232 = vmatmul.mubr.msk.bf16.gmra.mrb[8].mxu1 %vm3966_vm5, %v9240_v58 }
 0x3fb   : > { %4418 = vmatprep.mubr.bf16.mxu1 %v9862_v37 }
 0x400   : > { %8197 = vmatmul.mubr.msk.bf16.gmra.mrb[12].mxu0 %vm3966_vm5, %v9241_v34 }
 0x401   : > { %4087 = vmatprep.mubr.bf16.mxu0 %v9862_v37 }
 0x402   : > { %8233 = vmatmul.mubr.msk.bf16.gmra.mrb[12].mxu1 %vm3966_vm5, %v9242_v27 }
 0x403   : > { %4428 = vmatprep.mubr.bf16.mxu1 %v9862_v37 }
 0x408   : > { %8198 = vmatmul.mubr.msk.bf16.gmra.mrb[16].mxu0 %vm3966_vm5, %v9243_v17 }
 0x409   : > { %4097 = vmatprep.mubr.bf16.mxu0 %v9862_v37 }
 0x40a   : > { %8234 = vmatmul.mubr.msk.bf16.gmra.mrb[16].mxu1 %vm3966_vm5, %v9244_v59 }
 0x40b   : > { %4438 = vmatprep.mubr.bf16.mxu1 %v9862_v37 }
 0x410   : > { %8199 = vmatmul.mubr.msk.bf16.gmra.mrb[20].mxu0 %vm3966_vm5, %v9245_v0 }
 0x411   : > { %4107 = vmatprep.mubr.bf16.mxu0 %v9862_v37 }
 0x412   : > { %8235 = vmatmul.mubr.msk.bf16.gmra.mrb[20].mxu1 %vm3966_vm5, %v9246_v52 }
 0x413   : > { %4448 = vmatprep.mubr.bf16.mxu1 %v9862_v37 }
 0x418   : > { %8200 = vmatmul.mubr.msk.bf16.gmra.mrb[24].mxu0 %vm3966_vm5, %v9247_v18 }
 0x419   : > { %4117 = vmatprep.mubr.bf16.mxu0 %v9862_v37 }
 0x41a   : > { %8236 = vmatmul.mubr.msk.bf16.gmra.mrb[24].mxu1 %vm3966_vm5, %v9248_v46 }
 0x41b   : > { %4458 = vmatprep.mubr.bf16.mxu1 %v9862_v37 }
 0x420   : > { %8201 = vmatmul.mubr.msk.bf16.gmra.mrb[28].mxu0 %vm3966_vm5, %v9249_v2  ;;  %v4556_v2 = vadd.s32 48, %v12261_v23 }
 0x421   : > { %4127 = vmatprep.mubr.bf16.mxu0 %v9862_v37 }
 0x422   : > { %8237 = vmatmul.mubr.msk.bf16.gmra.mrb[28].mxu1 %vm3966_vm5, %v9250_v62  ;;  %vm4597_vm12 = vcmp.le.s32.totalorder %v12263_v33, %v4556_v2 }
 0x423   : > { %4468 = vmatprep.mubr.bf16.mxu1 %v9862_v37 }
 0x428   : > { %8202 = vmatmul.mubr.msk.bf16.gmra.mrb[32].mxu0 %vm3966_vm5, %v9251_v57 }
 0x429   : > { %4137 = vmatprep.mubr.bf16.mxu0 %v9862_v37 }
 0x42a   : > { %8238 = vmatmul.mubr.msk.bf16.gmra.mrb[32].mxu1 %vm3966_vm5, %v9252_v63 }
 0x42b   : > { %4478 = vmatprep.mubr.bf16.mxu1 %v9862_v37 }
 0x430   : > { %8203 = vmatmul.mubr.msk.bf16.gmra.mrb[36].mxu0 %vm3966_vm5, %v9253_v38 }
 0x431   : > { %4147 = vmatprep.mubr.bf16.mxu0 %v9862_v37 }
 0x432   : > { %8239 = vmatmul.mubr.msk.bf16.gmra.mrb[36].mxu1 %vm3966_vm5, %v9254_v11 }
 0x433   : > { %4488 = vmatprep.mubr.bf16.mxu1 %v9862_v37 }
 0x438   : > { %8204 = vmatmul.mubr.msk.bf16.gmra.mrb[40].mxu0 %vm3966_vm5, %v9255_v10 }
 0x439   : > { %4157 = vmatprep.mubr.bf16.mxu0 %v9862_v37 }
 0x43a   : > { %8240 = vmatmul.mubr.msk.bf16.gmra.mrb[40].mxu1 %vm3966_vm5, %v9256_v60 }
 0x43b   : > { %4498 = vmatprep.mubr.bf16.mxu1 %v9862_v37 }
 0x440   : > { %8205 = vmatmul.mubr.msk.bf16.gmra.mrb[44].mxu0 %vm3966_vm5, %v9257_v13  ;;  %v4557_v13 = vadd.s32 56, %v12261_v23 }
 0x441   : > { %4167 = vmatprep.mubr.bf16.mxu0 %v9862_v37 }
 0x442   : > { %8241 = vmatmul.mubr.msk.bf16.gmra.mrb[44].mxu1 %vm3966_vm5, %v9258_v25  ;;  %vm4599_vm13 = vcmp.le.s32.totalorder %v12263_v33, %v4557_v13 }
 0x443   : > { %4508 = vmatprep.mubr.bf16.mxu1 %v9862_v37 }
 0x448   : > { %8206 = vmatmul.mubr.msk.bf16.gmra.mrb[48].mxu0 %vm3966_vm5, %v9259_v40 }
 0x449   : > { %4177 = vmatprep.mubr.bf16.mxu0 %v9862_v37 }
 0x44a   : > { %8242 = vmatmul.mubr.msk.bf16.gmra.mrb[48].mxu1 %vm3966_vm5, %v9260_v36 }
 0x44b   : > { %4518 = vmatprep.mubr.bf16.mxu1 %v9862_v37 }
 0x450   : > { %8207 = vmatmul.mubr.msk.bf16.gmra.mrb[52].mxu0 %vm3966_vm5, %v9261_v28 }
 0x451   : > { %4187 = vmatprep.mubr.bf16.mxu0 %v9862_v37 }
 0x452   : > { %8243 = vmatmul.mubr.msk.bf16.gmra.mrb[52].mxu1 %vm3966_vm5, %v9262_v32 }
 0x453   : > { %4528 = vmatprep.mubr.bf16.mxu1 %v9862_v37 }
 0x458   : > { %8208 = vmatmul.mubr.msk.bf16.gmra.mrb[56].mxu0 %vm3966_vm5, %v9263_v20 }
 0x459   : > { %4197 = vmatprep.mubr.bf16.mxu0 %v9862_v37 }
 0x45a   : > { %8244 = vmatmul.mubr.msk.bf16.gmra.mrb[56].mxu1 %vm3966_vm5, %v9264_v1 }
 0x45b   : > { %4538 = vmatprep.mubr.bf16.mxu1 %v9862_v37 }
 0x460   : > { %8209 = vmatmul.mubr.msk.bf16.gmra.mrb[60].mxu0 %vm3966_vm5, %v9265_v12 }
 0x462   : > { %8245 = vmatmul.mubr.msk.bf16.gmra.mrb[60].mxu1 %vm3966_vm5, %v9266_v7 }
 0x4bb   : > { %v4049_v55 = vpop.f32.mrb[0].mxu0 }
 0x4bc   : > { %v12268_v15 = vsel %vm4585_vm6, %v4049_v55, -1e+30  ;;  %v4051_v22 = vpop.f32.mrb[1].mxu0 }
 0x4bd   : > { %15166 = vst [vmem:[#allocation163_spill] sm:$0xff] %v12268_v15  ;;  %v4390_v19 = vpop.f32.mrb[0].mxu1  ;;  %v4053_v4 = vpop.f32.mrb[2].mxu0  ;;  %v4969_v14 = vmax.f32 %v12268_v15, -1e+30 }
 0x4be   : > { %v12272_v42 = vsel %vm4585_vm6, %v4390_v19, -1e+30  ;;  %v4392_v44 = vpop.f32.mrb[1].mxu1  ;;  %v4055_v53 = vpop.f32.mrb[3].mxu0  ;;  %v12281_v50 = vsel %vm4587_vm7, %v4053_v4, -1e+30 }
 0x4bf   : > { %15167 = vst [vmem:[#allocation164_spill] sm:$0xff] %v12272_v42  ;;  %v4394_v6 = vpop.f32.mrb[2].mxu1  ;;  %4970 = vmax.xlane.f32.xlu0 %v4969_v14  ;;  %v5065_v9 = vmax.f32 %v12272_v42, -1e+30  ;;  %15169 = vst [vmem:[#allocation166_spill] sm:$0xff] %v12281_v50  ;;  %v4559_v44 = vadd.s32 72, %v12261_v23 }
 0x4c0   : > { %v12277_v26 = vsel %vm4587_vm7, %v4394_v6, -1e+30  ;;  %v4396_v39 = vpop.f32.mrb[3].mxu1  ;;  %v4972_v21 = vmax.f32 %v12281_v50, -1e+30  ;;  %v13006_v42 = vld [vmem:[#allocation2 + $0x170] sm:$0xff] }
 0x4c1   : > { %15168 = vst [vmem:[#allocation165_spill] sm:$0xff] %v12277_v26  ;;  %v5068_v29 = vmax.f32 %v12277_v26, -1e+30  ;;  %vm4603_vm15 = vcmp.le.s32.totalorder %v12263_v33, %v4559_v44  ;;  %v13004_v26 = vld [vmem:[#allocation2 + $0x78] sm:$0xff]  ;;  %15273 = vst [vmem:[#allocation270_spill] sm:$0xff] %v13006_v42 }
 0x4c2   : > { %15272 = vst [vmem:[#allocation269_spill] sm:$0xff] %v13004_v26 }
 0x4c3   : > { %5069 = vmax.xlane.f32.xlu1 %v5068_v29  ;;  %5066 = vmax.xlane.f32.xlu0 %v5065_v9  ;;  %v4059_v24 = vpop.f32.mrb[4].mxu0 }
 0x4c4   : > { %v12284_v41 = vsel %vm4589_vm8, %v4059_v24, -1e+30  ;;  %v4061_v30 = vpop.f32.mrb[5].mxu0 }
 0x4c5   : > { %15170 = vst [vmem:[#allocation167_spill] sm:$0xff] %v12284_v41  ;;  %v4063_v37 = vpop.f32.mrb[6].mxu0  ;;  %v4400_v61 = vpop.f32.mrb[4].mxu1  ;;  %v4975_v35 = vmax.f32 %v12284_v41, -1e+30 }
 0x4c6   : > { %v12291_v8 = vsel %vm4591_vm9, %v4063_v37, -1e+30  ;;  %v4065_v31 = vpop.f32.mrb[7].mxu0  ;;  %v12293_v56 = vsel %vm4589_vm8, %v4400_v61, -1e+30  ;;  %v4402_v49 = vpop.f32.mrb[5].mxu1 }
 0x4c7   : > { %15171 = vst [vmem:[#allocation168_spill] sm:$0xff] %v12291_v8  ;;  %15172 = vst [vmem:[#allocation169_spill] sm:$0xff] %v12293_v56  ;;  %4973 = vmax.xlane.f32.xlu0 %v4972_v21  ;;  %4976 = vmax.xlane.f32.xlu1 %v4975_v35  ;;  %v4404_v16 = vpop.f32.mrb[6].mxu1  ;;  %v5071_v47 = vmax.f32 %v12293_v56, -1e+30  ;;  %v4560_v37 = vadd.s32 80, %v12261_v23 }
 0x4c8   : > { %v12299_v5 = vsel %vm4591_vm9, %v4404_v16, -1e+30  ;;  %v4406_v58 = vpop.f32.mrb[7].mxu1  ;;  %v4978_v34 = vmax.f32 %v12291_v8, -1e+30  ;;  %v12984_v56 = vld [vmem:[#allocation2 + $0x168] sm:$0xff] }
 0x4c9   : > { %15173 = vst [vmem:[#allocation170_spill] sm:$0xff] %v12299_v5  ;;  %v5074_v17 = vmax.f32 %v12299_v5, -1e+30  ;;  %vm4605_vm0 = vcmp.le.s32.totalorder %v12263_v33, %v4560_v37  ;;  %15268 = vst [vmem:[#allocation265_spill] sm:$0xff] %v12984_v56  ;;  %v12986_v5 = vld [vmem:[#allocation2 + $0x70] sm:$0xff] }
 0x4ca   : > { %15269 = vst [vmem:[#allocation266_spill] sm:$0xff] %v12986_v5 }
 0x4cb   : > { %4979 = vmax.xlane.f32.xlu1 %v4978_v34  ;;  %v4069_v27 = vpop.f32.mrb[8].mxu0  ;;  %5072 = vmax.xlane.f32.xlu0 %v5071_v47 }
 0x4cc   : > { %v12305_v59 = vsel %vm4593_vm10, %v4069_v27, -1e+30  ;;  %v4071_v0 = vpop.f32.mrb[9].mxu0 }
 0x4cd   : > { %15174 = vst [vmem:[#allocation171_spill] sm:$0xff] %v12305_v59  ;;  %v4073_v52 = vpop.f32.mrb[10].mxu0  ;;  %v4410_v18 = vpop.f32.mrb[8].mxu1  ;;  %v4981_v46 = vmax.f32 %v12305_v59, -1e+30  ;;  %v12966_v59 = vld [vmem:[#allocation2 + $0x160] sm:$0xff] }
 0x4ce   : > { %v12311_v62 = vsel %vm4595_vm11, %v4073_v52, -1e+30  ;;  %v4075_v57 = vpop.f32.mrb[11].mxu0  ;;  %v12313_v63 = vsel %vm4593_vm10, %v4410_v18, -1e+30  ;;  %v4412_v38 = vpop.f32.mrb[9].mxu1 }
 0x4cf   : > { %15175 = vst [vmem:[#allocation172_spill] sm:$0xff] %v12311_v62  ;;  %15176 = vst [vmem:[#allocation173_spill] sm:$0xff] %v12313_v63  ;;  %5075 = vmax.xlane.f32.xlu1 %v5074_v17  ;;  %4982 = vmax.xlane.f32.xlu0 %v4981_v46  ;;  %v4414_v11 = vpop.f32.mrb[10].mxu1  ;;  %v4984_v10 = vmax.f32 %v12311_v62, -1e+30  ;;  %v4562_v57 = vadd.s32 96, %v12261_v23 }
 0x4d0   : > { %v5077_v60 = vmax.f32 %v12313_v63, -1e+30  ;;  %v12320_v25 = vsel %vm4595_vm11, %v4414_v11, -1e+30  ;;  %v4416_v40 = vpop.f32.mrb[11].mxu1  ;;  %v12964_v63 = vld [vmem:[#allocation2 + $0x68] sm:$0xff] }
 0x4d1   : > { %15177 = vst [vmem:[#allocation174_spill] sm:$0xff] %v12320_v25  ;;  %v5080_v28 = vmax.f32 %v12320_v25, -1e+30  ;;  %vm4609_vm2 = vcmp.le.s32.totalorder %v12263_v33, %v4562_v57  ;;  %15264 = vst [vmem:[#allocation261_spill] sm:$0xff] %v12964_v63 }
 0x4d2   : > { %15265 = vst [vmem:[#allocation262_spill] sm:$0xff] %v12966_v59 }
 0x4d3   : > { %4985 = vmax.xlane.f32.xlu1 %v4984_v10  ;;  %v4079_v36 = vpop.f32.mrb[12].mxu0  ;;  %5078 = vmax.xlane.f32.xlu0 %v5077_v60 }
 0x4d4   : > { %v12325_v32 = vsel %vm4597_vm12, %v4079_v36, -1e+30  ;;  %v4081_v20 = vpop.f32.mrb[13].mxu0 }
 0x4d5   : > { %15178 = vst [vmem:[#allocation175_spill] sm:$0xff] %v12325_v32  ;;  %v4083_v1 = vpop.f32.mrb[14].mxu0  ;;  %v4420_v12 = vpop.f32.mrb[12].mxu1  ;;  %v4987_v7 = vmax.f32 %v12325_v32, -1e+30  ;;  %v12944_v32 = vld [vmem:[#allocation2 + $0x158] sm:$0xff] }
 0x4d6   : > { %v12331_v55 = vsel %vm4599_vm13, %v4083_v1, -1e+30  ;;  %v4085_v3 = vpop.f32.mrb[15].mxu0  ;;  %v12333_v22 = vsel %vm4597_vm12, %v4420_v12, -1e+30  ;;  %v4422_v19 = vpop.f32.mrb[13].mxu1 }
 0x4d7   : > { %15179 = vst [vmem:[#allocation176_spill] sm:$0xff] %v12331_v55  ;;  %15180 = vst [vmem:[#allocation177_spill] sm:$0xff] %v12333_v22  ;;  %5081 = vmax.xlane.f32.xlu1 %v5080_v28  ;;  %4988 = vmax.xlane.f32.xlu0 %v4987_v7  ;;  %v4424_v4 = vpop.f32.mrb[14].mxu1  ;;  %v4990_v14 = vmax.f32 %v12331_v55, -1e+30  ;;  %v4563_v28 = vadd.s32 104, %v12261_v23 }
 0x4d8   : > { %v5083_v43 = vmax.f32 %v12333_v22, -1e+30  ;;  %v12340_v53 = vsel %vm4599_vm13, %v4424_v4, -1e+30  ;;  %v4426_v6 = vpop.f32.mrb[15].mxu1  ;;  %v12924_v55 = vld [vmem:[#allocation2 + $0x58] sm:$0xff] }
 0x4d9   : > { %15181 = vst [vmem:[#allocation178_spill] sm:$0xff] %v12340_v53  ;;  %v5086_v54 = vmax.f32 %v12340_v53, -1e+30  ;;  %vm4611_vm3 = vcmp.le.s32.totalorder %v12263_v33, %v4563_v28 }
 0x4db   : > { %4991 = vmax.xlane.f32.xlu1 %v4990_v14  ;;  %v4089_v9 = vpop.f32.mrb[16].mxu0  ;;  %5084 = vmax.xlane.f32.xlu0 %v5083_v43  ;;  %v4564_v43 = vadd.s32 112, %v12261_v23 }
 0x4dc   : > { %v12345_v39 = vsel %vm4601_vm14, %v4089_v9, -1e+30  ;;  %v4091_v29 = vpop.f32.mrb[17].mxu0 }
 0x4dd   : > { %15182 = vst [vmem:[#allocation179_spill] sm:$0xff] %v12345_v39  ;;  %v4093_v24 = vpop.f32.mrb[18].mxu0  ;;  %v4430_v30 = vpop.f32.mrb[16].mxu1  ;;  %v4993_v51 = vmax.f32 %v12345_v39, -1e+30  ;;  %vm4613_vm4 = vcmp.le.s32.totalorder %v12263_v33, %v4564_v43 }
 0x4de   : > { %v12351_v61 = vsel %vm4603_vm15, %v4093_v24, -1e+30  ;;  %v4095_v21 = vpop.f32.mrb[19].mxu0  ;;  %v12353_v35 = vsel %vm4601_vm14, %v4430_v30, -1e+30  ;;  %v4432_v31 = vpop.f32.mrb[17].mxu1 }
 0x4df   : > { %15183 = vst [vmem:[#allocation180_spill] sm:$0xff] %v12351_v61  ;;  %15184 = vst [vmem:[#allocation181_spill] sm:$0xff] %v12353_v35  ;;  %5087 = vmax.xlane.f32.xlu1 %v5086_v54  ;;  %4994 = vmax.xlane.f32.xlu0 %v4993_v51  ;;  %v4434_v49 = vpop.f32.mrb[18].mxu1  ;;  %v4996_v16 = vmax.f32 %v12351_v61, -1e+30  ;;  %v4565_v51 = vadd.s32 120, %v12261_v23 }
 0x4e0   : > { %v5089_v47 = vmax.f32 %v12353_v35, -1e+30  ;;  %v12360_v58 = vsel %vm4603_vm15, %v4434_v49, -1e+30  ;;  %v4436_v34 = vpop.f32.mrb[19].mxu1  ;;  %v12904_v35 = vld [vmem:[#allocation2 + $0x148] sm:$0xff] }
 0x4e1   : > { %15185 = vst [vmem:[#allocation182_spill] sm:$0xff] %v12360_v58  ;;  %v5092_v17 = vmax.f32 %v12360_v58, -1e+30  ;;  %vm4615_vm6 = vcmp.le.s32.totalorder %v12263_v33, %v4565_v51  ;;  %v12946_v61 = vld [vmem:[#allocation2 + $0x60] sm:$0xff] }
 0x4e2   : > { %15262 = vst [vmem:[#allocation259_spill] sm:$0xff] %v12946_v61 }
 0x4e3   : > { %4997 = vmax.xlane.f32.xlu1 %v4996_v16  ;;  %v4099_v27 = vpop.f32.mrb[20].mxu0  ;;  %5090 = vmax.xlane.f32.xlu0 %v5089_v47 }
 0x4e4   : > { %v12365_v0 = vsel %vm4605_vm0, %v4099_v27, -1e+30  ;;  %v4101_v52 = vpop.f32.mrb[21].mxu0 }
 0x4e5   : > { %15186 = vst [vmem:[#allocation183_spill] sm:$0xff] %v12365_v0  ;;  %v4103_v18 = vpop.f32.mrb[22].mxu0  ;;  %v4440_v46 = vpop.f32.mrb[20].mxu1  ;;  %v4999_v2 = vmax.f32 %v12365_v0, -1e+30  ;;  %v12410_v52 = vadd.s32 128, %v12263_v33 }
 0x4e6   : > { %v12371_v38 = vsel %vm4607_vm1, %v4103_v18, -1e+30  ;;  %v4105_v11 = vpop.f32.mrb[23].mxu0  ;;  %v12373_v10 = vsel %vm4605_vm0, %v4440_v46, -1e+30  ;;  %v4442_v60 = vpop.f32.mrb[21].mxu1 }
 0x4e7   : > { %15187 = vst [vmem:[#allocation184_spill] sm:$0xff] %v12371_v38  ;;  %15188 = vst [vmem:[#allocation185_spill] sm:$0xff] %v12373_v10  ;;  %5093 = vmax.xlane.f32.xlu1 %v5092_v17  ;;  %5000 = vmax.xlane.f32.xlu0 %v4999_v2  ;;  %v4444_v13 = vpop.f32.mrb[22].mxu1  ;;  %v5002_v40 = vmax.f32 %v12371_v38, -1e+30  ;;  %v4566_v17 = vadd.s32 128, %v12261_v23 }
 0x4e8   : > { %v5095_v36 = vmax.f32 %v12373_v10, -1e+30  ;;  %v12380_v20 = vsel %vm4607_vm1, %v4444_v13, -1e+30  ;;  %v4446_v1 = vpop.f32.mrb[23].mxu1  ;;  %v12867_v10 = vld [vmem:[#allocation2 + $0x40] sm:$0xff] }
 0x4e9   : > { %15189 = vst [vmem:[#allocation186_spill] sm:$0xff] %v12380_v20  ;;  %v5098_v7 = vmax.f32 %v12380_v20, -1e+30  ;;  %v4567_v1 = vadd.s32 136, %v12261_v23  ;;  %vm4618_vm7 = vcmp.le.s32.totalorder %v12410_v52, %v4566_v17  ;;  %v12926_v38 = vld [vmem:[#allocation2 + $0x150] sm:$0xff] }
 0x4eb   : > { %5003 = vmax.xlane.f32.xlu1 %v5002_v40  ;;  %v4109_v12 = vpop.f32.mrb[24].mxu0  ;;  %5096 = vmax.xlane.f32.xlu0 %v5095_v36  ;;  %v9267_v40 = vld [vmem:[%s9943_s29 + $0x40] sm:$0xff]   ;;  %vm4620_vm8 = vcmp.le.s32.totalorder %v12410_v52, %v4567_v1 }
 0x4ec   : > { %v12385_v45 = vsel %vm4609_vm2, %v4109_v12, -1e+30  ;;  %v4111_v3 = vpop.f32.mrb[25].mxu0  ;;  %v9268_v12 = vld [vmem:[%s9943_s29] sm:$0xff]   ;;  %8504 = vmatprep.subr.bf16.mxu0 %v9267_v40 }
 0x4ed   : > { %15190 = vst [vmem:[#allocation187_spill] sm:$0xff] %v12385_v45  ;;  %v4113_v19 = vpop.f32.mrb[26].mxu0  ;;  %v4450_v4 = vpop.f32.mrb[24].mxu1  ;;  %v5005_v14 = vmax.f32 %v12385_v45, -1e+30  ;;  %8505 = vmatpush3.bf16.msra.mxu0 %v9268_v12  ;;  %v4570_v12 = vadd.s32 160, %v12261_v23 }
 0x4ee   : > { %v12391_v44 = vsel %vm4611_vm3, %v4113_v19, -1e+30  ;;  %v4115_v6 = vpop.f32.mrb[27].mxu0  ;;  %v12393_v9 = vsel %vm4609_vm2, %v4450_v4, -1e+30  ;;  %v4452_v54 = vpop.f32.mrb[25].mxu1 }
 0x4ef   : > { %15191 = vst [vmem:[#allocation188_spill] sm:$0xff] %v12391_v44  ;;  %15192 = vst [vmem:[#allocation189_spill] sm:$0xff] %v12393_v9  ;;  %5099 = vmax.xlane.f32.xlu1 %v5098_v7  ;;  %5006 = vmax.xlane.f32.xlu0 %v5005_v14  ;;  %v4454_v29 = vpop.f32.mrb[26].mxu1  ;;  %v5008_v24 = vmax.f32 %v12391_v44, -1e+30  ;;  %v9269_v7 = vld [vmem:[%s9943_s29 + $0xc0] sm:$0xff]   ;;  %vm4626_vm11 = vcmp.le.s32.totalorder %v12410_v52, %v4570_v12 }
 0x4f0   : > { %v5101_v30 = vmax.f32 %v12393_v9, -1e+30  ;;  %v12400_v37 = vsel %vm4611_vm3, %v4454_v29, -1e+30  ;;  %v4456_v21 = vpop.f32.mrb[27].mxu1  ;;  %8616 = vmatprep.subr.bf16.mxu1 %v9269_v7  ;;  %v9270_v4 = vld [vmem:[%s9943_s29 + $0x80] sm:$0xff]  }
 0x4f1   : > { %15193 = vst [vmem:[#allocation190_spill] sm:$0xff] %v12400_v37  ;;  %v5104_v49 = vmax.f32 %v12400_v37, -1e+30  ;;  %8617 = vmatpush3.bf16.msra.mxu1 %v9270_v4  ;;  %v9298_v9 = vld [vmem:[%s9943_s29 + $0xb8] sm:$0xff]   ;;  %v12906_v44 = vld [vmem:[#allocation2 + $0x50] sm:$0xff] }
 0x4f3   : > { %5009 = vmax.xlane.f32.xlu1 %v5008_v24  ;;  %v4119_v31 = vpop.f32.mrb[28].mxu0  ;;  %5102 = vmax.xlane.f32.xlu0 %v5101_v30  ;;  %v4568_v30 = vadd.s32 144, %v12261_v23 }
 0x4f4   : > { %v12405_v16 = vsel %vm4613_vm4, %v4119_v31, -1e+30  ;;  %v4121_v47 = vpop.f32.mrb[29].mxu0 }
 0x4f5   : > { %15194 = vst [vmem:[#allocation191_spill] sm:$0xff] %v12405_v16  ;;  %v4123_v48 = vpop.f32.mrb[30].mxu0  ;;  %v4460_v34 = vpop.f32.mrb[28].mxu1  ;;  %v5011_v27 = vmax.f32 %v12405_v16, -1e+30  ;;  %vm4622_vm9 = vcmp.le.s32.totalorder %v12410_v52, %v4568_v30  ;;  %v4571_v30 = vadd.s32 168, %v12261_v23 }
 0x4f6   : > { %v12414_v18 = vsel %vm4615_vm6, %v4123_v48, -1e+30  ;;  %v4125_v46 = vpop.f32.mrb[31].mxu0  ;;  %v12416_v2 = vsel %vm4613_vm4, %v4460_v34, -1e+30  ;;  %v4462_v57 = vpop.f32.mrb[29].mxu1 }
 0x4f7   : > { %15195 = vst [vmem:[#allocation192_spill] sm:$0xff] %v12414_v18  ;;  %15196 = vst [vmem:[#allocation193_spill] sm:$0xff] %v12416_v2  ;;  %5105 = vmax.xlane.f32.xlu1 %v5104_v49  ;;  %5012 = vmax.xlane.f32.xlu0 %v5011_v27  ;;  %v4464_v11 = vpop.f32.mrb[30].mxu1  ;;  %v5014_v60 = vmax.f32 %v12414_v18, -1e+30  ;;  %v4569_v34 = vadd.s32 152, %v12261_v23  ;;  %vm4628_vm12 = vcmp.le.s32.totalorder %v12410_v52, %v4571_v30 }
 0x4f8   : > { %v5107_v13 = vmax.f32 %v12416_v2, -1e+30  ;;  %v12423_v36 = vsel %vm4615_vm6, %v4464_v11, -1e+30  ;;  %v4466_v28 = vpop.f32.mrb[31].mxu1  ;;  %v12841_v2 = vld [vmem:[#allocation2 + $0x38] sm:$0xff] }
 0x4f9   : > { %15197 = vst [vmem:[#allocation194_spill] sm:$0xff] %v12423_v36  ;;  %v5110_v19 = vmax.f32 %v12423_v36, -1e+30  ;;  %vm4624_vm10 = vcmp.le.s32.totalorder %v12410_v52, %v4569_v34  ;;  %v12886_v18 = vld [vmem:[#allocation2 + $0x140] sm:$0xff] }
 0x4fb   : > { %5015 = vmax.xlane.f32.xlu1 %v5014_v60  ;;  %v12429_v3 = vpop.f32.mrb[32].mxu0  ;;  %5108 = vmax.xlane.f32.xlu0 %v5107_v13 }
 0x4fc   : > { %15198 = vst [vmem:[#allocation195_spill] sm:$0xff] %v12429_v3  ;;  %v4131_v33 = vpop.f32.mrb[33].mxu0 }
 0x4fd   : > { %v12436_v14 = vsel %vm4618_vm7, %v4131_v33, -1e+30  ;;  %v12438_v43 = vpop.f32.mrb[34].mxu0  ;;  %v12440_v6 = vpop.f32.mrb[32].mxu1  ;;  %v9271_v33 = vld [vmem:[%s9943_s29 + $0x48] sm:$0xff]  }
 0x4fe   : > { %15199 = vst [vmem:[#allocation196_spill] sm:$0xff] %v12436_v14  ;;  %15200 = vst [vmem:[#allocation197_spill] sm:$0xff] %v12438_v43  ;;  %v4135_v54 = vpop.f32.mrb[35].mxu0  ;;  %v4472_v29 = vpop.f32.mrb[33].mxu1  ;;  %v5017_v24 = vmax.f32 %v12429_v3, %v12436_v14  ;;  %8506 = vmatprep.subr.bf16.mxu0 %v9271_v33 }
 0x4ff   : > { %15201 = vst [vmem:[#allocation198_spill] sm:$0xff] %v12440_v6  ;;  %v12447_v51 = vsel %vm4620_vm8, %v4135_v54, -1e+30  ;;  %v12451_v21 = vsel %vm4618_vm7, %v4472_v29, -1e+30  ;;  %5111 = vmax.xlane.f32.xlu1 %v5110_v19  ;;  %v12453_v31 = vpop.f32.mrb[34].mxu1 }
 0x500   : > { %15202 = vst [vmem:[#allocation199_spill] sm:$0xff] %v12447_v51  ;;  %15203 = vst [vmem:[#allocation200_spill] sm:$0xff] %v12451_v21  ;;  %5018 = vmax.xlane.f32.xlu0 %v5017_v24  ;;  %v4476_v49 = vpop.f32.mrb[35].mxu1  ;;  %v5020_v47 = vmax.f32 %v12438_v43, %v12447_v51  ;;  %v5113_v48 = vmax.f32 %v12440_v6, %v12451_v21  ;;  %v9276_v21 = vld [vmem:[%s9943_s29 + $0x10] sm:$0xff]  }
 0x501   : > { %15204 = vst [vmem:[#allocation201_spill] sm:$0xff] %v12453_v31  ;;  %v12462_v27 = vsel %vm4620_vm8, %v4476_v49, -1e+30  ;;  %v9272_v49 = vld [vmem:[%s9943_s29 + $0x8] sm:$0xff]   ;;  %vm7276_vm8 = vcmask 7168   ;;  %v9293_v6 = vld [vmem:[%s9943_s29 + $0xf0] sm:$0xff]  }
 0x502   : > { %15205 = vst [vmem:[#allocation202_spill] sm:$0xff] %v12462_v27  ;;  %v5116_v13 = vmax.f32 %v12453_v31, %v12462_v27  ;;  %8507 = vmatpush3.bf16.msra.mxu0 %v9272_v49  ;;  %v4572_v49 = vadd.s32 176, %v12261_v23  ;;  %v9297_v27 = vld [vmem:[%s9943_s29 + $0xf8] sm:$0xff]   ;;  %v12844_v31 = vld [vmem:[#allocation2 + $0x130] sm:$0xff] }
 0x503   : > { %5021 = vmax.xlane.f32.xlu1 %v5020_v47  ;;  %v12465_v17 = vpop.f32.mrb[36].mxu0  ;;  %v9273_v47 = vld [vmem:[%s9943_s29 + $0xc8] sm:$0xff]  }
 0x504   : > { %15206 = vst [vmem:[#allocation203_spill] sm:$0xff] %v12465_v17  ;;  %5114 = vmax.xlane.f32.xlu0 %v5113_v48  ;;  %v4141_v46 = vpop.f32.mrb[37].mxu0  ;;  %8618 = vmatprep.subr.bf16.mxu1 %v9273_v47  ;;  %vm4630_vm13 = vcmp.le.s32.totalorder %v12410_v52, %v4572_v49 }
 0x505   : > { %v12468_v57 = vsel %vm4622_vm9, %v4141_v46, -1e+30  ;;  %v12470_v11 = vpop.f32.mrb[38].mxu0  ;;  %v12472_v60 = vpop.f32.mrb[36].mxu1 }
 0x506   : > { %15207 = vst [vmem:[#allocation204_spill] sm:$0xff] %v12468_v57  ;;  %15208 = vst [vmem:[#allocation205_spill] sm:$0xff] %v12470_v11  ;;  %v4145_v40 = vpop.f32.mrb[39].mxu0  ;;  %v4482_v28 = vpop.f32.mrb[37].mxu1  ;;  %v5023_v1 = vmax.f32 %v12465_v17, %v12468_v57  ;;  %v9275_v17 = vld [vmem:[%s9943_s29 + $0x50] sm:$0xff]  }
 0x507   : > { %15209 = vst [vmem:[#allocation206_spill] sm:$0xff] %v12472_v60  ;;  %v12481_v7 = vsel %vm4624_vm10, %v4145_v40, -1e+30  ;;  %v12483_v19 = vsel %vm4622_vm9, %v4482_v28, -1e+30  ;;  %5117 = vmax.xlane.f32.xlu1 %v5116_v13  ;;  %v12485_v4 = vpop.f32.mrb[38].mxu1  ;;  %8508 = vmatprep.subr.bf16.mxu0 %v9275_v17 }
 0x508   : > { %15210 = vst [vmem:[#allocation207_spill] sm:$0xff] %v12481_v7  ;;  %15211 = vst [vmem:[#allocation208_spill] sm:$0xff] %v12483_v19  ;;  %5024 = vmax.xlane.f32.xlu0 %v5023_v1  ;;  %v4486_v54 = vpop.f32.mrb[39].mxu1  ;;  %v5026_v29 = vmax.f32 %v12470_v11, %v12481_v7  ;;  %v5119_v24 = vmax.f32 %v12472_v60, %v12483_v19  ;;  %v9274_v13 = vld [vmem:[%s9943_s29 + $0x88] sm:$0xff]   ;;  %8509 = vmatpush3.bf16.msra.mxu0 %v9276_v21  ;;  %v9295_v7 = vld [vmem:[%s9943_s29 + $0x78] sm:$0xff]   ;;  %vm7211_vm9 = vcmask 269312  }
 0x509   : > { %15212 = vst [vmem:[#allocation209_spill] sm:$0xff] %v12485_v4  ;;  %v12497_v48 = vsel %vm4624_vm10, %v4486_v54, -1e+30  ;;  %8619 = vmatpush3.bf16.msra.mxu1 %v9274_v13 }
 0x50a   : > { %15213 = vst [vmem:[#allocation210_spill] sm:$0xff] %v12497_v48  ;;  %v5122_v33 = vmax.f32 %v12485_v4, %v12497_v48  ;;  %v12802_v48 = vld [vmem:[#allocation2 + $0x28] sm:$0xff]  ;;  %v12804_v4 = vld [vmem:[#allocation2 + $0x120] sm:$0xff] }
 0x50b   : > { %5027 = vmax.xlane.f32.xlu1 %v5026_v29  ;;  %v12500_v46 = vpop.f32.mrb[40].mxu0 }
 0x50c   : > { %15214 = vst [vmem:[#allocation211_spill] sm:$0xff] %v12500_v46  ;;  %5120 = vmax.xlane.f32.xlu0 %v5119_v24  ;;  %v4151_v40 = vpop.f32.mrb[41].mxu0 }
 0x50d   : > { %v12506_v28 = vsel %vm4626_vm11, %v4151_v40, -1e+30  ;;  %v12508_v34 = vpop.f32.mrb[42].mxu0  ;;  %v12510_v1 = vpop.f32.mrb[40].mxu1 }
 0x50e   : > { %15215 = vst [vmem:[#allocation212_spill] sm:$0xff] %v12506_v28  ;;  %15216 = vst [vmem:[#allocation213_spill] sm:$0xff] %v12508_v34  ;;  %v4155_v54 = vpop.f32.mrb[43].mxu0  ;;  %v4492_v29 = vpop.f32.mrb[41].mxu1  ;;  %v5029_v24 = vmax.f32 %v12500_v46, %v12506_v28  ;;  %v4573_v46 = vadd.s32 184, %v12261_v23 }
 0x50f   : > { %15217 = vst [vmem:[#allocation214_spill] sm:$0xff] %v12510_v1  ;;  %v12519_v47 = vsel %vm4628_vm12, %v4155_v54, -1e+30  ;;  %v12523_v40 = vsel %vm4626_vm11, %v4492_v29, -1e+30  ;;  %5123 = vmax.xlane.f32.xlu1 %v5122_v33  ;;  %v12525_v19 = vpop.f32.mrb[42].mxu1 }
 0x510   : > { %15218 = vst [vmem:[#allocation215_spill] sm:$0xff] %v12519_v47  ;;  %15219 = vst [vmem:[#allocation216_spill] sm:$0xff] %v12523_v40  ;;  %5030 = vmax.xlane.f32.xlu0 %v5029_v24  ;;  %v4496_v13 = vpop.f32.mrb[43].mxu1  ;;  %v5032_v60 = vmax.f32 %v12508_v34, %v12519_v47  ;;  %v5125_v28 = vmax.f32 %v12510_v1, %v12523_v40  ;;  %vm4632_vm14 = vcmp.le.s32.totalorder %v12410_v52, %v4573_v46  ;;  %v12782_v47 = vld [vmem:[#allocation2 + $0x118] sm:$0xff]  ;;  %v9294_v34 = vld [vmem:[%s9943_s29 + $0xb0] sm:$0xff]  }
 0x511   : > { %15220 = vst [vmem:[#allocation217_spill] sm:$0xff] %v12525_v19  ;;  %v12534_v54 = vsel %vm4628_vm12, %v4496_v13, -1e+30 }
 0x512   : > { %15221 = vst [vmem:[#allocation218_spill] sm:$0xff] %v12534_v54  ;;  %v5128_v30 = vmax.f32 %v12525_v19, %v12534_v54 }
 0x513   : > { %5033 = vmax.xlane.f32.xlu1 %v5032_v60  ;;  %v12537_v12 = vpop.f32.mrb[44].mxu0 }
 0x514   : > { %15222 = vst [vmem:[#allocation219_spill] sm:$0xff] %v12537_v12  ;;  %5126 = vmax.xlane.f32.xlu0 %v5125_v28  ;;  %v4161_v33 = vpop.f32.mrb[45].mxu0  ;;  %v4574_v28 = vadd.s32 192, %v12261_v23 }
 0x515   : > { %v12540_v29 = vsel %vm4630_vm13, %v4161_v33, -1e+30  ;;  %v12542_v24 = vpop.f32.mrb[46].mxu0  ;;  %v12544_v40 = vpop.f32.mrb[44].mxu1 }
 0x516   : > { %15223 = vst [vmem:[#allocation220_spill] sm:$0xff] %v12540_v29  ;;  %15224 = vst [vmem:[#allocation221_spill] sm:$0xff] %v12542_v24  ;;  %v4165_v49 = vpop.f32.mrb[47].mxu0  ;;  %v4502_v60 = vpop.f32.mrb[45].mxu1  ;;  %v5035_v13 = vmax.f32 %v12537_v12, %v12540_v29  ;;  %v4575_v12 = vadd.s32 200, %v12261_v23  ;;  %vm4634_vm15 = vcmp.le.s32.totalorder %v12410_v52, %v4574_v28 }
 0x517   : > { %15225 = vst [vmem:[#allocation222_spill] sm:$0xff] %v12544_v40  ;;  %v12553_v33 = vsel %vm4632_vm14, %v4165_v49, -1e+30  ;;  %v12555_v1 = vsel %vm4630_vm13, %v4502_v60, -1e+30  ;;  %5129 = vmax.xlane.f32.xlu1 %v5128_v30  ;;  %v12557_v57 = vpop.f32.mrb[46].mxu1 }
 0x518   : > { %15226 = vst [vmem:[#allocation223_spill] sm:$0xff] %v12553_v33  ;;  %15227 = vst [vmem:[#allocation224_spill] sm:$0xff] %v12555_v1  ;;  %5036 = vmax.xlane.f32.xlu0 %v5035_v13  ;;  %v4506_v54 = vpop.f32.mrb[47].mxu1  ;;  %v5038_v19 = vmax.f32 %v12542_v24, %v12553_v33  ;;  %v5131_v29 = vmax.f32 %v12544_v40, %v12555_v1  ;;  %v9277_v49 = vld [vmem:[%s9943_s29 + $0xd0] sm:$0xff]   ;;  %vm4636_vm0 = vcmp.le.s32.totalorder %v12410_v52, %v4575_v12 }
 0x519   : > { %15228 = vst [vmem:[#allocation225_spill] sm:$0xff] %v12557_v57  ;;  %v12569_v60 = vsel %vm4632_vm14, %v4506_v54, -1e+30  ;;  %8620 = vmatprep.subr.bf16.mxu1 %v9277_v49  ;;  %v9278_v13 = vld [vmem:[%s9943_s29 + $0x90] sm:$0xff]   ;;  %v4576_v49 = vadd.s32 208, %v12261_v23 }
 0x51a   : > { %15229 = vst [vmem:[#allocation226_spill] sm:$0xff] %v12569_v60  ;;  %v5134_v21 = vmax.f32 %v12557_v57, %v12569_v60  ;;  %8621 = vmatpush3.bf16.msra.mxu1 %v9278_v13  ;;  %v9280_v57 = vld [vmem:[%s9943_s29 + $0x18] sm:$0xff]  }
 0x51b   : > { %5039 = vmax.xlane.f32.xlu1 %v5038_v19  ;;  %v12572_v30 = vpop.f32.mrb[48].mxu0  ;;  %vm4638_vm1 = vcmp.le.s32.totalorder %v12410_v52, %v4576_v49 }
 0x51c   : > { %15230 = vst [vmem:[#allocation227_spill] sm:$0xff] %v12572_v30  ;;  %5132 = vmax.xlane.f32.xlu0 %v5131_v29  ;;  %v4171_v33 = vpop.f32.mrb[49].mxu0 }
 0x51d   : > { %v12578_v1 = vsel %vm4634_vm15, %v4171_v33, -1e+30  ;;  %v12580_v46 = vpop.f32.mrb[50].mxu0  ;;  %v12582_v54 = vpop.f32.mrb[48].mxu1 }
 0x51e   : > { %15231 = vst [vmem:[#allocation228_spill] sm:$0xff] %v12578_v1  ;;  %15232 = vst [vmem:[#allocation229_spill] sm:$0xff] %v12580_v46  ;;  %v4175_v17 = vpop.f32.mrb[51].mxu0  ;;  %v4512_v19 = vpop.f32.mrb[49].mxu1  ;;  %v5041_v29 = vmax.f32 %v12572_v30, %v12578_v1  ;;  %v4577_v30 = vadd.s32 216, %v12261_v23 }
 0x51f   : > { %15233 = vst [vmem:[#allocation230_spill] sm:$0xff] %v12582_v54  ;;  %v12591_v40 = vsel %vm4636_vm0, %v4175_v17, -1e+30  ;;  %v12595_v33 = vsel %vm4634_vm15, %v4512_v19, -1e+30  ;;  %5135 = vmax.xlane.f32.xlu1 %v5134_v21  ;;  %v12597_v24 = vpop.f32.mrb[50].mxu1 }
 0x520   : > { %15234 = vst [vmem:[#allocation231_spill] sm:$0xff] %v12591_v40  ;;  %15235 = vst [vmem:[#allocation232_spill] sm:$0xff] %v12595_v33  ;;  %5042 = vmax.xlane.f32.xlu0 %v5041_v29  ;;  %v4516_v13 = vpop.f32.mrb[51].mxu1  ;;  %v5044_v60 = vmax.f32 %v12580_v46, %v12591_v40  ;;  %v5137_v1 = vmax.f32 %v12582_v54, %v12595_v33  ;;  %vm4640_vm2 = vcmp.le.s32.totalorder %v12410_v52, %v4577_v30  ;;  %v9279_v46 = vld [vmem:[%s9943_s29 + $0x58] sm:$0xff]  }
 0x521   : > { %15236 = vst [vmem:[#allocation233_spill] sm:$0xff] %v12597_v24  ;;  %v12606_v17 = vsel %vm4636_vm0, %v4516_v13, -1e+30  ;;  %8510 = vmatprep.subr.bf16.mxu0 %v9279_v46 }
 0x522   : > { %15237 = vst [vmem:[#allocation234_spill] sm:$0xff] %v12606_v17  ;;  %v5140_v12 = vmax.f32 %v12597_v24, %v12606_v17  ;;  %8511 = vmatpush3.bf16.msra.mxu0 %v9280_v57 }
 0x523   : > { %5045 = vmax.xlane.f32.xlu1 %v5044_v60  ;;  %v12609_v28 = vpop.f32.mrb[52].mxu0 }
 0x524   : > { %15238 = vst [vmem:[#allocation235_spill] sm:$0xff] %v12609_v28  ;;  %5138 = vmax.xlane.f32.xlu0 %v5137_v1  ;;  %v4181_v21 = vpop.f32.mrb[53].mxu0  ;;  %v4578_v1 = vadd.s32 224, %v12261_v23 }
 0x525   : > { %v12612_v19 = vsel %vm4638_vm1, %v4181_v21, -1e+30  ;;  %v12614_v29 = vpop.f32.mrb[54].mxu0  ;;  %v12616_v33 = vpop.f32.mrb[52].mxu1 }
 0x526   : > { %15239 = vst [vmem:[#allocation236_spill] sm:$0xff] %v12612_v19  ;;  %15240 = vst [vmem:[#allocation237_spill] sm:$0xff] %v12614_v29  ;;  %v4185_v49 = vpop.f32.mrb[55].mxu0  ;;  %v4522_v60 = vpop.f32.mrb[53].mxu1  ;;  %v5047_v13 = vmax.f32 %v12609_v28, %v12612_v19  ;;  %v4579_v28 = vadd.s32 232, %v12261_v23  ;;  %vm4642_vm3 = vcmp.le.s32.totalorder %v12410_v52, %v4578_v1 }
 0x527   : > { %15241 = vst [vmem:[#allocation238_spill] sm:$0xff] %v12616_v33  ;;  %v12625_v21 = vsel %vm4640_vm2, %v4185_v49, -1e+30  ;;  %v12627_v54 = vsel %vm4638_vm1, %v4522_v60, -1e+30  ;;  %5141 = vmax.xlane.f32.xlu1 %v5140_v12  ;;  %v12629_v40 = vpop.f32.mrb[54].mxu1 }
 0x528   : > { %15242 = vst [vmem:[#allocation239_spill] sm:$0xff] %v12625_v21  ;;  %15243 = vst [vmem:[#allocation240_spill] sm:$0xff] %v12627_v54  ;;  %5048 = vmax.xlane.f32.xlu0 %v5047_v13  ;;  %v4526_v17 = vpop.f32.mrb[55].mxu1  ;;  %v5050_v24 = vmax.f32 %v12614_v29, %v12625_v21  ;;  %v5143_v19 = vmax.f32 %v12616_v33, %v12627_v54  ;;  %v9281_v49 = vld [vmem:[%s9943_s29 + $0xd8] sm:$0xff]   ;;  %vm4644_vm4 = vcmp.le.s32.totalorder %v12410_v52, %v4579_v28 }
 0x529   : > { %15244 = vst [vmem:[#allocation241_spill] sm:$0xff] %v12629_v40  ;;  %v12641_v60 = vsel %vm4640_vm2, %v4526_v17, -1e+30  ;;  %8622 = vmatprep.subr.bf16.mxu1 %v9281_v49  ;;  %v9282_v13 = vld [vmem:[%s9943_s29 + $0x98] sm:$0xff]   ;;  %v4580_v49 = vadd.s32 240, %v12261_v23 }
 0x52a   : > { %15245 = vst [vmem:[#allocation242_spill] sm:$0xff] %v12641_v60  ;;  %v5146_v57 = vmax.f32 %v12629_v40, %v12641_v60  ;;  %8623 = vmatpush3.bf16.msra.mxu1 %v9282_v13 }
 0x52b   : > { %5051 = vmax.xlane.f32.xlu1 %v5050_v24  ;;  %v12644_v12 = vpop.f32.mrb[56].mxu0  ;;  %vm4646_vm6 = vcmp.le.s32.totalorder %v12410_v52, %v4580_v49 }
 0x52c   : > { %15246 = vst [vmem:[#allocation243_spill] sm:$0xff] %v12644_v12  ;;  %5144 = vmax.xlane.f32.xlu0 %v5143_v19  ;;  %v4191_v21 = vpop.f32.mrb[57].mxu0 }
 0x52d   : > { %v12650_v54 = vsel %vm4642_vm3, %v4191_v21, -1e+30  ;;  %v12652_v30 = vpop.f32.mrb[58].mxu0  ;;  %v12654_v17 = vpop.f32.mrb[56].mxu1 }
 0x52e   : > { %15247 = vst [vmem:[#allocation244_spill] sm:$0xff] %v12650_v54  ;;  %15248 = vst [vmem:[#allocation245_spill] sm:$0xff] %v12652_v30  ;;  %v4195_v24 = vpop.f32.mrb[59].mxu0  ;;  %v4532_v46 = vpop.f32.mrb[57].mxu1  ;;  %v5053_v19 = vmax.f32 %v12644_v12, %v12650_v54  ;;  %v4581_v12 = vadd.s32 248, %v12261_v23 }
 0x52f   : > { %15249 = vst [vmem:[#allocation246_spill] sm:$0xff] %v12654_v17  ;;  %v12663_v33 = vsel %vm4644_vm4, %v4195_v24, -1e+30  ;;  %v12667_v21 = vsel %vm4642_vm3, %v4532_v46, -1e+30  ;;  %5147 = vmax.xlane.f32.xlu1 %v5146_v57  ;;  %v12669_v29 = vpop.f32.mrb[58].mxu1 }
 0x530   : > { %15250 = vst [vmem:[#allocation247_spill] sm:$0xff] %v12663_v33  ;;  %15251 = vst [vmem:[#allocation248_spill] sm:$0xff] %v12667_v21  ;;  %5054 = vmax.xlane.f32.xlu0 %v5053_v19  ;;  %v4536_v13 = vpop.f32.mrb[59].mxu1  ;;  %v5056_v60 = vmax.f32 %v12652_v30, %v12663_v33  ;;  %v5149_v54 = vmax.f32 %v12654_v17, %v12667_v21  ;;  %vm4648_vm7 = vcmp.le.s32.totalorder %v12410_v52, %v4581_v12  ;;  %v9283_v17 = vld [vmem:[%s9943_s29 + $0x60] sm:$0xff]   ;;  %v9290_v52 = vld [vmem:[%s9943_s29 + $0xa8] sm:$0xff]  }
 0x531   : > { %15252 = vst [vmem:[#allocation249_spill] sm:$0xff] %v12669_v29  ;;  %v12678_v24 = vsel %vm4644_vm4, %v4536_v13, -1e+30  ;;  %8512 = vmatprep.subr.bf16.mxu0 %v9283_v17  ;;  %v12725_v17 = vld [vmem:[#allocation2 + $0x108] sm:$0xff] }
 0x532   : > { %15253 = vst [vmem:[#allocation250_spill] sm:$0xff] %v12678_v24  ;;  %v5152_v28 = vmax.f32 %v12669_v29, %v12678_v24 }
 0x533   : > { %5057 = vmax.xlane.f32.xlu1 %v5056_v60  ;;  %v12681_v1 = vpop.f32.mrb[60].mxu0 }
 0x534   : > { %15254 = vst [vmem:[#allocation251_spill] sm:$0xff] %v12681_v1  ;;  %5150 = vmax.xlane.f32.xlu0 %v5149_v54  ;;  %v4201_v57 = vpop.f32.mrb[61].mxu0 }
 0x535   : > { %v12684_v46 = vsel %vm4646_vm6, %v4201_v57, -1e+30  ;;  %v12686_v19 = vpop.f32.mrb[62].mxu0  ;;  %v12688_v23 = vpop.f32.mrb[60].mxu1 }
 0x536   : > { %15255 = vst [vmem:[#allocation252_spill] sm:$0xff] %v12684_v46  ;;  %15256 = vst [vmem:[#allocation253_spill] sm:$0xff] %v12686_v19  ;;  %v4205_v49 = vpop.f32.mrb[63].mxu0  ;;  %v4542_v60 = vpop.f32.mrb[61].mxu1  ;;  %v5059_v13 = vmax.f32 %v12681_v1, %v12684_v46  ;;  %v9285_v1 = vld [vmem:[%s9943_s29 + $0xe0] sm:$0xff]  }
 0x537   : > { %15257 = vst [vmem:[#allocation254_spill] sm:$0xff] %v12688_v23  ;;  %v12696_v54 = vsel %vm4648_vm7, %v4205_v49, -1e+30  ;;  %v12698_v57 = vsel %vm4646_vm6, %v4542_v60, -1e+30  ;;  %5153 = vmax.xlane.f32.xlu1 %v5152_v28  ;;  %v12700_v21 = vpop.f32.mrb[62].mxu1  ;;  %8624 = vmatprep.subr.bf16.mxu1 %v9285_v1 }
 0x538   : > { %15258 = vst [vmem:[#allocation255_spill] sm:$0xff] %v12696_v54  ;;  %15259 = vst [vmem:[#allocation256_spill] sm:$0xff] %v12698_v57  ;;  %5060 = vmax.xlane.f32.xlu0 %v5059_v13  ;;  %v4546_v33 = vpop.f32.mrb[63].mxu1  ;;  %v5062_v24 = vmax.f32 %v12686_v19, %v12696_v54  ;;  %v5155_v46 = vmax.f32 %v12688_v23, %v12698_v57  ;;  %v9284_v49 = vld [vmem:[%s9943_s29 + $0x20] sm:$0xff]   ;;  %v9287_v54 = vld [vmem:[%s9943_s29 + $0x68] sm:$0xff]  }
 0x539   : > { %15260 = vst [vmem:[#allocation257_spill] sm:$0xff] %v12700_v21  ;;  %v12711_v60 = vsel %vm4648_vm7, %v4546_v33, -1e+30  ;;  %8513 = vmatpush3.bf16.msra.mxu0 %v9284_v49  ;;  %v9286_v28 = vld [vmem:[%s9943_s29 + $0xa0] sm:$0xff]   ;;  %v9288_v57 = vld [vmem:[%s9943_s29 + $0x28] sm:$0xff]   ;;  %v12760_v1 = vld [vmem:[#allocation2 + $0x18] sm:$0xff] }
 0x53a   : > { %15261 = vst [vmem:[#allocation258_spill] sm:$0xff] %v12711_v60  ;;  %v5158_v13 = vmax.f32 %v12700_v21, %v12711_v60  ;;  %8625 = vmatpush3.bf16.msra.mxu1 %v9286_v28  ;;  %v9289_v23 = vld [vmem:[%s9943_s29 + $0xe8] sm:$0xff]   ;;  %8514 = vmatprep.subr.bf16.mxu0 %v9287_v54  ;;  %v12719_v19 = vld [vmem:[#allocation2] sm:$0xff]  ;;  %v12742_v28 = vld [vmem:[#allocation2 + $0x10] sm:$0xff] }
 0x53b   : > { %5063 = vmax.xlane.f32.xlu1 %v5062_v24  ;;  %8626 = vmatprep.subr.bf16.mxu1 %v9289_v23  ;;  %v12727_v24 = vld [vmem:[#allocation2 + $0x100] sm:$0xff]  ;;  %v12740_v49 = vld [vmem:[#allocation2 + $0x8] sm:$0xff]  ;;  %v9292_v60 = vld [vmem:[%s9943_s29 + $0x30] sm:$0xff]  }
 0x53c   : > { %5156 = vmax.xlane.f32.xlu0 %v5155_v46 }
 0x53d   : > { %8515 = vmatpush3.bf16.msra.mxu0 %v9288_v57 }
 0x53e   : > { %8627 = vmatpush3.bf16.msra.mxu1 %v9290_v52  ;;  %v12762_v52 = vld [vmem:[#allocation2 + $0x110] sm:$0xff] }
 0x53f   : > { %5159 = vmax.xlane.f32.xlu1 %v5158_v13  ;;  %8628 = vmatprep.subr.bf16.mxu1 %v9293_v6  ;;  %v12824_v6 = vld [vmem:[#allocation2 + $0x30] sm:$0xff] }
 0x542   : > { %8629 = vmatpush3.bf16.msra.mxu1 %v9294_v34 }
 0x543   : > { %8630 = vmatprep.subr.bf16.mxu1 %v9297_v27 }
 0x546   : > { %8631 = vmatpush3.bf16.msra.mxu1 %v9298_v9 }
 0x54c   : > { %v4971_v33 = vpop.xlane.xlu0 %4970 }
 0x54d   : > { %v12723_v12 = vmax.f32 %v12719_v19, %v4971_v33 }
 0x54f   : > { %7277 = vst.msk [vmem:[#allocation2] sm:$0xff] %vm7276_vm8, %v12723_v12 }
 0x550   : > { %v5070_v46 = vpop.xlane.xlu1 %5069  ;;  %v5067_v54 = vpop.xlane.xlu0 %5066 }
 0x551   : > { %v12734_v23 = vmax.f32 %v12725_v17, %v5070_v46  ;;  %v12737_v57 = vmax.f32 %v12727_v24, %v5067_v54 }
 0x552   : > { %5419 = vperm.xlu0 %9219, %v12723_v12  }
 0x553   : > { %7310 = vst.msk [vmem:[#allocation2 + $0x108] sm:$0xff] %vm7276_vm8, %v12734_v23  ;;  %7309 = vst.msk [vmem:[#allocation2 + $0x100] sm:$0xff] %vm7276_vm8, %v12737_v57  ;;  %5579 = vperm.xlu1 %9220, %v12737_v57  }
 0x554   : > { %v4974_v33 = vpop.xlane.xlu0 %4973  ;;  %v4977_v46 = vpop.xlane.xlu1 %4976 }
 0x555   : > { %v12754_v54 = vmax.f32 %v12740_v49, %v4974_v33  ;;  %v12757_v13 = vmax.f32 %v12742_v28, %v4977_v46  ;;  %v9291_v46 = vld [vmem:[%s9943_s29 + $0x70] sm:$0xff]   ;;  %v12784_v33 = vld [vmem:[#allocation2 + $0x20] sm:$0xff] }
 0x556   : > { %5584 = vperm.xlu0 %9219, %v12734_v23   ;;  %8516 = vmatprep.subr.bf16.mxu0 %v9291_v46 }
 0x557   : > { %7278 = vst.msk [vmem:[#allocation2 + $0x8] sm:$0xff] %vm7276_vm8, %v12754_v54  ;;  %7279 = vst.msk [vmem:[#allocation2 + $0x10] sm:$0xff] %vm7276_vm8, %v12757_v13  ;;  %5424 = vperm.xlu1 %9220, %v12754_v54   ;;  %8517 = vmatpush3.bf16.msra.mxu0 %v9292_v60 }
 0x558   : > { %v4980_v21 = vpop.xlane.xlu1 %4979  ;;  %v5073_v29 = vpop.xlane.xlu0 %5072  ;;  %8518 = vmatprep.subr.bf16.mxu0 %v9295_v7 }
 0x559   : > { %v12775_v30 = vmax.f32 %v12760_v1, %v4980_v21  ;;  %v12778_v40 = vmax.f32 %v12762_v52, %v5073_v29  ;;  %v12822_v21 = vld [vmem:[#allocation2 + $0x128] sm:$0xff] }
 0x55b   : > { %7280 = vst.msk [vmem:[#allocation2 + $0x18] sm:$0xff] %vm7276_vm8, %v12775_v30  ;;  %7311 = vst.msk [vmem:[#allocation2 + $0x110] sm:$0xff] %vm7276_vm8, %v12778_v40  ;;  %5429 = vperm.xlu1 %9220, %v12757_v13  }
 0x55c   : > { %v5076_v29 = vpop.xlane.xlu1 %5075  ;;  %v4983_v46 = vpop.xlane.xlu0 %4982 }
 0x55d   : > { %v12797_v3 = vmax.f32 %v12782_v47, %v5076_v29  ;;  %v12800_v14 = vmax.f32 %v12784_v33, %v4983_v46 }
 0x55f   : > { %7312 = vst.msk [vmem:[#allocation2 + $0x118] sm:$0xff] %vm7276_vm8, %v12797_v3  ;;  %7281 = vst.msk [vmem:[#allocation2 + $0x20] sm:$0xff] %vm7276_vm8, %v12800_v14  ;;  %5594 = vperm.xlu0 %9219, %v12797_v3   ;;  %5589 = vperm.xlu1 %9220, %v12778_v40  }
 0x560   : > { %v4986_v34 = vpop.xlane.xlu1 %4985  ;;  %v5079_v60 = vpop.xlane.xlu0 %5078 }
 0x561   : > { %v12817_v29 = vmax.f32 %v12802_v48, %v4986_v34  ;;  %v12820_v46 = vmax.f32 %v12804_v4, %v5079_v60 }
 0x563   : > { %7282 = vst.msk [vmem:[#allocation2 + $0x28] sm:$0xff] %vm7276_vm8, %v12817_v29  ;;  %7313 = vst.msk [vmem:[#allocation2 + $0x120] sm:$0xff] %vm7276_vm8, %v12820_v46  ;;  %5434 = vperm.xlu1 %9220, %v12775_v30  }
 0x564   : > { %v5082_v34 = vpop.xlane.xlu1 %5081  ;;  %v4989_v60 = vpop.xlane.xlu0 %4988 }
 0x565   : > { %v12836_v11 = vmax.f32 %v12822_v21, %v5082_v34  ;;  %v12839_v16 = vmax.f32 %v12824_v6, %v4989_v60  ;;  %v9296_v60 = vld [vmem:[%s9943_s29 + $0x38] sm:$0xff]  }
 0x566   : > { %8519 = vmatpush3.bf16.msra.mxu0 %v9296_v60  ;;  %v12865_v34 = vld [vmem:[#allocation2 + $0x138] sm:$0xff]  ;;  %v12884_v60 = vld [vmem:[#allocation2 + $0x48] sm:$0xff] }
 0x567   : > { %7314 = vst.msk [vmem:[#allocation2 + $0x128] sm:$0xff] %vm7276_vm8, %v12836_v11  ;;  %7283 = vst.msk [vmem:[#allocation2 + $0x30] sm:$0xff] %vm7276_vm8, %v12839_v16  ;;  %5604 = vperm.xlu0 %9219, %v12836_v11   ;;  %5439 = vperm.xlu1 %9220, %v12800_v14  }
 0x568   : > { %v4992_v43 = vpop.xlane.xlu1 %4991  ;;  %v5085_v45 = vpop.xlane.xlu0 %5084 }
 0x569   : > { %v12860_v51 = vmax.f32 %v12841_v2, %v4992_v43  ;;  %v12863_v36 = vmax.f32 %v12844_v31, %v5085_v45 }
 0x56b   : > { %7284 = vst.msk [vmem:[#allocation2 + $0x38] sm:$0xff] %vm7276_vm8, %v12860_v51  ;;  %7315 = vst.msk [vmem:[#allocation2 + $0x130] sm:$0xff] %vm7276_vm8, %v12863_v36  ;;  %5599 = vperm.xlu1 %9220, %v12820_v46  }
 0x56c   : > { %v5088_v45 = vpop.xlane.xlu1 %5087  ;;  %v4995_v9 = vpop.xlane.xlu0 %4994 }
 0x56d   : > { %v12879_v43 = vmax.f32 %v12865_v34, %v5088_v45  ;;  %v12882_v7 = vmax.f32 %v12867_v10, %v4995_v9 }
 0x56f   : > { %7316 = vst.msk [vmem:[#allocation2 + $0x138] sm:$0xff] %vm7276_vm8, %v12879_v43  ;;  %7285 = vst.msk [vmem:[#allocation2 + $0x40] sm:$0xff] %vm7276_vm8, %v12882_v7  ;;  %5614 = vperm.xlu0 %9219, %v12879_v43   ;;  %5444 = vperm.xlu1 %9220, %v12817_v29  }
 0x570   : > { %v4998_v45 = vpop.xlane.xlu1 %4997  ;;  %v5091_v9 = vpop.xlane.xlu0 %5090 }
 0x571   : > { %v12899_v37 = vmax.f32 %v12884_v60, %v4998_v45  ;;  %v12902_v27 = vmax.f32 %v12886_v18, %v5091_v9 }
 0x573   : > { %7286 = vst.msk [vmem:[#allocation2 + $0x48] sm:$0xff] %vm7276_vm8, %v12899_v37  ;;  %7317 = vst.msk [vmem:[#allocation2 + $0x140] sm:$0xff] %vm7276_vm8, %v12902_v27  ;;  %5464 = vperm.xlu0 %9219, %v12899_v37   ;;  %5449 = vperm.xlu1 %9220, %v12839_v16  }
 0x574   : > { %v5094_v45 = vpop.xlane.xlu1 %5093  ;;  %v5001_v9 = vpop.xlane.xlu0 %5000 }
 0x575   : > { %v12919_v20 = vmax.f32 %v12904_v35, %v5094_v45  ;;  %v12922_v0 = vmax.f32 %v12906_v44, %v5001_v9 }
 0x577   : > { %7318 = vst.msk [vmem:[#allocation2 + $0x148] sm:$0xff] %vm7276_vm8, %v12919_v20  ;;  %7287 = vst.msk [vmem:[#allocation2 + $0x50] sm:$0xff] %vm7276_vm8, %v12922_v0  ;;  %5624 = vperm.xlu0 %9219, %v12919_v20   ;;  %5609 = vperm.xlu1 %9220, %v12863_v36  }
 0x578   : > { %v5004_v45 = vpop.xlane.xlu1 %5003  ;;  %v5097_v9 = vpop.xlane.xlu0 %5096 }
 0x579   : > { %v12939_v58 = vmax.f32 %v12924_v55, %v5004_v45  ;;  %v12942_v39 = vmax.f32 %v12926_v38, %v5097_v9 }
 0x57b   : > { %7288 = vst.msk [vmem:[#allocation2 + $0x58] sm:$0xff] %vm7276_vm8, %v12939_v58  ;;  %7319 = vst.msk [vmem:[#allocation2 + $0x150] sm:$0xff] %vm7276_vm8, %v12942_v39  ;;  %5474 = vperm.xlu0 %9219, %v12939_v58   ;;  %5454 = vperm.xlu1 %9220, %v12860_v51  }
 0x57c   : > { %v5100_v45 = vpop.xlane.xlu1 %5099  ;;  %v5007_v9 = vpop.xlane.xlu0 %5006 }
 0x57d   : > { %v12959_v53 = vmax.f32 %v12944_v32, %v5100_v45  ;;  %v12962_v22 = vmax.f32 %v12946_v61, %v5007_v9  ;;  %v15286_v61 = vsub.f32 %v12727_v24, %v12737_v57 }
 0x57f   : > { %15263 = vst [vmem:[#allocation260_spill] sm:$0xff] %v12962_v22  ;;  %7320 = vst.msk [vmem:[#allocation2 + $0x158] sm:$0xff] %vm7276_vm8, %v12959_v53  ;;  %5634 = vperm.xlu0 %9219, %v12959_v53   ;;  %5459 = vperm.xlu1 %9220, %v12882_v7  }
 0x580   : > { %7289 = vst.msk [vmem:[#allocation2 + $0x60] sm:$0xff] %vm7276_vm8, %v12962_v22  ;;  %v5010_v45 = vpop.xlane.xlu1 %5009  ;;  %v5103_v9 = vpop.xlane.xlu0 %5102 }
 0x581   : > { %v12979_v8 = vmax.f32 %v12964_v63, %v5010_v45  ;;  %v12982_v62 = vmax.f32 %v12966_v59, %v5103_v9  ;;  %v13064_v63 = vld [vmem:[#allocation2 + $0x188] sm:$0xff] }
 0x582   : > { %15281 = vst [vmem:[#allocation278_spill] sm:$0xff] %v13064_v63 }
 0x583   : > { %15266 = vst [vmem:[#allocation263_spill] sm:$0xff] %v12979_v8  ;;  %15267 = vst [vmem:[#allocation264_spill] sm:$0xff] %v12982_v62  ;;  %5484 = vperm.xlu0 %9219, %v12979_v8   ;;  %5619 = vperm.xlu1 %9220, %v12902_v27  }
 0x584   : > { %7290 = vst.msk [vmem:[#allocation2 + $0x68] sm:$0xff] %vm7276_vm8, %v12979_v8  ;;  %7321 = vst.msk [vmem:[#allocation2 + $0x160] sm:$0xff] %vm7276_vm8, %v12982_v62  ;;  %v5106_v45 = vpop.xlane.xlu1 %5105  ;;  %v5013_v9 = vpop.xlane.xlu0 %5012  ;;  %v13044_v8 = vld [vmem:[#allocation2 + $0x88] sm:$0xff] }
 0x585   : > { %v12999_v50 = vmax.f32 %v12984_v56, %v5106_v45  ;;  %v13002_v25 = vmax.f32 %v12986_v5, %v5013_v9  ;;  %v13024_v56 = vld [vmem:[#allocation2 + $0x178] sm:$0xff]  ;;  %15278 = vst [vmem:[#allocation275_spill] sm:$0xff] %v13044_v8 }
 0x586   : > { %15275 = vst [vmem:[#allocation272_spill] sm:$0xff] %v13024_v56 }
 0x587   : > { %15270 = vst [vmem:[#allocation267_spill] sm:$0xff] %v12999_v50  ;;  %15271 = vst [vmem:[#allocation268_spill] sm:$0xff] %v13002_v25  ;;  %5644 = vperm.xlu0 %9219, %v12999_v50   ;;  %5469 = vperm.xlu1 %9220, %v12922_v0  }
 0x588   : > { %7322 = vst.msk [vmem:[#allocation2 + $0x168] sm:$0xff] %vm7276_vm8, %v12999_v50  ;;  %7291 = vst.msk [vmem:[#allocation2 + $0x70] sm:$0xff] %vm7276_vm8, %v13002_v25  ;;  %v5016_v45 = vpop.xlane.xlu1 %5015  ;;  %v5109_v9 = vpop.xlane.xlu0 %5108 }
 0x589   : > { %v13019_v59 = vmax.f32 %v13004_v26, %v5016_v45  ;;  %v13022_v41 = vmax.f32 %v13006_v42, %v5109_v9  ;;  %v13036_v45 = vld [vmem:[#allocation2 + $0x80] sm:$0xff] }
 0x58a   : > { %15276 = vst [vmem:[#allocation273_spill] sm:$0xff] %v13036_v45  ;;  %v13052_v42 = vld [vmem:[#allocation2 + $0x180] sm:$0xff] }
 0x58b   : > { %15274 = vst [vmem:[#allocation271_spill] sm:$0xff] %v13019_v59  ;;  %7292 = vst.msk [vmem:[#allocation2 + $0x78] sm:$0xff] %vm7276_vm8, %v13019_v59  ;;  %5494 = vperm.xlu0 %9219, %v13019_v59   ;;  %5629 = vperm.xlu1 %9220, %v12942_v39  }
 0x58c   : > { %7323 = vst.msk [vmem:[#allocation2 + $0x170] sm:$0xff] %vm7276_vm8, %v13022_v41  ;;  %v5112_v9 = vpop.xlane.xlu1 %5111  ;;  %15279 = vst [vmem:[#allocation276_spill] sm:$0xff] %v13052_v42 }
 0x58d   : > { %v13039_v50 = vmax.f32 %v13024_v56, %v5112_v9  ;;  %v5019_v15 = vpop.xlane.xlu0 %5018  ;;  %v13072_v9 = vld [vmem:[#allocation2 + $0x90] sm:$0xff] }
 0x58e   : > { %v13042_v26 = vmax.f32 %v13036_v45, %v5019_v15  ;;  %15282 = vst [vmem:[#allocation279_spill] sm:$0xff] %v13072_v9 }
 0x58f   : > { %15277 = vst [vmem:[#allocation274_spill] sm:$0xff] %v13039_v50  ;;  %7324 = vst.msk [vmem:[#allocation2 + $0x178] sm:$0xff] %vm7276_vm8, %v13039_v50  ;;  %5654 = vperm.xlu0 %9219, %v13039_v50   ;;  %5479 = vperm.xlu1 %9220, %v12962_v22   ;;  %v13084_v22 = vld [vmem:[#allocation2 + $0x98] sm:$0xff] }
 0x590   : > { %7293 = vst.msk [vmem:[#allocation2 + $0x80] sm:$0xff] %vm7276_vm8, %v13042_v26  ;;  %v5022_v15 = vpop.xlane.xlu1 %5021 }
 0x591   : > { %v13059_v59 = vmax.f32 %v13044_v8, %v5022_v15  ;;  %v5115_v5 = vpop.xlane.xlu0 %5114  ;;  %v13092_v15 = vld [vmem:[#allocation2 + $0x190] sm:$0xff] }
 0x592   : > { %v13062_v56 = vmax.f32 %v13052_v42, %v5115_v5 }
 0x593   : > { %15280 = vst [vmem:[#allocation277_spill] sm:$0xff] %v13059_v59  ;;  %7294 = vst.msk [vmem:[#allocation2 + $0x88] sm:$0xff] %vm7276_vm8, %v13059_v59  ;;  %5504 = vperm.xlu0 %9219, %v13059_v59   ;;  %5639 = vperm.xlu1 %9220, %v12982_v62  }
 0x594   : > { %7325 = vst.msk [vmem:[#allocation2 + $0x180] sm:$0xff] %vm7276_vm8, %v13062_v56  ;;  %v5118_v5 = vpop.xlane.xlu1 %5117 }
 0x595   : > { %v13079_v45 = vmax.f32 %v13064_v63, %v5118_v5  ;;  %v5025_v50 = vpop.xlane.xlu0 %5024  ;;  %v15284_v5 = vsub.f32 %v12719_v19, %v12723_v12  ;;  %v15285_v63 = vsub.f32 %v12725_v17, %v12734_v23  ;;  %v5353_v19 = vmul.f32 1.442695, %v15286_v61 }
 0x596   : > { %v13082_v8 = vmax.f32 %v13072_v9, %v5025_v50  ;;  %v15287_v50 = vsub.f32 %v12740_v49, %v12754_v54  ;;  %v15289_v23 = vsub.f32 %v12760_v1, %v12775_v30  ;;  %v15332_v1 = vld [vmem:[#allocation271_spill] sm:$0xff] }
 0x597   : > { %15283 = vst [vmem:[#allocation280_spill] sm:$0xff] %v13079_v45  ;;  %7326 = vst.msk [vmem:[#allocation2 + $0x188] sm:$0xff] %vm7276_vm8, %v13079_v45  ;;  %5664 = vperm.xlu0 %9219, %v13079_v45   ;;  %5489 = vperm.xlu1 %9220, %v13002_v25   ;;  %v5289_v42 = vmul.f32 1.442695, %v15284_v5  ;;  %v5355_v62 = vmul.f32 1.442695, %v15285_v63 }
 0x598   : > { %7295 = vst.msk [vmem:[#allocation2 + $0x90] sm:$0xff] %vm7276_vm8, %v13082_v8  ;;  %v5028_v59 = vpop.xlane.xlu1 %5027  ;;  %v13113_v5 = vld [vmem:[#allocation2 + $0x198] sm:$0xff]  ;;  %v5291_v9 = vmul.f32 1.442695, %v15287_v50  ;;  %v5295_v57 = vmul.f32 1.442695, %v15289_v23 }
 0x599   : > { %v13105_v45 = vmax.f32 %v13084_v22, %v5028_v59  ;;  %v5121_v25 = vpop.xlane.xlu0 %5120  ;;  %v13124_v59 = vld [vmem:[#allocation2 + $0xa0] sm:$0xff]  ;;  %9299 = vpow2.f32 %v5289_v42  ;;  %v13145_v50 = vld [vmem:[#allocation2 + $0xa8] sm:$0xff] }
 0x59a   : > { %v13111_v12 = vmax.f32 %v13092_v15, %v5121_v25  ;;  %v15288_v25 = vsub.f32 %v12742_v28, %v12757_v13  ;;  %9301 = vpow2.f32 %v5355_v62  ;;  %v15290_v28 = vsub.f32 %v12762_v52, %v12778_v40  ;;  %v13156_v40 = vld [vmem:[#allocation2 + $0x1a0] sm:$0xff] }
 0x59b   : > { %7296 = vst.msk [vmem:[#allocation2 + $0x98] sm:$0xff] %vm7276_vm8, %v13105_v45  ;;  %5514 = vperm.xlu0 %9219, %v13105_v45   ;;  %5649 = vperm.xlu1 %9220, %v13022_v41   ;;  %9303 = vpow2.f32 %v5353_v19  ;;  %v15291_v62 = vsub.f32 %v12782_v47, %v12797_v3  ;;  %v15292_v52 = vsub.f32 %v12784_v33, %v12800_v14  ;;  %v15331_v3 = vld [vmem:[#allocation269_spill] sm:$0xff] }
 0x59c   : > { %v5293_v61 = vmul.f32 1.442695, %v15288_v25  ;;  %7327 = vst.msk [vmem:[#allocation2 + $0x190] sm:$0xff] %vm7276_vm8, %v13111_v12  ;;  %v5124_v24 = vpop.xlane.xlu1 %5123  ;;  %v5357_v13 = vmul.f32 1.442695, %v15290_v28  ;;  %9305 = vpow2.f32 %v5291_v9  ;;  %v15293_v19 = vsub.f32 %v12802_v48, %v12817_v29  ;;  %v13331_v29 = vld [vmem:[#allocation2 + $0x1c8] sm:$0xff] }
 0x59d   : > { %v13137_v49 = vmax.f32 %v13113_v5, %v5124_v24  ;;  %v5031_v42 = vpop.xlane.xlu0 %5030  ;;  %v5359_v30 = vmul.f32 1.442695, %v15291_v62  ;;  %v5297_v9 = vmul.f32 1.442695, %v15292_v52  ;;  %v15294_v14 = vsub.f32 %v12804_v4, %v12820_v46  ;;  %v13188_v4 = vld [vmem:[#allocation2 + $0xb0] sm:$0xff] }
 0x59e   : > { %v13143_v54 = vmax.f32 %v13124_v59, %v5031_v42  ;;  %9307 = vpow2.f32 %v5293_v61  ;;  %v5299_v25 = vmul.f32 1.442695, %v15293_v19  ;;  %v13177_v42 = vld [vmem:[#allocation2 + $0x1a8] sm:$0xff]  ;;  %v15296_v46 = vsub.f32 %v12824_v6, %v12839_v16  ;;  %v13211_v19 = vld [vmem:[#allocation2 + $0xb8] sm:$0xff] }
 0x59f   : > { %7328 = vst.msk [vmem:[#allocation2 + $0x198] sm:$0xff] %vm7276_vm8, %v13137_v49  ;;  %5674 = vperm.xlu0 %9219, %v13137_v49   ;;  %5499 = vperm.xlu1 %9220, %v13042_v26   ;;  %9309 = vpow2.f32 %v5295_v57  ;;  %v5361_v33 = vmul.f32 1.442695, %v15294_v14  ;;  %v15295_v57 = vsub.f32 %v12822_v21, %v12836_v11  ;;  %v15298_v16 = vsub.f32 %v12844_v31, %v12863_v36  ;;  %v13224_v36 = vld [vmem:[#allocation2 + $0x1b0] sm:$0xff] }
 0x5a0   : > { %7297 = vst.msk [vmem:[#allocation2 + $0xa0] sm:$0xff] %vm7276_vm8, %v13143_v54  ;;  %v5034_v47 = vpop.xlane.xlu1 %5033  ;;  %9311 = vpow2.f32 %v5357_v13  ;;  %v5301_v28 = vmul.f32 1.442695, %v15296_v46  ;;  %v15297_v13 = vsub.f32 %v12841_v2, %v12860_v51  ;;  %v15300_v2 = vsub.f32 %v12865_v34, %v12879_v43 }
 0x5a1   : > { %v13169_v24 = vmax.f32 %v13145_v50, %v5034_v47  ;;  %v5127_v61 = vpop.xlane.xlu0 %5126  ;;  %9313 = vpow2.f32 %v5359_v30  ;;  %v5363_v48 = vmul.f32 1.442695, %v15295_v57  ;;  %v5365_v6 = vmul.f32 1.442695, %v15298_v16  ;;  %v13251_v16 = vld [vmem:[#allocation2 + $0x1b8] sm:$0xff] }
 0x5a2   : > { %v13175_v23 = vmax.f32 %v13156_v40, %v5127_v61  ;;  %9315 = vpow2.f32 %v5297_v9  ;;  %v5303_v62 = vmul.f32 1.442695, %v15297_v13  ;;  %v5367_v51 = vmul.f32 1.442695, %v15300_v2 }
 0x5a3   : > { %7298 = vst.msk [vmem:[#allocation2 + $0xa8] sm:$0xff] %vm7276_vm8, %v13169_v24  ;;  %5524 = vperm.xlu0 %9219, %v13169_v24   ;;  %5659 = vperm.xlu1 %9220, %v13062_v56   ;;  %9317 = vpow2.f32 %v5299_v25  ;;  %v13203_v9 = vpop.eup %9299  ;;  %v15302_v14 = vsub.f32 %v12867_v10, %v12882_v7  ;;  %v15304_v7 = vsub.f32 %v12886_v18, %v12902_v27  ;;  %v13264_v18 = vld [vmem:[#allocation2 + $0xc0] sm:$0xff] }
 0x5a4   : > { %7329 = vst.msk [vmem:[#allocation2 + $0x1a0] sm:$0xff] %vm7276_vm8, %v13175_v23  ;;  %v5130_v21 = vpop.xlane.xlu1 %5129  ;;  %9319 = vpow2.f32 %v5361_v33  ;;  %v13213_v25 = vpop.eup %9301  ;;  %v15333_v17 = vsub.f32 %v15331_v3, %v15332_v1  ;;  %v15337_v1 = vld [vmem:[#allocation274_spill] sm:$0xff] }
 0x5a5   : > { %v13201_v30 = vmax.f32 %v13177_v42, %v5130_v21  ;;  %v5037_v52 = vpop.xlane.xlu0 %5036  ;;  %15299 = vst [vmem:[#allocation281_spill] sm:$0xff] %v13213_v25  ;;  %9321 = vpow2.f32 %v5363_v48  ;;  %v13226_v31 = vpop.eup %9303  ;;  %v5305_v34 = vmul.f32 1.442695, %v15302_v14  ;;  %v15303_v48 = vsub.f32 %v12884_v60, %v12899_v37 }
 0x5a6   : > { %v13209_v47 = vmax.f32 %v13188_v4, %v5037_v52  ;;  %15301 = vst [vmem:[#allocation282_spill] sm:$0xff] %v13226_v31  ;;  %9323 = vpow2.f32 %v5301_v28  ;;  %v13235_v57 = vpop.eup %9305  ;;  %v5369_v13 = vmul.f32 1.442695, %v15304_v7  ;;  %v15305_v37 = vsub.f32 %v12904_v35, %v12919_v20 }
 0x5a7   : > { %7330 = vst.msk [vmem:[#allocation2 + $0x1a8] sm:$0xff] %vm7276_vm8, %v13201_v30  ;;  %5684 = vperm.xlu0 %9219, %v13201_v30   ;;  %5509 = vperm.xlu1 %9220, %v13082_v8   ;;  %9325 = vpow2.f32 %v5303_v62  ;;  %v5307_v46 = vmul.f32 1.442695, %v15303_v48  ;;  %v5319_v63 = vmul.f32 1.442695, %v15333_v17  ;;  %v15336_v17 = vld [vmem:[#allocation272_spill] sm:$0xff] }
 0x5a8   : > { %7299 = vst.msk [vmem:[#allocation2 + $0xb0] sm:$0xff] %vm7276_vm8, %v13209_v47  ;;  %v5040_v33 = vpop.xlane.xlu1 %5039  ;;  %v13243_v10 = vpop.eup %9307  ;;  %9327 = vpow2.f32 %v5365_v6  ;;  %v5371_v60 = vmul.f32 1.442695, %v15305_v37  ;;  %v15307_v6 = vsub.f32 %v12906_v44, %v12922_v0  ;;  %v15310_v44 = vsub.f32 %v12926_v38, %v12942_v39  ;;  %v13304_v39 = vld [vmem:[#allocation2 + $0x1c0] sm:$0xff] }
 0x5a9   : > { %v13241_v28 = vmax.f32 %v13211_v19, %v5040_v33  ;;  %v5133_v21 = vpop.xlane.xlu0 %5132  ;;  %v13253_v62 = vpop.eup %9309  ;;  %9329 = vpow2.f32 %v5367_v51  ;;  %v15309_v33 = vsub.f32 %v12924_v55, %v12939_v58  ;;  %v15311_v55 = vsub.f32 %v12944_v32, %v12959_v53 }
 0x5aa   : > { %v13249_v52 = vmax.f32 %v13224_v36, %v5133_v21  ;;  %v13266_v27 = vpop.eup %9311  ;;  %9331 = vpow2.f32 %v5305_v34  ;;  %v5309_v35 = vmul.f32 1.442695, %v15307_v6  ;;  %v5373_v7 = vmul.f32 1.442695, %v15310_v44  ;;  %v13291_v6 = vld [vmem:[#allocation2 + $0xc8] sm:$0xff] }
 0x5ab   : > { %7300 = vst.msk [vmem:[#allocation2 + $0xb8] sm:$0xff] %vm7276_vm8, %v13241_v28  ;;  %5534 = vperm.xlu0 %9219, %v13241_v28   ;;  %5669 = vperm.xlu1 %9220, %v13111_v12   ;;  %15306 = vst [vmem:[#allocation283_spill] sm:$0xff] %v13266_v27  ;;  %v13275_v14 = vpop.eup %9313  ;;  %9333 = vpow2.f32 %v5307_v46  ;;  %v5311_v48 = vmul.f32 1.442695, %v15309_v33  ;;  %v5375_v58 = vmul.f32 1.442695, %v15311_v55  ;;  %v15338_v3 = vsub.f32 %v15336_v17, %v15337_v1 }
 0x5ac   : > { %7331 = vst.msk [vmem:[#allocation2 + $0x1b0] sm:$0xff] %vm7276_vm8, %v13249_v52  ;;  %v5136_v51 = vpop.xlane.xlu1 %5135  ;;  %15308 = vst [vmem:[#allocation284_spill] sm:$0xff] %v13275_v14  ;;  %v13283_v0 = vpop.eup %9315  ;;  %9335 = vpow2.f32 %v5369_v13  ;;  %v15313_v13 = vld [vmem:[#allocation259_spill] sm:$0xff]  ;;  %v15317_v55 = vld [vmem:[#allocation261_spill] sm:$0xff] }
 0x5ad   : > { %v13281_v34 = vmax.f32 %v13251_v16, %v5136_v51  ;;  %v5043_v21 = vpop.xlane.xlu0 %5042  ;;  %v13293_v46 = vpop.eup %9317  ;;  %9337 = vpow2.f32 %v5371_v60  ;;  %v15314_v60 = vld [vmem:[#allocation260_spill] sm:$0xff]  ;;  %v15318_v51 = vld [vmem:[#allocation263_spill] sm:$0xff]  ;;  %v13371_v27 = vld [vmem:[#allocation2 + $0xd8] sm:$0xff] }
 0x5ae   : > { %v13289_v37 = vmax.f32 %v13264_v18, %v5043_v21  ;;  %v13306_v38 = vpop.eup %9319  ;;  %9339 = vpow2.f32 %v5309_v35  ;;  %v15315_v33 = vsub.f32 %v15313_v13, %v15314_v60  ;;  %v15319_v20 = vsub.f32 %v15317_v55, %v15318_v51  ;;  %v15320_v60 = vld [vmem:[#allocation262_spill] sm:$0xff]  ;;  %v15324_v51 = vld [vmem:[#allocation267_spill] sm:$0xff] }
 0x5af   : > { %7332 = vst.msk [vmem:[#allocation2 + $0x1b8] sm:$0xff] %vm7276_vm8, %v13281_v34  ;;  %5694 = vperm.xlu0 %9219, %v13281_v34   ;;  %5519 = vperm.xlu1 %9220, %v13143_v54   ;;  %15312 = vst [vmem:[#allocation285_spill] sm:$0xff] %v13306_v38  ;;  %v13315_v44 = vpop.eup %9321  ;;  %9341 = vpow2.f32 %v5311_v48 }
 0x5b0   : > { %v5313_v32 = vmul.f32 1.442695, %v15315_v33  ;;  %7301 = vst.msk [vmem:[#allocation2 + $0xc0] sm:$0xff] %vm7276_vm8, %v13289_v37  ;;  %v5046_v21 = vpop.xlane.xlu1 %5045  ;;  %15316 = vst [vmem:[#allocation259_spill] sm:$0xff] %v13315_v44  ;;  %v5315_v2 = vmul.f32 1.442695, %v15319_v20  ;;  %v13323_v13 = vpop.eup %9323  ;;  %9343 = vpow2.f32 %v5373_v7 }
 0x5b1   : > { %v13321_v35 = vmax.f32 %v13291_v6, %v5046_v21  ;;  %v5139_v43 = vpop.xlane.xlu0 %5138  ;;  %v15321_v33 = vld [vmem:[#allocation264_spill] sm:$0xff]  ;;  %v13333_v48 = vpop.eup %9325  ;;  %9345 = vpow2.f32 %v5375_v58  ;;  %v15323_v20 = vld [vmem:[#allocation265_spill] sm:$0xff]  ;;  %v15327_v58 = vld [vmem:[#allocation266_spill] sm:$0xff] }
 0x5b2   : > { %v15322_v53 = vsub.f32 %v15320_v60, %v15321_v33  ;;  %v13329_v11 = vmax.f32 %v13304_v39, %v5139_v43  ;;  %v15325_v21 = vsub.f32 %v15323_v20, %v15324_v51  ;;  %v13344_v43 = vld [vmem:[#allocation2 + $0xd0] sm:$0xff]  ;;  %v13346_v7 = vpop.eup %9327  ;;  %9347 = vpow2.f32 %v5313_v32 }
 0x5b3   : > { %7302 = vst.msk [vmem:[#allocation2 + $0xc8] sm:$0xff] %vm7276_vm8, %v13321_v35  ;;  %5544 = vperm.xlu0 %9219, %v13321_v35   ;;  %5679 = vperm.xlu1 %9220, %v13175_v23   ;;  %15326 = vst [vmem:[#allocation260_spill] sm:$0xff] %v13346_v7  ;;  %9349 = vpow2.f32 %v5315_v2 }
 0x5b4   : > { %v5377_v61 = vmul.f32 1.442695, %v15322_v53  ;;  %v5379_v55 = vmul.f32 1.442695, %v15325_v21  ;;  %v15328_v53 = vld [vmem:[#allocation268_spill] sm:$0xff]  ;;  %7333 = vst.msk [vmem:[#allocation2 + $0x1c0] sm:$0xff] %vm7276_vm8, %v13329_v11  ;;  %v5142_v51 = vpop.xlane.xlu1 %5141  ;;  %v13355_v21 = vpop.eup %9329 }
 0x5b5   : > { %v15329_v60 = vsub.f32 %v15327_v58, %v15328_v53  ;;  %15330 = vst [vmem:[#allocation261_spill] sm:$0xff] %v13355_v21  ;;  %v13361_v32 = vmax.f32 %v13331_v29, %v5142_v51  ;;  %v5049_v7 = vpop.xlane.xlu0 %5048  ;;  %v13363_v58 = vpop.eup %9331  ;;  %v15334_v53 = vld [vmem:[#allocation270_spill] sm:$0xff]  ;;  %v5383_v51 = vmul.f32 1.442695, %v15338_v3  ;;  %v15343_v3 = vld [vmem:[#allocation275_spill] sm:$0xff]  ;;  %v15344_v21 = vld [vmem:[#allocation277_spill] sm:$0xff] }
 0x5b6   : > { %9351 = vpow2.f32 %v5377_v61  ;;  %v13369_v38 = vmax.f32 %v13344_v43, %v5049_v7  ;;  %v13373_v2 = vpop.eup %9333  ;;  %v15345_v31 = vsub.f32 %v15343_v3, %v15344_v21  ;;  %v15349_v21 = vld [vmem:[#allocation280_spill] sm:$0xff] }
 0x5b7   : > { %v5317_v33 = vmul.f32 1.442695, %v15329_v60  ;;  %v15335_v60 = vsub.f32 %v15334_v53, %v13022_v41  ;;  %9353 = vpow2.f32 %v5379_v55  ;;  %7334 = vst.msk [vmem:[#allocation2 + $0x1c8] sm:$0xff] %vm7276_vm8, %v13361_v32  ;;  %5704 = vperm.xlu0 %9219, %v13361_v32   ;;  %5529 = vperm.xlu1 %9220, %v13209_v47   ;;  %v13384_v41 = vld [vmem:[#allocation2 + $0x1d0] sm:$0xff]  ;;  %v13386_v61 = vpop.eup %9335 }
 0x5b8   : > { %15339 = vst [vmem:[#allocation263_spill] sm:$0xff] %v13386_v61  ;;  %v15340_v55 = vld [vmem:[#allocation273_spill] sm:$0xff]  ;;  %7303 = vst.msk [vmem:[#allocation2 + $0xd0] sm:$0xff] %vm7276_vm8, %v13369_v38  ;;  %v5052_v17 = vpop.xlane.xlu1 %5051  ;;  %v13395_v1 = vpop.eup %9337  ;;  %v5323_v44 = vmul.f32 1.442695, %v15345_v31  ;;  %v15348_v31 = vld [vmem:[#allocation278_spill] sm:$0xff] }
 0x5b9   : > { %v5381_v20 = vmul.f32 1.442695, %v15335_v60  ;;  %9355 = vpow2.f32 %v5317_v33  ;;  %v15341_v7 = vsub.f32 %v15340_v55, %v13042_v26  ;;  %15342 = vst [vmem:[#allocation262_spill] sm:$0xff] %v13395_v1  ;;  %v13401_v33 = vmax.f32 %v13371_v27, %v5052_v17  ;;  %v5145_v61 = vpop.xlane.xlu0 %5144  ;;  %v13403_v26 = vpop.eup %9339  ;;  %v15346_v55 = vld [vmem:[#allocation276_spill] sm:$0xff]  ;;  %v13411_v1 = vld [vmem:[#allocation2 + $0x1d8] sm:$0xff] }
 0x5ba   : > { %9357 = vpow2.f32 %v5319_v63  ;;  %v13409_v14 = vmax.f32 %v13384_v41, %v5145_v61  ;;  %v13413_v63 = vpop.eup %9341  ;;  %v15350_v17 = vsub.f32 %v15348_v31, %v15349_v21  ;;  %v15352_v61 = vld [vmem:[#allocation279_spill] sm:$0xff] }
 0x5bb   : > { %v5321_v53 = vmul.f32 1.442695, %v15341_v7  ;;  %9359 = vpow2.f32 %v5381_v20  ;;  %v15347_v7 = vsub.f32 %v15346_v55, %v13062_v56  ;;  %7304 = vst.msk [vmem:[#allocation2 + $0xd8] sm:$0xff] %vm7276_vm8, %v13401_v33  ;;  %5554 = vperm.xlu0 %9219, %v13401_v33   ;;  %5689 = vperm.xlu1 %9220, %v13249_v52   ;;  %v13422_v56 = vld [vmem:[#allocation2 + $0xe0] sm:$0xff]  ;;  %v13424_v20 = vpop.eup %9343  ;;  %v15353_v55 = vsub.f32 %v15352_v61, %v13082_v8 }
 0x5bc   : > { %9361 = vpow2.f32 %v5383_v51  ;;  %v5387_v3 = vmul.f32 1.442695, %v15350_v17  ;;  %15351 = vst [vmem:[#allocation264_spill] sm:$0xff] %v13424_v20  ;;  %7335 = vst.msk [vmem:[#allocation2 + $0x1d0] sm:$0xff] %vm7276_vm8, %v13409_v14  ;;  %v5148_v31 = vpop.xlane.xlu1 %5147  ;;  %v13433_v21 = vpop.eup %9345  ;;  %v15355_v17 = vsub.f32 %v13084_v22, %v13105_v45  ;;  %v15356_v61 = vsub.f32 %v13092_v15, %v13111_v12  ;;  %v13462_v15 = vld [vmem:[#allocation2 + $0x1e0] sm:$0xff] }
 0x5bd   : > { %v5385_v60 = vmul.f32 1.442695, %v15347_v7  ;;  %9363 = vpow2.f32 %v5321_v53  ;;  %v5325_v51 = vmul.f32 1.442695, %v15353_v55  ;;  %15354 = vst [vmem:[#allocation265_spill] sm:$0xff] %v13433_v21  ;;  %v13439_v53 = vmax.f32 %v13411_v1, %v5148_v31  ;;  %v5055_v20 = vpop.xlane.xlu0 %5054  ;;  %v13441_v8 = vpop.eup %9347  ;;  %v13449_v21 = vld [vmem:[#allocation2 + $0xe8] sm:$0xff] }
 0x5be   : > { %9365 = vpow2.f32 %v5323_v44  ;;  %v5327_v25 = vmul.f32 1.442695, %v15355_v17  ;;  %v5389_v55 = vmul.f32 1.442695, %v15356_v61  ;;  %v13447_v7 = vmax.f32 %v13422_v56, %v5055_v20  ;;  %v13451_v44 = vpop.eup %9349  ;;  %v13489_v31 = vld [vmem:[#allocation2 + $0x1e8] sm:$0xff] }
 0x5bf   : > { %9367 = vpow2.f32 %v5385_v60  ;;  %v15357_v22 = vsub.f32 %v13113_v5, %v13137_v49  ;;  %7336 = vst.msk [vmem:[#allocation2 + $0x1d8] sm:$0xff] %vm7276_vm8, %v13439_v53  ;;  %5714 = vperm.xlu0 %9219, %v13439_v53   ;;  %5539 = vperm.xlu1 %9220, %v13289_v37   ;;  %v15358_v60 = vsub.f32 %v13124_v59, %v13143_v54 }
 0x5c0   : > { %9369 = vpow2.f32 %v5387_v3  ;;  %v13464_v12 = vpop.eup %9351  ;;  %7305 = vst.msk [vmem:[#allocation2 + $0xe0] sm:$0xff] %vm7276_vm8, %v13447_v7  ;;  %v5058_v3 = vpop.xlane.xlu1 %5057  ;;  %v15359_v17 = vsub.f32 %v13145_v50, %v13169_v24  ;;  %v15360_v54 = vsub.f32 %v13156_v40, %v13175_v23  ;;  %v15361_v50 = vsub.f32 %v13177_v42, %v13201_v30  ;;  %v13502_v40 = vld [vmem:[#allocation2 + $0xf0] sm:$0xff] }
 0x5c1   : > { %v5391_v45 = vmul.f32 1.442695, %v15357_v22  ;;  %9371 = vpow2.f32 %v5325_v51  ;;  %v5329_v5 = vmul.f32 1.442695, %v15358_v60  ;;  %v13473_v20 = vpop.eup %9353  ;;  %v13479_v51 = vmax.f32 %v13449_v21, %v5058_v3  ;;  %v5151_v22 = vpop.xlane.xlu0 %5150  ;;  %v13529_v3 = vld [vmem:[#allocation2 + $0xf8] sm:$0xff] }
 0x5c2   : > { %9373 = vpow2.f32 %v5327_v25  ;;  %v5331_v61 = vmul.f32 1.442695, %v15359_v17  ;;  %v5393_v60 = vmul.f32 1.442695, %v15360_v54  ;;  %v13487_v49 = vmax.f32 %v13462_v15, %v5151_v22 }
 0x5c3   : > { %v13481_v59 = vpop.eup %9355  ;;  %9375 = vpow2.f32 %v5389_v55  ;;  %v5395_v24 = vmul.f32 1.442695, %v15361_v50  ;;  %7306 = vst.msk [vmem:[#allocation2 + $0xe8] sm:$0xff] %vm7276_vm8, %v13479_v51  ;;  %5564 = vperm.xlu0 %9219, %v13479_v51   ;;  %5699 = vperm.xlu1 %9220, %v13329_v11   ;;  %v15362_v55 = vsub.f32 %v13188_v4, %v13209_v47  ;;  %v15363_v22 = vsub.f32 %v13211_v19, %v13241_v28 }
 0x5c4   : > { %v13491_v25 = vpop.eup %9357  ;;  %9377 = vpow2.f32 %v5391_v45  ;;  %7337 = vst.msk [vmem:[#allocation2 + $0x1e0] sm:$0xff] %vm7276_vm8, %v13487_v49  ;;  %v5154_v45 = vpop.xlane.xlu1 %5153  ;;  %v15364_v47 = vsub.f32 %v13224_v36, %v13249_v52  ;;  %v15365_v19 = vsub.f32 %v13251_v16, %v13281_v34  ;;  %v13542_v36 = vld [vmem:[#allocation2 + $0x1f0] sm:$0xff] }
 0x5c5   : > { %v13504_v23 = vpop.eup %9359  ;;  %9379 = vpow2.f32 %v5329_v5  ;;  %v5333_v42 = vmul.f32 1.442695, %v15362_v55  ;;  %v5335_v54 = vmul.f32 1.442695, %v15363_v22  ;;  %v13519_v5 = vmax.f32 %v13489_v31, %v5154_v45  ;;  %v5061_v50 = vpop.xlane.xlu0 %5060  ;;  %v13571_v45 = vld [vmem:[#allocation2 + $0x1f8] sm:$0xff] }
 0x5c6   : > { %v13513_v17 = vpop.eup %9361  ;;  %9381 = vpow2.f32 %v5331_v61  ;;  %v5397_v55 = vmul.f32 1.442695, %v15364_v47  ;;  %v13527_v30 = vmax.f32 %v13502_v40, %v5061_v50  ;;  %v5399_v28 = vmul.f32 1.442695, %v15365_v19 }
 0x5c7   : > { %v13521_v4 = vpop.eup %9363  ;;  %9383 = vpow2.f32 %v5393_v60  ;;  %7338 = vst.msk [vmem:[#allocation2 + $0x1e8] sm:$0xff] %vm7276_vm8, %v13519_v5  ;;  %5724 = vperm.xlu0 %9219, %v13519_v5   ;;  %5549 = vperm.xlu1 %9220, %v13369_v38   ;;  %v15366_v60 = vsub.f32 %v13264_v18, %v13289_v37  ;;  %v15367_v50 = vsub.f32 %v13291_v6, %v13321_v35 }
 0x5c8   : > { %v13531_v61 = vpop.eup %9365  ;;  %9385 = vpow2.f32 %v5395_v24  ;;  %7307 = vst.msk [vmem:[#allocation2 + $0xf0] sm:$0xff] %vm7276_vm8, %v13527_v30  ;;  %v5064_v24 = vpop.xlane.xlu1 %5063 }
 0x5c9   : > { %v13544_v52 = vpop.eup %9367  ;;  %9387 = vpow2.f32 %v5333_v42  ;;  %v5337_v16 = vmul.f32 1.442695, %v15366_v60  ;;  %v5339_v47 = vmul.f32 1.442695, %v15367_v50  ;;  %v5252_v42 = vsub.f32 %v13371_v27, %v13401_v33  ;;  %v5157_v37 = vpop.xlane.xlu0 %5156 }
 0x5ca   : > { %v13553_v22 = vpop.eup %9369  ;;  %9389 = vpow2.f32 %v5335_v54  ;;  %v13561_v18 = vmax.f32 %v13529_v3, %v5064_v24  ;;  %v15368_v60 = vsub.f32 %v13304_v39, %v13329_v11  ;;  %v13569_v54 = vmax.f32 %v13542_v36, %v5157_v37 }
 0x5cb   : > { %v13563_v19 = vpop.eup %9371  ;;  %9391 = vpow2.f32 %v5397_v55  ;;  %v15369_v27 = vsub.f32 %v13331_v29, %v13361_v32  ;;  %5709 = vperm.xlu1 %9220, %v13409_v14   ;;  %v15370_v39 = vsub.f32 %v13344_v43, %v13369_v38  ;;  %v5343_v24 = vmul.f32 1.442695, %v5252_v42 }
 0x5cc   : > { %v5401_v34 = vmul.f32 1.442695, %v15368_v60  ;;  %v13573_v6 = vpop.eup %9373  ;;  %9393 = vpow2.f32 %v5399_v28  ;;  %7308 = vst.msk [vmem:[#allocation2 + $0xf8] sm:$0xff] %vm7276_vm8, %v13561_v18  ;;  %5574 = vperm.xlu0 %9219, %v13561_v18   ;;  %7339 = vst.msk [vmem:[#allocation2 + $0x1f0] sm:$0xff] %vm7276_vm8, %v13569_v54  ;;  %v5160_v32 = vpop.xlane.xlu1 %5159  ;;  %v15371_v38 = vsub.f32 %v13384_v41, %v13409_v14  ;;  %v15372_v60 = vsub.f32 %v13411_v1, %v13439_v53 }
 0x5cd   : > { %v5403_v35 = vmul.f32 1.442695, %v15369_v27  ;;  %v13584_v11 = vpop.eup %9375  ;;  %9395 = vpow2.f32 %v5337_v16  ;;  %v5341_v55 = vmul.f32 1.442695, %v15370_v39  ;;  %v13596_v50 = vmax.f32 %v13571_v45, %v5160_v32  ;;  %v15376_v32 = vld [vmem:[#allocation163_spill] sm:$0xff] }
 0x5ce   : > { %v13593_v28 = vpop.eup %9377  ;;  %9397 = vpow2.f32 %v5339_v47  ;;  %v5405_v43 = vmul.f32 1.442695, %v15371_v38  ;;  %v5407_v27 = vmul.f32 1.442695, %v15372_v60  ;;  %v15374_v14 = vsub.f32 %v13422_v56, %v13447_v7  ;;  %v15377_v56 = vld [vmem:[#allocation164_spill] sm:$0xff] }
 0x5cf   : > { %v13598_v37 = vpop.eup %9379  ;;  %9399 = vpow2.f32 %v5401_v34  ;;  %7340 = vst.msk [vmem:[#allocation2 + $0x1f8] sm:$0xff] %vm7276_vm8, %v13596_v50  ;;  %5559 = vperm.xlu1 %9220, %v13447_v7   ;;  %v15375_v1 = vsub.f32 %v13449_v21, %v13479_v51 }
 0x5d0   : > { %v13603_v16 = vpop.eup %9381  ;;  %9401 = vpow2.f32 %v5403_v35  ;;  %5734 = vperm.xlu0 %9219, %v13596_v50   ;;  %v5345_v41 = vmul.f32 1.442695, %v15374_v14 }
 0x5d1   : > { %v13614_v34 = vpop.eup %9383  ;;  %9403 = vpow2.f32 %v5341_v55  ;;  %v5347_v53 = vmul.f32 1.442695, %v15375_v1  ;;  %v5420_v35 = vpop.permute.xlu0 %5419 }
 0x5d2   : > { %15373 = vst [vmem:[#allocation267_spill] sm:$0xff] %v13614_v34  ;;  %v13619_v42 = vpop.eup %9385  ;;  %9405 = vpow2.f32 %v5343_v24  ;;  %v5737_v38 = vsub.f32 %v15376_v32, %v5420_v35  ;;  %v5738_v60 = vsub.f32 -1e+30, %v5420_v35  ;;  %v5580_v47 = vpop.permute.xlu1 %5579 }
 0x5d3   : > { %v13624_v39 = vpop.eup %9387  ;;  %9407 = vpow2.f32 %v5405_v43  ;;  %v5801_v7 = vsub.f32 %v15377_v56, %v5580_v47  ;;  %v5802_v14 = vsub.f32 -1e+30, %v5580_v47  ;;  %5719 = vperm.xlu1 %9220, %v13487_v49  }
 0x5d4   : > { %v13627_v55 = vpop.eup %9389  ;;  %9409 = vpow2.f32 %v5407_v27  ;;  %6256 = vperm.xlu0 %9219, %v13235_v57   ;;  %v5865_v51 = vmul.f32 1.442695, %v5737_v38  ;;  %v5867_v24 = vmul.f32 1.442695, %v5738_v60  ;;  %v15379_v27 = vld [vmem:[#allocation165_spill] sm:$0xff]  ;;  %v15380_v57 = vld [vmem:[#allocation166_spill] sm:$0xff] }
 0x5d5   : > { %v13632_v21 = vpop.eup %9391  ;;  %9411 = vpow2.f32 %v5345_v41  ;;  %v5993_v1 = vmul.f32 1.442695, %v5801_v7  ;;  %v5995_v35 = vmul.f32 1.442695, %v5802_v14  ;;  %v5585_v32 = vpop.permute.xlu0 %5584 }
 0x5d6   : > { %15378 = vst [vmem:[#allocation266_spill] sm:$0xff] %v13632_v21  ;;  %v13634_v43 = vpop.eup %9393  ;;  %9413 = vpow2.f32 %v5347_v53  ;;  %v5803_v47 = vsub.f32 %v15379_v27, %v5585_v32  ;;  %v5804_v56 = vsub.f32 -1e+30, %v5585_v32  ;;  %v5425_v33 = vpop.permute.xlu1 %5424 }
 0x5d7   : > { %v13636_v29 = vpop.eup %9395  ;;  %9415 = vpow2.f32 %v5865_v51  ;;  %v5739_v41 = vsub.f32 %v15380_v57, %v5425_v33  ;;  %v5740_v38 = vsub.f32 -1e+30, %v5425_v33  ;;  %5569 = vperm.xlu1 %9220, %v13527_v30  }
 0x5d8   : > { %v13639_v34 = vpop.eup %9397  ;;  %9417 = vpow2.f32 %v5867_v24  ;;  %6266 = vperm.xlu0 %9219, %v13253_v62   ;;  %v5997_v60 = vmul.f32 1.442695, %v5803_v47  ;;  %v5999_v7 = vmul.f32 1.442695, %v5804_v56  ;;  %v15381_v24 = vsub.f32 %v13462_v15, %v13487_v49  ;;  %v15383_v47 = vld [vmem:[#allocation167_spill] sm:$0xff] }
 0x5d9   : > { %v13644_v53 = vpop.eup %9399  ;;  %9419 = vpow2.f32 %v5993_v1  ;;  %v5869_v51 = vmul.f32 1.442695, %v5739_v41  ;;  %v5871_v32 = vmul.f32 1.442695, %v5740_v38  ;;  %v15382_v62 = vsub.f32 %v13489_v31, %v13519_v5 }
 0x5da   : > { %v13646_v14 = vpop.eup %9401  ;;  %9421 = vpow2.f32 %v5995_v35  ;;  %v5409_v33 = vmul.f32 1.442695, %v15381_v24  ;;  %v5430_v57 = vpop.permute.xlu1 %5429  ;;  %v15385_v15 = vsub.f32 %v13502_v40, %v13527_v30  ;;  %v15386_v31 = vsub.f32 %v13529_v3, %v13561_v18 }
 0x5db   : > { %v13648_v27 = vpop.eup %9403  ;;  %9423 = vpow2.f32 %v5997_v60  ;;  %v5411_v1 = vmul.f32 1.442695, %v15382_v62  ;;  %v5741_v56 = vsub.f32 %v15383_v47, %v5430_v57  ;;  %5729 = vperm.xlu1 %9220, %v13569_v54   ;;  %v15388_v62 = vld [vmem:[#allocation170_spill] sm:$0xff]  ;;  %v5742_v18 = vsub.f32 -1e+30, %v5430_v57 }
 0x5dc   : > { %v13653_v21 = vpop.eup %9405  ;;  %9425 = vpow2.f32 %v5999_v7  ;;  %6276 = vperm.xlu0 %9219, %v13293_v46   ;;  %v5349_v49 = vmul.f32 1.442695, %v15385_v15  ;;  %v5351_v5 = vmul.f32 1.442695, %v15386_v31 }
 0x5dd   : > { %v13661_v35 = vpop.eup %9407  ;;  %9427 = vpow2.f32 %v5869_v51  ;;  %v5873_v60 = vmul.f32 1.442695, %v5741_v56  ;;  %v15389_v51 = vld [vmem:[#allocation169_spill] sm:$0xff]  ;;  %v5875_v57 = vmul.f32 1.442695, %v5742_v18 }
 0x5de   : > { %15384 = vst [vmem:[#allocation268_spill] sm:$0xff] %v13661_v35  ;;  %v13666_v41 = vpop.eup %9409  ;;  %9429 = vpow2.f32 %v5871_v32  ;;  %v5595_v7 = vpop.permute.xlu0 %5594 }
 0x5df   : > { %v13671_v38 = vpop.eup %9411  ;;  %9431 = vpow2.f32 %v5409_v33  ;;  %v5590_v46 = vpop.permute.xlu1 %5589  ;;  %v5807_v40 = vsub.f32 %v15388_v62, %v5595_v7  ;;  %v5808_v30 = vsub.f32 -1e+30, %v5595_v7  ;;  %6251 = vperm.xlu1 %9220, %v13203_v9  }
 0x5e0   : > { %15387 = vst [vmem:[#allocation269_spill] sm:$0xff] %v13671_v38  ;;  %v13673_v24 = vpop.eup %9413  ;;  %9433 = vpow2.f32 %v5411_v1  ;;  %v5805_v47 = vsub.f32 %v15389_v51, %v5590_v46  ;;  %6286 = vperm.xlu0 %9219, %v13333_v48   ;;  %v5806_v32 = vsub.f32 -1e+30, %v5590_v46  ;;  %v15390_v51 = vld [vmem:[#allocation168_spill] sm:$0xff] }
 0x5e1   : > { %v9416_v3 = vpop.eup %9415  ;;  %9435 = vpow2.f32 %v5349_v49  ;;  %v6005_v56 = vmul.f32 1.442695, %v5807_v40  ;;  %v6007_v15 = vmul.f32 1.442695, %v5808_v30  ;;  %v15391_v30 = vsub.f32 %v13542_v36, %v13569_v54 }
 0x5e2   : > { %v9418_v33 = vpop.eup %9417  ;;  %9437 = vpow2.f32 %v5351_v5  ;;  %v6001_v31 = vmul.f32 1.442695, %v5805_v47  ;;  %v6003_v1 = vmul.f32 1.442695, %v5806_v32  ;;  %v15392_v32 = vsub.f32 %v13571_v45, %v13596_v50 }
 0x5e3   : > { %v9420_v38 = vpop.eup %9419  ;;  %9439 = vpow2.f32 %v5873_v60  ;;  %v5435_v62 = vpop.permute.xlu1 %5434  ;;  %6261 = vperm.xlu1 %9220, %v13243_v10   ;;  %v5413_v47 = vmul.f32 1.442695, %v15391_v30 }
 0x5e4   : > { %v9422_v7 = vpop.eup %9421  ;;  %9441 = vpow2.f32 %v6005_v56  ;;  %v5743_v35 = vsub.f32 %v15390_v51, %v5435_v62  ;;  %v5744_v9 = vsub.f32 -1e+30, %v5435_v62  ;;  %6296 = vperm.xlu0 %9219, %v13373_v2   ;;  %v5415_v56 = vmul.f32 1.442695, %v15392_v32  ;;  %v15394_v51 = vld [vmem:[#allocation171_spill] sm:$0xff] }
 0x5e5   : > { %v9424_v48 = vpop.eup %9423  ;;  %9443 = vpow2.f32 %v6007_v15  ;;  %v15393_v15 = vld [vmem:[#allocation174_spill] sm:$0xff] }
 0x5e6   : > { %v9426_v49 = vpop.eup %9425  ;;  %9445 = vpow2.f32 %v6001_v31  ;;  %v5877_v5 = vmul.f32 1.442695, %v5743_v35  ;;  %v5879_v46 = vmul.f32 1.442695, %v5744_v9  ;;  %v6153_v40 = vpack.c.bf16 %v9424_v48, %v9420_v38  ;;  %v5605_v10 = vpop.permute.xlu0 %5604 }
 0x5e7   : > { %v9428_v60 = vpop.eup %9427  ;;  %9447 = vpow2.f32 %v6003_v1  ;;  %v5440_v2 = vpop.permute.xlu1 %5439  ;;  %v6154_v62 = vpack.c.bf16 %v9426_v49, %v9422_v7  ;;  %v5811_v31 = vsub.f32 %v15393_v15, %v5605_v10  ;;  %v5812_v35 = vsub.f32 -1e+30, %v5605_v10  ;;  %6271 = vperm.xlu1 %9220, %v13283_v0   ;;  %v15397_v15 = vld [vmem:[#allocation172_spill] sm:$0xff] }
 0x5e8   : > { %v9430_v18 = vpop.eup %9429  ;;  %9449 = vpow2.f32 %v5877_v5  ;;  %v5745_v38 = vsub.f32 %v15394_v51, %v5440_v2  ;;  %6306 = vperm.xlu0 %9219, %v13413_v63   ;;  %v6121_v54 = vpack.c.bf16 %v9428_v60, %v9416_v3  ;;  %v5746_v48 = vsub.f32 -1e+30, %v5440_v2  ;;  %v15395_v5 = vld [vmem:[#allocation173_spill] sm:$0xff]  ;;  %v15396_v2 = vld [vmem:[#allocation178_spill] sm:$0xff] }
 0x5e9   : > { %v13692_v36 = vpop.eup %9431  ;;  %9451 = vpow2.f32 %v5879_v46  ;;  %7018 = vmatprep.mubr.bf16.mxu1 %v6154_v62  ;;  %v6122_v45 = vpack.c.bf16 %v9430_v18, %v9418_v33  ;;  %v6013_v1 = vmul.f32 1.442695, %v5811_v31  ;;  %v6015_v7 = vmul.f32 1.442695, %v5812_v35 }
 0x5ea   : > { %v13694_v50 = vpop.eup %9433  ;;  %9453 = vpow2.f32 %v5875_v57  ;;  %7019 = vmatmul.mubr.bf16.vlgmr.msra.gmra.mrb[64].mxu1 %v6153_v40  ;;  %v5881_v49 = vmul.f32 1.442695, %v5745_v38 }
 0x5eb   : > { %v13696_v9 = vpop.eup %9435  ;;  %9455 = vpow2.f32 %v5413_v47  ;;  %6761 = vmatprep.mubr.bf16.mxu0 %v6122_v45  ;;  %v5600_v0 = vpop.permute.xlu1 %5599  ;;  %6281 = vperm.xlu1 %9220, %v13323_v13   ;;  %v5883_v47 = vmul.f32 1.442695, %v5746_v48 }
 0x5ec   : > { %v13698_v63 = vpop.eup %9437  ;;  %9457 = vpow2.f32 %v5415_v56  ;;  %6762 = vmatmul.mubr.bf16.vlgmr.msra.gmra.mrb[64].mxu0 %v6121_v54  ;;  %v5809_v33 = vsub.f32 %v15395_v5, %v5600_v0  ;;  %v5810_v3 = vsub.f32 -1e+30, %v5600_v0  ;;  %6316 = vperm.xlu0 %9219, %v13451_v44  }
 0x5ed   : > { %v9440_v57 = vpop.eup %9439  ;;  %9459 = vpow2.f32 %v6013_v1 }
 0x5ee   : > { %v9442_v46 = vpop.eup %9441  ;;  %9461 = vpow2.f32 %v6015_v7  ;;  %v6009_v40 = vmul.f32 1.442695, %v5809_v33  ;;  %v6011_v60 = vmul.f32 1.442695, %v5810_v3  ;;  %v5615_v32 = vpop.permute.xlu0 %5614 }
 0x5ef   : > { %v9444_v30 = vpop.eup %9443  ;;  %9463 = vpow2.f32 %v5881_v49  ;;  %v5445_v10 = vpop.permute.xlu1 %5444  ;;  %v5815_v62 = vsub.f32 %v15396_v2, %v5615_v32  ;;  %v5816_v18 = vsub.f32 -1e+30, %v5615_v32  ;;  %6291 = vperm.xlu1 %9220, %v13363_v58   ;;  %v15398_v58 = vld [vmem:[#allocation180_spill] sm:$0xff] }
 0x5f0   : > { %v9446_v56 = vpop.eup %9445  ;;  %9465 = vpow2.f32 %v6009_v40  ;;  %v5747_v13 = vsub.f32 %v15397_v15, %v5445_v10  ;;  %v5748_v44 = vsub.f32 -1e+30, %v5445_v10  ;;  %6326 = vperm.xlu0 %9219, %v13491_v25  }
 0x5f1   : > { %v9448_v31 = vpop.eup %9447  ;;  %9467 = vpow2.f32 %v6011_v60  ;;  %v6155_v35 = vpack.c.bf16 %v9442_v46, %v9446_v56  ;;  %v6021_v38 = vmul.f32 1.442695, %v5815_v62  ;;  %v6023_v45 = vmul.f32 1.442695, %v5816_v18  ;;  %v15399_v60 = vld [vmem:[#allocation175_spill] sm:$0xff] }
 0x5f2   : > { %v9450_v51 = vpop.eup %9449  ;;  %v5885_v54 = vmul.f32 1.442695, %v5747_v13  ;;  %v6156_v1 = vpack.c.bf16 %v9444_v30, %v9448_v31  ;;  %9469 = vpow2.f32 %v5883_v47  ;;  %v5887_v48 = vmul.f32 1.442695, %v5748_v44  ;;  %v5465_v49 = vpop.permute.xlu0 %5464  ;;  %v15400_v13 = vld [vmem:[#allocation182_spill] sm:$0xff] }
 0x5f3   : > { %v9452_v7 = vpop.eup %9451  ;;  %v5450_v0 = vpop.permute.xlu1 %5449  ;;  %v6123_v5 = vpack.c.bf16 %v9450_v51, %v9440_v57  ;;  %9471 = vpow2.f32 %v6021_v38  ;;  %v5755_v3 = vsub.f32 %v15398_v58, %v5465_v49  ;;  %v5756_v40 = vsub.f32 -1e+30, %v5465_v49  ;;  %6301 = vperm.xlu1 %9220, %v13403_v26   ;;  %v15402_v58 = vld [vmem:[#allocation184_spill] sm:$0xff] }
 0x5f4   : > { %v9454_v33 = vpop.eup %9453  ;;  %7026 = vmatprep.mubr.bf16.mxu1 %v6156_v1  ;;  %v5749_v25 = vsub.f32 %v15399_v60, %v5450_v0  ;;  %9473 = vpow2.f32 %v6023_v45  ;;  %v5750_v30 = vsub.f32 -1e+30, %v5450_v0  ;;  %6336 = vperm.xlu0 %9219, %v13531_v61   ;;  %v15401_v61 = vld [vmem:[#allocation177_spill] sm:$0xff] }
 0x5f5   : > { %v13710_v46 = vpop.eup %9455  ;;  %7027 = vmatmul.mubr.bf16.gmra.mrb[68].mxu1 %v6155_v35  ;;  %v6124_v47 = vpack.c.bf16 %v9452_v7, %v9454_v33  ;;  %9475 = vpow2.f32 %v5885_v54  ;;  %v5901_v57 = vmul.f32 1.442695, %v5755_v3  ;;  %v5903_v10 = vmul.f32 1.442695, %v5756_v40  ;;  %v15403_v40 = vld [vmem:[#allocation176_spill] sm:$0xff] }
 0x5f6   : > { %v13713_v32 = vpop.eup %9457  ;;  %v5889_v56 = vmul.f32 1.442695, %v5749_v25  ;;  %9477 = vpow2.f32 %v5887_v48  ;;  %v5891_v62 = vmul.f32 1.442695, %v5750_v30  ;;  %v5625_v18 = vpop.permute.xlu0 %5624 }
 0x5f7   : > { %v9460_v2 = vpop.eup %9459  ;;  %6769 = vmatprep.mubr.bf16.mxu0 %v6124_v47  ;;  %v5610_v26 = vpop.permute.xlu1 %5609  ;;  %9479 = vpow2.f32 %v5901_v57  ;;  %v5819_v31 = vsub.f32 %v15400_v13, %v5625_v18  ;;  %v5820_v44 = vsub.f32 -1e+30, %v5625_v18  ;;  %6311 = vperm.xlu1 %9220, %v13441_v8   ;;  %v15404_v13 = vld [vmem:[#allocation186_spill] sm:$0xff] }
 0x5f8   : > { %v9462_v15 = vpop.eup %9461  ;;  %6770 = vmatmul.mubr.bf16.gmra.mrb[68].mxu0 %v6123_v5  ;;  %v5813_v35 = vsub.f32 %v15401_v61, %v5610_v26  ;;  %9481 = vpow2.f32 %v5903_v10  ;;  %v5814_v38 = vsub.f32 -1e+30, %v5610_v26  ;;  %6346 = vperm.xlu0 %9219, %v13573_v6  }
 0x5f9   : > { %v13718_v51 = vpop.eup %9463  ;;  %9483 = vpow2.f32 %v5889_v56  ;;  %v6029_v54 = vmul.f32 1.442695, %v5819_v31  ;;  %v6031_v1 = vmul.f32 1.442695, %v5820_v44 }
 0x5fa   : > { %v9466_v45 = vpop.eup %9465  ;;  %v6017_v7 = vmul.f32 1.442695, %v5813_v35  ;;  %9485 = vpow2.f32 %v5891_v62  ;;  %v6019_v49 = vmul.f32 1.442695, %v5814_v38  ;;  %v5475_v0 = vpop.permute.xlu0 %5474 }
 0x5fb   : > { %v9468_v48 = vpop.eup %9467  ;;  %v5455_v5 = vpop.permute.xlu1 %5454  ;;  %v6157_v33 = vpack.c.bf16 %v9460_v2, %v9466_v45  ;;  %9487 = vpow2.f32 %v6029_v54  ;;  %v5759_v8 = vsub.f32 %v15402_v58, %v5475_v0  ;;  %v5760_v3 = vsub.f32 -1e+30, %v5475_v0  ;;  %6321 = vperm.xlu1 %9220, %v13481_v59   ;;  %v15406_v58 = vld [vmem:[#allocation188_spill] sm:$0xff] }
 0x5fc   : > { %v5751_v60 = vsub.f32 %v15403_v40, %v5455_v5  ;;  %v9470_v6 = vpop.eup %9469  ;;  %9489 = vpow2.f32 %v6031_v1  ;;  %v5752_v25 = vsub.f32 -1e+30, %v5455_v5  ;;  %6356 = vperm.xlu0 %9219, %v13603_v16   ;;  %v6158_v30 = vpack.c.bf16 %v9462_v15, %v9468_v48  ;;  %v15405_v15 = vld [vmem:[#allocation179_spill] sm:$0xff] }
 0x5fd   : > { %v13725_v47 = vpop.eup %9471  ;;  %9491 = vpow2.f32 %v6017_v7  ;;  %v5909_v57 = vmul.f32 1.442695, %v5759_v8  ;;  %v5911_v10 = vmul.f32 1.442695, %v5760_v3 }
 0x5fe   : > { %v5893_v56 = vmul.f32 1.442695, %v5751_v60  ;;  %v13727_v2 = vpop.eup %9473  ;;  %9493 = vpow2.f32 %v6019_v49  ;;  %v5895_v62 = vmul.f32 1.442695, %v5752_v25  ;;  %7034 = vmatprep.mubr.bf16.mxu1 %v6158_v30  ;;  %v5635_v18 = vpop.permute.xlu0 %5634 }
 0x5ff   : > { %v5460_v26 = vpop.permute.xlu1 %5459  ;;  %v9476_v59 = vpop.eup %9475  ;;  %9495 = vpow2.f32 %v5909_v57  ;;  %7035 = vmatmul.mubr.bf16.gmra.mrb[72].mxu1 %v6157_v33  ;;  %v5823_v31 = vsub.f32 %v15404_v13, %v5635_v18  ;;  %v5824_v16 = vsub.f32 -1e+30, %v5635_v18  ;;  %6331 = vperm.xlu1 %9220, %v13521_v4  }
 0x600   : > { %v5753_v44 = vsub.f32 %v15405_v15, %v5460_v26  ;;  %v9478_v61 = vpop.eup %9477  ;;  %9497 = vpow2.f32 %v5911_v10  ;;  %v5754_v35 = vsub.f32 -1e+30, %v5460_v26  ;;  %6366 = vperm.xlu0 %9219, %v13627_v55   ;;  %v6125_v38 = vpack.c.bf16 %v9476_v59, %v13718_v51  ;;  %v15407_v51 = vld [vmem:[#allocation181_spill] sm:$0xff]  ;;  %v15408_v26 = vld [vmem:[#allocation190_spill] sm:$0xff] }
 0x601   : > { %v13734_v45 = vpop.eup %9479  ;;  %9499 = vpow2.f32 %v5893_v56  ;;  %v6037_v54 = vmul.f32 1.442695, %v5823_v31  ;;  %v6039_v1 = vmul.f32 1.442695, %v5824_v16  ;;  %v6126_v0 = vpack.c.bf16 %v9478_v61, %v9470_v6  ;;  %v15409_v31 = vld [vmem:[#allocation183_spill] sm:$0xff] }
 0x602   : > { %v5897_v7 = vmul.f32 1.442695, %v5753_v44  ;;  %v13736_v48 = vpop.eup %9481  ;;  %9501 = vpow2.f32 %v5895_v62  ;;  %v5899_v49 = vmul.f32 1.442695, %v5754_v35  ;;  %v5485_v5 = vpop.permute.xlu0 %5484 }
 0x603   : > { %v5620_v4 = vpop.permute.xlu1 %5619  ;;  %v13738_v33 = vpop.eup %9483  ;;  %9503 = vpow2.f32 %v6037_v54  ;;  %v5763_v55 = vsub.f32 %v15406_v58, %v5485_v5  ;;  %v5764_v8 = vsub.f32 -1e+30, %v5485_v5  ;;  %6341 = vperm.xlu1 %9220, %v13563_v19   ;;  %6777 = vmatprep.mubr.bf16.mxu0 %v6126_v0 }
 0x604   : > { %v5817_v3 = vsub.f32 %v15407_v51, %v5620_v4  ;;  %v13743_v40 = vpop.eup %9485  ;;  %9505 = vpow2.f32 %v6039_v1  ;;  %v5818_v60 = vsub.f32 -1e+30, %v5620_v4  ;;  %6376 = vperm.xlu0 %9219, %v13639_v34   ;;  %6778 = vmatmul.mubr.bf16.gmra.mrb[72].mxu0 %v6125_v38  ;;  %v15410_v4 = vld [vmem:[#allocation192_spill] sm:$0xff] }
 0x605   : > { %v13746_v6 = vpop.eup %9487  ;;  %9507 = vpow2.f32 %v5897_v7  ;;  %v5917_v25 = vmul.f32 1.442695, %v5763_v55  ;;  %v5919_v30 = vmul.f32 1.442695, %v5764_v8 }
 0x606   : > { %v6025_v57 = vmul.f32 1.442695, %v5817_v3  ;;  %v13748_v10 = vpop.eup %9489  ;;  %9509 = vpow2.f32 %v5899_v49  ;;  %v6027_v56 = vmul.f32 1.442695, %v5818_v60  ;;  %v5645_v62 = vpop.permute.xlu0 %5644  ;;  %v15412_v3 = vld [vmem:[#allocation281_spill] sm:$0xff] }
 0x607   : > { %v5470_v19 = vpop.permute.xlu1 %5469  ;;  %v9492_v18 = vpop.eup %9491  ;;  %9511 = vpow2.f32 %v5917_v25  ;;  %v5827_v59 = vsub.f32 %v15408_v26, %v5645_v62  ;;  %v5828_v13 = vsub.f32 -1e+30, %v5645_v62  ;;  %6351 = vperm.xlu1 %9220, %v13598_v37  }
 0x608   : > { %v5757_v34 = vsub.f32 %v15409_v31, %v5470_v19  ;;  %v9494_v16 = vpop.eup %9493  ;;  %9513 = vpow2.f32 %v5919_v30  ;;  %v5758_v15 = vsub.f32 -1e+30, %v5470_v19  ;;  %6386 = vperm.xlu0 %9219, %v13653_v21   ;;  %v6159_v44 = vpack.c.bf16 %v13725_v47, %v9492_v18  ;;  %v15411_v47 = vld [vmem:[#allocation185_spill] sm:$0xff]  ;;  %v15414_v31 = vld [vmem:[#allocation187_spill] sm:$0xff] }
 0x609   : > { %v13755_v61 = vpop.eup %9495  ;;  %9515 = vpow2.f32 %v6025_v57  ;;  %v6045_v35 = vmul.f32 1.442695, %v5827_v59  ;;  %v6047_v38 = vmul.f32 1.442695, %v5828_v13  ;;  %v6160_v49 = vpack.c.bf16 %v13727_v2, %v9494_v16  ;;  %v15413_v59 = vld [vmem:[#allocation194_spill] sm:$0xff] }
 0x60a   : > { %v5905_v54 = vmul.f32 1.442695, %v5757_v34  ;;  %v13757_v1 = vpop.eup %9497  ;;  %9517 = vpow2.f32 %v6027_v56  ;;  %v5907_v7 = vmul.f32 1.442695, %v5758_v15  ;;  %v5495_v37 = vpop.permute.xlu0 %5494 }
 0x60b   : > { %v5630_v0 = vpop.permute.xlu1 %5629  ;;  %v9500_v5 = vpop.eup %9499  ;;  %9519 = vpow2.f32 %v6045_v35  ;;  %v5767_v21 = vsub.f32 %v15410_v4, %v5495_v37  ;;  %v5768_v58 = vsub.f32 -1e+30, %v5495_v37  ;;  %6361 = vperm.xlu1 %9220, %v13624_v39   ;;  %7042 = vmatprep.mubr.bf16.mxu1 %v6160_v49  ;;  %v15416_v4 = vld [vmem:[#allocation197_spill] sm:$0xff] }
 0x60c   : > { %v5821_v55 = vsub.f32 %v15411_v47, %v5630_v0  ;;  %v9502_v8 = vpop.eup %9501  ;;  %9521 = vpow2.f32 %v6047_v38  ;;  %v5822_v51 = vsub.f32 -1e+30, %v5630_v0  ;;  %6416 = vperm.xlu0 %9219, %v15412_v3   ;;  %v6127_v60 = vpack.c.bf16 %v9500_v5, %v13738_v33  ;;  %7043 = vmatmul.mubr.bf16.gmra.mrb[76].mxu1 %v6159_v44  ;;  %v15415_v44 = vld [vmem:[#allocation284_spill] sm:$0xff] }
 0x60d   : > { %v13765_v2 = vpop.eup %9503  ;;  %9523 = vpow2.f32 %v5905_v54  ;;  %v5925_v25 = vmul.f32 1.442695, %v5767_v21  ;;  %v5927_v30 = vmul.f32 1.442695, %v5768_v58  ;;  %v6128_v39 = vpack.c.bf16 %v9502_v8, %v13743_v40  ;;  %v15417_v58 = vld [vmem:[#allocation199_spill] sm:$0xff] }
 0x60e   : > { %v6033_v57 = vmul.f32 1.442695, %v5821_v55  ;;  %v13767_v56 = vpop.eup %9505  ;;  %9525 = vpow2.f32 %v5907_v7  ;;  %v6035_v62 = vmul.f32 1.442695, %v5822_v51  ;;  %v5655_v19 = vpop.permute.xlu0 %5654  ;;  %v15418_v55 = vld [vmem:[#allocation189_spill] sm:$0xff] }
 0x60f   : > { %v5480_v18 = vpop.permute.xlu1 %5479  ;;  %v9508_v26 = vpop.eup %9507  ;;  %9527 = vpow2.f32 %v5925_v25  ;;  %v5831_v13 = vsub.f32 %v15413_v59, %v5655_v19  ;;  %v5832_v33 = vsub.f32 -1e+30, %v5655_v19  ;;  %6371 = vperm.xlu1 %9220, %v13636_v29   ;;  %6785 = vmatprep.mubr.bf16.mxu0 %v6128_v39 }
 0x610   : > { %v5761_v34 = vsub.f32 %v15414_v31, %v5480_v18  ;;  %v9510_v16 = vpop.eup %9509  ;;  %9529 = vpow2.f32 %v5927_v30  ;;  %v5762_v15 = vsub.f32 -1e+30, %v5480_v18  ;;  %6426 = vperm.xlu0 %9219, %v15415_v44   ;;  %6786 = vmatmul.mubr.bf16.gmra.mrb[76].mxu0 %v6127_v60  ;;  %v15419_v60 = vld [vmem:[#allocation259_spill] sm:$0xff]  ;;  %v6129_v18 = vpack.c.bf16 %v13734_v45, %v9508_v26  ;;  %v15420_v31 = vld [vmem:[#allocation201_spill] sm:$0xff] }
 0x611   : > { %v13774_v35 = vpop.eup %9511  ;;  %9531 = vpow2.f32 %v6033_v57  ;;  %v6053_v40 = vmul.f32 1.442695, %v5831_v13  ;;  %v6055_v38 = vmul.f32 1.442695, %v5832_v33  ;;  %v6130_v37 = vpack.c.bf16 %v13736_v48, %v9510_v16 }
 0x612   : > { %v5913_v54 = vmul.f32 1.442695, %v5761_v34  ;;  %v13776_v7 = vpop.eup %9513  ;;  %9533 = vpow2.f32 %v6035_v62  ;;  %v5915_v49 = vmul.f32 1.442695, %v5762_v15  ;;  %v5505_v29 = vpop.permute.xlu0 %5504  ;;  %v15421_v34 = vld [vmem:[#allocation202_spill] sm:$0xff]  ;;  %v15422_v15 = vld [vmem:[#allocation191_spill] sm:$0xff] }
 0x613   : > { %v5640_v0 = vpop.permute.xlu1 %5639  ;;  %v9516_v5 = vpop.eup %9515  ;;  %9535 = vpow2.f32 %v6053_v40  ;;  %v5771_v21 = vsub.f32 %v15416_v4, %v5505_v29  ;;  %v5772_v47 = vsub.f32 %v15417_v58, %v5505_v29  ;;  %6381 = vperm.xlu1 %9220, %v13648_v27   ;;  %6793 = vmatprep.mubr.bf16.mxu0 %v6130_v37  ;;  %v15423_v40 = vld [vmem:[#allocation282_spill] sm:$0xff] }
 0x614   : > { %v5825_v8 = vsub.f32 %v15418_v55, %v5640_v0  ;;  %v9518_v51 = vpop.eup %9517  ;;  %9537 = vpow2.f32 %v6055_v38  ;;  %v5826_v3 = vsub.f32 -1e+30, %v5640_v0  ;;  %6436 = vperm.xlu0 %9219, %v15419_v60   ;;  %v6161_v48 = vpack.c.bf16 %v13746_v6, %v9516_v5 }
 0x615   : > { %v13785_v25 = vpop.eup %9519  ;;  %9539 = vpow2.f32 %v5913_v54  ;;  %v5933_v30 = vmul.f32 1.442695, %v5771_v21  ;;  %v5935_v57 = vmul.f32 1.442695, %v5772_v47  ;;  %v6162_v27 = vpack.c.bf16 %v13748_v10, %v9518_v51  ;;  %v15425_v47 = vld [vmem:[#allocation205_spill] sm:$0xff] }
 0x616   : > { %v6041_v62 = vmul.f32 1.442695, %v5825_v8  ;;  %v13787_v39 = vpop.eup %9521  ;;  %9541 = vpow2.f32 %v5915_v49  ;;  %v6043_v19 = vmul.f32 1.442695, %v5826_v3  ;;  %v5665_v59 = vpop.permute.xlu0 %5664  ;;  %v15424_v49 = vld [vmem:[#allocation261_spill] sm:$0xff]  ;;  %v15426_v8 = vld [vmem:[#allocation207_spill] sm:$0xff] }
 0x617   : > { %v5490_v13 = vpop.permute.xlu1 %5489  ;;  %v9524_v33 = vpop.eup %9523  ;;  %9543 = vpow2.f32 %v5933_v30  ;;  %v5835_v6 = vsub.f32 %v15420_v31, %v5665_v59  ;;  %v5836_v16 = vsub.f32 %v15421_v34, %v5665_v59  ;;  %6411 = vperm.xlu1 %9220, %v15423_v40   ;;  %7050 = vmatprep.mubr.bf16.mxu1 %v6162_v27  ;;  %v15427_v3 = vld [vmem:[#allocation193_spill] sm:$0xff] }
 0x618   : > { %v5765_v44 = vsub.f32 %v15422_v15, %v5490_v13  ;;  %v9526_v38 = vpop.eup %9525  ;;  %9545 = vpow2.f32 %v5935_v57  ;;  %v5766_v54 = vsub.f32 -1e+30, %v5490_v13  ;;  %6446 = vperm.xlu0 %9219, %v15424_v49   ;;  %6794 = vmatmul.mubr.bf16.gmra.mrb[80].mxu0 %v6129_v18  ;;  %v6131_v34 = vpack.c.bf16 %v13755_v61, %v9524_v33  ;;  %v15430_v40 = vld [vmem:[#allocation209_spill] sm:$0xff]  ;;  %v15432_v49 = vld [vmem:[#allocation195_spill] sm:$0xff] }
 0x619   : > { %v13796_v10 = vpop.eup %9527  ;;  %9547 = vpow2.f32 %v6041_v62  ;;  %7051 = vmatmul.mubr.bf16.gmra.mrb[80].mxu1 %v6161_v48  ;;  %v6061_v45 = vmul.f32 1.442695, %v5835_v6  ;;  %v6063_v26 = vmul.f32 1.442695, %v5836_v16  ;;  %v6132_v5 = vpack.c.bf16 %v13757_v1, %v9526_v38  ;;  %v15428_v48 = vld [vmem:[#allocation283_spill] sm:$0xff]  ;;  %v15429_v62 = vld [vmem:[#allocation262_spill] sm:$0xff] }
 0x61a   : > { %v5921_v37 = vmul.f32 1.442695, %v5765_v44  ;;  %v13798_v29 = vpop.eup %9529  ;;  %9549 = vpow2.f32 %v6043_v19  ;;  %v5923_v0 = vmul.f32 1.442695, %v5766_v54  ;;  %v5515_v4 = vpop.permute.xlu0 %5514  ;;  %v15431_v38 = vld [vmem:[#allocation210_spill] sm:$0xff] }
 0x61b   : > { %v5650_v21 = vpop.permute.xlu1 %5649  ;;  %v9532_v58 = vpop.eup %9531  ;;  %9551 = vpow2.f32 %v6061_v45  ;;  %v5775_v55 = vsub.f32 %v15425_v47, %v5515_v4  ;;  %v5776_v51 = vsub.f32 %v15426_v8, %v5515_v4  ;;  %6421 = vperm.xlu1 %9220, %v15428_v48   ;;  %6801 = vmatprep.mubr.bf16.mxu0 %v6132_v5 }
 0x61c   : > { %v5829_v60 = vsub.f32 %v15427_v3, %v5650_v21  ;;  %v9534_v30 = vpop.eup %9533  ;;  %9553 = vpow2.f32 %v6063_v26  ;;  %v5830_v57 = vsub.f32 -1e+30, %v5650_v21  ;;  %6456 = vperm.xlu0 %9219, %v15429_v62   ;;  %v6163_v1 = vpack.c.bf16 %v13765_v2, %v9532_v58  ;;  %v15433_v26 = vld [vmem:[#allocation285_spill] sm:$0xff]  ;;  %v15438_v62 = vld [vmem:[#allocation198_spill] sm:$0xff] }
 0x61d   : > { %v13807_v19 = vpop.eup %9535  ;;  %9555 = vpow2.f32 %v5921_v37  ;;  %v5941_v27 = vmul.f32 1.442695, %v5775_v55  ;;  %v5943_v18 = vmul.f32 1.442695, %v5776_v51  ;;  %v6164_v6 = vpack.c.bf16 %v13767_v56, %v9534_v30  ;;  %v15435_v56 = vld [vmem:[#allocation265_spill] sm:$0xff]  ;;  %v15437_v30 = vld [vmem:[#allocation215_spill] sm:$0xff] }
 0x61e   : > { %v6049_v59 = vmul.f32 1.442695, %v5829_v60  ;;  %v13809_v13 = vpop.eup %9537  ;;  %9557 = vpow2.f32 %v5923_v0  ;;  %v6051_v31 = vmul.f32 1.442695, %v5830_v57  ;;  %v5675_v16 = vpop.permute.xlu0 %5674  ;;  %v15434_v0 = vld [vmem:[#allocation196_spill] sm:$0xff]  ;;  %v15436_v60 = vld [vmem:[#allocation213_spill] sm:$0xff] }
 0x61f   : > { %v5500_v15 = vpop.permute.xlu1 %5499  ;;  %v9540_v44 = vpop.eup %9539  ;;  %9559 = vpow2.f32 %v5941_v27  ;;  %v5839_v2 = vsub.f32 %v15430_v40, %v5675_v16  ;;  %v5840_v54 = vsub.f32 %v15431_v38, %v5675_v16  ;;  %6431 = vperm.xlu1 %9220, %v15433_v26   ;;  %7058 = vmatprep.mubr.bf16.mxu1 %v6164_v6 }
 0x620   : > { %v5769_v45 = vsub.f32 %v15432_v49, %v5500_v15  ;;  %v9542_v37 = vpop.eup %9541  ;;  %9561 = vpow2.f32 %v5943_v18  ;;  %v5770_v5 = vsub.f32 %v15434_v0, %v5500_v15  ;;  %6466 = vperm.xlu0 %9219, %v15435_v56   ;;  %6802 = vmatmul.mubr.bf16.gmra.mrb[84].mxu0 %v6131_v34 }
 0x621   : > { %v13819_v61 = vpop.eup %9543  ;;  %9563 = vpow2.f32 %v6049_v59  ;;  %7059 = vmatmul.mubr.bf16.gmra.mrb[84].mxu1 %v6163_v1  ;;  %v6069_v33 = vmul.f32 1.442695, %v5839_v2  ;;  %v6071_v4 = vmul.f32 1.442695, %v5840_v54  ;;  %v6134_v55 = vpack.c.bf16 %v13776_v7, %v9542_v37  ;;  %v15439_v1 = vld [vmem:[#allocation260_spill] sm:$0xff]  ;;  %v15442_v37 = vld [vmem:[#allocation218_spill] sm:$0xff] }
 0x622   : > { %v5929_v21 = vmul.f32 1.442695, %v5769_v45  ;;  %v13821_v58 = vpop.eup %9545  ;;  %9565 = vpow2.f32 %v6051_v31  ;;  %v5931_v47 = vmul.f32 1.442695, %v5770_v5  ;;  %v5525_v8 = vpop.permute.xlu0 %5524  ;;  %v15440_v59 = vld [vmem:[#allocation200_spill] sm:$0xff]  ;;  %v6133_v54 = vpack.c.bf16 %v13774_v35, %v9540_v44  ;;  %v15443_v5 = vld [vmem:[#allocation203_spill] sm:$0xff] }
 0x623   : > { %v5660_v51 = vpop.permute.xlu1 %5659  ;;  %v9548_v3 = vpop.eup %9547  ;;  %9567 = vpow2.f32 %v6069_v33  ;;  %v5779_v48 = vsub.f32 %v15436_v60, %v5525_v8  ;;  %v5780_v57 = vsub.f32 %v15437_v30, %v5525_v8  ;;  %6441 = vperm.xlu1 %9220, %v15439_v1   ;;  %6809 = vmatprep.mubr.bf16.mxu0 %v6134_v55  ;;  %v15444_v33 = vld [vmem:[#allocation263_spill] sm:$0xff]  ;;  %v15448_v1 = vld [vmem:[#allocation206_spill] sm:$0xff] }
 0x624   : > { %v5833_v27 = vsub.f32 %v15438_v62, %v5660_v51  ;;  %v9550_v18 = vpop.eup %9549  ;;  %9569 = vpow2.f32 %v6071_v4  ;;  %v5834_v31 = vsub.f32 %v15440_v59, %v5660_v51  ;;  %6476 = vperm.xlu0 %9219, %v13473_v20   ;;  %v6165_v7 = vpack.c.bf16 %v13785_v25, %v9548_v3  ;;  %v15441_v20 = vld [vmem:[#allocation217_spill] sm:$0xff]  ;;  %v15447_v62 = vld [vmem:[#allocation223_spill] sm:$0xff]  ;;  %v15449_v59 = vld [vmem:[#allocation264_spill] sm:$0xff] }
 0x625   : > { %v13831_v6 = vpop.eup %9551  ;;  %9571 = vpow2.f32 %v5929_v21  ;;  %v5949_v34 = vmul.f32 1.442695, %v5779_v48  ;;  %v5951_v16 = vmul.f32 1.442695, %v5780_v57  ;;  %v6166_v38 = vpack.c.bf16 %v13787_v39, %v9550_v18  ;;  %v15445_v21 = vld [vmem:[#allocation204_spill] sm:$0xff]  ;;  %v15446_v57 = vld [vmem:[#allocation221_spill] sm:$0xff] }
 0x626   : > { %v6057_v15 = vmul.f32 1.442695, %v5833_v27  ;;  %v13833_v40 = vpop.eup %9553  ;;  %9573 = vpow2.f32 %v5931_v47  ;;  %v6059_v2 = vmul.f32 1.442695, %v5834_v31  ;;  %v5685_v49 = vpop.permute.xlu0 %5684 }
 0x627   : > { %v5510_v45 = vpop.permute.xlu1 %5509  ;;  %v9556_v26 = vpop.eup %9555  ;;  %9575 = vpow2.f32 %v5949_v34  ;;  %v5843_v25 = vsub.f32 %v15441_v20, %v5685_v49  ;;  %v5844_v0 = vsub.f32 %v15442_v37, %v5685_v49  ;;  %6451 = vperm.xlu1 %9220, %v15444_v33   ;;  %7066 = vmatprep.mubr.bf16.mxu1 %v6166_v38  ;;  %v15453_v33 = vld [vmem:[#allocation211_spill] sm:$0xff] }
 0x628   : > { %v5773_v56 = vsub.f32 %v15443_v5, %v5510_v45  ;;  %v9558_v4 = vpop.eup %9557  ;;  %9577 = vpow2.f32 %v5951_v16  ;;  %v5774_v47 = vsub.f32 %v15445_v21, %v5510_v45  ;;  %6486 = vperm.xlu0 %9219, %v13513_v17   ;;  %6810 = vmatmul.mubr.bf16.gmra.mrb[88].mxu0 %v6133_v54  ;;  %v6135_v20 = vpack.c.bf16 %v13796_v10, %v9556_v26  ;;  %v15452_v5 = vld [vmem:[#allocation226_spill] sm:$0xff] }
 0x629   : > { %v13843_v35 = vpop.eup %9559  ;;  %9579 = vpow2.f32 %v6057_v15  ;;  %7067 = vmatmul.mubr.bf16.gmra.mrb[88].mxu1 %v6165_v7  ;;  %v6077_v39 = vmul.f32 1.442695, %v5843_v25  ;;  %v6079_v44 = vmul.f32 1.442695, %v5844_v0  ;;  %v6136_v3 = vpack.c.bf16 %v13798_v29, %v9558_v4  ;;  %v15450_v7 = vld [vmem:[#allocation208_spill] sm:$0xff] }
 0x62a   : > { %v5937_v55 = vmul.f32 1.442695, %v5773_v56  ;;  %v13845_v8 = vpop.eup %9561  ;;  %9581 = vpow2.f32 %v6059_v2  ;;  %v5939_v51 = vmul.f32 1.442695, %v5774_v47  ;;  %v5535_v60 = vpop.permute.xlu0 %5534  ;;  %v15454_v47 = vld [vmem:[#allocation212_spill] sm:$0xff] }
 0x62b   : > { %v5670_v48 = vpop.permute.xlu1 %5669  ;;  %v9564_v30 = vpop.eup %9563  ;;  %9583 = vpow2.f32 %v6077_v39  ;;  %v5783_v17 = vsub.f32 %v15446_v57, %v5535_v60  ;;  %v5784_v27 = vsub.f32 %v15447_v62, %v5535_v60  ;;  %6461 = vperm.xlu1 %9220, %v15449_v59   ;;  %6817 = vmatprep.mubr.bf16.mxu0 %v6136_v3  ;;  %v15456_v57 = vld [vmem:[#allocation231_spill] sm:$0xff]  ;;  %v15457_v62 = vld [vmem:[#allocation214_spill] sm:$0xff] }
 0x62c   : > { %v5837_v18 = vsub.f32 %v15448_v1, %v5670_v48  ;;  %v9566_v31 = vpop.eup %9565  ;;  %9585 = vpow2.f32 %v6079_v44  ;;  %v5838_v34 = vsub.f32 %v15450_v7, %v5670_v48  ;;  %6496 = vperm.xlu0 %9219, %v13553_v22   ;;  %v6167_v29 = vpack.c.bf16 %v13807_v19, %v9564_v30  ;;  %v15451_v22 = vld [vmem:[#allocation225_spill] sm:$0xff] }
 0x62d   : > { %v13855_v16 = vpop.eup %9567  ;;  %9587 = vpow2.f32 %v5937_v55  ;;  %v5957_v15 = vmul.f32 1.442695, %v5783_v17  ;;  %v5959_v2 = vmul.f32 1.442695, %v5784_v27  ;;  %v6168_v45 = vpack.c.bf16 %v13809_v13, %v9566_v31 }
 0x62e   : > { %v6065_v38 = vmul.f32 1.442695, %v5837_v18  ;;  %v13857_v54 = vpop.eup %9569  ;;  %9589 = vpow2.f32 %v5939_v51  ;;  %v6067_v49 = vmul.f32 1.442695, %v5838_v34  ;;  %v5695_v25 = vpop.permute.xlu0 %5694  ;;  %v15458_v18 = vld [vmem:[#allocation216_spill] sm:$0xff] }
 0x62f   : > { %v5520_v37 = vpop.permute.xlu1 %5519  ;;  %v9572_v0 = vpop.eup %9571  ;;  %9591 = vpow2.f32 %v5957_v15  ;;  %v5847_v19 = vsub.f32 %v15451_v22, %v5695_v25  ;;  %v5848_v56 = vsub.f32 %v15452_v5, %v5695_v25  ;;  %6471 = vperm.xlu1 %9220, %v13464_v12   ;;  %7074 = vmatprep.mubr.bf16.mxu1 %v6168_v45 }
 0x630   : > { %v5777_v4 = vsub.f32 %v15453_v33, %v5520_v37  ;;  %v9574_v21 = vpop.eup %9573  ;;  %9593 = vpow2.f32 %v5959_v2  ;;  %v5778_v39 = vsub.f32 %v15454_v47, %v5520_v37  ;;  %6506 = vperm.xlu0 %9219, %v13593_v28   ;;  %v6137_v10 = vpack.c.bf16 %v13819_v61, %v9572_v0  ;;  %6818 = vmatmul.mubr.bf16.gmra.mrb[92].mxu0 %v6135_v20  ;;  %v15455_v28 = vld [vmem:[#allocation229_spill] sm:$0xff] }
 0x631   : > { %v13868_v13 = vpop.eup %9575  ;;  %9595 = vpow2.f32 %v6065_v38  ;;  %7075 = vmatmul.mubr.bf16.gmra.mrb[92].mxu1 %v6167_v29  ;;  %v6085_v26 = vmul.f32 1.442695, %v5847_v19  ;;  %v6087_v44 = vmul.f32 1.442695, %v5848_v56  ;;  %v6138_v3 = vpack.c.bf16 %v13821_v58, %v9574_v21  ;;  %v15459_v20 = vld [vmem:[#allocation233_spill] sm:$0xff]  ;;  %v15462_v19 = vld [vmem:[#allocation220_spill] sm:$0xff] }
 0x632   : > { %v5945_v55 = vmul.f32 1.442695, %v5777_v4  ;;  %v13870_v51 = vpop.eup %9577  ;;  %9597 = vpow2.f32 %v6067_v49  ;;  %v5947_v12 = vmul.f32 1.442695, %v5778_v39  ;;  %v5545_v60 = vpop.permute.xlu0 %5544 }
 0x633   : > { %v5680_v48 = vpop.permute.xlu1 %5679  ;;  %v9580_v30 = vpop.eup %9579  ;;  %9599 = vpow2.f32 %v6085_v26  ;;  %v5787_v61 = vsub.f32 %v15455_v28, %v5545_v60  ;;  %v5788_v17 = vsub.f32 %v15456_v57, %v5545_v60  ;;  %6481 = vperm.xlu1 %9220, %v13504_v23   ;;  %6825 = vmatprep.mubr.bf16.mxu0 %v6138_v3  ;;  %v15465_v60 = vld [vmem:[#allocation239_spill] sm:$0xff] }
 0x634   : > { %v5841_v27 = vsub.f32 %v15457_v62, %v5680_v48  ;;  %v9582_v1 = vpop.eup %9581  ;;  %9601 = vpow2.f32 %v6087_v44  ;;  %v5842_v59 = vsub.f32 %v15458_v18, %v5680_v48  ;;  %6516 = vperm.xlu0 %9219, %v13619_v42   ;;  %v6169_v58 = vpack.c.bf16 %v13831_v6, %v9580_v30  ;;  %v15460_v42 = vld [vmem:[#allocation234_spill] sm:$0xff]  ;;  %v15461_v6 = vld [vmem:[#allocation219_spill] sm:$0xff]  ;;  %v15466_v30 = vld [vmem:[#allocation224_spill] sm:$0xff] }
 0x635   : > { %v13880_v31 = vpop.eup %9583  ;;  %9603 = vpow2.f32 %v5945_v55  ;;  %v5965_v7 = vmul.f32 1.442695, %v5787_v61  ;;  %v6170_v23 = vpack.c.bf16 %v13833_v40, %v9582_v1  ;;  %v5967_v45 = vmul.f32 1.442695, %v5788_v17  ;;  %v15463_v55 = vld [vmem:[#allocation237_spill] sm:$0xff] }
 0x636   : > { %v6073_v34 = vmul.f32 1.442695, %v5841_v27  ;;  %v13882_v29 = vpop.eup %9585  ;;  %9605 = vpow2.f32 %v5947_v12  ;;  %v6075_v15 = vmul.f32 1.442695, %v5842_v59  ;;  %v5705_v2 = vpop.permute.xlu0 %5704  ;;  %v15464_v12 = vld [vmem:[#allocation222_spill] sm:$0xff] }
 0x637   : > { %v5530_v38 = vpop.permute.xlu1 %5529  ;;  %v9588_v49 = vpop.eup %9587  ;;  %v5851_v25 = vsub.f32 %v15459_v20, %v5705_v2  ;;  %v5852_v37 = vsub.f32 %v15460_v42, %v5705_v2  ;;  %6491 = vperm.xlu1 %9220, %v13544_v52   ;;  %9607 = vpow2.f32 %v5965_v7  ;;  %7082 = vmatprep.mubr.bf16.mxu1 %v6170_v23  ;;  %v15470_v2 = vld [vmem:[#allocation242_spill] sm:$0xff] }
 0x638   : > { %v5781_v0 = vsub.f32 %v15461_v6, %v5530_v38  ;;  %v9590_v22 = vpop.eup %9589  ;;  %v5782_v5 = vsub.f32 %v15462_v19, %v5530_v38  ;;  %6526 = vperm.xlu0 %9219, %v13634_v43   ;;  %v6139_v40 = vpack.c.bf16 %v13843_v35, %v9588_v49  ;;  %9609 = vpow2.f32 %v6073_v34  ;;  %6826 = vmatmul.mubr.bf16.gmra.mrb[96].mxu0 %v6137_v10  ;;  %v15471_v49 = vld [vmem:[#allocation228_spill] sm:$0xff] }
 0x639   : > { %v13892_v56 = vpop.eup %9591  ;;  %7083 = vmatmul.mubr.bf16.gmra.mrb[96].mxu1 %v6169_v58  ;;  %v6093_v33 = vmul.f32 1.442695, %v5851_v25  ;;  %9611 = vpow2.f32 %v6075_v15  ;;  %v6140_v47 = vpack.c.bf16 %v13845_v8, %v9590_v22  ;;  %v6095_v43 = vmul.f32 1.442695, %v5852_v37  ;;  %v15467_v58 = vld [vmem:[#allocation241_spill] sm:$0xff] }
 0x63a   : > { %v5953_v4 = vmul.f32 1.442695, %v5781_v0  ;;  %v13894_v21 = vpop.eup %9593  ;;  %v5955_v52 = vmul.f32 1.442695, %v5782_v5  ;;  %v5555_v39 = vpop.permute.xlu0 %5554  ;;  %9613 = vpow2.f32 %v5967_v45  ;;  %v15472_v5 = vld [vmem:[#allocation245_spill] sm:$0xff] }
 0x63b   : > { %v5690_v26 = vpop.permute.xlu1 %5689  ;;  %v9596_v44 = vpop.eup %9595  ;;  %v5791_v35 = vsub.f32 %v15463_v55, %v5555_v39  ;;  %6501 = vperm.xlu1 %9220, %v13584_v11   ;;  %9615 = vpow2.f32 %v6093_v33  ;;  %6833 = vmatprep.mubr.bf16.mxu0 %v6140_v47  ;;  %v5792_v48 = vsub.f32 %v15465_v60, %v5555_v39  ;;  %v15475_v47 = vld [vmem:[#allocation232_spill] sm:$0xff]  ;;  %v15476_v60 = vld [vmem:[#allocation247_spill] sm:$0xff] }
 0x63c   : > { %v5845_v3 = vsub.f32 %v15464_v12, %v5690_v26  ;;  %v9598_v10 = vpop.eup %9597  ;;  %v5846_v28 = vsub.f32 %v15466_v30, %v5690_v26  ;;  %6536 = vperm.xlu0 %9219, %v13646_v14   ;;  %v6171_v8 = vpack.c.bf16 %v13855_v16, %v9596_v44  ;;  %9617 = vpow2.f32 %v5953_v4  ;;  %v15468_v14 = vld [vmem:[#allocation227_spill] sm:$0xff] }
 0x63d   : > { %v13904_v61 = vpop.eup %9599  ;;  %9619 = vpow2.f32 %v5955_v52  ;;  %v6172_v11 = vpack.c.bf16 %v13857_v54, %v9598_v10  ;;  %v5973_v59 = vmul.f32 1.442695, %v5791_v35  ;;  %v15469_v16 = vld [vmem:[#allocation267_spill] sm:$0xff]  ;;  %v5975_v23 = vmul.f32 1.442695, %v5792_v48 }
 0x63e   : > { %v6081_v57 = vmul.f32 1.442695, %v5845_v3  ;;  %v13906_v17 = vpop.eup %9601  ;;  %v6083_v62 = vmul.f32 1.442695, %v5846_v28  ;;  %v5715_v27 = vpop.permute.xlu0 %5714  ;;  %9621 = vpow2.f32 %v6095_v43 }
 0x63f   : > { %v5540_v1 = vpop.permute.xlu1 %5539  ;;  %v9604_v18 = vpop.eup %9603  ;;  %v5855_v7 = vsub.f32 %v15467_v58, %v5715_v27  ;;  %6511 = vperm.xlu1 %9220, %v15469_v16   ;;  %7090 = vmatprep.mubr.bf16.mxu1 %v6172_v11  ;;  %v5856_v38 = vsub.f32 %v15470_v2, %v5715_v27 }
 0x640   : > { %v5785_v34 = vsub.f32 %v15468_v14, %v5540_v1  ;;  %v9606_v15 = vpop.eup %9605  ;;  %v5786_v45 = vsub.f32 %v15471_v49, %v5540_v1  ;;  %6546 = vperm.xlu0 %9219, %v13666_v41   ;;  %v6141_v54 = vpack.c.bf16 %v13868_v13, %v9604_v18  ;;  %9623 = vpow2.f32 %v6081_v57  ;;  %6834 = vmatmul.mubr.bf16.gmra.mrb[100].mxu0 %v6139_v40  ;;  %v15473_v41 = vld [vmem:[#allocation230_spill] sm:$0xff] }
 0x641   : > { %7091 = vmatmul.mubr.bf16.gmra.mrb[100].mxu1 %v6171_v8  ;;  %v13916_v25 = vpop.eup %9607  ;;  %9625 = vpow2.f32 %v6083_v62  ;;  %v6142_v37 = vpack.c.bf16 %v13870_v51, %v9606_v15  ;;  %v6101_v19 = vmul.f32 1.442695, %v5855_v7  ;;  %v15474_v13 = vld [vmem:[#allocation266_spill] sm:$0xff]  ;;  %v6103_v52 = vmul.f32 1.442695, %v5856_v38  ;;  %v15478_v8 = vld [vmem:[#allocation249_spill] sm:$0xff] }
 0x642   : > { %v5961_v20 = vmul.f32 1.442695, %v5785_v34  ;;  %v5963_v42 = vmul.f32 1.442695, %v5786_v45  ;;  %v5565_v6 = vpop.permute.xlu0 %5564  ;;  %v9610_v22 = vpop.eup %9609  ;;  %9627 = vpow2.f32 %v5973_v59  ;;  %v15479_v62 = vld [vmem:[#allocation236_spill] sm:$0xff]  ;;  %v15480_v34 = vld [vmem:[#allocation250_spill] sm:$0xff] }
 0x643   : > { %v5700_v0 = vpop.permute.xlu1 %5699  ;;  %v5795_v33 = vsub.f32 %v15472_v5, %v5565_v6  ;;  %6521 = vperm.xlu1 %9220, %v15474_v13   ;;  %v9612_v40 = vpop.eup %9611  ;;  %9629 = vpow2.f32 %v5975_v23  ;;  %6841 = vmatprep.mubr.bf16.mxu0 %v6142_v37  ;;  %v6173_v51 = vpack.c.bf16 %v13880_v31, %v9610_v22  ;;  %v5796_v48 = vsub.f32 %v15476_v60, %v5565_v6  ;;  %v15483_v38 = vld [vmem:[#allocation253_spill] sm:$0xff]  ;;  %v15484_v45 = vld [vmem:[#allocation240_spill] sm:$0xff] }
 0x644   : > { %v5849_v4 = vsub.f32 %v15473_v41, %v5700_v0  ;;  %v5850_v39 = vsub.f32 %v15475_v47, %v5700_v0  ;;  %6396 = vperm.xlu0 %9219, %v13673_v24   ;;  %v13925_v26 = vpop.eup %9613  ;;  %9631 = vpow2.f32 %v5961_v20  ;;  %v6174_v35 = vpack.c.bf16 %v13882_v29, %v9612_v40  ;;  %v15477_v24 = vld [vmem:[#allocation235_spill] sm:$0xff]  ;;  %v15487_v13 = vld [vmem:[#allocation244_spill] sm:$0xff] }
 0x645   : > { %v13927_v43 = vpop.eup %9615  ;;  %9633 = vpow2.f32 %v5963_v42  ;;  %v5981_v30 = vmul.f32 1.442695, %v5795_v33  ;;  %v5983_v14 = vmul.f32 1.442695, %v5796_v48  ;;  %v15485_v33 = vld [vmem:[#allocation243_spill] sm:$0xff]  ;;  %v15490_v60 = vld [vmem:[#allocation248_spill] sm:$0xff] }
 0x646   : > { %v6089_v44 = vmul.f32 1.442695, %v5849_v4  ;;  %v6091_v55 = vmul.f32 1.442695, %v5850_v39  ;;  %v5725_v12 = vpop.permute.xlu0 %5724  ;;  %v9618_v10 = vpop.eup %9617  ;;  %9635 = vpow2.f32 %v6101_v19  ;;  %7098 = vmatprep.mubr.bf16.mxu1 %v6174_v35  ;;  %v15486_v4 = vld [vmem:[#allocation269_spill] sm:$0xff] }
 0x647   : > { %v5550_v3 = vpop.permute.xlu1 %5549  ;;  %6531 = vperm.xlu1 %9220, %v13644_v53   ;;  %v9620_v31 = vpop.eup %9619  ;;  %9637 = vpow2.f32 %v6103_v52  ;;  %v5859_v57 = vsub.f32 %v15478_v8, %v5725_v12  ;;  %v6143_v29 = vpack.c.bf16 %v13892_v56, %v9618_v10  ;;  %v5860_v16 = vsub.f32 %v15480_v34, %v5725_v12  ;;  %v15482_v56 = vld [vmem:[#allocation268_spill] sm:$0xff] }
 0x648   : > { %v5789_v28 = vsub.f32 %v15477_v24, %v5550_v3  ;;  %v5790_v11 = vsub.f32 %v15479_v62, %v5550_v3  ;;  %6556 = vperm.xlu0 %9219, %v13694_v50   ;;  %v13937_v27 = vpop.eup %9621  ;;  %9639 = vpow2.f32 %v6089_v44  ;;  %6842 = vmatmul.mubr.bf16.gmra.mrb[104].mxu0 %v6141_v54  ;;  %v6144_v53 = vpack.c.bf16 %v13894_v21, %v9620_v31  ;;  %v15481_v50 = vld [vmem:[#allocation238_spill] sm:$0xff]  ;;  %v15488_v44 = vld [vmem:[#allocation255_spill] sm:$0xff]  ;;  %v15491_v24 = vld [vmem:[#allocation257_spill] sm:$0xff] }
 0x649   : > { %7099 = vmatmul.mubr.bf16.gmra.mrb[104].mxu1 %v6173_v51  ;;  %9641 = vpow2.f32 %v6091_v55  ;;  %v6109_v2 = vmul.f32 1.442695, %v5859_v57  ;;  %v6111_v5 = vmul.f32 1.442695, %v5860_v16  ;;  %v9863_v34 = vmov 32  }
 0x64a   : > { %v5969_v1 = vmul.f32 1.442695, %v5789_v28  ;;  %v5971_v18 = vmul.f32 1.442695, %v5790_v11  ;;  %v9624_v7 = vpop.eup %9623  ;;  %9643 = vpow2.f32 %v5981_v30  ;;  %6849 = vmatprep.mubr.bf16.mxu0 %v6144_v53  ;;  %v15493_v53 = vld [vmem:[#allocation251_spill] sm:$0xff] }
 0x64b   : > { %v5575_v59 = vpop.permute.xlu0 %5574  ;;  %v5710_v58 = vpop.permute.xlu1 %5709  ;;  %6541 = vperm.xlu1 %9220, %v15482_v56   ;;  %v6175_v21 = vpack.c.bf16 %v13904_v61, %v9624_v7 }
 0x64c   : > { %v5853_v15 = vsub.f32 %v15481_v50, %v5710_v58  ;;  %v9626_v23 = vpop.eup %9625  ;;  %v5799_v49 = vsub.f32 %v15483_v38, %v5575_v59  ;;  %v5854_v54 = vsub.f32 %v15484_v45, %v5710_v58  ;;  %6406 = vperm.xlu0 %9219, %v13698_v63   ;;  %9645 = vpow2.f32 %v5969_v1  ;;  %v15494_v58 = vld [vmem:[#allocation252_spill] sm:$0xff] }
 0x64d   : > { %v13947_v20 = vpop.eup %9627  ;;  %9647 = vpow2.f32 %v5971_v18  ;;  %v6176_v0 = vpack.c.bf16 %v13906_v17, %v9626_v23  ;;  %v5800_v55 = vsub.f32 %v15488_v44, %v5575_v59 }
 0x64e   : > { %v6097_v42 = vmul.f32 1.442695, %v5853_v15  ;;  %v13949_v37 = vpop.eup %9629  ;;  %v6099_v6 = vmul.f32 1.442695, %v5854_v54  ;;  %9649 = vpow2.f32 %v5983_v14  ;;  %v5989_v61 = vmul.f32 1.442695, %v5799_v49 }
 0x64f   : > { %v5560_v22 = vpop.permute.xlu1 %5559  ;;  %v9632_v19 = vpop.eup %9631  ;;  %6391 = vperm.xlu1 %9220, %v15486_v4   ;;  %9651 = vpow2.f32 %v6109_v2  ;;  %7106 = vmatprep.mubr.bf16.mxu1 %v6176_v0  ;;  %v5991_v11 = vmul.f32 1.442695, %v5800_v55  ;;  %v15496_v54 = vld [vmem:[#allocation256_spill] sm:$0xff] }
 0x650   : > { %v5793_v41 = vsub.f32 %v15485_v33, %v5560_v22  ;;  %v9634_v63 = vpop.eup %9633  ;;  %v5794_v40 = vsub.f32 %v15487_v13, %v5560_v22  ;;  %6566 = vperm.xlu0 %9219, %v13713_v32   ;;  %v6145_v52 = vpack.c.bf16 %v13916_v25, %v9632_v19  ;;  %9653 = vpow2.f32 %v6097_v42  ;;  %6850 = vmatmul.mubr.bf16.gmra.mrb[108].mxu0 %v6143_v29  ;;  %v5735_v17 = vpop.permute.xlu0 %5734  ;;  %v15489_v32 = vld [vmem:[#allocation246_spill] sm:$0xff] }
 0x651   : > { %v13957_v47 = vpop.eup %9635  ;;  %7107 = vmatmul.mubr.bf16.gmra.mrb[108].mxu1 %v6175_v21  ;;  %9655 = vpow2.f32 %v6099_v6  ;;  %v6146_v12 = vpack.c.bf16 %v13925_v26, %v9634_v63  ;;  %v5863_v28 = vsub.f32 %v15491_v24, %v5735_v17  ;;  %v15492_v29 = vld [vmem:[#allocation258_spill] sm:$0xff] }
 0x652   : > { %v5977_v39 = vmul.f32 1.442695, %v5793_v41  ;;  %v13959_v51 = vpop.eup %9637  ;;  %v5979_v35 = vmul.f32 1.442695, %v5794_v40  ;;  %9657 = vpow2.f32 %v6111_v5  ;;  %v5864_v1 = vsub.f32 %v15492_v29, %v5735_v17 }
 0x653   : > { %v5720_v3 = vpop.permute.xlu1 %5719  ;;  %v9640_v10 = vpop.eup %9639  ;;  %6551 = vperm.xlu1 %9220, %v13692_v36   ;;  %9659 = vpow2.f32 %v5989_v61  ;;  %6857 = vmatprep.mubr.bf16.mxu0 %v6146_v12  ;;  %v6117_v16 = vmul.f32 1.442695, %v5863_v28 }
 0x654   : > { %v5857_v25 = vsub.f32 %v15489_v32, %v5720_v3  ;;  %v5858_v48 = vsub.f32 %v15490_v60, %v5720_v3  ;;  %v9642_v30 = vpop.eup %9641  ;;  %v6177_v31 = vpack.c.bf16 %v13927_v43, %v9640_v10  ;;  %9661 = vpow2.f32 %v5977_v39  ;;  %9222 = vset.pattern.permute.xlu0 %v9863_v34  ;;  %v6257_v12 = vpop.permute.xlu0 %6256 }
 0x655   : > { %v13968_v8 = vpop.eup %9643  ;;  %v6178_v62 = vpack.c.bf16 %v13937_v27, %v9642_v30  ;;  %9663 = vpow2.f32 %v5979_v35  ;;  %v6119_v2 = vmul.f32 1.442695, %v5864_v1 }
 0x656   : > { %v6105_v26 = vmul.f32 1.442695, %v5857_v25  ;;  %v6107_v57 = vmul.f32 1.442695, %v5858_v48  ;;  %v9646_v36 = vpop.eup %9645 }
 0x657   : > { %v5570_v18 = vpop.permute.xlu1 %5569  ;;  %7114 = vmatprep.mubr.bf16.mxu1 %v6178_v62  ;;  %6401 = vperm.xlu1 %9220, %v13696_v9   ;;  %v9648_v43 = vpop.eup %9647  ;;  %v6147_v14 = vpack.c.bf16 %v13947_v20, %v9646_v36  ;;  %v15495_v9 = vld [vmem:[#allocation254_spill] sm:$0xff] }
 0x658   : > { %9665 = vpow2.f32 %v6105_v26  ;;  %v5797_v59 = vsub.f32 %v15493_v53, %v5570_v18  ;;  %v5798_v7 = vsub.f32 %v15494_v58, %v5570_v18  ;;  %v9650_v27 = vpop.eup %9649  ;;  %6858 = vmatmul.mubr.bf16.gmra.mrb[112].mxu0 %v6145_v52  ;;  %v6148_v56 = vpack.c.bf16 %v13949_v37, %v9648_v43  ;;  %v13985_v60 = vpop.permute.xlu0 %6266 }
 0x659   : > { %9667 = vpow2.f32 %v6107_v57  ;;  %7115 = vmatmul.mubr.bf16.gmra.mrb[112].mxu1 %v6177_v31  ;;  %v9652_v23 = vpop.eup %9651 }
 0x65a   : > { %v5985_v50 = vmul.f32 1.442695, %v5797_v59  ;;  %v5987_v15 = vmul.f32 1.442695, %v5798_v7  ;;  %9669 = vpow2.f32 %v5991_v11  ;;  %v9654_v49 = vpop.eup %9653  ;;  %6865 = vmatprep.mubr.bf16.mxu0 %v6148_v56 }
 0x65b   : > { %v5730_v38 = vpop.permute.xlu1 %5729  ;;  %6561 = vperm.xlu1 %9220, %v13710_v46   ;;  %v9656_v20 = vpop.eup %9655  ;;  %v6179_v42 = vpack.c.bf16 %v13957_v47, %v9654_v49 }
 0x65c   : > { %9671 = vpow2.f32 %v5985_v50  ;;  %v5861_v45 = vsub.f32 %v15495_v9, %v5730_v38  ;;  %v5862_v21 = vsub.f32 %v15496_v54, %v5730_v38  ;;  %v9658_v6 = vpop.eup %9657  ;;  %v6180_v22 = vpack.c.bf16 %v13959_v51, %v9656_v20  ;;  %v13989_v30 = vpop.permute.xlu0 %6276  ;;  %v6218_v9 = vld [vmem:[#allocation3 + $0x108] sm:$0xff] }
 0x65d   : > { %9673 = vpow2.f32 %v5987_v15  ;;  %v9660_v19 = vpop.eup %9659  ;;  %v6217_v15 = vld [vmem:[#allocation3 + $0x100] sm:$0xff] }
 0x65e   : > { %9675 = vpow2.f32 %v6117_v16  ;;  %v6113_v37 = vmul.f32 1.442695, %v5861_v45  ;;  %v6115_v0 = vmul.f32 1.442695, %v5862_v21  ;;  %v9662_v5 = vpop.eup %9661  ;;  %7122 = vmatprep.mubr.bf16.mxu1 %v6180_v22 }
 0x65f   : > { %9677 = vpow2.f32 %v6119_v2  ;;  %9221 = vset.pattern.permute.xlu1 %v9863_v34  ;;  %v9664_v33 = vpop.eup %9663  ;;  %v6149_v46 = vpack.c.bf16 %v13968_v8, %v9662_v5  ;;  %v6252_v51 = vpop.permute.xlu1 %6251  ;;  %v6185_v2 = vld [vmem:[#allocation3] sm:$0xff] }
 0x660   : > { %9679 = vpow2.f32 %v6113_v37  ;;  %6866 = vmatmul.mubr.bf16.gmra.mrb[116].mxu0 %v6147_v14  ;;  %v6150_v4 = vpack.c.bf16 %v9650_v27, %v9664_v33  ;;  %v13993_v28 = vpop.permute.xlu0 %6286  ;;  %v6569_v37 = vmul.f32 %v6252_v51, %v6185_v2 }
 0x661   : > { %9681 = vpow2.f32 %v6115_v0  ;;  %7123 = vmatmul.mubr.bf16.gmra.mrb[116].mxu1 %v6179_v42  ;;  %v6186_v42 = vld [vmem:[#allocation3 + $0x8] sm:$0xff] }
 0x662   : > { %v9666_v41 = vpop.eup %9665  ;;  %6873 = vmatprep.mubr.bf16.mxu0 %v6150_v4  ;;  %v6570_v4 = vmul.f32 %v6257_v12, %v6186_v42 }
 0x663   : > { %v9668_v63 = vpop.eup %9667  ;;  %v6181_v61 = vpack.c.bf16 %v9652_v23, %v9666_v41  ;;  %v13983_v25 = vpop.permute.xlu1 %6261 }
 0x664   : > { %v6182_v13 = vpack.c.bf16 %v9658_v6, %v9668_v63  ;;  %v9670_v40 = vpop.eup %9669  ;;  %v13997_v8 = vpop.permute.xlu0 %6296 }
 0x666   : > { %v9672_v52 = vpop.eup %9671  ;;  %7130 = vmatprep.mubr.bf16.mxu1 %v6182_v13 }
 0x667   : > { %v9674_v47 = vpop.eup %9673  ;;  %v6151_v17 = vpack.c.bf16 %v9660_v19, %v9672_v52  ;;  %v13987_v48 = vpop.permute.xlu1 %6271  ;;  %v6219_v52 = vld [vmem:[#allocation3 + $0x110] sm:$0xff] }
 0x668   : > { %v9676_v39 = vpop.eup %9675  ;;  %v6152_v44 = vpack.c.bf16 %v9670_v40, %v9674_v47  ;;  %6874 = vmatmul.mubr.bf16.gmra.mrb[120].mxu0 %v6149_v46  ;;  %v14001_v57 = vpop.permute.xlu0 %6306 }
 0x669   : > { %v9678_v55 = vpop.eup %9677  ;;  %7131 = vmatmul.mubr.bf16.gmra.mrb[120].mxu1 %v6181_v61 }
 0x66a   : > { %v9680_v35 = vpop.eup %9679  ;;  %6881 = vmatprep.mubr.bf16.mxu0 %v6152_v44 }
 0x66b   : > { %v9682_v3 = vpop.eup %9681  ;;  %v6183_v10 = vpack.c.bf16 %v9676_v39, %v9680_v35  ;;  %v13991_v24 = vpop.permute.xlu1 %6281  ;;  %v6220_v39 = vld [vmem:[#allocation3 + $0x118] sm:$0xff] }
 0x66c   : > { %v6184_v32 = vpack.c.bf16 %v9678_v55, %v9682_v3  ;;  %v14005_v11 = vpop.permute.xlu0 %6316  ;;  %v6187_v55 = vld [vmem:[#allocation3 + $0x10] sm:$0xff] }
 0x66e   : > { %7138 = vmatprep.mubr.bf16.mxu1 %v6184_v32 }
 0x66f   : > { %v13995_v31 = vpop.permute.xlu1 %6291 }
 0x670   : > { %6882 = vmatmul.mubr.bf16.gmra.mrb[124].mxu0 %v6151_v17  ;;  %v14009_v1 = vpop.permute.xlu0 %6326 }
 0x671   : > { %7139 = vmatmul.mubr.bf16.gmra.mrb[124].mxu1 %v6183_v10 }
 0x673   : > { %v13999_v26 = vpop.permute.xlu1 %6301 }
 0x674   : > { %v14013_v36 = vpop.permute.xlu0 %6336 }
 0x677   : > { %v14003_v62 = vpop.permute.xlu1 %6311 }
 0x678   : > { %v14017_v59 = vpop.permute.xlu0 %6346 }
 0x67b   : > { %v14007_v29 = vpop.permute.xlu1 %6321 }
 0x67c   : > { %v14021_v7 = vpop.permute.xlu0 %6356 }
 0x67f   : > { %v14011_v18 = vpop.permute.xlu1 %6331 }
 0x680   : > { %v14025_v14 = vpop.permute.xlu0 %6366 }
 0x683   : > { %v14015_v53 = vpop.permute.xlu1 %6341 }
 0x684   : > { %v14029_v27 = vpop.permute.xlu0 %6376 }
 0x687   : > { %v14019_v58 = vpop.permute.xlu1 %6351 }
 0x688   : > { %v14033_v50 = vpop.permute.xlu0 %6386 }
 0x68b   : > { %v14023_v43 = vpop.permute.xlu1 %6361 }
 0x68c   : > { %v6417_v38 = vpop.permute.xlu0 %6416 }
 0x68d   : > { %v6602_v33 = vmul.f32 %v6417_v38, %v6218_v9 }
 0x68f   : > { %v14027_v34 = vpop.permute.xlu1 %6371 }
 0x690   : > { %v6427_v51 = vpop.permute.xlu0 %6426 }
 0x693   : > { %v14031_v16 = vpop.permute.xlu1 %6381 }
 0x697   : > { %v6412_v56 = vpop.permute.xlu1 %6411 }
 0x698   : > { %v6601_v45 = vmul.f32 %v6412_v56, %v6217_v15  ;;  %v6188_v56 = vld [vmem:[#allocation3 + $0x18] sm:$0xff] }
 0x69b   : > { %v6422_v47 = vpop.permute.xlu1 %6421 }
 0x69c   : > { %v6603_v35 = vmul.f32 %v6422_v47, %v6219_v52 }
 0x6bd   : > { %v8632_v23 = vpop.f32.mrb[64].mxu1 }
 0x6be   : > { %v8633_v49 = vpop.f32.mrb[65].mxu1 }
 0x6bf   : > { %v8520_v54 = vpop.f32.mrb[64].mxu0  ;;  %v8634_v21 = vadd.f32 %v8633_v49, %v8632_v23  ;;  %v8635_v20 = vpop.f32.mrb[66].mxu1  ;;  %v6604_v23 = vmul.f32 %v6427_v51, %v6220_v39 }
 0x6c0   : > { %v8521_v6 = vpop.f32.mrb[65].mxu0  ;;  %v8636_v5 = vpop.f32.mrb[67].mxu1 }
 0x6c1   : > { %v7179_v0 = vadd.f32 %v8634_v21, %v6601_v45  ;;  %v8522_v22 = vadd.f32 %v8521_v6, %v8520_v54  ;;  %v8523_v19 = vpop.f32.mrb[66].mxu0  ;;  %v8637_v46 = vadd.f32 %v8636_v5, %v8635_v20  ;;  %v6571_v45 = vmul.f32 %v13983_v25, %v6187_v55  ;;  %v6221_v5 = vld [vmem:[#allocation3 + $0x120] sm:$0xff] }
 0x6c2   : > { %v8524_v41 = vpop.f32.mrb[67].mxu0  ;;  %v6189_v55 = vld [vmem:[#allocation3 + $0x20] sm:$0xff] }
 0x6c3   : > { %7244 = vst.msk [vmem:[#allocation3 + $0x100] sm:$0xff] %vm7211_vm9, %v7179_v0  ;;  %v7147_v63 = vadd.f32 %v8522_v22, %v6569_v37  ;;  %v8525_v61 = vadd.f32 %v8524_v41, %v8523_v19  ;;  %v7180_v13 = vadd.f32 %v8637_v46, %v6602_v33  ;;  %v6572_v0 = vmul.f32 %v13985_v60, %v6188_v56  ;;  %v6432_v33 = vpop.permute.xlu1 %6431  ;;  %v6437_v46 = vpop.permute.xlu0 %6436 }
 0x6c5   : > { %7212 = vst.msk [vmem:[#allocation3] sm:$0xff] %vm7211_vm9, %v7147_v63  ;;  %v7148_v40 = vadd.f32 %v8525_v61, %v6570_v4  ;;  %7245 = vst.msk [vmem:[#allocation3 + $0x108] sm:$0xff] %vm7211_vm9, %v7180_v13  ;;  %v6222_v4 = vld [vmem:[#allocation3 + $0x128] sm:$0xff]  ;;  %v6605_v13 = vmul.f32 %v6432_v33, %v6221_v5  ;;  %v6224_v5 = vld [vmem:[#allocation3 + $0x138] sm:$0xff] }
 0x6c6   : > { %v6606_v39 = vmul.f32 %v6437_v46, %v6222_v4 }
 0x6c7   : > { %7213 = vst.msk [vmem:[#allocation3 + $0x8] sm:$0xff] %vm7211_vm9, %v7148_v40  ;;  %v6442_v56 = vpop.permute.xlu1 %6441 }
 0x6c8   : > { %v8638_v17 = vpop.f32.mrb[68].mxu1 }
 0x6c9   : > { %v8639_v44 = vpop.f32.mrb[69].mxu1 }
 0x6ca   : > { %v7373_v12 = vld [vmem:[#allocation3 + $0x100] sm:$0xff]  ;;  %v8640_v3 = vadd.f32 %v8639_v44, %v8638_v17  ;;  %v8641_v10 = vpop.f32.mrb[70].mxu1 }
 0x6cb   : > { %9683 = vrcp.f32 %v7373_v12  ;;  %v8642_v32 = vpop.f32.mrb[71].mxu1  ;;  %v8526_v15 = vpop.f32.mrb[68].mxu0 }
 0x6cc   : > { %v7341_v2 = vld [vmem:[#allocation3] sm:$0xff]  ;;  %v7181_v38 = vadd.f32 %v8640_v3, %v6603_v35  ;;  %v8643_v49 = vadd.f32 %v8642_v32, %v8641_v10  ;;  %v8527_v9 = vpop.f32.mrb[69].mxu0  ;;  %v7374_v20 = vld [vmem:[#allocation3 + $0x108] sm:$0xff]  ;;  %v6447_v3 = vpop.permute.xlu0 %6446 }
 0x6cd   : > { %9685 = vrcp.f32 %v7341_v2  ;;  %v8528_v54 = vadd.f32 %v8527_v9, %v8526_v15  ;;  %v8529_v21 = vpop.f32.mrb[70].mxu0  ;;  %v6190_v15 = vld [vmem:[#allocation3 + $0x28] sm:$0xff] }
 0x6ce   : > { %v7342_v42 = vld [vmem:[#allocation3 + $0x8] sm:$0xff]  ;;  %7246 = vst.msk [vmem:[#allocation3 + $0x110] sm:$0xff] %vm7211_vm9, %v7181_v38  ;;  %v7182_v6 = vadd.f32 %v8643_v49, %v6604_v23  ;;  %v8530_v37 = vpop.f32.mrb[71].mxu0  ;;  %v6573_v49 = vmul.f32 %v13987_v48, %v6189_v55  ;;  %v6452_v48 = vpop.permute.xlu1 %6451 }
 0x6cf   : > { %9687 = vrcp.f32 %v7342_v42  ;;  %v7149_v22 = vadd.f32 %v8528_v54, %v6571_v45  ;;  %v8531_v19 = vadd.f32 %v8530_v37, %v8529_v21  ;;  %v6574_v21 = vmul.f32 %v13989_v30, %v6190_v15 }
 0x6d0   : > { %7247 = vst.msk [vmem:[#allocation3 + $0x118] sm:$0xff] %vm7211_vm9, %v7182_v6  ;;  %9689 = vrcp.f32 %v7374_v20  ;;  %v14049_v37 = vpop.permute.xlu0 %6456 }
 0x6d1   : > { %7214 = vst.msk [vmem:[#allocation3 + $0x10] sm:$0xff] %vm7211_vm9, %v7149_v22  ;;  %v7150_v25 = vadd.f32 %v8531_v19, %v6572_v0  ;;  %v6223_v19 = vld [vmem:[#allocation3 + $0x130] sm:$0xff] }
 0x6d2   : > { %v8644_v41 = vpop.f32.mrb[72].mxu1  ;;  %v6607_v46 = vmul.f32 %v6442_v56, %v6223_v19 }
 0x6d3   : > { %7215 = vst.msk [vmem:[#allocation3 + $0x18] sm:$0xff] %vm7211_vm9, %v7150_v25  ;;  %v8645_v63 = vpop.f32.mrb[73].mxu1 }
 0x6d4   : > { %v8646_v40 = vadd.f32 %v8645_v63, %v8644_v41  ;;  %v8647_v52 = vpop.f32.mrb[74].mxu1  ;;  %v6191_v63 = vld [vmem:[#allocation3 + $0x30] sm:$0xff] }
 0x6d5   : > { %v9684_v61 = vpop.eup %9683  ;;  %v7375_v60 = vld [vmem:[#allocation3 + $0x110] sm:$0xff]  ;;  %v8648_v47 = vpop.f32.mrb[75].mxu1 }
 0x6d6   : > { %9691 = vrcp.f32 %v7375_v60  ;;  %7631 = vperm.xlu0 %9222, %v9684_v61   ;;  %v7183_v51 = vadd.f32 %v8646_v40, %v6605_v13  ;;  %v8649_v44 = vadd.f32 %v8648_v47, %v8647_v52  ;;  %v6608_v13 = vmul.f32 %v6447_v3, %v6224_v5  ;;  %v14053_v60 = vpop.permute.xlu0 %6466 }
 0x6d7   : > { %v9686_v17 = vpop.eup %9685  ;;  %v8532_v32 = vpop.f32.mrb[72].mxu0  ;;  %v7376_v6 = vld [vmem:[#allocation3 + $0x118] sm:$0xff] }
 0x6d8   : > { %v7343_v35 = vld [vmem:[#allocation3 + $0x10] sm:$0xff]  ;;  %7471 = vperm.xlu1 %9221, %v9686_v17   ;;  %7248 = vst.msk [vmem:[#allocation3 + $0x120] sm:$0xff] %vm7211_vm9, %v7183_v51  ;;  %v7184_v10 = vadd.f32 %v8649_v44, %v6606_v39  ;;  %v8533_v2 = vpop.f32.mrb[73].mxu0  ;;  %v6192_v17 = vld [vmem:[#allocation3 + $0x38] sm:$0xff]  ;;  %v14055_v39 = vpop.permute.xlu1 %6461 }
 0x6d9   : > { %v9688_v12 = vpop.eup %9687  ;;  %9693 = vrcp.f32 %v7343_v35  ;;  %v8534_v9 = vadd.f32 %v8533_v2, %v8532_v32  ;;  %v8535_v45 = vpop.f32.mrb[74].mxu0  ;;  %v6575_v35 = vmul.f32 %v13991_v24, %v6191_v63 }
 0x6da   : > { %v7344_v23 = vld [vmem:[#allocation3 + $0x18] sm:$0xff]  ;;  %7476 = vperm.xlu0 %9222, %v9688_v12   ;;  %v9690_v38 = vpop.eup %9689  ;;  %7249 = vst.msk [vmem:[#allocation3 + $0x128] sm:$0xff] %vm7211_vm9, %v7184_v10  ;;  %v8536_v54 = vpop.f32.mrb[75].mxu0 }
 0x6db   : > { %9695 = vrcp.f32 %v7344_v23  ;;  %v7151_v20 = vadd.f32 %v8534_v9, %v6573_v49  ;;  %v8537_v42 = vadd.f32 %v8536_v54, %v8535_v45  ;;  %v6576_v23 = vmul.f32 %v13993_v28, %v6192_v17  ;;  %v6193_v45 = vld [vmem:[#allocation3 + $0x40] sm:$0xff]  ;;  %v14062_v54 = vpop.permute.xlu0 %6476 }
 0x6dc   : > { %7636 = vperm.xlu1 %9221, %v9690_v38   ;;  %9697 = vrcp.f32 %v7376_v6  ;;  %v6194_v6 = vld [vmem:[#allocation3 + $0x48] sm:$0xff]  ;;  %v6577_v19 = vmul.f32 %v13995_v31, %v6193_v45 }
 0x6dd   : > { %7216 = vst.msk [vmem:[#allocation3 + $0x20] sm:$0xff] %vm7211_vm9, %v7151_v20  ;;  %v7152_v0 = vadd.f32 %v8537_v42, %v6574_v21  ;;  %v6225_v21 = vld [vmem:[#allocation3 + $0x140] sm:$0xff]  ;;  %v14064_v20 = vpop.permute.xlu1 %6471 }
 0x6de   : > { %v6609_v5 = vmul.f32 %v6452_v48, %v6225_v21 }
 0x6df   : > { %7217 = vst.msk [vmem:[#allocation3 + $0x28] sm:$0xff] %vm7211_vm9, %v7152_v0  ;;  %v8650_v25 = vpop.f32.mrb[76].mxu1  ;;  %v7377_v3 = vld [vmem:[#allocation3 + $0x120] sm:$0xff] }
 0x6e0   : > { %v9692_v22 = vpop.eup %9691  ;;  %v8651_v33 = vpop.f32.mrb[77].mxu1 }
 0x6e1   : > { %7641 = vperm.xlu0 %9222, %v9692_v22   ;;  %v8652_v41 = vadd.f32 %v8651_v33, %v8650_v25  ;;  %v8653_v4 = vpop.f32.mrb[78].mxu1  ;;  %v7378_v49 = vld [vmem:[#allocation3 + $0x128] sm:$0xff] }
 0x6e2   : > { %v8654_v61 = vpop.f32.mrb[79].mxu1  ;;  %v6226_v25 = vld [vmem:[#allocation3 + $0x148] sm:$0xff] }
 0x6e3   : > { %v9694_v30 = vpop.eup %9693  ;;  %v7185_v40 = vadd.f32 %v8652_v41, %v6607_v46  ;;  %v8655_v52 = vadd.f32 %v8654_v61, %v8653_v4  ;;  %v8538_v47 = vpop.f32.mrb[76].mxu0  ;;  %v6610_v17 = vmul.f32 %v14049_v37, %v6226_v25 }
 0x6e4   : > { %7481 = vperm.xlu1 %9221, %v9694_v30   ;;  %v7345_v51 = vld [vmem:[#allocation3 + $0x20] sm:$0xff]  ;;  %v8539_v44 = vpop.f32.mrb[77].mxu0 }
 0x6e5   : > { %v9696_v55 = vpop.eup %9695  ;;  %9699 = vrcp.f32 %v7345_v51  ;;  %7250 = vst.msk [vmem:[#allocation3 + $0x130] sm:$0xff] %vm7211_vm9, %v7185_v40  ;;  %v7186_v12 = vadd.f32 %v8655_v52, %v6608_v13  ;;  %v8540_v10 = vadd.f32 %v8539_v44, %v8538_v47  ;;  %v8541_v32 = vpop.f32.mrb[78].mxu0  ;;  %v6578_v13 = vmul.f32 %v13997_v8, %v6194_v6 }
 0x6e6   : > { %v7346_v15 = vld [vmem:[#allocation3 + $0x28] sm:$0xff]  ;;  %v8542_v56 = vpop.f32.mrb[79].mxu0  ;;  %v9698_v9 = vpop.eup %9697 }
 0x6e7   : > { %9701 = vrcp.f32 %v7346_v15  ;;  %7251 = vst.msk [vmem:[#allocation3 + $0x138] sm:$0xff] %vm7211_vm9, %v7186_v12  ;;  %v7153_v2 = vadd.f32 %v8540_v10, %v6575_v35  ;;  %v8543_v38 = vadd.f32 %v8542_v56, %v8541_v32  ;;  %v14072_v35 = vpop.permute.xlu0 %6486  ;;  %v6227_v12 = vld [vmem:[#allocation3 + $0x150] sm:$0xff]  ;;  %v14074_v8 = vpop.permute.xlu1 %6481  ;;  %v6196_v15 = vld [vmem:[#allocation3 + $0x58] sm:$0xff] }
 0x6e8   : > { %7486 = vperm.xlu1 %9221, %v9696_v55   ;;  %9703 = vrcp.f32 %v7377_v3  ;;  %v6195_v55 = vld [vmem:[#allocation3 + $0x50] sm:$0xff]  ;;  %v6228_v56 = vld [vmem:[#allocation3 + $0x158] sm:$0xff]  ;;  %v6611_v21 = vmul.f32 %v14055_v39, %v6227_v12 }
 0x6e9   : > { %7218 = vst.msk [vmem:[#allocation3 + $0x30] sm:$0xff] %vm7211_vm9, %v7153_v2  ;;  %v7154_v24 = vadd.f32 %v8543_v38, %v6576_v23  ;;  %9705 = vrcp.f32 %v7378_v49  ;;  %v6579_v49 = vmul.f32 %v13999_v26, %v6195_v55 }
 0x6eb   : > { %7219 = vst.msk [vmem:[#allocation3 + $0x38] sm:$0xff] %vm7211_vm9, %v7154_v24  ;;  %v8544_v28 = vpop.f32.mrb[80].mxu0 }
 0x6ec   : > { %7646 = vperm.xlu1 %9221, %v9698_v9   ;;  %v8656_v42 = vpop.f32.mrb[80].mxu1  ;;  %v8545_v0 = vpop.f32.mrb[81].mxu0  ;;  %v7379_v10 = vld [vmem:[#allocation3 + $0x130] sm:$0xff] }
 0x6ed   : > { %v8657_v22 = vpop.f32.mrb[81].mxu1  ;;  %v8546_v33 = vadd.f32 %v8545_v0, %v8544_v28  ;;  %v8547_v46 = vpop.f32.mrb[82].mxu0 }
 0x6ee   : > { %v8658_v30 = vadd.f32 %v8657_v22, %v8656_v42  ;;  %v8659_v41 = vpop.f32.mrb[82].mxu1  ;;  %v8548_v4 = vpop.f32.mrb[83].mxu0  ;;  %v7380_v23 = vld [vmem:[#allocation3 + $0x138] sm:$0xff]  ;;  %v6580_v22 = vmul.f32 %v14001_v57, %v6196_v15 }
 0x6ef   : > { %v8660_v63 = vpop.f32.mrb[83].mxu1  ;;  %v9700_v61 = vpop.eup %9699  ;;  %v7155_v40 = vadd.f32 %v8546_v33, %v6577_v19  ;;  %v8549_v47 = vadd.f32 %v8548_v4, %v8547_v46  ;;  %v6612_v19 = vmul.f32 %v14053_v60, %v6228_v56  ;;  %v6197_v4 = vld [vmem:[#allocation3 + $0x60] sm:$0xff] }
 0x6f0   : > { %v7187_v52 = vadd.f32 %v8658_v30, %v6609_v5  ;;  %v7347_v51 = vld [vmem:[#allocation3 + $0x30] sm:$0xff]  ;;  %v8661_v44 = vadd.f32 %v8660_v63, %v8659_v41  ;;  %7491 = vperm.xlu0 %9222, %v9700_v61   ;;  %v14084_v57 = vpop.permute.xlu0 %6496  ;;  %v6229_v60 = vld [vmem:[#allocation3 + $0x160] sm:$0xff]  ;;  %v14086_v61 = vpop.permute.xlu1 %6491  ;;  %v6581_v55 = vmul.f32 %v14003_v62, %v6197_v4 }
 0x6f1   : > { %v9702_v31 = vpop.eup %9701  ;;  %9707 = vrcp.f32 %v7347_v51  ;;  %7220 = vst.msk [vmem:[#allocation3 + $0x40] sm:$0xff] %vm7211_vm9, %v7155_v40  ;;  %v7156_v48 = vadd.f32 %v8549_v47, %v6578_v13  ;;  %v6198_v47 = vld [vmem:[#allocation3 + $0x68] sm:$0xff] }
 0x6f2   : > { %7252 = vst.msk [vmem:[#allocation3 + $0x140] sm:$0xff] %vm7211_vm9, %v7187_v52  ;;  %v7348_v32 = vld [vmem:[#allocation3 + $0x38] sm:$0xff]  ;;  %v7188_v3 = vadd.f32 %v8661_v44, %v6610_v17  ;;  %7496 = vperm.xlu1 %9221, %v9702_v31   ;;  %v9704_v37 = vpop.eup %9703  ;;  %v6230_v17 = vld [vmem:[#allocation3 + $0x168] sm:$0xff] }
 0x6f3   : > { %9709 = vrcp.f32 %v7348_v32  ;;  %7221 = vst.msk [vmem:[#allocation3 + $0x48] sm:$0xff] %vm7211_vm9, %v7156_v48  ;;  %v8550_v2 = vpop.f32.mrb[84].mxu0  ;;  %v9706_v45 = vpop.eup %9705  ;;  %v6613_v32 = vmul.f32 %v14064_v20, %v6229_v60 }
 0x6f4   : > { %v8662_v38 = vpop.f32.mrb[84].mxu1  ;;  %7253 = vst.msk [vmem:[#allocation3 + $0x148] sm:$0xff] %vm7211_vm9, %v7188_v3  ;;  %v8551_v9 = vpop.f32.mrb[85].mxu0  ;;  %7651 = vperm.xlu0 %9222, %v9704_v37   ;;  %9711 = vrcp.f32 %v7379_v10 }
 0x6f5   : > { %v8663_v24 = vpop.f32.mrb[85].mxu1  ;;  %v8552_v28 = vadd.f32 %v8551_v9, %v8550_v2  ;;  %v8553_v6 = vpop.f32.mrb[86].mxu0  ;;  %9713 = vrcp.f32 %v7380_v23  ;;  %v6582_v23 = vmul.f32 %v14005_v11, %v6198_v47  ;;  %v6614_v2 = vmul.f32 %v14062_v54, %v6230_v17 }
 0x6f6   : > { %v8664_v42 = vadd.f32 %v8663_v24, %v8662_v38  ;;  %v8665_v0 = vpop.f32.mrb[86].mxu1  ;;  %v8554_v25 = vpop.f32.mrb[87].mxu0  ;;  %7656 = vperm.xlu1 %9221, %v9706_v45  }
 0x6f7   : > { %v8666_v26 = vpop.f32.mrb[87].mxu1  ;;  %v7157_v5 = vadd.f32 %v8552_v28, %v6579_v49  ;;  %v8555_v30 = vadd.f32 %v8554_v25, %v8553_v6  ;;  %v14096_v6 = vpop.permute.xlu0 %6506 }
 0x6f8   : > { %v7189_v33 = vadd.f32 %v8664_v42, %v6611_v21  ;;  %v8667_v46 = vadd.f32 %v8666_v26, %v8665_v0  ;;  %v7349_v41 = vld [vmem:[#allocation3 + $0x40] sm:$0xff]  ;;  %v6199_v42 = vld [vmem:[#allocation3 + $0x70] sm:$0xff] }
 0x6f9   : > { %9715 = vrcp.f32 %v7349_v41  ;;  %7222 = vst.msk [vmem:[#allocation3 + $0x50] sm:$0xff] %vm7211_vm9, %v7157_v5  ;;  %v7158_v39 = vadd.f32 %v8555_v30, %v6580_v22  ;;  %v7381_v13 = vld [vmem:[#allocation3 + $0x140] sm:$0xff]  ;;  %v6231_v0 = vld [vmem:[#allocation3 + $0x170] sm:$0xff]  ;;  %v14098_v22 = vpop.permute.xlu1 %6501  ;;  %v6200_v5 = vld [vmem:[#allocation3 + $0x78] sm:$0xff]  ;;  %v6583_v4 = vmul.f32 %v14007_v29, %v6199_v42 }
 0x6fa   : > { %7254 = vst.msk [vmem:[#allocation3 + $0x150] sm:$0xff] %vm7211_vm9, %v7189_v33  ;;  %v7190_v63 = vadd.f32 %v8667_v46, %v6612_v19  ;;  %v7350_v40 = vld [vmem:[#allocation3 + $0x48] sm:$0xff]  ;;  %v6232_v33 = vld [vmem:[#allocation3 + $0x178] sm:$0xff] }
 0x6fb   : > { %v9708_v52 = vpop.eup %9707  ;;  %9717 = vrcp.f32 %v7350_v40  ;;  %v7382_v51 = vld [vmem:[#allocation3 + $0x148] sm:$0xff]  ;;  %7223 = vst.msk [vmem:[#allocation3 + $0x58] sm:$0xff] %vm7211_vm9, %v7158_v39  ;;  %v8556_v44 = vpop.f32.mrb[88].mxu0 }
 0x6fc   : > { %7255 = vst.msk [vmem:[#allocation3 + $0x158] sm:$0xff] %vm7211_vm9, %v7190_v63  ;;  %v8668_v31 = vpop.f32.mrb[88].mxu1  ;;  %v8557_v48 = vpop.f32.mrb[89].mxu0  ;;  %7501 = vperm.xlu0 %9222, %v9708_v52   ;;  %9719 = vrcp.f32 %v7381_v13  ;;  %v6615_v13 = vmul.f32 %v14074_v8, %v6231_v0 }
 0x6fd   : > { %v8669_v12 = vpop.f32.mrb[89].mxu1  ;;  %v9710_v10 = vpop.eup %9709  ;;  %v8558_v3 = vadd.f32 %v8557_v48, %v8556_v44  ;;  %9721 = vrcp.f32 %v7382_v51  ;;  %v6584_v51 = vmul.f32 %v14009_v1, %v6200_v5  ;;  %v6616_v44 = vmul.f32 %v14072_v35, %v6232_v33 }
 0x6fe   : > { %v8670_v37 = vadd.f32 %v8669_v12, %v8668_v31  ;;  %v8559_v15 = vpop.f32.mrb[90].mxu0  ;;  %v8671_v56 = vpop.f32.mrb[90].mxu1  ;;  %7506 = vperm.xlu1 %9221, %v9710_v10  }
 0x6ff   : > { %v8560_v38 = vpop.f32.mrb[91].mxu0  ;;  %v8672_v49 = vpop.f32.mrb[91].mxu1  ;;  %v7159_v9 = vadd.f32 %v8558_v3, %v6581_v55 }
 0x700   : > { %v9712_v62 = vpop.eup %9711  ;;  %v7191_v24 = vadd.f32 %v8670_v37, %v6613_v32  ;;  %v8561_v45 = vadd.f32 %v8560_v38, %v8559_v15  ;;  %v8673_v21 = vadd.f32 %v8672_v49, %v8671_v56  ;;  %v7351_v20 = vld [vmem:[#allocation3 + $0x50] sm:$0xff]  ;;  %v6201_v37 = vld [vmem:[#allocation3 + $0x80] sm:$0xff]  ;;  %v14111_v15 = vpop.permute.xlu0 %6516 }
 0x701   : > { %v9714_v28 = vpop.eup %9713  ;;  %7661 = vperm.xlu0 %9222, %v9712_v62   ;;  %9723 = vrcp.f32 %v7351_v20  ;;  %7224 = vst.msk [vmem:[#allocation3 + $0x60] sm:$0xff] %vm7211_vm9, %v7159_v9  ;;  %v7383_v19 = vld [vmem:[#allocation3 + $0x150] sm:$0xff]  ;;  %v6233_v56 = vld [vmem:[#allocation3 + $0x180] sm:$0xff]  ;;  %v6202_v62 = vld [vmem:[#allocation3 + $0x88] sm:$0xff] }
 0x702   : > { %7256 = vst.msk [vmem:[#allocation3 + $0x160] sm:$0xff] %vm7211_vm9, %v7191_v24  ;;  %v7160_v11 = vadd.f32 %v8561_v45, %v6582_v23  ;;  %v7192_v54 = vadd.f32 %v8673_v21, %v6614_v2  ;;  %v7352_v25 = vld [vmem:[#allocation3 + $0x58] sm:$0xff]  ;;  %7666 = vperm.xlu1 %9221, %v9714_v28   ;;  %v14113_v23 = vpop.permute.xlu1 %6511  ;;  %v6234_v9 = vld [vmem:[#allocation3 + $0x188] sm:$0xff]  ;;  %v6585_v28 = vmul.f32 %v14011_v18, %v6201_v37 }
 0x703   : > { %v9716_v26 = vpop.eup %9715  ;;  %9725 = vrcp.f32 %v7352_v25  ;;  %v7384_v30 = vld [vmem:[#allocation3 + $0x158] sm:$0xff]  ;;  %v8562_v46 = vpop.f32.mrb[92].mxu0  ;;  %v6586_v5 = vmul.f32 %v14013_v36, %v6202_v62  ;;  %v6618_v33 = vmul.f32 %v14084_v57, %v6234_v9 }
 0x704   : > { %7225 = vst.msk [vmem:[#allocation3 + $0x68] sm:$0xff] %vm7211_vm9, %v7160_v11  ;;  %7257 = vst.msk [vmem:[#allocation3 + $0x168] sm:$0xff] %vm7211_vm9, %v7192_v54  ;;  %v8674_v41 = vpop.f32.mrb[92].mxu1  ;;  %v8563_v39 = vpop.f32.mrb[93].mxu0  ;;  %9727 = vrcp.f32 %v7383_v19  ;;  %v6617_v54 = vmul.f32 %v14086_v61, %v6233_v56 }
 0x705   : > { %v8675_v63 = vpop.f32.mrb[93].mxu1  ;;  %7511 = vperm.xlu0 %9222, %v9716_v26   ;;  %v9718_v60 = vpop.eup %9717  ;;  %v8564_v40 = vadd.f32 %v8563_v39, %v8562_v46  ;;  %9729 = vrcp.f32 %v7384_v30 }
 0x706   : > { %v8676_v52 = vadd.f32 %v8675_v63, %v8674_v41  ;;  %v8565_v47 = vpop.f32.mrb[94].mxu0  ;;  %v8677_v17 = vpop.f32.mrb[94].mxu1  ;;  %7516 = vperm.xlu1 %9221, %v9718_v60  }
 0x707   : > { %v8566_v31 = vpop.f32.mrb[95].mxu0  ;;  %v8678_v55 = vpop.f32.mrb[95].mxu1  ;;  %v7161_v48 = vadd.f32 %v8564_v40, %v6583_v4 }
 0x708   : > { %v9720_v29 = vpop.eup %9719  ;;  %v7193_v12 = vadd.f32 %v8676_v52, %v6615_v13  ;;  %v8567_v10 = vadd.f32 %v8566_v31, %v8565_v47  ;;  %v8679_v32 = vadd.f32 %v8678_v55, %v8677_v17  ;;  %v14106_v8 = vld [vmem:[#allocation3 + $0x60] sm:$0xff]  ;;  %v6203_v13 = vld [vmem:[#allocation3 + $0x90] sm:$0xff]  ;;  %v14135_v40 = vpop.permute.xlu0 %6526  ;;  %v6204_v31 = vld [vmem:[#allocation3 + $0x98] sm:$0xff] }
 0x709   : > { %v9722_v3 = vpop.eup %9721  ;;  %7671 = vperm.xlu0 %9222, %v9720_v29   ;;  %9731 = vrcp.f32 %v14106_v8  ;;  %7226 = vst.msk [vmem:[#allocation3 + $0x70] sm:$0xff] %vm7211_vm9, %v7161_v48  ;;  %v14115_v2 = vld [vmem:[#allocation3 + $0x160] sm:$0xff]  ;;  %v6235_v52 = vld [vmem:[#allocation3 + $0x190] sm:$0xff]  ;;  %v14137_v47 = vpop.permute.xlu1 %6521  ;;  %v6236_v55 = vld [vmem:[#allocation3 + $0x198] sm:$0xff]  ;;  %v6588_v9 = vmul.f32 %v14017_v59, %v6204_v31 }
 0x70a   : > { %7258 = vst.msk [vmem:[#allocation3 + $0x170] sm:$0xff] %vm7211_vm9, %v7193_v12  ;;  %v7162_v1 = vadd.f32 %v8567_v10, %v6584_v51  ;;  %v7194_v35 = vadd.f32 %v8679_v32, %v6616_v44  ;;  %7676 = vperm.xlu1 %9221, %v9722_v3   ;;  %v6587_v10 = vmul.f32 %v14015_v53, %v6203_v13 }
 0x70b   : > { %v14117_v38 = vld [vmem:[#allocation3 + $0x68] sm:$0xff]  ;;  %v9724_v49 = vpop.eup %9723  ;;  %v8568_v45 = vpop.f32.mrb[96].mxu0 }
 0x70c   : > { %9733 = vrcp.f32 %v14117_v38  ;;  %v14120_v24 = vld [vmem:[#allocation3 + $0x168] sm:$0xff]  ;;  %7227 = vst.msk [vmem:[#allocation3 + $0x78] sm:$0xff] %vm7211_vm9, %v7162_v1  ;;  %7259 = vst.msk [vmem:[#allocation3 + $0x178] sm:$0xff] %vm7211_vm9, %v7194_v35  ;;  %v8680_v21 = vpop.f32.mrb[96].mxu1  ;;  %v8569_v20 = vpop.f32.mrb[97].mxu0  ;;  %v6619_v1 = vmul.f32 %v14098_v22, %v6235_v52 }
 0x70d   : > { %v8681_v42 = vpop.f32.mrb[97].mxu1  ;;  %7521 = vperm.xlu0 %9222, %v9724_v49   ;;  %v9726_v11 = vpop.eup %9725  ;;  %9735 = vrcp.f32 %v14115_v2  ;;  %v8570_v0 = vadd.f32 %v8569_v20, %v8568_v45  ;;  %v6620_v45 = vmul.f32 %v14096_v6, %v6236_v55 }
 0x70e   : > { %v8682_v19 = vadd.f32 %v8681_v42, %v8680_v21  ;;  %v8571_v25 = vpop.f32.mrb[98].mxu0  ;;  %v8683_v26 = vpop.f32.mrb[98].mxu1  ;;  %9737 = vrcp.f32 %v14120_v24  ;;  %7526 = vperm.xlu1 %9221, %v9726_v11  }
 0x70f   : > { %v8572_v30 = vpop.f32.mrb[99].mxu0  ;;  %v8684_v18 = vpop.f32.mrb[99].mxu1  ;;  %v7163_v41 = vadd.f32 %v8570_v0, %v6585_v28 }
 0x710   : > { %v9728_v46 = vpop.eup %9727  ;;  %v7195_v4 = vadd.f32 %v8682_v19, %v6617_v54  ;;  %v8573_v39 = vadd.f32 %v8572_v30, %v8571_v25  ;;  %v8685_v61 = vadd.f32 %v8684_v18, %v8683_v26  ;;  %v14130_v60 = vld [vmem:[#allocation3 + $0x70] sm:$0xff]  ;;  %v6205_v19 = vld [vmem:[#allocation3 + $0xa0] sm:$0xff]  ;;  %v14159_v25 = vpop.permute.xlu0 %6536 }
 0x711   : > { %v9730_v63 = vpop.eup %9729  ;;  %7681 = vperm.xlu0 %9222, %v9728_v46   ;;  %9739 = vrcp.f32 %v14130_v60  ;;  %7228 = vst.msk [vmem:[#allocation3 + $0x80] sm:$0xff] %vm7211_vm9, %v7163_v41  ;;  %v14139_v17 = vld [vmem:[#allocation3 + $0x170] sm:$0xff]  ;;  %v6237_v26 = vld [vmem:[#allocation3 + $0x1a0] sm:$0xff]  ;;  %v6206_v46 = vld [vmem:[#allocation3 + $0xa8] sm:$0xff] }
 0x712   : > { %7260 = vst.msk [vmem:[#allocation3 + $0x180] sm:$0xff] %vm7211_vm9, %v7195_v4  ;;  %v7164_v36 = vadd.f32 %v8573_v39, %v6586_v5  ;;  %v7196_v57 = vadd.f32 %v8685_v61, %v6618_v33  ;;  %7686 = vperm.xlu1 %9221, %v9730_v63   ;;  %v14161_v5 = vpop.permute.xlu1 %6531  ;;  %v6238_v41 = vld [vmem:[#allocation3 + $0x1a8] sm:$0xff]  ;;  %v6589_v63 = vmul.f32 %v14019_v58, %v6205_v19 }
 0x713   : > { %v14141_v51 = vld [vmem:[#allocation3 + $0x78] sm:$0xff]  ;;  %v9732_v44 = vpop.eup %9731  ;;  %v8574_v48 = vpop.f32.mrb[100].mxu0  ;;  %v6621_v52 = vmul.f32 %v14113_v23, %v6237_v26 }
 0x714   : > { %9741 = vrcp.f32 %v14141_v51  ;;  %v14144_v29 = vld [vmem:[#allocation3 + $0x178] sm:$0xff]  ;;  %7229 = vst.msk [vmem:[#allocation3 + $0x88] sm:$0xff] %vm7211_vm9, %v7164_v36  ;;  %7261 = vst.msk [vmem:[#allocation3 + $0x188] sm:$0xff] %vm7211_vm9, %v7196_v57  ;;  %v8686_v12 = vpop.f32.mrb[100].mxu1  ;;  %v8575_v32 = vpop.f32.mrb[101].mxu0 }
 0x715   : > { %v8687_v3 = vpop.f32.mrb[101].mxu1  ;;  %7531 = vperm.xlu0 %9222, %v9732_v44   ;;  %9743 = vrcp.f32 %v14139_v17  ;;  %v8576_v35 = vadd.f32 %v8575_v32, %v8574_v48  ;;  %v8577_v49 = vpop.f32.mrb[102].mxu0 }
 0x716   : > { %v9734_v37 = vpop.eup %9733  ;;  %v8688_v56 = vadd.f32 %v8687_v3, %v8686_v12  ;;  %v8689_v62 = vpop.f32.mrb[102].mxu1  ;;  %9745 = vrcp.f32 %v14144_v29  ;;  %v6590_v12 = vmul.f32 %v14021_v7, %v6206_v46 }
 0x717   : > { %v8578_v21 = vpop.f32.mrb[103].mxu0  ;;  %v8690_v53 = vpop.f32.mrb[103].mxu1  ;;  %7536 = vperm.xlu1 %9221, %v9734_v37   ;;  %v7165_v20 = vadd.f32 %v8576_v35, %v6587_v10  ;;  %v6622_v10 = vmul.f32 %v14111_v15, %v6238_v41 }
 0x718   : > { %v9736_v28 = vpop.eup %9735  ;;  %v7197_v42 = vadd.f32 %v8688_v56, %v6619_v1  ;;  %v8579_v11 = vadd.f32 %v8578_v21, %v8577_v49  ;;  %v8691_v22 = vadd.f32 %v8690_v53, %v8689_v62  ;;  %v14154_v0 = vld [vmem:[#allocation3 + $0x80] sm:$0xff]  ;;  %v6207_v62 = vld [vmem:[#allocation3 + $0xb0] sm:$0xff]  ;;  %v14185_v21 = vpop.permute.xlu1 %6541 }
 0x719   : > { %v9738_v54 = vpop.eup %9737  ;;  %7691 = vperm.xlu0 %9222, %v9736_v28   ;;  %9747 = vrcp.f32 %v14154_v0  ;;  %7230 = vst.msk [vmem:[#allocation3 + $0x90] sm:$0xff] %vm7211_vm9, %v7165_v20  ;;  %v14163_v33 = vld [vmem:[#allocation3 + $0x180] sm:$0xff] }
 0x71a   : > { %7262 = vst.msk [vmem:[#allocation3 + $0x190] sm:$0xff] %vm7211_vm9, %v7197_v42  ;;  %v7166_v59 = vadd.f32 %v8579_v11, %v6588_v9  ;;  %v7198_v6 = vadd.f32 %v8691_v22, %v6620_v45  ;;  %v14183_v9 = vpop.permute.xlu0 %6546  ;;  %v6239_v45 = vld [vmem:[#allocation3 + $0x1b0] sm:$0xff]  ;;  %v6208_v42 = vld [vmem:[#allocation3 + $0xb8] sm:$0xff] }
 0x71b   : > { %v14165_v30 = vld [vmem:[#allocation3 + $0x88] sm:$0xff]  ;;  %7696 = vperm.xlu1 %9221, %v9738_v54   ;;  %v9740_v18 = vpop.eup %9739  ;;  %v8580_v39 = vpop.f32.mrb[104].mxu0  ;;  %v6240_v11 = vld [vmem:[#allocation3 + $0x1b8] sm:$0xff]  ;;  %v6623_v46 = vmul.f32 %v14137_v47, %v6239_v45 }
 0x71c   : > { %9749 = vrcp.f32 %v14165_v30  ;;  %v14168_v4 = vld [vmem:[#allocation3 + $0x188] sm:$0xff]  ;;  %7231 = vst.msk [vmem:[#allocation3 + $0x98] sm:$0xff] %vm7211_vm9, %v7166_v59  ;;  %7263 = vst.msk [vmem:[#allocation3 + $0x198] sm:$0xff] %vm7211_vm9, %v7198_v6  ;;  %v8692_v61 = vpop.f32.mrb[104].mxu1  ;;  %v8581_v13 = vpop.f32.mrb[105].mxu0  ;;  %v6591_v59 = vmul.f32 %v14023_v43, %v6207_v62 }
 0x71d   : > { %v8693_v36 = vpop.f32.mrb[105].mxu1  ;;  %7541 = vperm.xlu0 %9222, %v9740_v18   ;;  %9751 = vrcp.f32 %v14163_v33  ;;  %v8582_v44 = vadd.f32 %v8581_v13, %v8580_v39  ;;  %v8583_v55 = vpop.f32.mrb[106].mxu0  ;;  %v6592_v13 = vmul.f32 %v14025_v14, %v6208_v42 }
 0x71e   : > { %v9742_v57 = vpop.eup %9741  ;;  %v8694_v31 = vadd.f32 %v8693_v36, %v8692_v61  ;;  %v8695_v48 = vpop.f32.mrb[106].mxu1  ;;  %9753 = vrcp.f32 %v14168_v4  ;;  %v6624_v36 = vmul.f32 %v14135_v40, %v6240_v11 }
 0x71f   : > { %v8584_v32 = vpop.f32.mrb[107].mxu0  ;;  %v8696_v58 = vpop.f32.mrb[107].mxu1  ;;  %7546 = vperm.xlu1 %9221, %v9742_v57   ;;  %v7167_v37 = vadd.f32 %v8582_v44, %v6589_v63 }
 0x720   : > { %v9744_v3 = vpop.eup %9743  ;;  %v7199_v1 = vadd.f32 %v8694_v31, %v6621_v52  ;;  %v8585_v35 = vadd.f32 %v8584_v32, %v8583_v55  ;;  %v8697_v23 = vadd.f32 %v8696_v58, %v8695_v48  ;;  %v14178_v49 = vld [vmem:[#allocation3 + $0x90] sm:$0xff]  ;;  %v14207_v32 = vpop.permute.xlu0 %6396  ;;  %v6241_v58 = vld [vmem:[#allocation3 + $0x1c0] sm:$0xff] }
 0x721   : > { %v9746_v56 = vpop.eup %9745  ;;  %7701 = vperm.xlu0 %9222, %v9744_v3   ;;  %9755 = vrcp.f32 %v14178_v49  ;;  %7232 = vst.msk [vmem:[#allocation3 + $0xa0] sm:$0xff] %vm7211_vm9, %v7167_v37  ;;  %v14187_v53 = vld [vmem:[#allocation3 + $0x190] sm:$0xff]  ;;  %v14209_v3 = vpop.permute.xlu1 %6391 }
 0x722   : > { %7264 = vst.msk [vmem:[#allocation3 + $0x1a0] sm:$0xff] %vm7211_vm9, %v7199_v1  ;;  %v7168_v7 = vadd.f32 %v8585_v35, %v6590_v12  ;;  %v7200_v15 = vadd.f32 %v8697_v23, %v6622_v10  ;;  %v6209_v10 = vld [vmem:[#allocation3 + $0xc0] sm:$0xff]  ;;  %v6210_v23 = vld [vmem:[#allocation3 + $0xc8] sm:$0xff] }
 0x723   : > { %v14189_v28 = vld [vmem:[#allocation3 + $0x98] sm:$0xff]  ;;  %7706 = vperm.xlu1 %9221, %v9746_v56   ;;  %v9748_v20 = vpop.eup %9747  ;;  %v8586_v54 = vpop.f32.mrb[108].mxu0  ;;  %v6242_v56 = vld [vmem:[#allocation3 + $0x1c8] sm:$0xff]  ;;  %v6593_v45 = vmul.f32 %v14027_v34, %v6209_v10 }
 0x724   : > { %9757 = vrcp.f32 %v14189_v28  ;;  %v14192_v22 = vld [vmem:[#allocation3 + $0x198] sm:$0xff]  ;;  %7233 = vst.msk [vmem:[#allocation3 + $0xa8] sm:$0xff] %vm7211_vm9, %v7168_v7  ;;  %7265 = vst.msk [vmem:[#allocation3 + $0x1a8] sm:$0xff] %vm7211_vm9, %v7200_v15  ;;  %v8698_v19 = vpop.f32.mrb[108].mxu1  ;;  %v8587_v6 = vpop.f32.mrb[109].mxu0 }
 0x725   : > { %v8699_v26 = vpop.f32.mrb[109].mxu1  ;;  %7551 = vperm.xlu0 %9222, %v9748_v20   ;;  %9759 = vrcp.f32 %v14187_v53  ;;  %v8588_v41 = vadd.f32 %v8587_v6, %v8586_v54  ;;  %v8589_v61 = vpop.f32.mrb[110].mxu0  ;;  %v6625_v54 = vmul.f32 %v14161_v5, %v6241_v58  ;;  %v6212_v10 = vld [vmem:[#allocation3 + $0xd8] sm:$0xff] }
 0x726   : > { %v9750_v18 = vpop.eup %9749  ;;  %v8700_v39 = vadd.f32 %v8699_v26, %v8698_v19  ;;  %v8701_v63 = vpop.f32.mrb[110].mxu1  ;;  %9761 = vrcp.f32 %v14192_v22 }
 0x727   : > { %v8590_v57 = vpop.f32.mrb[111].mxu0  ;;  %v8702_v43 = vpop.f32.mrb[111].mxu1  ;;  %7556 = vperm.xlu1 %9221, %v9750_v18   ;;  %v7169_v44 = vadd.f32 %v8588_v41, %v6591_v59  ;;  %v6594_v18 = vmul.f32 %v14029_v27, %v6210_v23 }
 0x728   : > { %v9752_v52 = vpop.eup %9751  ;;  %v7201_v31 = vadd.f32 %v8700_v39, %v6623_v46  ;;  %v8591_v55 = vadd.f32 %v8590_v57, %v8589_v61  ;;  %v8703_v47 = vadd.f32 %v8702_v43, %v8701_v63  ;;  %v14202_v12 = vld [vmem:[#allocation3 + $0xa0] sm:$0xff]  ;;  %v6626_v46 = vmul.f32 %v14159_v25, %v6242_v56  ;;  %v6211_v43 = vld [vmem:[#allocation3 + $0xd0] sm:$0xff] }
 0x729   : > { %v9754_v48 = vpop.eup %9753  ;;  %7711 = vperm.xlu0 %9222, %v9752_v52   ;;  %9763 = vrcp.f32 %v14202_v12  ;;  %7234 = vst.msk [vmem:[#allocation3 + $0xb0] sm:$0xff] %vm7211_vm9, %v7169_v44  ;;  %v14211_v37 = vld [vmem:[#allocation3 + $0x1a0] sm:$0xff]  ;;  %v14231_v52 = vpop.permute.xlu0 %6556  ;;  %v6243_v44 = vld [vmem:[#allocation3 + $0x1d0] sm:$0xff]  ;;  %v6595_v23 = vmul.f32 %v14031_v16, %v6211_v43 }
 0x72a   : > { %7266 = vst.msk [vmem:[#allocation3 + $0x1b0] sm:$0xff] %vm7211_vm9, %v7201_v31  ;;  %v7170_v14 = vadd.f32 %v8591_v55, %v6592_v13  ;;  %v7202_v40 = vadd.f32 %v8703_v47, %v6624_v36  ;;  %v14233_v31 = vpop.permute.xlu1 %6551 }
 0x72b   : > { %v14213_v1 = vld [vmem:[#allocation3 + $0xa8] sm:$0xff]  ;;  %7716 = vperm.xlu1 %9221, %v9754_v48   ;;  %v9756_v35 = vpop.eup %9755  ;;  %v8592_v7 = vpop.f32.mrb[112].mxu0 }
 0x72c   : > { %9765 = vrcp.f32 %v14213_v1  ;;  %v14216_v62 = vld [vmem:[#allocation3 + $0x1a8] sm:$0xff]  ;;  %7235 = vst.msk [vmem:[#allocation3 + $0xb8] sm:$0xff] %vm7211_vm9, %v7170_v14  ;;  %7267 = vst.msk [vmem:[#allocation3 + $0x1b8] sm:$0xff] %vm7211_vm9, %v7202_v40  ;;  %v8704_v15 = vpop.f32.mrb[112].mxu1  ;;  %v8593_v20 = vpop.f32.mrb[113].mxu0  ;;  %v6244_v14 = vld [vmem:[#allocation3 + $0x1d8] sm:$0xff] }
 0x72d   : > { %v8705_v42 = vpop.f32.mrb[113].mxu1  ;;  %7561 = vperm.xlu0 %9222, %v9756_v35   ;;  %9767 = vrcp.f32 %v14211_v37  ;;  %v8594_v19 = vadd.f32 %v8593_v20, %v8592_v7  ;;  %v8595_v6 = vpop.f32.mrb[114].mxu0 }
 0x72e   : > { %v9758_v11 = vpop.eup %9757  ;;  %v8706_v59 = vadd.f32 %v8705_v42, %v8704_v15  ;;  %v8707_v26 = vpop.f32.mrb[114].mxu1  ;;  %9769 = vrcp.f32 %v14216_v62 }
 0x72f   : > { %v8596_v41 = vpop.f32.mrb[115].mxu0  ;;  %v8708_v34 = vpop.f32.mrb[115].mxu1  ;;  %7566 = vperm.xlu1 %9221, %v9758_v11   ;;  %v7171_v61 = vadd.f32 %v8594_v19, %v6593_v45  ;;  %v6627_v45 = vmul.f32 %v14185_v21, %v6243_v44  ;;  %v6596_v19 = vmul.f32 %v14033_v50, %v6212_v10  ;;  %v6246_v44 = vld [vmem:[#allocation3 + $0x1e8] sm:$0xff] }
 0x730   : > { %v9760_v39 = vpop.eup %9759  ;;  %v7203_v63 = vadd.f32 %v8706_v59, %v6625_v54  ;;  %v8597_v13 = vadd.f32 %v8596_v41, %v8595_v6  ;;  %v8709_v5 = vadd.f32 %v8708_v34, %v8707_v26  ;;  %v14226_v57 = vld [vmem:[#allocation3 + $0xb0] sm:$0xff]  ;;  %v6628_v59 = vmul.f32 %v14183_v9, %v6244_v14 }
 0x731   : > { %v9762_v36 = vpop.eup %9761  ;;  %7721 = vperm.xlu0 %9222, %v9760_v39   ;;  %9771 = vrcp.f32 %v14226_v57  ;;  %7236 = vst.msk [vmem:[#allocation3 + $0xc0] sm:$0xff] %vm7211_vm9, %v7171_v61  ;;  %v14235_v55 = vld [vmem:[#allocation3 + $0x1b0] sm:$0xff]  ;;  %v6213_v61 = vld [vmem:[#allocation3 + $0xe0] sm:$0xff] }
 0x732   : > { %7268 = vst.msk [vmem:[#allocation3 + $0x1c0] sm:$0xff] %vm7211_vm9, %v7203_v63  ;;  %v7172_v27 = vadd.f32 %v8597_v13, %v6594_v18  ;;  %v7204_v25 = vadd.f32 %v8709_v5, %v6626_v46  ;;  %v14255_v63 = vpop.permute.xlu0 %6406  ;;  %v6245_v13 = vld [vmem:[#allocation3 + $0x1e0] sm:$0xff]  ;;  %v6402_v5 = vpop.permute.xlu1 %6401 }
 0x733   : > { %v14237_v47 = vld [vmem:[#allocation3 + $0xb8] sm:$0xff]  ;;  %7726 = vperm.xlu1 %9221, %v9762_v36   ;;  %v9764_v48 = vpop.eup %9763  ;;  %v8598_v58 = vpop.f32.mrb[116].mxu0 }
 0x734   : > { %9773 = vrcp.f32 %v14237_v47  ;;  %v14240_v40 = vld [vmem:[#allocation3 + $0x1b8] sm:$0xff]  ;;  %7237 = vst.msk [vmem:[#allocation3 + $0xc8] sm:$0xff] %vm7211_vm9, %v7172_v27  ;;  %7269 = vst.msk [vmem:[#allocation3 + $0x1c8] sm:$0xff] %vm7211_vm9, %v7204_v25  ;;  %v8710_v35 = vpop.f32.mrb[116].mxu1  ;;  %v8599_v56 = vpop.f32.mrb[117].mxu0  ;;  %v6214_v25 = vld [vmem:[#allocation3 + $0xe8] sm:$0xff] }
 0x735   : > { %v8711_v7 = vpop.f32.mrb[117].mxu1  ;;  %7571 = vperm.xlu0 %9222, %v9764_v48   ;;  %9775 = vrcp.f32 %v14235_v55  ;;  %v8600_v20 = vadd.f32 %v8599_v56, %v8598_v58  ;;  %v8601_v11 = vpop.f32.mrb[118].mxu0  ;;  %v6597_v58 = vmul.f32 %v14209_v3, %v6213_v61 }
 0x736   : > { %v9766_v15 = vpop.eup %9765  ;;  %v8712_v42 = vadd.f32 %v8711_v7, %v8710_v35  ;;  %v8713_v54 = vpop.f32.mrb[118].mxu1  ;;  %9777 = vrcp.f32 %v14240_v40  ;;  %v6629_v7 = vmul.f32 %v14233_v31, %v6245_v13 }
 0x737   : > { %v8602_v6 = vpop.f32.mrb[119].mxu0  ;;  %v8714_v16 = vpop.f32.mrb[119].mxu1  ;;  %7576 = vperm.xlu1 %9221, %v9766_v15   ;;  %v7173_v18 = vadd.f32 %v8600_v20, %v6595_v23 }
 0x738   : > { %v9768_v26 = vpop.eup %9767  ;;  %v7205_v46 = vadd.f32 %v8712_v42, %v6627_v45  ;;  %v8603_v41 = vadd.f32 %v8602_v6, %v8601_v11  ;;  %v8715_v21 = vadd.f32 %v8714_v16, %v8713_v54  ;;  %v14250_v39 = vld [vmem:[#allocation3 + $0xc0] sm:$0xff]  ;;  %v6598_v11 = vmul.f32 %v14207_v32, %v6214_v25  ;;  %v6562_v61 = vpop.permute.xlu1 %6561  ;;  %v6248_v25 = vld [vmem:[#allocation3 + $0x1f8] sm:$0xff] }
 0x739   : > { %v9770_v34 = vpop.eup %9769  ;;  %7731 = vperm.xlu0 %9222, %v9768_v26   ;;  %9779 = vrcp.f32 %v14250_v39  ;;  %7238 = vst.msk [vmem:[#allocation3 + $0xd0] sm:$0xff] %vm7211_vm9, %v7173_v18  ;;  %v14257_v36 = vld [vmem:[#allocation3 + $0x1c0] sm:$0xff]  ;;  %v6630_v54 = vmul.f32 %v14231_v52, %v6246_v44 }
 0x73a   : > { %7270 = vst.msk [vmem:[#allocation3 + $0x1d0] sm:$0xff] %vm7211_vm9, %v7205_v46  ;;  %v7174_v50 = vadd.f32 %v8603_v41, %v6596_v19  ;;  %v7206_v9 = vadd.f32 %v8715_v21, %v6628_v59  ;;  %v6215_v41 = vld [vmem:[#allocation3 + $0xf0] sm:$0xff]  ;;  %v6567_v21 = vpop.permute.xlu0 %6566 }
 0x73b   : > { %v14259_v43 = vld [vmem:[#allocation3 + $0xc8] sm:$0xff]  ;;  %7736 = vperm.xlu1 %9221, %v9770_v34   ;;  %v9772_v27 = vpop.eup %9771  ;;  %v8604_v10 = vpop.f32.mrb[120].mxu0  ;;  %v6247_v34 = vld [vmem:[#allocation3 + $0x1f0] sm:$0xff] }
 0x73c   : > { %9781 = vrcp.f32 %v14259_v43  ;;  %v14262_v48 = vld [vmem:[#allocation3 + $0x1c8] sm:$0xff]  ;;  %7239 = vst.msk [vmem:[#allocation3 + $0xd8] sm:$0xff] %vm7211_vm9, %v7174_v50  ;;  %7271 = vst.msk [vmem:[#allocation3 + $0x1d8] sm:$0xff] %vm7211_vm9, %v7206_v9  ;;  %v8716_v14 = vpop.f32.mrb[120].mxu1  ;;  %v8605_v35 = vpop.f32.mrb[121].mxu0 }
 0x73d   : > { %v8717_v23 = vpop.f32.mrb[121].mxu1  ;;  %7581 = vperm.xlu0 %9222, %v9772_v27   ;;  %9783 = vrcp.f32 %v14257_v36  ;;  %v8606_v15 = vadd.f32 %v8605_v35, %v8604_v10  ;;  %v8607_v20 = vpop.f32.mrb[122].mxu0  ;;  %v6216_v27 = vld [vmem:[#allocation3 + $0xf8] sm:$0xff] }
 0x73e   : > { %v9774_v56 = vpop.eup %9773  ;;  %v8718_v45 = vadd.f32 %v8717_v23, %v8716_v14  ;;  %v8719_v42 = vpop.f32.mrb[122].mxu1  ;;  %9785 = vrcp.f32 %v14262_v48 }
 0x73f   : > { %v8608_v19 = vpop.f32.mrb[123].mxu0  ;;  %v8720_v3 = vpop.f32.mrb[123].mxu1  ;;  %7586 = vperm.xlu1 %9221, %v9774_v56   ;;  %v7175_v6 = vadd.f32 %v8606_v15, %v6597_v58  ;;  %v6599_v58 = vmul.f32 %v6402_v5, %v6215_v41 }
 0x740   : > { %v9776_v59 = vpop.eup %9775  ;;  %v7207_v16 = vadd.f32 %v8718_v45, %v6629_v7  ;;  %v8609_v26 = vadd.f32 %v8608_v19, %v8607_v20  ;;  %v8721_v31 = vadd.f32 %v8720_v3, %v8719_v42  ;;  %v14272_v46 = vld [vmem:[#allocation3 + $0xd0] sm:$0xff]  ;;  %v6631_v7 = vmul.f32 %v6562_v61, %v6247_v34 }
 0x741   : > { %v9778_v18 = vpop.eup %9777  ;;  %7741 = vperm.xlu0 %9222, %v9776_v59   ;;  %9787 = vrcp.f32 %v14272_v46  ;;  %7240 = vst.msk [vmem:[#allocation3 + $0xe0] sm:$0xff] %vm7211_vm9, %v7175_v6  ;;  %v14277_v50 = vld [vmem:[#allocation3 + $0x1d0] sm:$0xff] }
 0x742   : > { %7272 = vst.msk [vmem:[#allocation3 + $0x1e0] sm:$0xff] %vm7211_vm9, %v7207_v16  ;;  %v7176_v32 = vadd.f32 %v8609_v26, %v6598_v11  ;;  %v7208_v52 = vadd.f32 %v8721_v31, %v6630_v54  ;;  %v6600_v11 = vmul.f32 %v14255_v63, %v6216_v27  ;;  %v6632_v54 = vmul.f32 %v6567_v21, %v6248_v25 }
 0x743   : > { %v14279_v9 = vld [vmem:[#allocation3 + $0xd8] sm:$0xff]  ;;  %7746 = vperm.xlu1 %9221, %v9778_v18   ;;  %v9780_v13 = vpop.eup %9779  ;;  %v8610_v10 = vpop.f32.mrb[124].mxu0 }
 0x744   : > { %9789 = vrcp.f32 %v14279_v9  ;;  %v14282_v44 = vld [vmem:[#allocation3 + $0x1d8] sm:$0xff]  ;;  %7241 = vst.msk [vmem:[#allocation3 + $0xe8] sm:$0xff] %vm7211_vm9, %v7176_v32  ;;  %7273 = vst.msk [vmem:[#allocation3 + $0x1e8] sm:$0xff] %vm7211_vm9, %v7208_v52  ;;  %v8722_v14 = vpop.f32.mrb[124].mxu1  ;;  %v8611_v35 = vpop.f32.mrb[125].mxu0 }
 0x745   : > { %v8723_v23 = vpop.f32.mrb[125].mxu1  ;;  %7591 = vperm.xlu0 %9222, %v9780_v13   ;;  %9791 = vrcp.f32 %v14277_v50  ;;  %v8612_v15 = vadd.f32 %v8611_v35, %v8610_v10  ;;  %v8613_v20 = vpop.f32.mrb[126].mxu0 }
 0x746   : > { %v9782_v56 = vpop.eup %9781  ;;  %v8724_v45 = vadd.f32 %v8723_v23, %v8722_v14  ;;  %v8725_v42 = vpop.f32.mrb[126].mxu1  ;;  %9793 = vrcp.f32 %v14282_v44 }
 0x747   : > { %v8614_v19 = vpop.f32.mrb[127].mxu0  ;;  %v8726_v3 = vpop.f32.mrb[127].mxu1  ;;  %7596 = vperm.xlu1 %9221, %v9782_v56   ;;  %v7177_v59 = vadd.f32 %v8612_v15, %v6599_v58  ;;  %v9811_v56 = vld [vmem:[#allocation3 + $0x100] sm:$0xff] }
 0x748   : > { %v9784_v5 = vpop.eup %9783  ;;  %v7209_v6 = vadd.f32 %v8724_v45, %v6631_v7  ;;  %v8615_v16 = vadd.f32 %v8614_v19, %v8613_v20  ;;  %v8727_v26 = vadd.f32 %v8726_v3, %v8725_v42  ;;  %v14289_v18 = vld [vmem:[#allocation3 + $0xe0] sm:$0xff]  ;;  %v9813_v19 = vld [vmem:[#allocation3 + $0x8] sm:$0xff] }
 0x749   : > { %v9786_v31 = vpop.eup %9785  ;;  %7751 = vperm.xlu0 %9222, %v9784_v5   ;;  %9795 = vrcp.f32 %v14289_v18  ;;  %7242 = vst.msk [vmem:[#allocation3 + $0xf0] sm:$0xff] %vm7211_vm9, %v7177_v59  ;;  %v14294_v32 = vld [vmem:[#allocation3 + $0x1e0] sm:$0xff] }
 0x74a   : > { %7274 = vst.msk [vmem:[#allocation3 + $0x1f0] sm:$0xff] %vm7211_vm9, %v7209_v6  ;;  %v7178_v63 = vadd.f32 %v8615_v16, %v6600_v11  ;;  %v7210_v41 = vadd.f32 %v8727_v26, %v6632_v54  ;;  %v9812_v20 = vld [vmem:[#allocation3] sm:$0xff]  ;;  %v9814_v6 = vld [vmem:[#allocation3 + $0x108] sm:$0xff] }
 0x74b   : > { %v14296_v52 = vld [vmem:[#allocation3 + $0xe8] sm:$0xff]  ;;  %7756 = vperm.xlu1 %9221, %v9786_v31   ;;  %v9788_v21 = vpop.eup %9787 }
 0x74c   : > { %9797 = vrcp.f32 %v14296_v52  ;;  %7243 = vst.msk [vmem:[#allocation3 + $0xf8] sm:$0xff] %vm7211_vm9, %v7178_v63  ;;  %7275 = vst.msk [vmem:[#allocation3 + $0x1f8] sm:$0xff] %vm7211_vm9, %v7210_v41  ;;  %v14301_v34 = vld [vmem:[#allocation3 + $0x1e8] sm:$0xff] }
 0x74d   : > { %7601 = vperm.xlu0 %9222, %v9788_v21   ;;  %9799 = vrcp.f32 %v14294_v32  ;;  %v9815_v21 = vld [vmem:[#allocation3 + $0x110] sm:$0xff] }
 0x74e   : > { %v9790_v61 = vpop.eup %9789  ;;  %9801 = vrcp.f32 %v14301_v34 }
 0x74f   : > { %7606 = vperm.xlu1 %9221, %v9790_v61   ;;  %v9792_v13 = vpop.eup %9791 }
 0x750   : > { %v9794_v27 = vpop.eup %9793  ;;  %v14305_v25 = vld [vmem:[#allocation3 + $0xf0] sm:$0xff] }
 0x751   : > { %7761 = vperm.xlu0 %9222, %v9792_v13   ;;  %9803 = vrcp.f32 %v14305_v25  ;;  %v14308_v10 = vld [vmem:[#allocation3 + $0x1f0] sm:$0xff] }
 0x753   : > { %v14310_v14 = vld [vmem:[#allocation3 + $0xf8] sm:$0xff]  ;;  %7766 = vperm.xlu1 %9221, %v9794_v27   ;;  %v9796_v58 = vpop.eup %9795 }
 0x754   : > { %9805 = vrcp.f32 %v14310_v14  ;;  %v14313_v23 = vld [vmem:[#allocation3 + $0x1f8] sm:$0xff] }
 0x755   : > { %v7632_v35 = vpop.permute.xlu0 %7631  ;;  %7611 = vperm.xlu0 %9222, %v9796_v58   ;;  %9807 = vrcp.f32 %v14308_v10  ;;  %v9816_v58 = vld [vmem:[#allocation3 + $0x10] sm:$0xff] }
 0x756   : > { %v7821_v7 = vmul.f32 %v9811_v56, %v7632_v35  ;;  %v9798_v15 = vpop.eup %9797  ;;  %9809 = vrcp.f32 %v14313_v23 }
 0x757   : > { %v7472_v45 = vpop.permute.xlu1 %7471  ;;  %7616 = vperm.xlu1 %9221, %v9798_v15   ;;  %v9800_v11 = vpop.eup %9799 }
 0x758   : > { %7885 = vst.msk [vmem:[%s9938_s20 + $0x100] sm:$0xff] %vm3966_vm5, %v7821_v7  ;;  %v7789_v42 = vmul.f32 %v9812_v20, %v7472_v45  ;;  %v9802_v5 = vpop.eup %9801  ;;  %v9817_v7 = vld [vmem:[#allocation3 + $0x18] sm:$0xff] }
 0x759   : > { %v7477_v54 = vpop.permute.xlu0 %7476  ;;  %7771 = vperm.xlu0 %9222, %v9800_v11   ;;  %v9818_v20 = vld [vmem:[#allocation3 + $0x118] sm:$0xff] }
 0x75a   : > { %7853 = vst.msk [vmem:[%s9938_s20] sm:$0xff] %vm3966_vm5, %v7789_v42  ;;  %v7790_v3 = vmul.f32 %v9813_v19, %v7477_v54  ;;  %v9819_v54 = vld [vmem:[#allocation3 + $0x20] sm:$0xff] }
 0x75b   : > { %v7637_v59 = vpop.permute.xlu1 %7636  ;;  %7776 = vperm.xlu1 %9221, %v9802_v5   ;;  %v9804_v26 = vpop.eup %9803  ;;  %v9820_v5 = vld [vmem:[#allocation3 + $0x28] sm:$0xff] }
 0x75c   : > { %7854 = vst.msk [vmem:[%s9938_s20 + $0x8] sm:$0xff] %vm3966_vm5, %v7790_v3  ;;  %v7822_v16 = vmul.f32 %v9814_v6, %v7637_v59 }
 0x75d   : > { %7621 = vperm.xlu0 %9222, %v9804_v26  }
 0x75e   : > { %7886 = vst.msk [vmem:[%s9938_s20 + $0x108] sm:$0xff] %vm3966_vm5, %v7822_v16  ;;  %v9806_v31 = vpop.eup %9805  ;;  %v9821_v16 = vld [vmem:[#allocation3 + $0x120] sm:$0xff] }
 0x75f   : > { %7626 = vperm.xlu1 %9221, %v9806_v31   ;;  %v9808_v41 = vpop.eup %9807 }
 0x760   : > { %v7642_v63 = vpop.permute.xlu0 %7641  ;;  %v9810_v13 = vpop.eup %9809 }
 0x761   : > { %v7823_v61 = vmul.f32 %v9815_v21, %v7642_v63  ;;  %7781 = vperm.xlu0 %9222, %v9808_v41   ;;  %v9822_v63 = vld [vmem:[#allocation3 + $0x128] sm:$0xff] }
 0x763   : > { %7887 = vst.msk [vmem:[%s9938_s20 + $0x110] sm:$0xff] %vm3966_vm5, %v7823_v61  ;;  %v7482_v27 = vpop.permute.xlu1 %7481  ;;  %7786 = vperm.xlu1 %9221, %v9810_v13   ;;  %v9823_v61 = vld [vmem:[#allocation3 + $0x30] sm:$0xff] }
 0x764   : > { %v7791_v35 = vmul.f32 %v9816_v58, %v7482_v27  ;;  %v9824_v58 = vld [vmem:[#allocation3 + $0x38] sm:$0xff] }
 0x766   : > { %7855 = vst.msk [vmem:[%s9938_s20 + $0x10] sm:$0xff] %vm3966_vm5, %v7791_v35 }
 0x767   : > { %v7487_v56 = vpop.permute.xlu1 %7486 }
 0x768   : > { %v7792_v15 = vmul.f32 %v9817_v7, %v7487_v56  ;;  %v9825_v7 = vld [vmem:[#allocation3 + $0x130] sm:$0xff] }
 0x76a   : > { %7856 = vst.msk [vmem:[%s9938_s20 + $0x18] sm:$0xff] %vm3966_vm5, %v7792_v15 }
 0x76b   : > { %v7647_v45 = vpop.permute.xlu1 %7646 }
 0x76c   : > { %v7824_v42 = vmul.f32 %v9818_v20, %v7647_v45  ;;  %v9826_v20 = vld [vmem:[#allocation3 + $0x138] sm:$0xff] }
 0x76e   : > { %7888 = vst.msk [vmem:[%s9938_s20 + $0x118] sm:$0xff] %vm3966_vm5, %v7824_v42 }
 0x76f   : > { %v7492_v11 = vpop.permute.xlu0 %7491 }
 0x770   : > { %v7793_v19 = vmul.f32 %v9819_v54, %v7492_v11  ;;  %v9827_v54 = vld [vmem:[#allocation3 + $0x40] sm:$0xff] }
 0x771   : > { %v7497_v3 = vpop.permute.xlu1 %7496 }
 0x772   : > { %7857 = vst.msk [vmem:[%s9938_s20 + $0x20] sm:$0xff] %vm3966_vm5, %v7793_v19  ;;  %v7794_v59 = vmul.f32 %v9820_v5, %v7497_v3  ;;  %v9828_v5 = vld [vmem:[#allocation3 + $0x48] sm:$0xff] }
 0x773   : > { %v7652_v6 = vpop.permute.xlu0 %7651 }
 0x774   : > { %7858 = vst.msk [vmem:[%s9938_s20 + $0x28] sm:$0xff] %vm3966_vm5, %v7794_v59  ;;  %v7825_v26 = vmul.f32 %v9821_v16, %v7652_v6  ;;  %v9829_v16 = vld [vmem:[#allocation3 + $0x140] sm:$0xff] }
 0x775   : > { %v7657_v31 = vpop.permute.xlu1 %7656 }
 0x776   : > { %7889 = vst.msk [vmem:[%s9938_s20 + $0x120] sm:$0xff] %vm3966_vm5, %v7825_v26  ;;  %v7826_v41 = vmul.f32 %v9822_v63, %v7657_v31  ;;  %v9830_v63 = vld [vmem:[#allocation3 + $0x148] sm:$0xff] }
 0x778   : > { %7890 = vst.msk [vmem:[%s9938_s20 + $0x128] sm:$0xff] %vm3966_vm5, %v7826_v41 }
 0x77b   : > { %v7502_v21 = vpop.permute.xlu0 %7501 }
 0x77c   : > { %v7795_v13 = vmul.f32 %v9823_v61, %v7502_v21  ;;  %v9831_v61 = vld [vmem:[#allocation3 + $0x50] sm:$0xff] }
 0x77d   : > { %v7507_v27 = vpop.permute.xlu1 %7506 }
 0x77e   : > { %7859 = vst.msk [vmem:[%s9938_s20 + $0x30] sm:$0xff] %vm3966_vm5, %v7795_v13  ;;  %v7796_v35 = vmul.f32 %v9824_v58, %v7507_v27  ;;  %v9832_v58 = vld [vmem:[#allocation3 + $0x58] sm:$0xff] }
 0x780   : > { %v7662_v56 = vpop.permute.xlu0 %7661  ;;  %7860 = vst.msk [vmem:[%s9938_s20 + $0x38] sm:$0xff] %vm3966_vm5, %v7796_v35 }
 0x781   : > { %v7827_v15 = vmul.f32 %v9825_v7, %v7662_v56  ;;  %v7667_v45 = vpop.permute.xlu1 %7666  ;;  %v9833_v7 = vld [vmem:[#allocation3 + $0x150] sm:$0xff] }
 0x782   : > { %v7828_v42 = vmul.f32 %v9826_v20, %v7667_v45  ;;  %v9834_v20 = vld [vmem:[#allocation3 + $0x158] sm:$0xff] }
 0x783   : > { %7891 = vst.msk [vmem:[%s9938_s20 + $0x130] sm:$0xff] %vm3966_vm5, %v7827_v15 }
 0x784   : > { %v7512_v11 = vpop.permute.xlu0 %7511  ;;  %7892 = vst.msk [vmem:[%s9938_s20 + $0x138] sm:$0xff] %vm3966_vm5, %v7828_v42 }
 0x785   : > { %v7797_v19 = vmul.f32 %v9827_v54, %v7512_v11  ;;  %v7517_v3 = vpop.permute.xlu1 %7516 }
 0x786   : > { %v7798_v59 = vmul.f32 %v9828_v5, %v7517_v3 }
 0x787   : > { %7861 = vst.msk [vmem:[%s9938_s20 + $0x40] sm:$0xff] %vm3966_vm5, %v7797_v19 }
 0x788   : > { %v7672_v6 = vpop.permute.xlu0 %7671  ;;  %7862 = vst.msk [vmem:[%s9938_s20 + $0x48] sm:$0xff] %vm3966_vm5, %v7798_v59 }
 0x789   : > { %v7829_v26 = vmul.f32 %v9829_v16, %v7672_v6  ;;  %v7677_v31 = vpop.permute.xlu1 %7676 }
 0x78a   : > { %v7830_v41 = vmul.f32 %v9830_v63, %v7677_v31 }
 0x78b   : > { %7893 = vst.msk [vmem:[%s9938_s20 + $0x140] sm:$0xff] %vm3966_vm5, %v7829_v26 }
 0x78c   : > { %v7522_v21 = vpop.permute.xlu0 %7521  ;;  %7894 = vst.msk [vmem:[%s9938_s20 + $0x148] sm:$0xff] %vm3966_vm5, %v7830_v41 }
 0x78d   : > { %v7799_v13 = vmul.f32 %v9831_v61, %v7522_v21  ;;  %v7527_v27 = vpop.permute.xlu1 %7526 }
 0x78e   : > { %v7800_v35 = vmul.f32 %v9832_v58, %v7527_v27 }
 0x78f   : > { %7863 = vst.msk [vmem:[%s9938_s20 + $0x50] sm:$0xff] %vm3966_vm5, %v7799_v13 }
 0x790   : > { %v7682_v56 = vpop.permute.xlu0 %7681  ;;  %7864 = vst.msk [vmem:[%s9938_s20 + $0x58] sm:$0xff] %vm3966_vm5, %v7800_v35 }
 0x791   : > { %v7831_v15 = vmul.f32 %v9833_v7, %v7682_v56  ;;  %v7687_v45 = vpop.permute.xlu1 %7686 }
 0x792   : > { %v7832_v42 = vmul.f32 %v9834_v20, %v7687_v45 }
 0x793   : > { %7895 = vst.msk [vmem:[%s9938_s20 + $0x150] sm:$0xff] %vm3966_vm5, %v7831_v15 }
 0x794   : > { %v7532_v11 = vpop.permute.xlu0 %7531  ;;  %7896 = vst.msk [vmem:[%s9938_s20 + $0x158] sm:$0xff] %vm3966_vm5, %v7832_v42 }
 0x795   : > { %v7801_v54 = vmul.f32 %v7532_v11, %v14106_v8 }
 0x796   : > { %v7537_v19 = vpop.permute.xlu1 %7536 }
 0x797   : > { %7865 = vst.msk [vmem:[%s9938_s20 + $0x60] sm:$0xff] %vm3966_vm5, %v7801_v54  ;;  %v7802_v3 = vmul.f32 %v7537_v19, %v14117_v38 }
 0x798   : > { %v7692_v5 = vpop.permute.xlu0 %7691 }
 0x799   : > { %7866 = vst.msk [vmem:[%s9938_s20 + $0x68] sm:$0xff] %vm3966_vm5, %v7802_v3  ;;  %v7833_v59 = vmul.f32 %v7692_v5, %v14115_v2 }
 0x79a   : > { %v7697_v6 = vpop.permute.xlu1 %7696 }
 0x79b   : > { %7897 = vst.msk [vmem:[%s9938_s20 + $0x160] sm:$0xff] %vm3966_vm5, %v7833_v59  ;;  %v7834_v16 = vmul.f32 %v7697_v6, %v14120_v24 }
 0x79c   : > { %v7542_v26 = vpop.permute.xlu0 %7541 }
 0x79d   : > { %7898 = vst.msk [vmem:[%s9938_s20 + $0x168] sm:$0xff] %vm3966_vm5, %v7834_v16  ;;  %v7803_v8 = vmul.f32 %v7542_v26, %v14130_v60 }
 0x79e   : > { %v7547_v31 = vpop.permute.xlu1 %7546 }
 0x79f   : > { %7867 = vst.msk [vmem:[%s9938_s20 + $0x70] sm:$0xff] %vm3966_vm5, %v7803_v8  ;;  %v7804_v38 = vmul.f32 %v7547_v31, %v14141_v51 }
 0x7a0   : > { %v7702_v63 = vpop.permute.xlu0 %7701 }
 0x7a1   : > { %7868 = vst.msk [vmem:[%s9938_s20 + $0x78] sm:$0xff] %vm3966_vm5, %v7804_v38  ;;  %v7835_v2 = vmul.f32 %v7702_v63, %v14139_v17 }
 0x7a2   : > { %v7707_v41 = vpop.permute.xlu1 %7706 }
 0x7a3   : > { %7899 = vst.msk [vmem:[%s9938_s20 + $0x170] sm:$0xff] %vm3966_vm5, %v7835_v2  ;;  %v7836_v24 = vmul.f32 %v7707_v41, %v14144_v29 }
 0x7a4   : > { %v7552_v21 = vpop.permute.xlu0 %7551 }
 0x7a5   : > { %7900 = vst.msk [vmem:[%s9938_s20 + $0x178] sm:$0xff] %vm3966_vm5, %v7836_v24  ;;  %v7805_v60 = vmul.f32 %v7552_v21, %v14154_v0 }
 0x7a6   : > { %v7557_v61 = vpop.permute.xlu1 %7556 }
 0x7a7   : > { %7869 = vst.msk [vmem:[%s9938_s20 + $0x80] sm:$0xff] %vm3966_vm5, %v7805_v60  ;;  %v7806_v51 = vmul.f32 %v7557_v61, %v14165_v30 }
 0x7a8   : > { %v7712_v13 = vpop.permute.xlu0 %7711 }
 0x7a9   : > { %7870 = vst.msk [vmem:[%s9938_s20 + $0x88] sm:$0xff] %vm3966_vm5, %v7806_v51  ;;  %v7837_v17 = vmul.f32 %v7712_v13, %v14163_v33 }
 0x7aa   : > { %v7717_v27 = vpop.permute.xlu1 %7716 }
 0x7ab   : > { %7901 = vst.msk [vmem:[%s9938_s20 + $0x180] sm:$0xff] %vm3966_vm5, %v7837_v17  ;;  %v7838_v29 = vmul.f32 %v7717_v27, %v14168_v4 }
 0x7ac   : > { %v7562_v58 = vpop.permute.xlu0 %7561 }
 0x7ad   : > { %7902 = vst.msk [vmem:[%s9938_s20 + $0x188] sm:$0xff] %vm3966_vm5, %v7838_v29  ;;  %v7807_v0 = vmul.f32 %v7562_v58, %v14178_v49 }
 0x7ae   : > { %v7567_v35 = vpop.permute.xlu1 %7566 }
 0x7af   : > { %7871 = vst.msk [vmem:[%s9938_s20 + $0x90] sm:$0xff] %vm3966_vm5, %v7807_v0  ;;  %v7808_v30 = vmul.f32 %v7567_v35, %v14189_v28 }
 0x7b0   : > { %v7722_v56 = vpop.permute.xlu0 %7721 }
 0x7b1   : > { %7872 = vst.msk [vmem:[%s9938_s20 + $0x98] sm:$0xff] %vm3966_vm5, %v7808_v30  ;;  %v7839_v33 = vmul.f32 %v7722_v56, %v14187_v53 }
 0x7b2   : > { %v7727_v7 = vpop.permute.xlu1 %7726 }
 0x7b3   : > { %7903 = vst.msk [vmem:[%s9938_s20 + $0x190] sm:$0xff] %vm3966_vm5, %v7839_v33  ;;  %v7840_v4 = vmul.f32 %v7727_v7, %v14192_v22 }
 0x7b4   : > { %v7572_v15 = vpop.permute.xlu0 %7571 }
 0x7b5   : > { %7904 = vst.msk [vmem:[%s9938_s20 + $0x198] sm:$0xff] %vm3966_vm5, %v7840_v4  ;;  %v7809_v49 = vmul.f32 %v7572_v15, %v14202_v12 }
 0x7b6   : > { %v7577_v45 = vpop.permute.xlu1 %7576 }
 0x7b7   : > { %7873 = vst.msk [vmem:[%s9938_s20 + $0xa0] sm:$0xff] %vm3966_vm5, %v7809_v49  ;;  %v7810_v28 = vmul.f32 %v7577_v45, %v14213_v1 }
 0x7b8   : > { %v7732_v20 = vpop.permute.xlu0 %7731 }
 0x7b9   : > { %7874 = vst.msk [vmem:[%s9938_s20 + $0xa8] sm:$0xff] %vm3966_vm5, %v7810_v28  ;;  %v7841_v53 = vmul.f32 %v7732_v20, %v14211_v37 }
 0x7ba   : > { %v7737_v42 = vpop.permute.xlu1 %7736 }
 0x7bb   : > { %7905 = vst.msk [vmem:[%s9938_s20 + $0x1a0] sm:$0xff] %vm3966_vm5, %v7841_v53  ;;  %v7842_v22 = vmul.f32 %v7737_v42, %v14216_v62 }
 0x7bc   : > { %v7582_v11 = vpop.permute.xlu0 %7581 }
 0x7bd   : > { %7906 = vst.msk [vmem:[%s9938_s20 + $0x1a8] sm:$0xff] %vm3966_vm5, %v7842_v22  ;;  %v7811_v12 = vmul.f32 %v7582_v11, %v14226_v57 }
 0x7be   : > { %v7587_v54 = vpop.permute.xlu1 %7586 }
 0x7bf   : > { %7875 = vst.msk [vmem:[%s9938_s20 + $0xb0] sm:$0xff] %vm3966_vm5, %v7811_v12  ;;  %v7812_v1 = vmul.f32 %v7587_v54, %v14237_v47 }
 0x7c0   : > { %v7742_v19 = vpop.permute.xlu0 %7741 }
 0x7c1   : > { %7876 = vst.msk [vmem:[%s9938_s20 + $0xb8] sm:$0xff] %vm3966_vm5, %v7812_v1  ;;  %v7843_v37 = vmul.f32 %v7742_v19, %v14235_v55 }
 0x7c2   : > { %v7747_v3 = vpop.permute.xlu1 %7746 }
 0x7c3   : > { %7907 = vst.msk [vmem:[%s9938_s20 + $0x1b0] sm:$0xff] %vm3966_vm5, %v7843_v37  ;;  %v7844_v62 = vmul.f32 %v7747_v3, %v14240_v40 }
 0x7c4   : > { %v7592_v5 = vpop.permute.xlu0 %7591 }
 0x7c5   : > { %7908 = vst.msk [vmem:[%s9938_s20 + $0x1b8] sm:$0xff] %vm3966_vm5, %v7844_v62  ;;  %v7813_v57 = vmul.f32 %v7592_v5, %v14250_v39 }
 0x7c6   : > { %v7597_v59 = vpop.permute.xlu1 %7596 }
 0x7c7   : > { %7877 = vst.msk [vmem:[%s9938_s20 + $0xc0] sm:$0xff] %vm3966_vm5, %v7813_v57  ;;  %v7814_v47 = vmul.f32 %v7597_v59, %v14259_v43 }
 0x7c8   : > { %v7752_v6 = vpop.permute.xlu0 %7751 }
 0x7c9   : > { %7878 = vst.msk [vmem:[%s9938_s20 + $0xc8] sm:$0xff] %vm3966_vm5, %v7814_v47  ;;  %v7845_v55 = vmul.f32 %v7752_v6, %v14257_v36 }
 0x7ca   : > { %v7757_v16 = vpop.permute.xlu1 %7756 }
 0x7cb   : > { %7909 = vst.msk [vmem:[%s9938_s20 + $0x1c0] sm:$0xff] %vm3966_vm5, %v7845_v55  ;;  %v7846_v40 = vmul.f32 %v7757_v16, %v14262_v48 }
 0x7cc   : > { %v7602_v26 = vpop.permute.xlu0 %7601 }
 0x7cd   : > { %7910 = vst.msk [vmem:[%s9938_s20 + $0x1c8] sm:$0xff] %vm3966_vm5, %v7846_v40  ;;  %v7815_v39 = vmul.f32 %v7602_v26, %v14272_v46 }
 0x7ce   : > { %v7607_v8 = vpop.permute.xlu1 %7606 }
 0x7cf   : > { %7879 = vst.msk [vmem:[%s9938_s20 + $0xd0] sm:$0xff] %vm3966_vm5, %v7815_v39  ;;  %v7816_v43 = vmul.f32 %v7607_v8, %v14279_v9 }
 0x7d0   : > { %v7762_v31 = vpop.permute.xlu0 %7761 }
 0x7d1   : > { %7880 = vst.msk [vmem:[%s9938_s20 + $0xd8] sm:$0xff] %vm3966_vm5, %v7816_v43  ;;  %v7847_v36 = vmul.f32 %v7762_v31, %v14277_v50 }
 0x7d2   : > { %v7767_v38 = vpop.permute.xlu1 %7766 }
 0x7d3   : > { %7911 = vst.msk [vmem:[%s9938_s20 + $0x1d0] sm:$0xff] %vm3966_vm5, %v7847_v36  ;;  %v7848_v48 = vmul.f32 %v7767_v38, %v14282_v44 }
 0x7d4   : > { %v7612_v63 = vpop.permute.xlu0 %7611 }
 0x7d5   : > { %7912 = vst.msk [vmem:[%s9938_s20 + $0x1d8] sm:$0xff] %vm3966_vm5, %v7848_v48  ;;  %v7817_v46 = vmul.f32 %v7612_v63, %v14289_v18 }
 0x7d6   : > { %v7617_v2 = vpop.permute.xlu1 %7616 }
 0x7d7   : > { %7881 = vst.msk [vmem:[%s9938_s20 + $0xe0] sm:$0xff] %vm3966_vm5, %v7817_v46  ;;  %v7818_v9 = vmul.f32 %v7617_v2, %v14296_v52 }
 0x7d8   : > { %v7772_v41 = vpop.permute.xlu0 %7771 }
 0x7d9   : > { %7882 = vst.msk [vmem:[%s9938_s20 + $0xe8] sm:$0xff] %vm3966_vm5, %v7818_v9  ;;  %v7849_v50 = vmul.f32 %v7772_v41, %v14294_v32 }
 0x7da   : > { %v7777_v44 = vpop.permute.xlu1 %7776 }
 0x7db   : > { %7913 = vst.msk [vmem:[%s9938_s20 + $0x1e0] sm:$0xff] %vm3966_vm5, %v7849_v50  ;;  %v7850_v24 = vmul.f32 %v7777_v44, %v14301_v34 }
 0x7dc   : > { %v7622_v21 = vpop.permute.xlu0 %7621 }
 0x7dd   : > { %7914 = vst.msk [vmem:[%s9938_s20 + $0x1e8] sm:$0xff] %vm3966_vm5, %v7850_v24  ;;  %v7819_v18 = vmul.f32 %v7622_v21, %v14305_v25 }
 0x7de   : > { %v7627_v60 = vpop.permute.xlu1 %7626 }
 0x7df   : > { %7883 = vst.msk [vmem:[%s9938_s20 + $0xf0] sm:$0xff] %vm3966_vm5, %v7819_v18  ;;  %v7820_v52 = vmul.f32 %v7627_v60, %v14310_v14 }
 0x7e0   : > { %v7782_v61 = vpop.permute.xlu0 %7781 }
 0x7e1   : > { %7884 = vst.msk [vmem:[%s9938_s20 + $0xf8] sm:$0xff] %vm3966_vm5, %v7820_v52  ;;  %v7851_v32 = vmul.f32 %v7782_v61, %v14308_v10 }
 0x7e2   : > { %v7787_v51 = vpop.permute.xlu1 %7786 }
 0x7e3   : > { %7915 = vst.msk [vmem:[%s9938_s20 + $0x1f0] sm:$0xff] %vm3966_vm5, %v7851_v32  ;;  %v7852_v34 = vmul.f32 %v7787_v51, %v14313_v23 }
 0x7e5   : > { %7916 = vst.msk [vmem:[%s9938_s20 + $0x1f8] sm:$0xff] %vm3966_vm5, %v7852_v34 }
 0x7e6 PF: > { %s17_s24 = sadd.s32 1, %s9857_s24   ;;  %s15497_s22 = smov %s9853_s23 }
 0x7e7   : > { %p14_p11 = scmp.ge.s32.totalorder %s17_s24, 4   ;;  %s15498_s23 = smov %s15500_s0 }
 0x7e9   :  { %16 = sbr.rel (!%p14_p11) target bundleno = 3 (0x3), region = 80 }

</bundles_post_ra>
